<compile_context>
chip_gen: v6e
topology: v6e:2x2x1
jax: 0.10.0
libtpu: 0.0.40
codegen_flags: <defaults>
</compile_context>

<pallas_src>
import functools
import math

import jax
import jax.numpy as jnp
from jax.experimental import pallas as pl
from jax.experimental.pallas import tpu as pltpu


# ----------------------------- Pallas kernels --------------------------------
def _mm_bias_act_kernel(x_ref, w_ref, b_ref, o_ref, *, leaky):
    """y = (leaky_relu)(x @ w + b); x, w are bf16, accumulation is f32."""
    acc = jnp.dot(x_ref[...], w_ref[...], preferred_element_type=jnp.float32)
    acc = acc + b_ref[...]
    if leaky:
        acc = jnp.where(acc > 0, acc, 0.01 * acc)
    o_ref[...] = acc


def matmul_bias_act(x_bf16, w_bf16, b_f32, *, leaky):
    """Gridless single-step matmul: whole operands resident in VMEM."""
    M, K = x_bf16.shape
    N = w_bf16.shape[1]
    return pl.pallas_call(
        functools.partial(_mm_bias_act_kernel, leaky=leaky),
        out_shape=jax.ShapeDtypeStruct((M, N), jnp.float32),
    )(x_bf16, w_bf16, b_f32.reshape(1, N))


def _head_kernel(flat_ref, pref_ref, fcw_ref, fcb_ref,
                 h1wf_ref, h1wp_ref, h1b_ref, h2w_ref, h2b_ref, out_ref):
    """Fused fc(3136->512) + [actor|critic] hidden (516->256) + block-diag output.

    xcat = [feat | pref] is never materialized: xcat @ [a1|v1] is computed as
    feat @ Wf + pref @ Wp.  The final layer uses a block-diagonal weight so
    out[:, :A] = a @ a2_w and out[:, A:] = c @ v2_w in a single matmul.
    """
    feat = jnp.dot(flat_ref[...], fcw_ref[...], preferred_element_type=jnp.float32)
    feat = feat + fcb_ref[...]
    feat = jnp.where(feat > 0, feat, 0.01 * feat)

    h = jnp.dot(feat.astype(jnp.bfloat16), h1wf_ref[...],
                preferred_element_type=jnp.float32)
    h = h + jnp.dot(pref_ref[...], h1wp_ref[...],
                    preferred_element_type=jnp.float32)
    h = h + h1b_ref[...]
    h = jnp.where(h > 0, h, 0.01 * h)

    out = jnp.dot(h.astype(jnp.bfloat16), h2w_ref[...],
                  preferred_element_type=jnp.float32)
    out_ref[...] = out + h2b_ref[...]


# ------------------------------ conv via im2col ------------------------------
def _im2col_nhwc(x, k, s):
    """x:(B,H,W,C) NHWC -> (B*OH*OW, k*k*C) with feature order (kh, kw, C)."""
    B, H, W, C = x.shape
    OH = (H - k) // s + 1
    OW = (W - k) // s + 1
    patches = []
    for kh in range(k):
        for kw in range(k):
            patches.append(x[:, kh:kh + s * OH:s, kw:kw + s * OW:s, :])  # (B,OH,OW,C)
    p = jnp.stack(patches, axis=3)                     # (B, OH, OW, k*k, C)
    return p.reshape(B * OH * OW, k * k * C), OH, OW


def conv2d_pallas(x_nhwc, w_flat_bf16, b_f32, k, s):
    """Valid conv, stride s, NHWC in / NHWC out. w rows ordered (kh, kw, Cin)."""
    B = x_nhwc.shape[0]
    cols, OH, OW = _im2col_nhwc(x_nhwc, k, s)
    cout = w_flat_bf16.shape[1]
    y = matmul_bias_act(cols.astype(jnp.bfloat16), w_flat_bf16, b_f32, leaky=True)
    return y.reshape(B, OH, OW, cout)


# ------------------------------ parameters -----------------------------------
def _kaiming_uniform(key, shape, fan_in, a):
    gain = math.sqrt(2.0 / (1.0 + a * a))
    bound = gain * math.sqrt(3.0 / fan_in)
    return jax.random.uniform(key, shape, jnp.float32, -bound, bound)


def init_params(key, output_size, reward_size):
    """Torch-equivalent params (f32, (in,out) layout).

    Conv weights are stored as (kh*kw*Cin, Cout) == torch weight.permute(2,3,1,0)
    .reshape(-1, Cout); fc weight rows are ordered for the NHWC flatten (h,w,c)
    == torch rows permuted from (c,h,w) — equivalent for a fresh random init.
    """
    ks = jax.random.split(key, 8)
    p = {}
    p["c1_w"] = _kaiming_uniform(ks[0], (8 * 8 * 4, 32), 4 * 8 * 8, 0.0)
    p["c1_b"] = jnp.zeros((32,), jnp.float32)
    p["c2_w"] = _kaiming_uniform(ks[1], (4 * 4 * 32, 64), 32 * 4 * 4, 0.0)
    p["c2_b"] = jnp.zeros((64,), jnp.float32)
    p["c3_w"] = _kaiming_uniform(ks[2], (3 * 3 * 64, 64), 64 * 3 * 3, 0.0)
    p["c3_b"] = jnp.zeros((64,), jnp.float32)
    p["fc_w"] = _kaiming_uniform(ks[3], (7 * 7 * 64, 512), 7 * 7 * 64, 1.0)
    p["fc_b"] = jnp.zeros((512,), jnp.float32)
    p["a1_w"] = _kaiming_uniform(ks[4], (512 + reward_size, 128), 512 + reward_size, 1.0)
    p["a1_b"] = jnp.zeros((128,), jnp.float32)
    p["a2_w"] = _kaiming_uniform(ks[5], (128, output_size), 128, 1.0)
    p["a2_b"] = jnp.zeros((output_size,), jnp.float32)
    p["v1_w"] = _kaiming_uniform(ks[6], (512 + reward_size, 128), 512 + reward_size, 1.0)
    p["v1_b"] = jnp.zeros((128,), jnp.float32)
    p["v2_w"] = _kaiming_uniform(ks[7], (128, reward_size), 128, 1.0)
    p["v2_b"] = jnp.zeros((reward_size,), jnp.float32)
    return p


def prepare_params(p, output_size, reward_size):
    """One-time conversion to kernel layout: bf16 weights + fused head matrices."""
    D = 512
    A, R = output_size, reward_size
    kp = {}
    kp["c1_w"] = p["c1_w"].astype(jnp.bfloat16)
    kp["c1_b"] = p["c1_b"]
    kp["c2_w"] = p["c2_w"].astype(jnp.bfloat16)
    kp["c2_b"] = p["c2_b"]
    kp["c3_w"] = p["c3_w"].astype(jnp.bfloat16)
    kp["c3_b"] = p["c3_b"]
    kp["fc_w"] = p["fc_w"].astype(jnp.bfloat16)
    kp["fc_b"] = p["fc_b"].reshape(1, -1)
    # Merge actor/critic first layers: columns [a1 | v1]; split rows feat / pref.
    kp["h1_wf"] = jnp.concatenate([p["a1_w"][:D], p["v1_w"][:D]], axis=1).astype(jnp.bfloat16)
    kp["h1_wp"] = jnp.concatenate([p["a1_w"][D:], p["v1_w"][D:]], axis=1).astype(jnp.bfloat16)
    kp["h1_b"] = jnp.concatenate([p["a1_b"], p["v1_b"]]).reshape(1, -1)
    # Merge actor/critic output layers into a block-diagonal (256, A+R) matrix.
    h2 = jnp.zeros((256, A + R), jnp.float32)
    h2 = h2.at[:128, :A].set(p["a2_w"]).at[128:, A:].set(p["v2_w"])
    kp["h2_w"] = h2.astype(jnp.bfloat16)
    kp["h2_b"] = jnp.concatenate([p["a2_b"], p["v2_b"]]).reshape(1, -1)
    return kp


# ------------------------------ forward pass ----------------------------------
def forward(kp, state, preference, *, output_size, reward_size):
    # One-time activation layout change: torch NCHW frame stack -> NHWC.
    x = jnp.transpose(state, (0, 2, 3, 1))
    x = conv2d_pallas(x, kp["c1_w"], kp["c1_b"], 8, 4)   # (B, 20, 20, 32)
    x = conv2d_pallas(x, kp["c2_w"], kp["c2_b"], 4, 2)   # (B,  9,  9, 64)
    x = conv2d_pallas(x, kp["c3_w"], kp["c3_b"], 3, 1)   # (B,  7,  7, 64)
    B = x.shape[0]
    flat = x.reshape(B, -1).astype(jnp.bfloat16)         # NHWC flatten (fc_w rows match)

    # Fused fc + both heads in a single gridless pallas_call (~4 MB resident VMEM,
    # well under the scoped-VMEM default on every TPU generation incl. v7x).
    out = pl.pallas_call(
        _head_kernel,
        out_shape=jax.ShapeDtypeStruct((B, output_size + reward_size), jnp.float32),
        compiler_params=pltpu.CompilerParams(vmem_limit_bytes=32 * 1024 * 1024),
    )(flat, preference.astype(jnp.bfloat16),
      kp["fc_w"], kp["fc_b"],
      kp["h1_wf"], kp["h1_wp"], kp["h1_b"],
      kp["h2_w"], kp["h2_b"])
    return out[:, :output_size], out[:, output_size:]


# ------------------------- pure-JAX reference (check) --------------------------
def reference_forward(p, state, preference):
    hi = jax.lax.Precision.HIGHEST

    def leaky(z):
        return jnp.where(z > 0, z, 0.01 * z)

    def conv(x, w_flat, b, k, s):
        cin = x.shape[-1]
        cout = w_flat.shape[1]
        w = w_flat.reshape(k, k, cin, cout)              # HWIO
        y = jax.lax.conv_general_dilated(
            x, w, (s, s), "VALID",
            dimension_numbers=("NHWC", "HWIO", "NHWC"), precision=hi)
        return leaky(y + b)

    x = jnp.transpose(state, (0, 2, 3, 1))
    x = conv(x, p["c1_w"], p["c1_b"], 8, 4)
    x = conv(x, p["c2_w"], p["c2_b"], 4, 2)
    x = conv(x, p["c3_w"], p["c3_b"], 3, 1)
    flat = x.reshape(x.shape[0], -1)
    feat = leaky(jnp.dot(flat, p["fc_w"], precision=hi) + p["fc_b"])
    xcat = jnp.concatenate([feat, preference], axis=1)
    a = leaky(jnp.dot(xcat, p["a1_w"], precision=hi) + p["a1_b"])
    policy = jnp.dot(a, p["a2_w"], precision=hi) + p["a2_b"]
    c = leaky(jnp.dot(xcat, p["v1_w"], precision=hi) + p["v1_b"])
    value = jnp.dot(c, p["v2_w"], precision=hi) + p["v2_b"]
    return policy, value


if __name__ == "__main__":
    B, output_size, reward_size = 2, 7, 4
    key = jax.random.PRNGKey(0)
    pk, sk, prk = jax.random.split(key, 3)

    params = init_params(pk, output_size, reward_size)
    kparams = prepare_params(params, output_size, reward_size)   # one-time, outside jit

    state = jax.random.uniform(sk, (B, 4, 84, 84), jnp.float32)       # NCHW frames
    preference = jax.random.uniform(prk, (B, reward_size), jnp.float32)
    preference = preference / jnp.sum(preference, axis=1, keepdims=True)

    fwd = jax.jit(functools.partial(forward, output_size=output_size,
                                    reward_size=reward_size))
    policy, value = fwd(kparams, state, preference)
    jax.block_until_ready((policy, value))

    assert policy.shape == (B, output_size)
    assert value.shape == (B, reward_size)

    ref_policy, ref_value = reference_forward(params, state, preference)
    assert float(jnp.max(jnp.abs(policy - ref_policy))) < 5e-2
    assert float(jnp.max(jnp.abs(value - ref_value))) < 5e-2

    print("KERNEL_OK")
</pallas_src>

<mosaic_0001>
module attributes {stable_mosaic.version = 11 : i64} {
  func.func @_mm_bias_act_kernel(%arg0: memref<800x256xbf16, #tpu.memory_space<vmem>>, %arg1: memref<256x32xbf16, #tpu.memory_space<vmem>>, %arg2: memref<1x32xf32, #tpu.memory_space<vmem>>, %arg3: memref<800x32xf32, #tpu.memory_space<vmem>>) attributes {dimension_semantics = [], scalar_prefetch = 0 : i64, scratch_operands = 0 : i64, tpu.core_type = #tpu.core_type<tc>} {
    %c0 = arith.constant 0 : index
    %c0_0 = arith.constant 0 : index
    %0 = vector.load %arg0[%c0, %c0_0] : memref<800x256xbf16, #tpu.memory_space<vmem>>, vector<800x256xbf16>
    %c0_1 = arith.constant 0 : index
    %c0_2 = arith.constant 0 : index
    %1 = vector.load %arg1[%c0_1, %c0_2] : memref<256x32xbf16, #tpu.memory_space<vmem>>, vector<256x32xbf16>
    %cst = arith.constant dense<0.000000e+00> : vector<800x32xf32>
    %2 = tpu.matmul %0, %1, %cst {dimension_numbers = #tpu.dot_dimension_numbers<[1], [0], [0], [1], [0, 0, 1, 1], [], []>} : vector<800x256xbf16>, vector<256x32xbf16>, vector<800x32xf32> -> vector<800x32xf32>
    %c0_3 = arith.constant 0 : index
    %c0_4 = arith.constant 0 : index
    %3 = vector.load %arg2[%c0_3, %c0_4] : memref<1x32xf32, #tpu.memory_space<vmem>>, vector<1x32xf32>
    %4 = vector.broadcast %3 : vector<1x32xf32> to vector<800x32xf32>
    %5 = arith.addf %2, %4 : vector<800x32xf32>
    %cst_5 = arith.constant 0.000000e+00 : f32
    %6 = vector.broadcast %cst_5 : f32 to vector<800x32xf32>
    %7 = arith.cmpf ogt, %5, %6 : vector<800x32xf32>
    %cst_6 = arith.constant 0.00999999977 : f32
    %8 = vector.broadcast %cst_6 : f32 to vector<800x32xf32>
    %9 = arith.mulf %8, %5 : vector<800x32xf32>
    %10 = arith.select %7, %5, %9 : vector<800x32xi1>, vector<800x32xf32>
    %c0_7 = arith.constant 0 : index
    %c0_8 = arith.constant 0 : index
    %11 = vector.load %arg3[%c0_7, %c0_8] : memref<800x32xf32, #tpu.memory_space<vmem>>, vector<800x32xf32>
    tpu.vector_store %arg3[%c0_7, %c0_8], %10 {strides = array<i32>} : memref<800x32xf32, #tpu.memory_space<vmem>>, vector<800x32xf32>,
    return
  }
}

module attributes {stable_mosaic.version = 11 : i64} {
  func.func @_mm_bias_act_kernel(%arg0: memref<162x512xbf16, #tpu.memory_space<vmem>>, %arg1: memref<512x64xbf16, #tpu.memory_space<vmem>>, %arg2: memref<1x64xf32, #tpu.memory_space<vmem>>, %arg3: memref<162x64xf32, #tpu.memory_space<vmem>>) attributes {dimension_semantics = [], scalar_prefetch = 0 : i64, scratch_operands = 0 : i64, tpu.core_type = #tpu.core_type<tc>} {
    %c0 = arith.constant 0 : index
    %c0_0 = arith.constant 0 : index
    %0 = vector.load %arg0[%c0, %c0_0] : memref<162x512xbf16, #tpu.memory_space<vmem>>, vector<162x512xbf16>
    %c0_1 = arith.constant 0 : index
    %c0_2 = arith.constant 0 : index
    %1 = vector.load %arg1[%c0_1, %c0_2] : memref<512x64xbf16, #tpu.memory_space<vmem>>, vector<512x64xbf16>
    %cst = arith.constant dense<0.000000e+00> : vector<162x64xf32>
    %2 = tpu.matmul %0, %1, %cst {dimension_numbers = #tpu.dot_dimension_numbers<[1], [0], [0], [1], [0, 0, 1, 1], [], []>} : vector<162x512xbf16>, vector<512x64xbf16>, vector<162x64xf32> -> vector<162x64xf32>
    %c0_3 = arith.constant 0 : index
    %c0_4 = arith.constant 0 : index
    %3 = vector.load %arg2[%c0_3, %c0_4] : memref<1x64xf32, #tpu.memory_space<vmem>>, vector<1x64xf32>
    %4 = vector.broadcast %3 : vector<1x64xf32> to vector<162x64xf32>
    %5 = arith.addf %2, %4 : vector<162x64xf32>
    %cst_5 = arith.constant 0.000000e+00 : f32
    %6 = vector.broadcast %cst_5 : f32 to vector<162x64xf32>
    %7 = arith.cmpf ogt, %5, %6 : vector<162x64xf32>
    %cst_6 = arith.constant 0.00999999977 : f32
    %8 = vector.broadcast %cst_6 : f32 to vector<162x64xf32>
    %9 = arith.mulf %8, %5 : vector<162x64xf32>
    %10 = arith.select %7, %5, %9 : vector<162x64xi1>, vector<162x64xf32>
    %c0_7 = arith.constant 0 : index
    %c0_8 = arith.constant 0 : index
    %11 = vector.load %arg3[%c0_7, %c0_8] : memref<162x64xf32, #tpu.memory_space<vmem>>, vector<162x64xf32>
    tpu.vector_store %arg3[%c0_7, %c0_8], %10 {strides = array<i32>} : memref<162x64xf32, #tpu.memory_space<vmem>>, vector<162x64xf32>,
    return
  }
}

module attributes {stable_mosaic.version = 11 : i64} {
  func.func @_mm_bias_act_kernel(%arg0: memref<98x576xbf16, #tpu.memory_space<vmem>>, %arg1: memref<576x64xbf16, #tpu.memory_space<vmem>>, %arg2: memref<1x64xf32, #tpu.memory_space<vmem>>, %arg3: memref<98x64xf32, #tpu.memory_space<vmem>>) attributes {dimension_semantics = [], scalar_prefetch = 0 : i64, scratch_operands = 0 : i64, tpu.core_type = #tpu.core_type<tc>} {
    %c0 = arith.constant 0 : index
    %c0_0 = arith.constant 0 : index
    %0 = vector.load %arg0[%c0, %c0_0] : memref<98x576xbf16, #tpu.memory_space<vmem>>, vector<98x576xbf16>
    %c0_1 = arith.constant 0 : index
    %c0_2 = arith.constant 0 : index
    %1 = vector.load %arg1[%c0_1, %c0_2] : memref<576x64xbf16, #tpu.memory_space<vmem>>, vector<576x64xbf16>
    %cst = arith.constant dense<0.000000e+00> : vector<98x64xf32>
    %2 = tpu.matmul %0, %1, %cst {dimension_numbers = #tpu.dot_dimension_numbers<[1], [0], [0], [1], [0, 0, 1, 1], [], []>} : vector<98x576xbf16>, vector<576x64xbf16>, vector<98x64xf32> -> vector<98x64xf32>
    %c0_3 = arith.constant 0 : index
    %c0_4 = arith.constant 0 : index
    %3 = vector.load %arg2[%c0_3, %c0_4] : memref<1x64xf32, #tpu.memory_space<vmem>>, vector<1x64xf32>
    %4 = vector.broadcast %3 : vector<1x64xf32> to vector<98x64xf32>
    %5 = arith.addf %2, %4 : vector<98x64xf32>
    %cst_5 = arith.constant 0.000000e+00 : f32
    %6 = vector.broadcast %cst_5 : f32 to vector<98x64xf32>
    %7 = arith.cmpf ogt, %5, %6 : vector<98x64xf32>
    %cst_6 = arith.constant 0.00999999977 : f32
    %8 = vector.broadcast %cst_6 : f32 to vector<98x64xf32>
    %9 = arith.mulf %8, %5 : vector<98x64xf32>
    %10 = arith.select %7, %5, %9 : vector<98x64xi1>, vector<98x64xf32>
    %c0_7 = arith.constant 0 : index
    %c0_8 = arith.constant 0 : index
    %11 = vector.load %arg3[%c0_7, %c0_8] : memref<98x64xf32, #tpu.memory_space<vmem>>, vector<98x64xf32>
    tpu.vector_store %arg3[%c0_7, %c0_8], %10 {strides = array<i32>} : memref<98x64xf32, #tpu.memory_space<vmem>>, vector<98x64xf32>,
    return
  }
}

module attributes {stable_mosaic.version = 11 : i64} {
  func.func @_head_kernel(%arg0: memref<2x3136xbf16, #tpu.memory_space<vmem>>, %arg1: memref<2x4xbf16, #tpu.memory_space<vmem>>, %arg2: memref<3136x512xbf16, #tpu.memory_space<vmem>>, %arg3: memref<1x512xf32, #tpu.memory_space<vmem>>, %arg4: memref<512x256xbf16, #tpu.memory_space<vmem>>, %arg5: memref<4x256xbf16, #tpu.memory_space<vmem>>, %arg6: memref<1x256xf32, #tpu.memory_space<vmem>>, %arg7: memref<256x11xbf16, #tpu.memory_space<vmem>>, %arg8: memref<1x11xf32, #tpu.memory_space<vmem>>, %arg9: memref<2x11xf32, #tpu.memory_space<vmem>>) attributes {dimension_semantics = [], scalar_prefetch = 0 : i64, scratch_operands = 0 : i64, tpu.core_type = #tpu.core_type<tc>} {
    %c0 = arith.constant 0 : index
    %c0_0 = arith.constant 0 : index
    %0 = vector.load %arg0[%c0, %c0_0] : memref<2x3136xbf16, #tpu.memory_space<vmem>>, vector<2x3136xbf16>
    %c0_1 = arith.constant 0 : index
    %c0_2 = arith.constant 0 : index
    %1 = vector.load %arg2[%c0_1, %c0_2] : memref<3136x512xbf16, #tpu.memory_space<vmem>>, vector<3136x512xbf16>
    %cst = arith.constant dense<0.000000e+00> : vector<2x512xf32>
    %2 = tpu.matmul %0, %1, %cst {dimension_numbers = #tpu.dot_dimension_numbers<[1], [0], [0], [1], [0, 0, 1, 1], [], []>} : vector<2x3136xbf16>, vector<3136x512xbf16>, vector<2x512xf32> -> vector<2x512xf32>
    %c0_3 = arith.constant 0 : index
    %c0_4 = arith.constant 0 : index
    %3 = vector.load %arg3[%c0_3, %c0_4] : memref<1x512xf32, #tpu.memory_space<vmem>>, vector<1x512xf32>
    %4 = vector.broadcast %3 : vector<1x512xf32> to vector<2x512xf32>
    %5 = arith.addf %2, %4 : vector<2x512xf32>
    %cst_5 = arith.constant 0.000000e+00 : f32
    %6 = vector.broadcast %cst_5 : f32 to vector<2x512xf32>
    %7 = arith.cmpf ogt, %5, %6 : vector<2x512xf32>
    %cst_6 = arith.constant 0.00999999977 : f32
    %8 = vector.broadcast %cst_6 : f32 to vector<2x512xf32>
    %9 = arith.mulf %8, %5 : vector<2x512xf32>
    %10 = arith.select %7, %5, %9 : vector<2x512xi1>, vector<2x512xf32>
    %11 = arith.truncf %10 : vector<2x512xf32> to vector<2x512xbf16>
    %c0_7 = arith.constant 0 : index
    %c0_8 = arith.constant 0 : index
    %12 = vector.load %arg4[%c0_7, %c0_8] : memref<512x256xbf16, #tpu.memory_space<vmem>>, vector<512x256xbf16>
    %cst_9 = arith.constant dense<0.000000e+00> : vector<2x256xf32>
    %13 = tpu.matmul %11, %12, %cst_9 {dimension_numbers = #tpu.dot_dimension_numbers<[1], [0], [0], [1], [0, 0, 1, 1], [], []>} : vector<2x512xbf16>, vector<512x256xbf16>, vector<2x256xf32> -> vector<2x256xf32>
    %c0_10 = arith.constant 0 : index
    %c0_11 = arith.constant 0 : index
    %14 = vector.load %arg1[%c0_10, %c0_11] : memref<2x4xbf16, #tpu.memory_space<vmem>>, vector<2x4xbf16>
    %c0_12 = arith.constant 0 : index
    %c0_13 = arith.constant 0 : index
    %15 = vector.load %arg5[%c0_12, %c0_13] : memref<4x256xbf16, #tpu.memory_space<vmem>>, vector<4x256xbf16>
    %cst_14 = arith.constant dense<0.000000e+00> : vector<2x256xf32>
    %16 = tpu.matmul %14, %15, %cst_14 {dimension_numbers = #tpu.dot_dimension_numbers<[1], [0], [0], [1], [0, 0, 1, 1], [], []>} : vector<2x4xbf16>, vector<4x256xbf16>, vector<2x256xf32> -> vector<2x256xf32>
    %17 = arith.addf %13, %16 : vector<2x256xf32>
    %c0_15 = arith.constant 0 : index
    %c0_16 = arith.constant 0 : index
    %18 = vector.load %arg6[%c0_15, %c0_16] : memref<1x256xf32, #tpu.memory_space<vmem>>, vector<1x256xf32>
    %19 = vector.broadcast %18 : vector<1x256xf32> to vector<2x256xf32>
    %20 = arith.addf %17, %19 : vector<2x256xf32>
    %cst_17 = arith.constant 0.000000e+00 : f32
    %21 = vector.broadcast %cst_17 : f32 to vector<2x256xf32>
    %22 = arith.cmpf ogt, %20, %21 : vector<2x256xf32>
    %cst_18 = arith.constant 0.00999999977 : f32
    %23 = vector.broadcast %cst_18 : f32 to vector<2x256xf32>
    %24 = arith.mulf %23, %20 : vector<2x256xf32>
    %25 = arith.select %22, %20, %24 : vector<2x256xi1>, vector<2x256xf32>
    %26 = arith.truncf %25 : vector<2x256xf32> to vector<2x256xbf16>
    %c0_19 = arith.constant 0 : index
    %c0_20 = arith.constant 0 : index
    %27 = vector.load %arg7[%c0_19, %c0_20] : memref<256x11xbf16, #tpu.memory_space<vmem>>, vector<256x11xbf16>
    %cst_21 = arith.constant dense<0.000000e+00> : vector<2x11xf32>
    %28 = tpu.matmul %26, %27, %cst_21 {dimension_numbers = #tpu.dot_dimension_numbers<[1], [0], [0], [1], [0, 0, 1, 1], [], []>} : vector<2x256xbf16>, vector<256x11xbf16>, vector<2x11xf32> -> vector<2x11xf32>
    %c0_22 = arith.constant 0 : index
    %c0_23 = arith.constant 0 : index
    %29 = vector.load %arg8[%c0_22, %c0_23] : memref<1x11xf32, #tpu.memory_space<vmem>>, vector<1x11xf32>
    %30 = vector.broadcast %29 : vector<1x11xf32> to vector<2x11xf32>
    %31 = arith.addf %28, %30 : vector<2x11xf32>
    %c0_24 = arith.constant 0 : index
    %c0_25 = arith.constant 0 : index
    %32 = vector.load %arg9[%c0_24, %c0_25] : memref<2x11xf32, #tpu.memory_space<vmem>>, vector<2x11xf32>
    tpu.vector_store %arg9[%c0_24, %c0_25], %31 {strides = array<i32>} : memref<2x11xf32, #tpu.memory_space<vmem>>, vector<2x11xf32>,
    return
  }
}

</mosaic_0001>

<bundles_post_ra>
// kernel: forward.4
= control target key start
LH: loop header
LB: loop body
LE: loop exit
PB: predicated region body
PF: predicated region fallthrough
CT: control target
= control target key end

     0   :  { %v1903_v0 = vmov 0   ;;  %vm1483_vm0 = vcmask 261120   ;;  %s2820_s1 = inlined_call_operand.vmem [shape: bf16[256,32], index: 1, kind: input, shape index: {}]   ;;  %s2821_s0 = inlined_call_operand.vmem [shape: bf16[800,256], index: 0, kind: input, shape index: {}]   ;;  %s2822_s2 = inlined_call_operand.vmem [shape: f32[1,32], index: 2, kind: input, shape index: {}]   ;;  %s2823_s3 = inlined_call_operand.vmem [shape: f32[800,32], index: 3, kind: output, shape index: {}]  }
   0x1   :  { %750 = vmatprep.subr.bf16.mxu0 %v1903_v0  ;;  %1705 = vmatprep.subr.bf16.mxu1 %v1903_v0  ;;  %v1738_v1 = vld [vmem:[%s2820_s1 + $0x38] sm:$0xff]   ;;  %v1739_v2 = vld [vmem:[%s2820_s1 + $0x30] sm:$0xff]   ;;  %v1740_v3 = vld [vmem:[%s2820_s1 + $0x28] sm:$0xff]  }
   0x2   :  { %751 = vmatpush1.bf16.msra.mxu0 %v1738_v1  ;;  %1721 = vmatpush1.bf16.msra.mxu1 %v1738_v1  ;;  %v1741_v4 = vld [vmem:[%s2820_s1 + $0x20] sm:$0xff]   ;;  %v1742_v5 = vld [vmem:[%s2820_s1 + $0x18] sm:$0xff]   ;;  %v1743_v7 = vld [vmem:[%s2820_s1 + $0x10] sm:$0xff]  }
   0x3   :  { %752 = vmatprep.subr.bf16.mxu0 %v1903_v0  ;;  %1706 = vmatprep.subr.bf16.mxu1 %v1903_v0  ;;  %v1756_v6 = vld [vmem:[%s2821_s0 + $0x4] ss:$8 sps:$4 sm:$0xff]   ;;  %v1759_v8 = vld [vmem:[%s2821_s0 + $0x194] ss:$8 sps:$4 sm:$0xff]   ;;  %v1754_v19 = vld [vmem:[%s2821_s0] ss:$8 sps:$4 sm:$0xff]  }
   0x4   :  { %782 = vmatprep.mubr.bf16.mxu0 %v1756_v6  ;;  %982 = vmatprep.mubr.bf16.mxu1 %v1759_v8  ;;  %v1744_v9 = vld [vmem:[%s2820_s1 + $0x8] sm:$0xff]   ;;  %v1745_v10 = vld [vmem:[%s2820_s1] sm:$0xff]   ;;  %v1746_v11 = vld [vmem:[%s2820_s1 + $0x78] sm:$0xff]  }
   0x5   :  { %v1747_v12 = vld [vmem:[%s2820_s1 + $0x70] sm:$0xff]   ;;  %v1748_v13 = vld [vmem:[%s2820_s1 + $0x68] sm:$0xff]   ;;  %v1749_v14 = vld [vmem:[%s2820_s1 + $0x60] sm:$0xff]  }
   0x6   :  { %753 = vmatpush1.bf16.msra.mxu0 %v1739_v2  ;;  %1722 = vmatpush1.bf16.msra.mxu1 %v1739_v2  ;;  %v1750_v15 = vld [vmem:[%s2820_s1 + $0x58] sm:$0xff]   ;;  %v1751_v16 = vld [vmem:[%s2820_s1 + $0x50] sm:$0xff]   ;;  %v1752_v17 = vld [vmem:[%s2820_s1 + $0x48] sm:$0xff]  }
   0x7   :  { %754 = vmatprep.subr.bf16.mxu0 %v1903_v0  ;;  %1707 = vmatprep.subr.bf16.mxu1 %v1903_v0  ;;  %v1753_v18 = vld [vmem:[%s2820_s1 + $0x40] sm:$0xff]   ;;  %v1757_v20 = vld [vmem:[%s2821_s0 + $0x190] ss:$8 sps:$4 sm:$0xff]   ;;  %v1760_v21 = vld [vmem:[%s2821_s0 + $0x14] ss:$8 sps:$4 sm:$0xff]  }
   0x8   :  { %v1762_v22 = vld [vmem:[%s2821_s0 + $0x1a4] ss:$8 sps:$4 sm:$0xff]   ;;  %v1764_v23 = vld [vmem:[%s2821_s0 + $0x10] ss:$8 sps:$4 sm:$0xff]   ;;  %v1765_v24 = vld [vmem:[%s2821_s0 + $0x1a0] ss:$8 sps:$4 sm:$0xff]  }
   0x9   :  { %v1766_v25 = vld [vmem:[%s2821_s0 + $0x24] ss:$8 sps:$4 sm:$0xff]   ;;  %v1768_v26 = vld [vmem:[%s2821_s0 + $0x1b4] ss:$8 sps:$4 sm:$0xff]   ;;  %v1770_v27 = vld [vmem:[%s2821_s0 + $0x20] ss:$8 sps:$4 sm:$0xff]  }
   0xa   :  { %755 = vmatpush1.bf16.msra.mxu0 %v1740_v3  ;;  %1723 = vmatpush1.bf16.msra.mxu1 %v1740_v3  ;;  %v1771_v28 = vld [vmem:[%s2821_s0 + $0x1b0] ss:$8 sps:$4 sm:$0xff]   ;;  %v1772_v29 = vld [vmem:[%s2821_s0 + $0x34] ss:$8 sps:$4 sm:$0xff]   ;;  %v1774_v30 = vld [vmem:[%s2821_s0 + $0x1c4] ss:$8 sps:$4 sm:$0xff]  }
   0xb   :  { %756 = vmatprep.subr.bf16.mxu0 %v1903_v0  ;;  %1708 = vmatprep.subr.bf16.mxu1 %v1903_v0  ;;  %v1776_v31 = vld [vmem:[%s2821_s0 + $0x30] ss:$8 sps:$4 sm:$0xff]   ;;  %v1777_v32 = vld [vmem:[%s2821_s0 + $0x1c0] ss:$8 sps:$4 sm:$0xff]   ;;  %v1778_v33 = vld [vmem:[%s2821_s0 + $0x44] ss:$8 sps:$4 sm:$0xff]  }
   0xc   :  { %v1780_v34 = vld [vmem:[%s2821_s0 + $0x1d4] ss:$8 sps:$4 sm:$0xff]   ;;  %v1782_v35 = vld [vmem:[%s2821_s0 + $0x40] ss:$8 sps:$4 sm:$0xff]   ;;  %v1783_v36 = vld [vmem:[%s2821_s0 + $0x1d0] ss:$8 sps:$4 sm:$0xff]  }
   0xd   :  { %v1784_v37 = vld [vmem:[%s2821_s0 + $0x54] ss:$8 sps:$4 sm:$0xff]   ;;  %v1786_v38 = vld [vmem:[%s2821_s0 + $0x1e4] ss:$8 sps:$4 sm:$0xff]   ;;  %v1788_v39 = vld [vmem:[%s2821_s0 + $0x50] ss:$8 sps:$4 sm:$0xff]  }
   0xe   :  { %757 = vmatpush1.bf16.msra.mxu0 %v1741_v4  ;;  %1724 = vmatpush1.bf16.msra.mxu1 %v1741_v4  ;;  %v1789_v40 = vld [vmem:[%s2821_s0 + $0x1e0] ss:$8 sps:$4 sm:$0xff]   ;;  %v1790_v41 = vld [vmem:[%s2821_s0 + $0x64] ss:$8 sps:$4 sm:$0xff]   ;;  %v1792_v42 = vld [vmem:[%s2821_s0 + $0x1f4] ss:$8 sps:$4 sm:$0xff]  }
   0xf   :  { %758 = vmatprep.subr.bf16.mxu0 %v1903_v0  ;;  %1709 = vmatprep.subr.bf16.mxu1 %v1903_v0  ;;  %v1794_v43 = vld [vmem:[%s2821_s0 + $0x60] ss:$8 sps:$4 sm:$0xff]   ;;  %v1795_v44 = vld [vmem:[%s2821_s0 + $0x1f0] ss:$8 sps:$4 sm:$0xff]   ;;  %v1796_v45 = vld [vmem:[%s2821_s0 + $0x74] ss:$8 sps:$4 sm:$0xff]  }
  0x10   :  { %v1798_v46 = vld [vmem:[%s2821_s0 + $0x204] ss:$8 sps:$4 sm:$0xff]   ;;  %v1800_v47 = vld [vmem:[%s2821_s0 + $0x70] ss:$8 sps:$4 sm:$0xff]   ;;  %v1801_v48 = vld [vmem:[%s2821_s0 + $0x200] ss:$8 sps:$4 sm:$0xff]  }
  0x11   :  { %v1802_v49 = vld [vmem:[%s2821_s0 + $0x84] ss:$8 sps:$4 sm:$0xff]   ;;  %v1804_v50 = vld [vmem:[%s2821_s0 + $0x214] ss:$8 sps:$4 sm:$0xff]   ;;  %v1806_v51 = vld [vmem:[%s2821_s0 + $0x80] ss:$8 sps:$4 sm:$0xff]  }
  0x12   :  { %759 = vmatpush1.bf16.msra.mxu0 %v1742_v5  ;;  %1725 = vmatpush1.bf16.msra.mxu1 %v1742_v5  ;;  %v1807_v52 = vld [vmem:[%s2821_s0 + $0x210] ss:$8 sps:$4 sm:$0xff]   ;;  %v1808_v53 = vld [vmem:[%s2821_s0 + $0x94] ss:$8 sps:$4 sm:$0xff]   ;;  %v1810_v54 = vld [vmem:[%s2821_s0 + $0x224] ss:$8 sps:$4 sm:$0xff]  }
  0x13   :  { %760 = vmatprep.subr.bf16.mxu0 %v1903_v0  ;;  %1710 = vmatprep.subr.bf16.mxu1 %v1903_v0  ;;  %v1812_v55 = vld [vmem:[%s2821_s0 + $0x90] ss:$8 sps:$4 sm:$0xff]   ;;  %v1813_v56 = vld [vmem:[%s2821_s0 + $0x220] ss:$8 sps:$4 sm:$0xff]   ;;  %v1814_v57 = vld [vmem:[%s2821_s0 + $0xa4] ss:$8 sps:$4 sm:$0xff]  }
  0x14   :  { %v1816_v58 = vld [vmem:[%s2821_s0 + $0x234] ss:$8 sps:$4 sm:$0xff]   ;;  %v1818_v59 = vld [vmem:[%s2821_s0 + $0xa0] ss:$8 sps:$4 sm:$0xff]   ;;  %v1819_v60 = vld [vmem:[%s2821_s0 + $0x230] ss:$8 sps:$4 sm:$0xff]  }
  0x15   :  { %v1820_v61 = vld [vmem:[%s2821_s0 + $0xb4] ss:$8 sps:$4 sm:$0xff]   ;;  %v1822_v62 = vld [vmem:[%s2821_s0 + $0x244] ss:$8 sps:$4 sm:$0xff]   ;;  %v1824_v63 = vld [vmem:[%s2821_s0 + $0xb0] ss:$8 sps:$4 sm:$0xff]  }
  0x16   :  { %761 = vmatpush1.bf16.msra.mxu0 %v1743_v7  ;;  %1726 = vmatpush1.bf16.msra.mxu1 %v1743_v7  ;;  %v1826_v1 = vld [vmem:[%s2821_s0 + $0xc4] ss:$8 sps:$4 sm:$0xff]   ;;  %v1828_v2 = vld [vmem:[%s2821_s0 + $0x254] ss:$8 sps:$4 sm:$0xff]   ;;  %v1830_v3 = vld [vmem:[%s2821_s0 + $0xc0] ss:$8 sps:$4 sm:$0xff]  }
  0x17   :  { %762 = vmatprep.subr.bf16.mxu0 %v1903_v0  ;;  %1711 = vmatprep.subr.bf16.mxu1 %v1903_v0  ;;  %v1831_v4 = vld [vmem:[%s2821_s0 + $0x250] ss:$8 sps:$4 sm:$0xff]   ;;  %v1832_v5 = vld [vmem:[%s2821_s0 + $0xd4] ss:$8 sps:$4 sm:$0xff]   ;;  %v1834_v6 = vld [vmem:[%s2821_s0 + $0x264] ss:$8 sps:$4 sm:$0xff]  }
  0x18   :  { %v1836_v7 = vld [vmem:[%s2821_s0 + $0xd0] ss:$8 sps:$4 sm:$0xff]   ;;  %v1837_v8 = vld [vmem:[%s2821_s0 + $0x260] ss:$8 sps:$4 sm:$0xff]  }
  0x1a   :  { %763 = vmatpush1.bf16.msra.mxu0 %v1744_v9  ;;  %1727 = vmatpush1.bf16.msra.mxu1 %v1744_v9  ;;  %v1838_v9 = vld [vmem:[%s2821_s0 + $0xe4] ss:$8 sps:$4 sm:$0xff]  }
  0x1b   :  { %764 = vmatprep.subr.bf16.mxu0 %v1903_v0  ;;  %1712 = vmatprep.subr.bf16.mxu1 %v1903_v0 }
  0x1e   :  { %765 = vmatpush1.bf16.msra.mxu0 %v1745_v10  ;;  %1728 = vmatpush1.bf16.msra.mxu1 %v1745_v10  ;;  %v1840_v10 = vld [vmem:[%s2821_s0 + $0x274] ss:$8 sps:$4 sm:$0xff]  }
  0x1f   :  { %766 = vmatprep.subr.bf16.mxu0 %v1903_v0  ;;  %1713 = vmatprep.subr.bf16.mxu1 %v1903_v0 }
  0x22   :  { %767 = vmatpush2.bf16.msra.mxu0 %v1746_v11  ;;  %1729 = vmatpush2.bf16.msra.mxu1 %v1746_v11  ;;  %v1842_v11 = vld [vmem:[%s2821_s0 + $0xe0] ss:$8 sps:$4 sm:$0xff]  }
  0x23   :  { %768 = vmatprep.subr.bf16.mxu0 %v1903_v0  ;;  %1714 = vmatprep.subr.bf16.mxu1 %v1903_v0 }
  0x26   :  { %769 = vmatpush2.bf16.msra.mxu0 %v1747_v12  ;;  %1730 = vmatpush2.bf16.msra.mxu1 %v1747_v12  ;;  %v1843_v12 = vld [vmem:[%s2821_s0 + $0x270] ss:$8 sps:$4 sm:$0xff]  }
  0x27   :  { %770 = vmatprep.subr.bf16.mxu0 %v1903_v0  ;;  %1715 = vmatprep.subr.bf16.mxu1 %v1903_v0 }
  0x2a   :  { %771 = vmatpush2.bf16.msra.mxu0 %v1748_v13  ;;  %1731 = vmatpush2.bf16.msra.mxu1 %v1748_v13  ;;  %v1844_v13 = vld [vmem:[%s2821_s0 + $0xf4] ss:$8 sps:$4 sm:$0xff]  }
  0x2b   :  { %772 = vmatprep.subr.bf16.mxu0 %v1903_v0  ;;  %1716 = vmatprep.subr.bf16.mxu1 %v1903_v0 }
  0x2e   :  { %773 = vmatpush2.bf16.msra.mxu0 %v1749_v14  ;;  %1732 = vmatpush2.bf16.msra.mxu1 %v1749_v14  ;;  %v1846_v14 = vld [vmem:[%s2821_s0 + $0x284] ss:$8 sps:$4 sm:$0xff]  }
  0x2f   :  { %774 = vmatprep.subr.bf16.mxu0 %v1903_v0  ;;  %1717 = vmatprep.subr.bf16.mxu1 %v1903_v0 }
  0x32   :  { %775 = vmatpush2.bf16.msra.mxu0 %v1750_v15  ;;  %1733 = vmatpush2.bf16.msra.mxu1 %v1750_v15  ;;  %v1848_v15 = vld [vmem:[%s2821_s0 + $0xf0] ss:$8 sps:$4 sm:$0xff]  }
  0x33   :  { %776 = vmatprep.subr.bf16.mxu0 %v1903_v0  ;;  %1718 = vmatprep.subr.bf16.mxu1 %v1903_v0 }
  0x36   :  { %777 = vmatpush2.bf16.msra.mxu0 %v1751_v16  ;;  %1734 = vmatpush2.bf16.msra.mxu1 %v1751_v16  ;;  %v1849_v16 = vld [vmem:[%s2821_s0 + $0x280] ss:$8 sps:$4 sm:$0xff]  }
  0x37   :  { %778 = vmatprep.subr.bf16.mxu0 %v1903_v0  ;;  %1719 = vmatprep.subr.bf16.mxu1 %v1903_v0 }
  0x3a   :  { %779 = vmatpush2.bf16.msra.mxu0 %v1752_v17  ;;  %1735 = vmatpush2.bf16.msra.mxu1 %v1752_v17  ;;  %v1850_v17 = vld [vmem:[%s2821_s0 + $0x104] ss:$8 sps:$4 sm:$0xff]  }
  0x3b   :  { %780 = vmatprep.subr.bf16.mxu0 %v1903_v0  ;;  %1720 = vmatprep.subr.bf16.mxu1 %v1903_v0  ;;  %v1825_v0 = vld [vmem:[%s2821_s0 + $0x240] ss:$8 sps:$4 sm:$0xff]  }
  0x3e   :  { %781 = vmatpush2.bf16.msra.mxu0 %v1753_v18  ;;  %1736 = vmatpush2.bf16.msra.mxu1 %v1753_v18  ;;  %v1852_v18 = vld [vmem:[%s2821_s0 + $0x294] ss:$8 sps:$4 sm:$0xff]  }
  0x41   :  { %783 = vmatmul.mubr.bf16.vlgmr.msra.gmra.mxu0 %v1754_v19  ;;  %983 = vmatmul.mubr.bf16.vlgmr.msra.gmra.mxu1 %v1757_v20  ;;  %v1854_v19 = vld [vmem:[%s2821_s0 + $0x100] ss:$8 sps:$4 sm:$0xff]   ;;  %v1855_v20 = vld [vmem:[%s2821_s0 + $0x290] ss:$8 sps:$4 sm:$0xff]  }
  0x42   :  { %790 = vmatprep.mubr.bf16.mxu0 %v1760_v21  ;;  %990 = vmatprep.mubr.bf16.mxu1 %v1762_v22  ;;  %v1856_v21 = vld [vmem:[%s2821_s0 + $0x114] ss:$8 sps:$4 sm:$0xff]   ;;  %v1858_v22 = vld [vmem:[%s2821_s0 + $0x2a4] ss:$8 sps:$4 sm:$0xff]  }
  0x49   :  { %791 = vmatmul.mubr.bf16.gmra.mxu0 %v1764_v23  ;;  %991 = vmatmul.mubr.bf16.gmra.mxu1 %v1765_v24  ;;  %v1860_v23 = vld [vmem:[%s2821_s0 + $0x110] ss:$8 sps:$4 sm:$0xff]   ;;  %v1861_v24 = vld [vmem:[%s2821_s0 + $0x2a0] ss:$8 sps:$4 sm:$0xff]  }
  0x4a   :  { %798 = vmatprep.mubr.bf16.mxu0 %v1766_v25  ;;  %998 = vmatprep.mubr.bf16.mxu1 %v1768_v26  ;;  %v1862_v25 = vld [vmem:[%s2821_s0 + $0x124] ss:$8 sps:$4 sm:$0xff]   ;;  %v1864_v26 = vld [vmem:[%s2821_s0 + $0x2b4] ss:$8 sps:$4 sm:$0xff]  }
  0x51   :  { %799 = vmatmul.mubr.bf16.gmra.mxu0 %v1770_v27  ;;  %999 = vmatmul.mubr.bf16.gmra.mxu1 %v1771_v28  ;;  %v1866_v27 = vld [vmem:[%s2821_s0 + $0x120] ss:$8 sps:$4 sm:$0xff]   ;;  %v1867_v28 = vld [vmem:[%s2821_s0 + $0x2b0] ss:$8 sps:$4 sm:$0xff]  }
  0x52   :  { %806 = vmatprep.mubr.bf16.mxu0 %v1772_v29  ;;  %1006 = vmatprep.mubr.bf16.mxu1 %v1774_v30  ;;  %v1868_v29 = vld [vmem:[%s2821_s0 + $0x134] ss:$8 sps:$4 sm:$0xff]   ;;  %v1870_v30 = vld [vmem:[%s2821_s0 + $0x2c4] ss:$8 sps:$4 sm:$0xff]  }
  0x59   :  { %807 = vmatmul.mubr.bf16.gmra.mxu0 %v1776_v31  ;;  %1007 = vmatmul.mubr.bf16.gmra.mxu1 %v1777_v32  ;;  %v1872_v31 = vld [vmem:[%s2821_s0 + $0x130] ss:$8 sps:$4 sm:$0xff]   ;;  %v1873_v32 = vld [vmem:[%s2821_s0 + $0x2c0] ss:$8 sps:$4 sm:$0xff]  }
  0x5a   :  { %814 = vmatprep.mubr.bf16.mxu0 %v1778_v33  ;;  %1014 = vmatprep.mubr.bf16.mxu1 %v1780_v34  ;;  %v1874_v33 = vld [vmem:[%s2821_s0 + $0x144] ss:$8 sps:$4 sm:$0xff]   ;;  %v1876_v34 = vld [vmem:[%s2821_s0 + $0x2d4] ss:$8 sps:$4 sm:$0xff]  }
  0x61   :  { %815 = vmatmul.mubr.bf16.gmra.mxu0 %v1782_v35  ;;  %1015 = vmatmul.mubr.bf16.gmra.mxu1 %v1783_v36  ;;  %v1878_v35 = vld [vmem:[%s2821_s0 + $0x140] ss:$8 sps:$4 sm:$0xff]   ;;  %v1879_v36 = vld [vmem:[%s2821_s0 + $0x2d0] ss:$8 sps:$4 sm:$0xff]  }
  0x62   :  { %822 = vmatprep.mubr.bf16.mxu0 %v1784_v37  ;;  %1022 = vmatprep.mubr.bf16.mxu1 %v1786_v38  ;;  %v1880_v37 = vld [vmem:[%s2821_s0 + $0x154] ss:$8 sps:$4 sm:$0xff]   ;;  %v1882_v38 = vld [vmem:[%s2821_s0 + $0x2e4] ss:$8 sps:$4 sm:$0xff]  }
  0x69   :  { %823 = vmatmul.mubr.bf16.gmra.mxu0 %v1788_v39  ;;  %1023 = vmatmul.mubr.bf16.gmra.mxu1 %v1789_v40  ;;  %v1884_v39 = vld [vmem:[%s2821_s0 + $0x150] ss:$8 sps:$4 sm:$0xff]   ;;  %v1885_v40 = vld [vmem:[%s2821_s0 + $0x2e0] ss:$8 sps:$4 sm:$0xff]  }
  0x6a   :  { %830 = vmatprep.mubr.bf16.mxu0 %v1790_v41  ;;  %1030 = vmatprep.mubr.bf16.mxu1 %v1792_v42  ;;  %v1886_v41 = vld [vmem:[%s2821_s0 + $0x164] ss:$8 sps:$4 sm:$0xff]   ;;  %v1888_v42 = vld [vmem:[%s2821_s0 + $0x2f4] ss:$8 sps:$4 sm:$0xff]  }
  0x71   :  { %831 = vmatmul.mubr.bf16.gmra.mxu0 %v1794_v43  ;;  %1031 = vmatmul.mubr.bf16.gmra.mxu1 %v1795_v44  ;;  %v1890_v43 = vld [vmem:[%s2821_s0 + $0x160] ss:$8 sps:$4 sm:$0xff]   ;;  %v1891_v44 = vld [vmem:[%s2821_s0 + $0x2f0] ss:$8 sps:$4 sm:$0xff]  }
  0x72   :  { %838 = vmatprep.mubr.bf16.mxu0 %v1796_v45  ;;  %1038 = vmatprep.mubr.bf16.mxu1 %v1798_v46  ;;  %v1892_v45 = vld [vmem:[%s2821_s0 + $0x174] ss:$8 sps:$4 sm:$0xff]   ;;  %v1894_v46 = vld [vmem:[%s2821_s0 + $0x304] ss:$8 sps:$4 sm:$0xff]  }
  0x79   :  { %839 = vmatmul.mubr.bf16.gmra.mxu0 %v1800_v47  ;;  %1039 = vmatmul.mubr.bf16.gmra.mxu1 %v1801_v48  ;;  %v1896_v47 = vld [vmem:[%s2821_s0 + $0x170] ss:$8 sps:$4 sm:$0xff]   ;;  %v1897_v48 = vld [vmem:[%s2821_s0 + $0x300] ss:$8 sps:$4 sm:$0xff]  }
  0x7a   :  { %846 = vmatprep.mubr.bf16.mxu0 %v1802_v49  ;;  %1046 = vmatprep.mubr.bf16.mxu1 %v1804_v50  ;;  %v1898_v49 = vld [vmem:[%s2821_s0 + $0x184] ss:$8 sps:$4 sm:$0xff]   ;;  %v1900_v50 = vld [vmem:[%s2821_s0 + $0x314] ss:$8 sps:$4 sm:$0xff]  }
  0x81   :  { %847 = vmatmul.mubr.bf16.gmra.mxu0 %v1806_v51  ;;  %1047 = vmatmul.mubr.bf16.gmra.mxu1 %v1807_v52  ;;  %v63_v51 = vld [vmem:[%s2821_s0 + $0x180] sm:$0xff]  ;;  %v64_v52 = vld [vmem:[%s2821_s0 + $0x188] sm:$0xff] }
  0x82   :  { %854 = vmatprep.mubr.bf16.mxu0 %v1808_v53  ;;  %1054 = vmatprep.mubr.bf16.mxu1 %v1810_v54  ;;  %v113_v53 = vld [vmem:[%s2821_s0 + $0x310] sm:$0xff]  ;;  %v114_v54 = vld [vmem:[%s2821_s0 + $0x318] sm:$0xff] }
  0x89   :  { %855 = vmatmul.mubr.bf16.gmra.mxu0 %v1812_v55  ;;  %1055 = vmatmul.mubr.bf16.gmra.mxu1 %v1813_v56  ;;  %v1637_v55 = vcombine.low %v63_v51, %v64_v52  ;;  %v1687_v56 = vcombine.low %v113_v53, %v114_v54 }
  0x8a   :  { %862 = vmatprep.mubr.bf16.mxu0 %v1814_v57  ;;  %1062 = vmatprep.mubr.bf16.mxu1 %v1816_v58  ;;  %v2313_v57 = vld [vmem:[%s2822_s2] ss:$0 sm:$0xff] }
  0x91   :  { %863 = vmatmul.mubr.bf16.gmra.mxu0 %v1818_v59  ;;  %1063 = vmatmul.mubr.bf16.gmra.mxu1 %v1819_v60 }
  0x92   :  { %870 = vmatprep.mubr.bf16.mxu0 %v1820_v61  ;;  %1070 = vmatprep.mubr.bf16.mxu1 %v1822_v62 }
  0x99   :  { %871 = vmatmul.mubr.bf16.gmra.mxu0 %v1824_v63  ;;  %1071 = vmatmul.mubr.bf16.gmra.mxu1 %v1825_v0 }
  0x9a   :  { %878 = vmatprep.mubr.bf16.mxu0 %v1826_v1  ;;  %1078 = vmatprep.mubr.bf16.mxu1 %v1828_v2 }
  0xa1   :  { %879 = vmatmul.mubr.bf16.gmra.mxu0 %v1830_v3  ;;  %1079 = vmatmul.mubr.bf16.gmra.mxu1 %v1831_v4 }
  0xa2   :  { %886 = vmatprep.mubr.bf16.mxu0 %v1832_v5  ;;  %1086 = vmatprep.mubr.bf16.mxu1 %v1834_v6 }
  0xa9   :  { %887 = vmatmul.mubr.bf16.gmra.mxu0 %v1836_v7  ;;  %1087 = vmatmul.mubr.bf16.gmra.mxu1 %v1837_v8 }
  0xaa   :  { %894 = vmatprep.mubr.bf16.mxu0 %v1838_v9  ;;  %1094 = vmatprep.mubr.bf16.mxu1 %v1840_v10 }
  0xb1   :  { %895 = vmatmul.mubr.bf16.gmra.mxu0 %v1842_v11  ;;  %1095 = vmatmul.mubr.bf16.gmra.mxu1 %v1843_v12 }
  0xb2   :  { %902 = vmatprep.mubr.bf16.mxu0 %v1844_v13  ;;  %1102 = vmatprep.mubr.bf16.mxu1 %v1846_v14 }
  0xb9   :  { %903 = vmatmul.mubr.bf16.gmra.mxu0 %v1848_v15  ;;  %1103 = vmatmul.mubr.bf16.gmra.mxu1 %v1849_v16 }
  0xba   :  { %910 = vmatprep.mubr.bf16.mxu0 %v1850_v17  ;;  %1110 = vmatprep.mubr.bf16.mxu1 %v1852_v18 }
  0xc1   :  { %911 = vmatmul.mubr.bf16.gmra.mxu0 %v1854_v19  ;;  %1111 = vmatmul.mubr.bf16.gmra.mxu1 %v1855_v20 }
  0xc2   :  { %918 = vmatprep.mubr.bf16.mxu0 %v1856_v21  ;;  %1118 = vmatprep.mubr.bf16.mxu1 %v1858_v22 }
  0xc9   :  { %919 = vmatmul.mubr.bf16.gmra.mxu0 %v1860_v23  ;;  %1119 = vmatmul.mubr.bf16.gmra.mxu1 %v1861_v24 }
  0xca   :  { %926 = vmatprep.mubr.bf16.mxu0 %v1862_v25  ;;  %1126 = vmatprep.mubr.bf16.mxu1 %v1864_v26 }
  0xd1   :  { %927 = vmatmul.mubr.bf16.gmra.mxu0 %v1866_v27  ;;  %1127 = vmatmul.mubr.bf16.gmra.mxu1 %v1867_v28 }
  0xd2   :  { %934 = vmatprep.mubr.bf16.mxu0 %v1868_v29  ;;  %1134 = vmatprep.mubr.bf16.mxu1 %v1870_v30 }
  0xd9   :  { %935 = vmatmul.mubr.bf16.gmra.mxu0 %v1872_v31  ;;  %1135 = vmatmul.mubr.bf16.gmra.mxu1 %v1873_v32 }
  0xda   :  { %942 = vmatprep.mubr.bf16.mxu0 %v1874_v33  ;;  %1142 = vmatprep.mubr.bf16.mxu1 %v1876_v34 }
  0xe1   :  { %943 = vmatmul.mubr.bf16.gmra.mxu0 %v1878_v35  ;;  %1143 = vmatmul.mubr.bf16.gmra.mxu1 %v1879_v36 }
  0xe2   :  { %950 = vmatprep.mubr.bf16.mxu0 %v1880_v37  ;;  %1150 = vmatprep.mubr.bf16.mxu1 %v1882_v38 }
  0xe9   :  { %951 = vmatmul.mubr.bf16.gmra.mxu0 %v1884_v39  ;;  %1151 = vmatmul.mubr.bf16.gmra.mxu1 %v1885_v40 }
  0xea   :  { %958 = vmatprep.mubr.bf16.mxu0 %v1886_v41  ;;  %1158 = vmatprep.mubr.bf16.mxu1 %v1888_v42 }
  0xf1   :  { %959 = vmatmul.mubr.bf16.gmra.mxu0 %v1890_v43  ;;  %1159 = vmatmul.mubr.bf16.gmra.mxu1 %v1891_v44 }
  0xf2   :  { %966 = vmatprep.mubr.bf16.mxu0 %v1892_v45  ;;  %1166 = vmatprep.mubr.bf16.mxu1 %v1894_v46 }
  0xf9   :  { %967 = vmatmul.mubr.bf16.gmra.mxu0 %v1896_v47  ;;  %1167 = vmatmul.mubr.bf16.gmra.mxu1 %v1897_v48 }
  0xfa   :  { %974 = vmatprep.mubr.bf16.mxu0 %v1898_v49  ;;  %1174 = vmatprep.mubr.bf16.mxu1 %v1900_v50 }
 0x101   :  { %v784_v58 = vpop.f32.mrf.mxu0  ;;  %975 = vmatmul.mubr.bf16.gmra.mxu0 %v1637_v55  ;;  %v984_v59 = vpop.f32.mrf.mxu1  ;;  %1175 = vmatmul.mubr.bf16.gmra.mxu1 %v1687_v56 }
 0x102   :  { %v785_v60 = vadd.f32 %v2313_v57, %v784_v58  ;;  %v985_v61 = vadd.f32 %v2313_v57, %v984_v59 }
 0x103   :  { %v786_v62 = vpop.f32.mrf.mxu0  ;;  %v986_v63 = vpop.f32.mrf.mxu1 }
 0x104   :  { %vm1183_vm1 = vcmp.gt.f32.partialorder %v785_v60, 0.0  ;;  %v1283_v0 = vmul.f32 0.01, %v785_v60  ;;  %vm1233_vm2 = vcmp.gt.f32.partialorder %v985_v61, 0.0  ;;  %v1333_v1 = vmul.f32 0.01, %v985_v61 }
 0x105   :  { %v787_v2 = vpop.f32.mrf.mxu0  ;;  %v987_v3 = vpop.f32.mrf.mxu1 }
 0x106   :  { %v1383_v4 = vsel %vm1183_vm1, %v785_v60, %v1283_v0  ;;  %v1433_v5 = vsel %vm1233_vm2, %v985_v61, %v1333_v1  ;;  %v788_v6 = vadd.f32 %v2313_v57, %v787_v2  ;;  %v988_v7 = vadd.f32 %v2313_v57, %v987_v3 }
 0x107   :  { %1484 = vst.msk [vmem:[%s2823_s3] sm:$0xff] %vm1483_vm0, %v1383_v4  ;;  %1534 = vst.msk [vmem:[%s2823_s3 + $0x190] sm:$0xff] %vm1483_vm0, %v1433_v5  ;;  %v789_v8 = vpop.f32.mrf.mxu0  ;;  %v989_v9 = vpop.f32.mrf.mxu1 }
 0x108   :  { %vm1184_vm3 = vcmp.gt.f32.partialorder %v788_v6, 0.0  ;;  %v1284_v10 = vmul.f32 0.01, %v788_v6  ;;  %vm1234_vm4 = vcmp.gt.f32.partialorder %v988_v7, 0.0  ;;  %v1334_v11 = vmul.f32 0.01, %v988_v7 }
 0x109   :  { %v792_v12 = vpop.f32.mrf.mxu0  ;;  %v992_v13 = vpop.f32.mrf.mxu1 }
 0x10a   :  { %v1384_v14 = vsel %vm1184_vm3, %v788_v6, %v1284_v10  ;;  %v1434_v15 = vsel %vm1234_vm4, %v988_v7, %v1334_v11  ;;  %v793_v16 = vadd.f32 %v2313_v57, %v792_v12  ;;  %v993_v17 = vadd.f32 %v2313_v57, %v992_v13 }
 0x10b   :  { %1485 = vst.msk [vmem:[%s2823_s3 + $0x8] sm:$0xff] %vm1483_vm0, %v1384_v14  ;;  %1535 = vst.msk [vmem:[%s2823_s3 + $0x198] sm:$0xff] %vm1483_vm0, %v1434_v15  ;;  %v794_v18 = vpop.f32.mrf.mxu0  ;;  %v994_v19 = vpop.f32.mrf.mxu1 }
 0x10c   :  { %vm1185_vm5 = vcmp.gt.f32.partialorder %v793_v16, 0.0  ;;  %v1285_v20 = vmul.f32 0.01, %v793_v16  ;;  %vm1235_vm6 = vcmp.gt.f32.partialorder %v993_v17, 0.0  ;;  %v1335_v21 = vmul.f32 0.01, %v993_v17 }
 0x10d   :  { %v795_v22 = vpop.f32.mrf.mxu0  ;;  %v995_v23 = vpop.f32.mrf.mxu1 }
 0x10e   :  { %v1385_v24 = vsel %vm1185_vm5, %v793_v16, %v1285_v20  ;;  %v1435_v25 = vsel %vm1235_vm6, %v993_v17, %v1335_v21  ;;  %v796_v26 = vadd.f32 %v2313_v57, %v795_v22  ;;  %v996_v27 = vadd.f32 %v2313_v57, %v995_v23 }
 0x10f   :  { %1486 = vst.msk [vmem:[%s2823_s3 + $0x10] sm:$0xff] %vm1483_vm0, %v1385_v24  ;;  %1536 = vst.msk [vmem:[%s2823_s3 + $0x1a0] sm:$0xff] %vm1483_vm0, %v1435_v25  ;;  %v797_v28 = vpop.f32.mrf.mxu0  ;;  %v997_v29 = vpop.f32.mrf.mxu1 }
 0x110   :  { %vm1186_vm7 = vcmp.gt.f32.partialorder %v796_v26, 0.0  ;;  %v1286_v30 = vmul.f32 0.01, %v796_v26  ;;  %vm1236_vm8 = vcmp.gt.f32.partialorder %v996_v27, 0.0  ;;  %v1336_v31 = vmul.f32 0.01, %v996_v27 }
 0x111   :  { %v800_v32 = vpop.f32.mrf.mxu0  ;;  %v1000_v33 = vpop.f32.mrf.mxu1 }
 0x112   :  { %v1386_v34 = vsel %vm1186_vm7, %v796_v26, %v1286_v30  ;;  %v1436_v35 = vsel %vm1236_vm8, %v996_v27, %v1336_v31  ;;  %v801_v36 = vadd.f32 %v2313_v57, %v800_v32  ;;  %v1001_v37 = vadd.f32 %v2313_v57, %v1000_v33 }
 0x113   :  { %1487 = vst.msk [vmem:[%s2823_s3 + $0x18] sm:$0xff] %vm1483_vm0, %v1386_v34  ;;  %1537 = vst.msk [vmem:[%s2823_s3 + $0x1a8] sm:$0xff] %vm1483_vm0, %v1436_v35  ;;  %v802_v38 = vpop.f32.mrf.mxu0  ;;  %v1002_v39 = vpop.f32.mrf.mxu1 }
 0x114   :  { %vm1187_vm9 = vcmp.gt.f32.partialorder %v801_v36, 0.0  ;;  %v1287_v40 = vmul.f32 0.01, %v801_v36  ;;  %vm1237_vm10 = vcmp.gt.f32.partialorder %v1001_v37, 0.0  ;;  %v1337_v41 = vmul.f32 0.01, %v1001_v37 }
 0x115   :  { %v803_v42 = vpop.f32.mrf.mxu0  ;;  %v1003_v43 = vpop.f32.mrf.mxu1 }
 0x116   :  { %v1387_v44 = vsel %vm1187_vm9, %v801_v36, %v1287_v40  ;;  %v1437_v45 = vsel %vm1237_vm10, %v1001_v37, %v1337_v41  ;;  %v804_v46 = vadd.f32 %v2313_v57, %v803_v42  ;;  %v1004_v47 = vadd.f32 %v2313_v57, %v1003_v43 }
 0x117   :  { %1488 = vst.msk [vmem:[%s2823_s3 + $0x20] sm:$0xff] %vm1483_vm0, %v1387_v44  ;;  %1538 = vst.msk [vmem:[%s2823_s3 + $0x1b0] sm:$0xff] %vm1483_vm0, %v1437_v45  ;;  %v805_v48 = vpop.f32.mrf.mxu0  ;;  %v1005_v49 = vpop.f32.mrf.mxu1 }
 0x118   :  { %vm1188_vm11 = vcmp.gt.f32.partialorder %v804_v46, 0.0  ;;  %v1288_v50 = vmul.f32 0.01, %v804_v46  ;;  %vm1238_vm12 = vcmp.gt.f32.partialorder %v1004_v47, 0.0  ;;  %v1338_v51 = vmul.f32 0.01, %v1004_v47 }
 0x119   :  { %v808_v52 = vpop.f32.mrf.mxu0  ;;  %v1008_v53 = vpop.f32.mrf.mxu1 }
 0x11a   :  { %v1388_v54 = vsel %vm1188_vm11, %v804_v46, %v1288_v50  ;;  %v1438_v55 = vsel %vm1238_vm12, %v1004_v47, %v1338_v51  ;;  %v809_v56 = vadd.f32 %v2313_v57, %v808_v52  ;;  %v1009_v58 = vadd.f32 %v2313_v57, %v1008_v53 }
 0x11b   :  { %1489 = vst.msk [vmem:[%s2823_s3 + $0x28] sm:$0xff] %vm1483_vm0, %v1388_v54  ;;  %1539 = vst.msk [vmem:[%s2823_s3 + $0x1b8] sm:$0xff] %vm1483_vm0, %v1438_v55  ;;  %v810_v59 = vpop.f32.mrf.mxu0  ;;  %v1010_v60 = vpop.f32.mrf.mxu1 }
 0x11c   :  { %vm1189_vm13 = vcmp.gt.f32.partialorder %v809_v56, 0.0  ;;  %v1289_v61 = vmul.f32 0.01, %v809_v56  ;;  %vm1239_vm14 = vcmp.gt.f32.partialorder %v1009_v58, 0.0  ;;  %v1339_v62 = vmul.f32 0.01, %v1009_v58 }
 0x11d   :  { %v811_v63 = vpop.f32.mrf.mxu0  ;;  %v1011_v0 = vpop.f32.mrf.mxu1 }
 0x11e   :  { %v1389_v1 = vsel %vm1189_vm13, %v809_v56, %v1289_v61  ;;  %v1439_v2 = vsel %vm1239_vm14, %v1009_v58, %v1339_v62  ;;  %v812_v3 = vadd.f32 %v2313_v57, %v811_v63  ;;  %v1012_v4 = vadd.f32 %v2313_v57, %v1011_v0 }
 0x11f   :  { %1490 = vst.msk [vmem:[%s2823_s3 + $0x30] sm:$0xff] %vm1483_vm0, %v1389_v1  ;;  %1540 = vst.msk [vmem:[%s2823_s3 + $0x1c0] sm:$0xff] %vm1483_vm0, %v1439_v2  ;;  %v813_v5 = vpop.f32.mrf.mxu0  ;;  %v1013_v6 = vpop.f32.mrf.mxu1 }
 0x120   :  { %vm1190_vm15 = vcmp.gt.f32.partialorder %v812_v3, 0.0  ;;  %v1290_v7 = vmul.f32 0.01, %v812_v3  ;;  %vm1240_vm1 = vcmp.gt.f32.partialorder %v1012_v4, 0.0  ;;  %v1340_v8 = vmul.f32 0.01, %v1012_v4 }
 0x121   :  { %v816_v9 = vpop.f32.mrf.mxu0  ;;  %v1016_v10 = vpop.f32.mrf.mxu1 }
 0x122   :  { %v1390_v11 = vsel %vm1190_vm15, %v812_v3, %v1290_v7  ;;  %v1440_v12 = vsel %vm1240_vm1, %v1012_v4, %v1340_v8  ;;  %v817_v13 = vadd.f32 %v2313_v57, %v816_v9  ;;  %v1017_v14 = vadd.f32 %v2313_v57, %v1016_v10 }
 0x123   :  { %1491 = vst.msk [vmem:[%s2823_s3 + $0x38] sm:$0xff] %vm1483_vm0, %v1390_v11  ;;  %1541 = vst.msk [vmem:[%s2823_s3 + $0x1c8] sm:$0xff] %vm1483_vm0, %v1440_v12  ;;  %v818_v15 = vpop.f32.mrf.mxu0  ;;  %v1018_v16 = vpop.f32.mrf.mxu1 }
 0x124   :  { %vm1191_vm2 = vcmp.gt.f32.partialorder %v817_v13, 0.0  ;;  %v1291_v17 = vmul.f32 0.01, %v817_v13  ;;  %vm1241_vm3 = vcmp.gt.f32.partialorder %v1017_v14, 0.0  ;;  %v1341_v18 = vmul.f32 0.01, %v1017_v14 }
 0x125   :  { %v819_v19 = vpop.f32.mrf.mxu0  ;;  %v1019_v20 = vpop.f32.mrf.mxu1 }
 0x126   :  { %v1391_v21 = vsel %vm1191_vm2, %v817_v13, %v1291_v17  ;;  %v1441_v22 = vsel %vm1241_vm3, %v1017_v14, %v1341_v18  ;;  %v820_v23 = vadd.f32 %v2313_v57, %v819_v19  ;;  %v1020_v24 = vadd.f32 %v2313_v57, %v1019_v20 }
 0x127   :  { %1492 = vst.msk [vmem:[%s2823_s3 + $0x40] sm:$0xff] %vm1483_vm0, %v1391_v21  ;;  %1542 = vst.msk [vmem:[%s2823_s3 + $0x1d0] sm:$0xff] %vm1483_vm0, %v1441_v22  ;;  %v821_v25 = vpop.f32.mrf.mxu0  ;;  %v1021_v26 = vpop.f32.mrf.mxu1 }
 0x128   :  { %vm1192_vm4 = vcmp.gt.f32.partialorder %v820_v23, 0.0  ;;  %v1292_v27 = vmul.f32 0.01, %v820_v23  ;;  %vm1242_vm5 = vcmp.gt.f32.partialorder %v1020_v24, 0.0  ;;  %v1342_v28 = vmul.f32 0.01, %v1020_v24 }
 0x129   :  { %v824_v29 = vpop.f32.mrf.mxu0  ;;  %v1024_v30 = vpop.f32.mrf.mxu1 }
 0x12a   :  { %v1392_v31 = vsel %vm1192_vm4, %v820_v23, %v1292_v27  ;;  %v1442_v32 = vsel %vm1242_vm5, %v1020_v24, %v1342_v28  ;;  %v825_v33 = vadd.f32 %v2313_v57, %v824_v29  ;;  %v1025_v34 = vadd.f32 %v2313_v57, %v1024_v30 }
 0x12b   :  { %1493 = vst.msk [vmem:[%s2823_s3 + $0x48] sm:$0xff] %vm1483_vm0, %v1392_v31  ;;  %1543 = vst.msk [vmem:[%s2823_s3 + $0x1d8] sm:$0xff] %vm1483_vm0, %v1442_v32  ;;  %v826_v35 = vpop.f32.mrf.mxu0  ;;  %v1026_v36 = vpop.f32.mrf.mxu1 }
 0x12c   :  { %vm1193_vm6 = vcmp.gt.f32.partialorder %v825_v33, 0.0  ;;  %v1293_v37 = vmul.f32 0.01, %v825_v33  ;;  %vm1243_vm7 = vcmp.gt.f32.partialorder %v1025_v34, 0.0  ;;  %v1343_v38 = vmul.f32 0.01, %v1025_v34 }
 0x12d   :  { %v827_v39 = vpop.f32.mrf.mxu0  ;;  %v1027_v40 = vpop.f32.mrf.mxu1 }
 0x12e   :  { %v1393_v41 = vsel %vm1193_vm6, %v825_v33, %v1293_v37  ;;  %v1443_v42 = vsel %vm1243_vm7, %v1025_v34, %v1343_v38  ;;  %v828_v43 = vadd.f32 %v2313_v57, %v827_v39  ;;  %v1028_v44 = vadd.f32 %v2313_v57, %v1027_v40 }
 0x12f   :  { %1494 = vst.msk [vmem:[%s2823_s3 + $0x50] sm:$0xff] %vm1483_vm0, %v1393_v41  ;;  %1544 = vst.msk [vmem:[%s2823_s3 + $0x1e0] sm:$0xff] %vm1483_vm0, %v1443_v42  ;;  %v829_v45 = vpop.f32.mrf.mxu0  ;;  %v1029_v46 = vpop.f32.mrf.mxu1 }
 0x130   :  { %vm1194_vm8 = vcmp.gt.f32.partialorder %v828_v43, 0.0  ;;  %v1294_v47 = vmul.f32 0.01, %v828_v43  ;;  %vm1244_vm9 = vcmp.gt.f32.partialorder %v1028_v44, 0.0  ;;  %v1344_v48 = vmul.f32 0.01, %v1028_v44 }
 0x131   :  { %v832_v49 = vpop.f32.mrf.mxu0  ;;  %v1032_v50 = vpop.f32.mrf.mxu1 }
 0x132   :  { %v1394_v51 = vsel %vm1194_vm8, %v828_v43, %v1294_v47  ;;  %v1444_v52 = vsel %vm1244_vm9, %v1028_v44, %v1344_v48  ;;  %v833_v53 = vadd.f32 %v2313_v57, %v832_v49  ;;  %v1033_v54 = vadd.f32 %v2313_v57, %v1032_v50 }
 0x133   :  { %1495 = vst.msk [vmem:[%s2823_s3 + $0x58] sm:$0xff] %vm1483_vm0, %v1394_v51  ;;  %1545 = vst.msk [vmem:[%s2823_s3 + $0x1e8] sm:$0xff] %vm1483_vm0, %v1444_v52  ;;  %v834_v55 = vpop.f32.mrf.mxu0  ;;  %v1034_v56 = vpop.f32.mrf.mxu1 }
 0x134   :  { %vm1195_vm10 = vcmp.gt.f32.partialorder %v833_v53, 0.0  ;;  %v1295_v58 = vmul.f32 0.01, %v833_v53  ;;  %vm1245_vm11 = vcmp.gt.f32.partialorder %v1033_v54, 0.0  ;;  %v1345_v59 = vmul.f32 0.01, %v1033_v54 }
 0x135   :  { %v835_v60 = vpop.f32.mrf.mxu0  ;;  %v1035_v61 = vpop.f32.mrf.mxu1 }
 0x136   :  { %v1395_v62 = vsel %vm1195_vm10, %v833_v53, %v1295_v58  ;;  %v1445_v63 = vsel %vm1245_vm11, %v1033_v54, %v1345_v59  ;;  %v836_v0 = vadd.f32 %v2313_v57, %v835_v60  ;;  %v1036_v1 = vadd.f32 %v2313_v57, %v1035_v61 }
 0x137   :  { %1496 = vst.msk [vmem:[%s2823_s3 + $0x60] sm:$0xff] %vm1483_vm0, %v1395_v62  ;;  %1546 = vst.msk [vmem:[%s2823_s3 + $0x1f0] sm:$0xff] %vm1483_vm0, %v1445_v63  ;;  %v837_v2 = vpop.f32.mrf.mxu0  ;;  %v1037_v3 = vpop.f32.mrf.mxu1 }
 0x138   :  { %vm1196_vm12 = vcmp.gt.f32.partialorder %v836_v0, 0.0  ;;  %v1296_v4 = vmul.f32 0.01, %v836_v0  ;;  %vm1246_vm13 = vcmp.gt.f32.partialorder %v1036_v1, 0.0  ;;  %v1346_v5 = vmul.f32 0.01, %v1036_v1 }
 0x139   :  { %v840_v6 = vpop.f32.mrf.mxu0  ;;  %v1040_v7 = vpop.f32.mrf.mxu1 }
 0x13a   :  { %v1396_v8 = vsel %vm1196_vm12, %v836_v0, %v1296_v4  ;;  %v1446_v9 = vsel %vm1246_vm13, %v1036_v1, %v1346_v5  ;;  %v841_v10 = vadd.f32 %v2313_v57, %v840_v6  ;;  %v1041_v11 = vadd.f32 %v2313_v57, %v1040_v7 }
 0x13b   :  { %1497 = vst.msk [vmem:[%s2823_s3 + $0x68] sm:$0xff] %vm1483_vm0, %v1396_v8  ;;  %1547 = vst.msk [vmem:[%s2823_s3 + $0x1f8] sm:$0xff] %vm1483_vm0, %v1446_v9  ;;  %v842_v12 = vpop.f32.mrf.mxu0  ;;  %v1042_v13 = vpop.f32.mrf.mxu1 }
 0x13c   :  { %vm1197_vm14 = vcmp.gt.f32.partialorder %v841_v10, 0.0  ;;  %v1297_v14 = vmul.f32 0.01, %v841_v10  ;;  %vm1247_vm15 = vcmp.gt.f32.partialorder %v1041_v11, 0.0  ;;  %v1347_v15 = vmul.f32 0.01, %v1041_v11 }
 0x13d   :  { %v843_v16 = vpop.f32.mrf.mxu0  ;;  %v1043_v17 = vpop.f32.mrf.mxu1 }
 0x13e   :  { %v1397_v18 = vsel %vm1197_vm14, %v841_v10, %v1297_v14  ;;  %v1447_v19 = vsel %vm1247_vm15, %v1041_v11, %v1347_v15  ;;  %v844_v20 = vadd.f32 %v2313_v57, %v843_v16  ;;  %v1044_v21 = vadd.f32 %v2313_v57, %v1043_v17 }
 0x13f   :  { %1498 = vst.msk [vmem:[%s2823_s3 + $0x70] sm:$0xff] %vm1483_vm0, %v1397_v18  ;;  %1548 = vst.msk [vmem:[%s2823_s3 + $0x200] sm:$0xff] %vm1483_vm0, %v1447_v19  ;;  %v845_v22 = vpop.f32.mrf.mxu0  ;;  %v1045_v23 = vpop.f32.mrf.mxu1 }
 0x140   :  { %vm1198_vm1 = vcmp.gt.f32.partialorder %v844_v20, 0.0  ;;  %v1298_v24 = vmul.f32 0.01, %v844_v20  ;;  %vm1248_vm2 = vcmp.gt.f32.partialorder %v1044_v21, 0.0  ;;  %v1348_v25 = vmul.f32 0.01, %v1044_v21 }
 0x141   :  { %v848_v26 = vpop.f32.mrf.mxu0  ;;  %v1048_v27 = vpop.f32.mrf.mxu1 }
 0x142   :  { %v1398_v28 = vsel %vm1198_vm1, %v844_v20, %v1298_v24  ;;  %v1448_v29 = vsel %vm1248_vm2, %v1044_v21, %v1348_v25  ;;  %v849_v30 = vadd.f32 %v2313_v57, %v848_v26  ;;  %v1049_v31 = vadd.f32 %v2313_v57, %v1048_v27 }
 0x143   :  { %1499 = vst.msk [vmem:[%s2823_s3 + $0x78] sm:$0xff] %vm1483_vm0, %v1398_v28  ;;  %1549 = vst.msk [vmem:[%s2823_s3 + $0x208] sm:$0xff] %vm1483_vm0, %v1448_v29  ;;  %v850_v32 = vpop.f32.mrf.mxu0  ;;  %v1050_v33 = vpop.f32.mrf.mxu1 }
 0x144   :  { %vm1199_vm3 = vcmp.gt.f32.partialorder %v849_v30, 0.0  ;;  %v1299_v34 = vmul.f32 0.01, %v849_v30  ;;  %vm1249_vm4 = vcmp.gt.f32.partialorder %v1049_v31, 0.0  ;;  %v1349_v35 = vmul.f32 0.01, %v1049_v31 }
 0x145   :  { %v851_v36 = vpop.f32.mrf.mxu0  ;;  %v1051_v37 = vpop.f32.mrf.mxu1 }
 0x146   :  { %v1399_v38 = vsel %vm1199_vm3, %v849_v30, %v1299_v34  ;;  %v1449_v39 = vsel %vm1249_vm4, %v1049_v31, %v1349_v35  ;;  %v852_v40 = vadd.f32 %v2313_v57, %v851_v36  ;;  %v1052_v41 = vadd.f32 %v2313_v57, %v1051_v37 }
 0x147   :  { %1500 = vst.msk [vmem:[%s2823_s3 + $0x80] sm:$0xff] %vm1483_vm0, %v1399_v38  ;;  %1550 = vst.msk [vmem:[%s2823_s3 + $0x210] sm:$0xff] %vm1483_vm0, %v1449_v39  ;;  %v853_v42 = vpop.f32.mrf.mxu0  ;;  %v1053_v43 = vpop.f32.mrf.mxu1 }
 0x148   :  { %vm1200_vm5 = vcmp.gt.f32.partialorder %v852_v40, 0.0  ;;  %v1300_v44 = vmul.f32 0.01, %v852_v40  ;;  %vm1250_vm6 = vcmp.gt.f32.partialorder %v1052_v41, 0.0  ;;  %v1350_v45 = vmul.f32 0.01, %v1052_v41 }
 0x149   :  { %v856_v46 = vpop.f32.mrf.mxu0  ;;  %v1056_v47 = vpop.f32.mrf.mxu1 }
 0x14a   :  { %v1400_v48 = vsel %vm1200_vm5, %v852_v40, %v1300_v44  ;;  %v1450_v49 = vsel %vm1250_vm6, %v1052_v41, %v1350_v45  ;;  %v857_v50 = vadd.f32 %v2313_v57, %v856_v46  ;;  %v1057_v51 = vadd.f32 %v2313_v57, %v1056_v47 }
 0x14b   :  { %1501 = vst.msk [vmem:[%s2823_s3 + $0x88] sm:$0xff] %vm1483_vm0, %v1400_v48  ;;  %1551 = vst.msk [vmem:[%s2823_s3 + $0x218] sm:$0xff] %vm1483_vm0, %v1450_v49  ;;  %v858_v52 = vpop.f32.mrf.mxu0  ;;  %v1058_v53 = vpop.f32.mrf.mxu1 }
 0x14c   :  { %vm1201_vm7 = vcmp.gt.f32.partialorder %v857_v50, 0.0  ;;  %v1301_v54 = vmul.f32 0.01, %v857_v50  ;;  %vm1251_vm8 = vcmp.gt.f32.partialorder %v1057_v51, 0.0  ;;  %v1351_v55 = vmul.f32 0.01, %v1057_v51 }
 0x14d   :  { %v859_v56 = vpop.f32.mrf.mxu0  ;;  %v1059_v58 = vpop.f32.mrf.mxu1 }
 0x14e   :  { %v1401_v59 = vsel %vm1201_vm7, %v857_v50, %v1301_v54  ;;  %v1451_v60 = vsel %vm1251_vm8, %v1057_v51, %v1351_v55  ;;  %v860_v61 = vadd.f32 %v2313_v57, %v859_v56  ;;  %v1060_v62 = vadd.f32 %v2313_v57, %v1059_v58 }
 0x14f   :  { %1502 = vst.msk [vmem:[%s2823_s3 + $0x90] sm:$0xff] %vm1483_vm0, %v1401_v59  ;;  %1552 = vst.msk [vmem:[%s2823_s3 + $0x220] sm:$0xff] %vm1483_vm0, %v1451_v60  ;;  %v861_v63 = vpop.f32.mrf.mxu0  ;;  %v1061_v0 = vpop.f32.mrf.mxu1 }
 0x150   :  { %vm1202_vm9 = vcmp.gt.f32.partialorder %v860_v61, 0.0  ;;  %v1302_v1 = vmul.f32 0.01, %v860_v61  ;;  %vm1252_vm10 = vcmp.gt.f32.partialorder %v1060_v62, 0.0  ;;  %v1352_v2 = vmul.f32 0.01, %v1060_v62 }
 0x151   :  { %v864_v3 = vpop.f32.mrf.mxu0  ;;  %v1064_v4 = vpop.f32.mrf.mxu1 }
 0x152   :  { %v1402_v5 = vsel %vm1202_vm9, %v860_v61, %v1302_v1  ;;  %v1452_v6 = vsel %vm1252_vm10, %v1060_v62, %v1352_v2  ;;  %v865_v7 = vadd.f32 %v2313_v57, %v864_v3  ;;  %v1065_v8 = vadd.f32 %v2313_v57, %v1064_v4 }
 0x153   :  { %1503 = vst.msk [vmem:[%s2823_s3 + $0x98] sm:$0xff] %vm1483_vm0, %v1402_v5  ;;  %1553 = vst.msk [vmem:[%s2823_s3 + $0x228] sm:$0xff] %vm1483_vm0, %v1452_v6  ;;  %v866_v9 = vpop.f32.mrf.mxu0  ;;  %v1066_v10 = vpop.f32.mrf.mxu1 }
 0x154   :  { %vm1203_vm11 = vcmp.gt.f32.partialorder %v865_v7, 0.0  ;;  %v1303_v11 = vmul.f32 0.01, %v865_v7  ;;  %vm1253_vm12 = vcmp.gt.f32.partialorder %v1065_v8, 0.0  ;;  %v1353_v12 = vmul.f32 0.01, %v1065_v8 }
 0x155   :  { %v867_v13 = vpop.f32.mrf.mxu0  ;;  %v1067_v14 = vpop.f32.mrf.mxu1 }
 0x156   :  { %v1403_v15 = vsel %vm1203_vm11, %v865_v7, %v1303_v11  ;;  %v1453_v16 = vsel %vm1253_vm12, %v1065_v8, %v1353_v12  ;;  %v868_v17 = vadd.f32 %v2313_v57, %v867_v13  ;;  %v1068_v18 = vadd.f32 %v2313_v57, %v1067_v14 }
 0x157   :  { %1504 = vst.msk [vmem:[%s2823_s3 + $0xa0] sm:$0xff] %vm1483_vm0, %v1403_v15  ;;  %1554 = vst.msk [vmem:[%s2823_s3 + $0x230] sm:$0xff] %vm1483_vm0, %v1453_v16  ;;  %v869_v19 = vpop.f32.mrf.mxu0  ;;  %v1069_v20 = vpop.f32.mrf.mxu1 }
 0x158   :  { %vm1204_vm13 = vcmp.gt.f32.partialorder %v868_v17, 0.0  ;;  %v1304_v21 = vmul.f32 0.01, %v868_v17  ;;  %vm1254_vm14 = vcmp.gt.f32.partialorder %v1068_v18, 0.0  ;;  %v1354_v22 = vmul.f32 0.01, %v1068_v18 }
 0x159   :  { %v872_v23 = vpop.f32.mrf.mxu0  ;;  %v1072_v24 = vpop.f32.mrf.mxu1 }
 0x15a   :  { %v1404_v25 = vsel %vm1204_vm13, %v868_v17, %v1304_v21  ;;  %v1454_v26 = vsel %vm1254_vm14, %v1068_v18, %v1354_v22  ;;  %v873_v27 = vadd.f32 %v2313_v57, %v872_v23  ;;  %v1073_v28 = vadd.f32 %v2313_v57, %v1072_v24 }
 0x15b   :  { %1505 = vst.msk [vmem:[%s2823_s3 + $0xa8] sm:$0xff] %vm1483_vm0, %v1404_v25  ;;  %1555 = vst.msk [vmem:[%s2823_s3 + $0x238] sm:$0xff] %vm1483_vm0, %v1454_v26  ;;  %v874_v29 = vpop.f32.mrf.mxu0  ;;  %v1074_v30 = vpop.f32.mrf.mxu1 }
 0x15c   :  { %vm1205_vm15 = vcmp.gt.f32.partialorder %v873_v27, 0.0  ;;  %v1305_v31 = vmul.f32 0.01, %v873_v27  ;;  %vm1255_vm1 = vcmp.gt.f32.partialorder %v1073_v28, 0.0  ;;  %v1355_v32 = vmul.f32 0.01, %v1073_v28 }
 0x15d   :  { %v875_v33 = vpop.f32.mrf.mxu0  ;;  %v1075_v34 = vpop.f32.mrf.mxu1 }
 0x15e   :  { %v1405_v35 = vsel %vm1205_vm15, %v873_v27, %v1305_v31  ;;  %v1455_v36 = vsel %vm1255_vm1, %v1073_v28, %v1355_v32  ;;  %v876_v37 = vadd.f32 %v2313_v57, %v875_v33  ;;  %v1076_v38 = vadd.f32 %v2313_v57, %v1075_v34 }
 0x15f   :  { %1506 = vst.msk [vmem:[%s2823_s3 + $0xb0] sm:$0xff] %vm1483_vm0, %v1405_v35  ;;  %1556 = vst.msk [vmem:[%s2823_s3 + $0x240] sm:$0xff] %vm1483_vm0, %v1455_v36  ;;  %v877_v39 = vpop.f32.mrf.mxu0  ;;  %v1077_v40 = vpop.f32.mrf.mxu1 }
 0x160   :  { %vm1206_vm2 = vcmp.gt.f32.partialorder %v876_v37, 0.0  ;;  %v1306_v41 = vmul.f32 0.01, %v876_v37  ;;  %vm1256_vm3 = vcmp.gt.f32.partialorder %v1076_v38, 0.0  ;;  %v1356_v42 = vmul.f32 0.01, %v1076_v38 }
 0x161   :  { %v880_v43 = vpop.f32.mrf.mxu0  ;;  %v1080_v44 = vpop.f32.mrf.mxu1 }
 0x162   :  { %v1406_v45 = vsel %vm1206_vm2, %v876_v37, %v1306_v41  ;;  %v1456_v46 = vsel %vm1256_vm3, %v1076_v38, %v1356_v42  ;;  %v881_v47 = vadd.f32 %v2313_v57, %v880_v43  ;;  %v1081_v48 = vadd.f32 %v2313_v57, %v1080_v44 }
 0x163   :  { %1507 = vst.msk [vmem:[%s2823_s3 + $0xb8] sm:$0xff] %vm1483_vm0, %v1406_v45  ;;  %1557 = vst.msk [vmem:[%s2823_s3 + $0x248] sm:$0xff] %vm1483_vm0, %v1456_v46  ;;  %v882_v49 = vpop.f32.mrf.mxu0  ;;  %v1082_v50 = vpop.f32.mrf.mxu1 }
 0x164   :  { %vm1207_vm4 = vcmp.gt.f32.partialorder %v881_v47, 0.0  ;;  %v1307_v51 = vmul.f32 0.01, %v881_v47  ;;  %vm1257_vm5 = vcmp.gt.f32.partialorder %v1081_v48, 0.0  ;;  %v1357_v52 = vmul.f32 0.01, %v1081_v48 }
 0x165   :  { %v883_v53 = vpop.f32.mrf.mxu0  ;;  %v1083_v54 = vpop.f32.mrf.mxu1 }
 0x166   :  { %v1407_v55 = vsel %vm1207_vm4, %v881_v47, %v1307_v51  ;;  %v1457_v56 = vsel %vm1257_vm5, %v1081_v48, %v1357_v52  ;;  %v884_v58 = vadd.f32 %v2313_v57, %v883_v53  ;;  %v1084_v59 = vadd.f32 %v2313_v57, %v1083_v54 }
 0x167   :  { %1508 = vst.msk [vmem:[%s2823_s3 + $0xc0] sm:$0xff] %vm1483_vm0, %v1407_v55  ;;  %1558 = vst.msk [vmem:[%s2823_s3 + $0x250] sm:$0xff] %vm1483_vm0, %v1457_v56  ;;  %v885_v60 = vpop.f32.mrf.mxu0  ;;  %v1085_v61 = vpop.f32.mrf.mxu1 }
 0x168   :  { %vm1208_vm6 = vcmp.gt.f32.partialorder %v884_v58, 0.0  ;;  %v1308_v62 = vmul.f32 0.01, %v884_v58  ;;  %vm1258_vm7 = vcmp.gt.f32.partialorder %v1084_v59, 0.0  ;;  %v1358_v63 = vmul.f32 0.01, %v1084_v59 }
 0x169   :  { %v888_v0 = vpop.f32.mrf.mxu0  ;;  %v1088_v1 = vpop.f32.mrf.mxu1 }
 0x16a   :  { %v1408_v2 = vsel %vm1208_vm6, %v884_v58, %v1308_v62  ;;  %v1458_v3 = vsel %vm1258_vm7, %v1084_v59, %v1358_v63  ;;  %v889_v4 = vadd.f32 %v2313_v57, %v888_v0  ;;  %v1089_v5 = vadd.f32 %v2313_v57, %v1088_v1 }
 0x16b   :  { %1509 = vst.msk [vmem:[%s2823_s3 + $0xc8] sm:$0xff] %vm1483_vm0, %v1408_v2  ;;  %1559 = vst.msk [vmem:[%s2823_s3 + $0x258] sm:$0xff] %vm1483_vm0, %v1458_v3  ;;  %v890_v6 = vpop.f32.mrf.mxu0  ;;  %v1090_v7 = vpop.f32.mrf.mxu1 }
 0x16c   :  { %vm1209_vm8 = vcmp.gt.f32.partialorder %v889_v4, 0.0  ;;  %v1309_v8 = vmul.f32 0.01, %v889_v4  ;;  %vm1259_vm9 = vcmp.gt.f32.partialorder %v1089_v5, 0.0  ;;  %v1359_v9 = vmul.f32 0.01, %v1089_v5 }
 0x16d   :  { %v891_v10 = vpop.f32.mrf.mxu0  ;;  %v1091_v11 = vpop.f32.mrf.mxu1 }
 0x16e   :  { %v1409_v12 = vsel %vm1209_vm8, %v889_v4, %v1309_v8  ;;  %v1459_v13 = vsel %vm1259_vm9, %v1089_v5, %v1359_v9  ;;  %v892_v14 = vadd.f32 %v2313_v57, %v891_v10  ;;  %v1092_v15 = vadd.f32 %v2313_v57, %v1091_v11 }
 0x16f   :  { %1510 = vst.msk [vmem:[%s2823_s3 + $0xd0] sm:$0xff] %vm1483_vm0, %v1409_v12  ;;  %1560 = vst.msk [vmem:[%s2823_s3 + $0x260] sm:$0xff] %vm1483_vm0, %v1459_v13  ;;  %v893_v16 = vpop.f32.mrf.mxu0  ;;  %v1093_v17 = vpop.f32.mrf.mxu1 }
 0x170   :  { %vm1210_vm10 = vcmp.gt.f32.partialorder %v892_v14, 0.0  ;;  %v1310_v18 = vmul.f32 0.01, %v892_v14  ;;  %vm1260_vm11 = vcmp.gt.f32.partialorder %v1092_v15, 0.0  ;;  %v1360_v19 = vmul.f32 0.01, %v1092_v15 }
 0x171   :  { %v896_v20 = vpop.f32.mrf.mxu0  ;;  %v1096_v21 = vpop.f32.mrf.mxu1 }
 0x172   :  { %v1410_v22 = vsel %vm1210_vm10, %v892_v14, %v1310_v18  ;;  %v1460_v23 = vsel %vm1260_vm11, %v1092_v15, %v1360_v19  ;;  %v897_v24 = vadd.f32 %v2313_v57, %v896_v20  ;;  %v1097_v25 = vadd.f32 %v2313_v57, %v1096_v21 }
 0x173   :  { %1511 = vst.msk [vmem:[%s2823_s3 + $0xd8] sm:$0xff] %vm1483_vm0, %v1410_v22  ;;  %1561 = vst.msk [vmem:[%s2823_s3 + $0x268] sm:$0xff] %vm1483_vm0, %v1460_v23  ;;  %v898_v26 = vpop.f32.mrf.mxu0  ;;  %v1098_v27 = vpop.f32.mrf.mxu1 }
 0x174   :  { %vm1211_vm12 = vcmp.gt.f32.partialorder %v897_v24, 0.0  ;;  %v1311_v28 = vmul.f32 0.01, %v897_v24  ;;  %vm1261_vm13 = vcmp.gt.f32.partialorder %v1097_v25, 0.0  ;;  %v1361_v29 = vmul.f32 0.01, %v1097_v25 }
 0x175   :  { %v899_v30 = vpop.f32.mrf.mxu0  ;;  %v1099_v31 = vpop.f32.mrf.mxu1 }
 0x176   :  { %v1411_v32 = vsel %vm1211_vm12, %v897_v24, %v1311_v28  ;;  %v1461_v33 = vsel %vm1261_vm13, %v1097_v25, %v1361_v29  ;;  %v900_v34 = vadd.f32 %v2313_v57, %v899_v30  ;;  %v1100_v35 = vadd.f32 %v2313_v57, %v1099_v31 }
 0x177   :  { %1512 = vst.msk [vmem:[%s2823_s3 + $0xe0] sm:$0xff] %vm1483_vm0, %v1411_v32  ;;  %1562 = vst.msk [vmem:[%s2823_s3 + $0x270] sm:$0xff] %vm1483_vm0, %v1461_v33  ;;  %v901_v36 = vpop.f32.mrf.mxu0  ;;  %v1101_v37 = vpop.f32.mrf.mxu1 }
 0x178   :  { %vm1212_vm14 = vcmp.gt.f32.partialorder %v900_v34, 0.0  ;;  %v1312_v38 = vmul.f32 0.01, %v900_v34  ;;  %vm1262_vm15 = vcmp.gt.f32.partialorder %v1100_v35, 0.0  ;;  %v1362_v39 = vmul.f32 0.01, %v1100_v35 }
 0x179   :  { %v904_v40 = vpop.f32.mrf.mxu0  ;;  %v1104_v41 = vpop.f32.mrf.mxu1 }
 0x17a   :  { %v1412_v42 = vsel %vm1212_vm14, %v900_v34, %v1312_v38  ;;  %v1462_v43 = vsel %vm1262_vm15, %v1100_v35, %v1362_v39  ;;  %v905_v44 = vadd.f32 %v2313_v57, %v904_v40  ;;  %v1105_v45 = vadd.f32 %v2313_v57, %v1104_v41 }
 0x17b   :  { %1513 = vst.msk [vmem:[%s2823_s3 + $0xe8] sm:$0xff] %vm1483_vm0, %v1412_v42  ;;  %1563 = vst.msk [vmem:[%s2823_s3 + $0x278] sm:$0xff] %vm1483_vm0, %v1462_v43  ;;  %v906_v46 = vpop.f32.mrf.mxu0  ;;  %v1106_v47 = vpop.f32.mrf.mxu1 }
 0x17c   :  { %vm1213_vm1 = vcmp.gt.f32.partialorder %v905_v44, 0.0  ;;  %v1313_v48 = vmul.f32 0.01, %v905_v44  ;;  %vm1263_vm2 = vcmp.gt.f32.partialorder %v1105_v45, 0.0  ;;  %v1363_v49 = vmul.f32 0.01, %v1105_v45 }
 0x17d   :  { %v907_v50 = vpop.f32.mrf.mxu0  ;;  %v1107_v51 = vpop.f32.mrf.mxu1 }
 0x17e   :  { %v1413_v52 = vsel %vm1213_vm1, %v905_v44, %v1313_v48  ;;  %v1463_v53 = vsel %vm1263_vm2, %v1105_v45, %v1363_v49  ;;  %v908_v54 = vadd.f32 %v2313_v57, %v907_v50  ;;  %v1108_v55 = vadd.f32 %v2313_v57, %v1107_v51  ;;  %v2680_v50 = vld [vmem:[%s2822_s2] ss:$0 sm:$0xff] }
 0x17f   :  { %1514 = vst.msk [vmem:[%s2823_s3 + $0xf0] sm:$0xff] %vm1483_vm0, %v1413_v52  ;;  %1564 = vst.msk [vmem:[%s2823_s3 + $0x280] sm:$0xff] %vm1483_vm0, %v1463_v53  ;;  %v909_v56 = vpop.f32.mrf.mxu0  ;;  %v1109_v58 = vpop.f32.mrf.mxu1 }
 0x180   :  { %vm1214_vm3 = vcmp.gt.f32.partialorder %v908_v54, 0.0  ;;  %v1314_v59 = vmul.f32 0.01, %v908_v54  ;;  %vm1264_vm4 = vcmp.gt.f32.partialorder %v1108_v55, 0.0  ;;  %v1364_v60 = vmul.f32 0.01, %v1108_v55 }
 0x181   :  { %v912_v61 = vpop.f32.mrf.mxu0  ;;  %v1112_v62 = vpop.f32.mrf.mxu1 }
 0x182   :  { %v1414_v63 = vsel %vm1214_vm3, %v908_v54, %v1314_v59  ;;  %v1464_v0 = vsel %vm1264_vm4, %v1108_v55, %v1364_v60  ;;  %v913_v1 = vadd.f32 %v2313_v57, %v912_v61  ;;  %v1113_v2 = vadd.f32 %v2313_v57, %v1112_v62 }
 0x183   :  { %1515 = vst.msk [vmem:[%s2823_s3 + $0xf8] sm:$0xff] %vm1483_vm0, %v1414_v63  ;;  %1565 = vst.msk [vmem:[%s2823_s3 + $0x288] sm:$0xff] %vm1483_vm0, %v1464_v0  ;;  %v914_v3 = vpop.f32.mrf.mxu0  ;;  %v1114_v4 = vpop.f32.mrf.mxu1 }
 0x184   :  { %vm1215_vm5 = vcmp.gt.f32.partialorder %v913_v1, 0.0  ;;  %v1315_v5 = vmul.f32 0.01, %v913_v1  ;;  %vm1265_vm6 = vcmp.gt.f32.partialorder %v1113_v2, 0.0  ;;  %v1365_v6 = vmul.f32 0.01, %v1113_v2 }
 0x185   :  { %v915_v7 = vpop.f32.mrf.mxu0  ;;  %v1115_v8 = vpop.f32.mrf.mxu1 }
 0x186   :  { %v1415_v9 = vsel %vm1215_vm5, %v913_v1, %v1315_v5  ;;  %v1465_v10 = vsel %vm1265_vm6, %v1113_v2, %v1365_v6  ;;  %v916_v11 = vadd.f32 %v2313_v57, %v915_v7  ;;  %v1116_v12 = vadd.f32 %v2313_v57, %v1115_v8 }
 0x187   :  { %1516 = vst.msk [vmem:[%s2823_s3 + $0x100] sm:$0xff] %vm1483_vm0, %v1415_v9  ;;  %1566 = vst.msk [vmem:[%s2823_s3 + $0x290] sm:$0xff] %vm1483_vm0, %v1465_v10  ;;  %v917_v13 = vpop.f32.mrf.mxu0  ;;  %v1117_v14 = vpop.f32.mrf.mxu1 }
 0x188   :  { %vm1216_vm7 = vcmp.gt.f32.partialorder %v916_v11, 0.0  ;;  %v1316_v15 = vmul.f32 0.01, %v916_v11  ;;  %vm1266_vm8 = vcmp.gt.f32.partialorder %v1116_v12, 0.0  ;;  %v1366_v16 = vmul.f32 0.01, %v1116_v12 }
 0x189   :  { %v920_v17 = vpop.f32.mrf.mxu0  ;;  %v1120_v18 = vpop.f32.mrf.mxu1 }
 0x18a   :  { %v1416_v19 = vsel %vm1216_vm7, %v916_v11, %v1316_v15  ;;  %v1466_v20 = vsel %vm1266_vm8, %v1116_v12, %v1366_v16  ;;  %v921_v21 = vadd.f32 %v2313_v57, %v920_v17  ;;  %v1121_v22 = vadd.f32 %v2313_v57, %v1120_v18 }
 0x18b   :  { %1517 = vst.msk [vmem:[%s2823_s3 + $0x108] sm:$0xff] %vm1483_vm0, %v1416_v19  ;;  %1567 = vst.msk [vmem:[%s2823_s3 + $0x298] sm:$0xff] %vm1483_vm0, %v1466_v20  ;;  %v922_v23 = vpop.f32.mrf.mxu0  ;;  %v1122_v24 = vpop.f32.mrf.mxu1 }
 0x18c   :  { %vm1217_vm9 = vcmp.gt.f32.partialorder %v921_v21, 0.0  ;;  %v1317_v25 = vmul.f32 0.01, %v921_v21  ;;  %vm1267_vm10 = vcmp.gt.f32.partialorder %v1121_v22, 0.0  ;;  %v1367_v26 = vmul.f32 0.01, %v1121_v22 }
 0x18d   :  { %v923_v27 = vpop.f32.mrf.mxu0  ;;  %v1123_v28 = vpop.f32.mrf.mxu1 }
 0x18e   :  { %v1417_v29 = vsel %vm1217_vm9, %v921_v21, %v1317_v25  ;;  %v1467_v30 = vsel %vm1267_vm10, %v1121_v22, %v1367_v26  ;;  %v924_v31 = vadd.f32 %v2313_v57, %v923_v27  ;;  %v1124_v32 = vadd.f32 %v2313_v57, %v1123_v28 }
 0x18f   :  { %1518 = vst.msk [vmem:[%s2823_s3 + $0x110] sm:$0xff] %vm1483_vm0, %v1417_v29  ;;  %1568 = vst.msk [vmem:[%s2823_s3 + $0x2a0] sm:$0xff] %vm1483_vm0, %v1467_v30  ;;  %v925_v33 = vpop.f32.mrf.mxu0  ;;  %v1125_v34 = vpop.f32.mrf.mxu1 }
 0x190   :  { %vm1218_vm11 = vcmp.gt.f32.partialorder %v924_v31, 0.0  ;;  %v1318_v35 = vmul.f32 0.01, %v924_v31  ;;  %vm1268_vm12 = vcmp.gt.f32.partialorder %v1124_v32, 0.0  ;;  %v1368_v36 = vmul.f32 0.01, %v1124_v32 }
 0x191   :  { %v928_v37 = vpop.f32.mrf.mxu0  ;;  %v1128_v38 = vpop.f32.mrf.mxu1 }
 0x192   :  { %v1418_v39 = vsel %vm1218_vm11, %v924_v31, %v1318_v35  ;;  %v1468_v40 = vsel %vm1268_vm12, %v1124_v32, %v1368_v36  ;;  %v929_v41 = vadd.f32 %v2313_v57, %v928_v37  ;;  %v1129_v42 = vadd.f32 %v2313_v57, %v1128_v38 }
 0x193   :  { %1519 = vst.msk [vmem:[%s2823_s3 + $0x118] sm:$0xff] %vm1483_vm0, %v1418_v39  ;;  %1569 = vst.msk [vmem:[%s2823_s3 + $0x2a8] sm:$0xff] %vm1483_vm0, %v1468_v40  ;;  %v930_v43 = vpop.f32.mrf.mxu0  ;;  %v1130_v44 = vpop.f32.mrf.mxu1 }
 0x194   :  { %vm1219_vm13 = vcmp.gt.f32.partialorder %v929_v41, 0.0  ;;  %v1319_v45 = vmul.f32 0.01, %v929_v41  ;;  %vm1269_vm14 = vcmp.gt.f32.partialorder %v1129_v42, 0.0  ;;  %v1369_v46 = vmul.f32 0.01, %v1129_v42 }
 0x195   :  { %v931_v47 = vpop.f32.mrf.mxu0  ;;  %v1131_v48 = vpop.f32.mrf.mxu1 }
 0x196   :  { %v1419_v49 = vsel %vm1219_vm13, %v929_v41, %v1319_v45  ;;  %v1469_v57 = vsel %vm1269_vm14, %v1129_v42, %v1369_v46  ;;  %v932_v51 = vadd.f32 %v2680_v50, %v931_v47  ;;  %v1132_v52 = vadd.f32 %v2680_v50, %v1131_v48 }
 0x197   :  { %1520 = vst.msk [vmem:[%s2823_s3 + $0x120] sm:$0xff] %vm1483_vm0, %v1419_v49  ;;  %1570 = vst.msk [vmem:[%s2823_s3 + $0x2b0] sm:$0xff] %vm1483_vm0, %v1469_v57  ;;  %v933_v53 = vpop.f32.mrf.mxu0  ;;  %v1133_v54 = vpop.f32.mrf.mxu1 }
 0x198   :  { %vm1220_vm15 = vcmp.gt.f32.partialorder %v932_v51, 0.0  ;;  %v1320_v55 = vmul.f32 0.01, %v932_v51  ;;  %vm1270_vm1 = vcmp.gt.f32.partialorder %v1132_v52, 0.0  ;;  %v1370_v56 = vmul.f32 0.01, %v1132_v52 }
 0x199   :  { %v936_v58 = vpop.f32.mrf.mxu0  ;;  %v1136_v59 = vpop.f32.mrf.mxu1 }
 0x19a   :  { %v1420_v60 = vsel %vm1220_vm15, %v932_v51, %v1320_v55  ;;  %v1470_v61 = vsel %vm1270_vm1, %v1132_v52, %v1370_v56  ;;  %v937_v62 = vadd.f32 %v2680_v50, %v936_v58  ;;  %v1137_v63 = vadd.f32 %v2680_v50, %v1136_v59 }
 0x19b   :  { %1521 = vst.msk [vmem:[%s2823_s3 + $0x128] sm:$0xff] %vm1483_vm0, %v1420_v60  ;;  %1571 = vst.msk [vmem:[%s2823_s3 + $0x2b8] sm:$0xff] %vm1483_vm0, %v1470_v61  ;;  %v938_v0 = vpop.f32.mrf.mxu0  ;;  %v1138_v1 = vpop.f32.mrf.mxu1 }
 0x19c   :  { %vm1221_vm2 = vcmp.gt.f32.partialorder %v937_v62, 0.0  ;;  %v1321_v2 = vmul.f32 0.01, %v937_v62  ;;  %vm1271_vm3 = vcmp.gt.f32.partialorder %v1137_v63, 0.0  ;;  %v1371_v3 = vmul.f32 0.01, %v1137_v63 }
 0x19d   :  { %v939_v4 = vpop.f32.mrf.mxu0  ;;  %v1139_v5 = vpop.f32.mrf.mxu1 }
 0x19e   :  { %v1421_v6 = vsel %vm1221_vm2, %v937_v62, %v1321_v2  ;;  %v1471_v7 = vsel %vm1271_vm3, %v1137_v63, %v1371_v3  ;;  %v940_v8 = vadd.f32 %v2680_v50, %v939_v4  ;;  %v1140_v9 = vadd.f32 %v2680_v50, %v1139_v5 }
 0x19f   :  { %1522 = vst.msk [vmem:[%s2823_s3 + $0x130] sm:$0xff] %vm1483_vm0, %v1421_v6  ;;  %1572 = vst.msk [vmem:[%s2823_s3 + $0x2c0] sm:$0xff] %vm1483_vm0, %v1471_v7  ;;  %v941_v10 = vpop.f32.mrf.mxu0  ;;  %v1141_v11 = vpop.f32.mrf.mxu1 }
 0x1a0   :  { %vm1222_vm4 = vcmp.gt.f32.partialorder %v940_v8, 0.0  ;;  %v1322_v12 = vmul.f32 0.01, %v940_v8  ;;  %vm1272_vm5 = vcmp.gt.f32.partialorder %v1140_v9, 0.0  ;;  %v1372_v13 = vmul.f32 0.01, %v1140_v9 }
 0x1a1   :  { %v944_v14 = vpop.f32.mrf.mxu0  ;;  %v1144_v15 = vpop.f32.mrf.mxu1 }
 0x1a2   :  { %v1422_v16 = vsel %vm1222_vm4, %v940_v8, %v1322_v12  ;;  %v1472_v17 = vsel %vm1272_vm5, %v1140_v9, %v1372_v13  ;;  %v945_v18 = vadd.f32 %v2680_v50, %v944_v14  ;;  %v1145_v19 = vadd.f32 %v2680_v50, %v1144_v15 }
 0x1a3   :  { %1523 = vst.msk [vmem:[%s2823_s3 + $0x138] sm:$0xff] %vm1483_vm0, %v1422_v16  ;;  %1573 = vst.msk [vmem:[%s2823_s3 + $0x2c8] sm:$0xff] %vm1483_vm0, %v1472_v17  ;;  %v946_v20 = vpop.f32.mrf.mxu0  ;;  %v1146_v21 = vpop.f32.mrf.mxu1 }
 0x1a4   :  { %vm1223_vm6 = vcmp.gt.f32.partialorder %v945_v18, 0.0  ;;  %v1323_v22 = vmul.f32 0.01, %v945_v18  ;;  %vm1273_vm7 = vcmp.gt.f32.partialorder %v1145_v19, 0.0  ;;  %v1373_v23 = vmul.f32 0.01, %v1145_v19 }
 0x1a5   :  { %v947_v24 = vpop.f32.mrf.mxu0  ;;  %v1147_v25 = vpop.f32.mrf.mxu1 }
 0x1a6   :  { %v1423_v26 = vsel %vm1223_vm6, %v945_v18, %v1323_v22  ;;  %v1473_v27 = vsel %vm1273_vm7, %v1145_v19, %v1373_v23  ;;  %v948_v28 = vadd.f32 %v2680_v50, %v947_v24  ;;  %v1148_v29 = vadd.f32 %v2680_v50, %v1147_v25 }
 0x1a7   :  { %1524 = vst.msk [vmem:[%s2823_s3 + $0x140] sm:$0xff] %vm1483_vm0, %v1423_v26  ;;  %1574 = vst.msk [vmem:[%s2823_s3 + $0x2d0] sm:$0xff] %vm1483_vm0, %v1473_v27  ;;  %v949_v30 = vpop.f32.mrf.mxu0  ;;  %v1149_v31 = vpop.f32.mrf.mxu1 }
 0x1a8   :  { %vm1224_vm8 = vcmp.gt.f32.partialorder %v948_v28, 0.0  ;;  %v1324_v32 = vmul.f32 0.01, %v948_v28  ;;  %vm1274_vm9 = vcmp.gt.f32.partialorder %v1148_v29, 0.0  ;;  %v1374_v33 = vmul.f32 0.01, %v1148_v29 }
 0x1a9   :  { %v952_v34 = vpop.f32.mrf.mxu0  ;;  %v1152_v35 = vpop.f32.mrf.mxu1 }
 0x1aa   :  { %v1424_v36 = vsel %vm1224_vm8, %v948_v28, %v1324_v32  ;;  %v1474_v37 = vsel %vm1274_vm9, %v1148_v29, %v1374_v33  ;;  %v953_v38 = vadd.f32 %v2680_v50, %v952_v34  ;;  %v1153_v39 = vadd.f32 %v2680_v50, %v1152_v35 }
 0x1ab   :  { %1525 = vst.msk [vmem:[%s2823_s3 + $0x148] sm:$0xff] %vm1483_vm0, %v1424_v36  ;;  %1575 = vst.msk [vmem:[%s2823_s3 + $0x2d8] sm:$0xff] %vm1483_vm0, %v1474_v37  ;;  %v954_v40 = vpop.f32.mrf.mxu0  ;;  %v1154_v41 = vpop.f32.mrf.mxu1 }
 0x1ac   :  { %vm1225_vm10 = vcmp.gt.f32.partialorder %v953_v38, 0.0  ;;  %v1325_v42 = vmul.f32 0.01, %v953_v38  ;;  %vm1275_vm11 = vcmp.gt.f32.partialorder %v1153_v39, 0.0  ;;  %v1375_v43 = vmul.f32 0.01, %v1153_v39 }
 0x1ad   :  { %v955_v44 = vpop.f32.mrf.mxu0  ;;  %v1155_v45 = vpop.f32.mrf.mxu1 }
 0x1ae   :  { %v1425_v46 = vsel %vm1225_vm10, %v953_v38, %v1325_v42  ;;  %v1475_v47 = vsel %vm1275_vm11, %v1153_v39, %v1375_v43  ;;  %v956_v48 = vadd.f32 %v2680_v50, %v955_v44  ;;  %v1156_v49 = vadd.f32 %v2680_v50, %v1155_v45 }
 0x1af   :  { %1526 = vst.msk [vmem:[%s2823_s3 + $0x150] sm:$0xff] %vm1483_vm0, %v1425_v46  ;;  %1576 = vst.msk [vmem:[%s2823_s3 + $0x2e0] sm:$0xff] %vm1483_vm0, %v1475_v47  ;;  %v957_v57 = vpop.f32.mrf.mxu0  ;;  %v1157_v51 = vpop.f32.mrf.mxu1 }
 0x1b0   :  { %vm1226_vm12 = vcmp.gt.f32.partialorder %v956_v48, 0.0  ;;  %v1326_v52 = vmul.f32 0.01, %v956_v48  ;;  %vm1276_vm13 = vcmp.gt.f32.partialorder %v1156_v49, 0.0  ;;  %v1376_v53 = vmul.f32 0.01, %v1156_v49 }
 0x1b1   :  { %v960_v54 = vpop.f32.mrf.mxu0  ;;  %v1160_v55 = vpop.f32.mrf.mxu1 }
 0x1b2   :  { %v1426_v56 = vsel %vm1226_vm12, %v956_v48, %v1326_v52  ;;  %v1476_v58 = vsel %vm1276_vm13, %v1156_v49, %v1376_v53  ;;  %v961_v59 = vadd.f32 %v2680_v50, %v960_v54  ;;  %v1161_v60 = vadd.f32 %v2680_v50, %v1160_v55 }
 0x1b3   :  { %1527 = vst.msk [vmem:[%s2823_s3 + $0x158] sm:$0xff] %vm1483_vm0, %v1426_v56  ;;  %1577 = vst.msk [vmem:[%s2823_s3 + $0x2e8] sm:$0xff] %vm1483_vm0, %v1476_v58  ;;  %v962_v61 = vpop.f32.mrf.mxu0  ;;  %v1162_v62 = vpop.f32.mrf.mxu1 }
 0x1b4   :  { %vm1227_vm14 = vcmp.gt.f32.partialorder %v961_v59, 0.0  ;;  %v1327_v63 = vmul.f32 0.01, %v961_v59  ;;  %vm1277_vm15 = vcmp.gt.f32.partialorder %v1161_v60, 0.0  ;;  %v1377_v0 = vmul.f32 0.01, %v1161_v60 }
 0x1b5   :  { %v963_v1 = vpop.f32.mrf.mxu0  ;;  %v1163_v2 = vpop.f32.mrf.mxu1 }
 0x1b6   :  { %v1427_v3 = vsel %vm1227_vm14, %v961_v59, %v1327_v63  ;;  %v1477_v4 = vsel %vm1277_vm15, %v1161_v60, %v1377_v0  ;;  %v964_v5 = vadd.f32 %v2680_v50, %v963_v1  ;;  %v1164_v6 = vadd.f32 %v2680_v50, %v1163_v2 }
 0x1b7   :  { %1528 = vst.msk [vmem:[%s2823_s3 + $0x160] sm:$0xff] %vm1483_vm0, %v1427_v3  ;;  %1578 = vst.msk [vmem:[%s2823_s3 + $0x2f0] sm:$0xff] %vm1483_vm0, %v1477_v4  ;;  %v965_v7 = vpop.f32.mrf.mxu0  ;;  %v1165_v8 = vpop.f32.mrf.mxu1 }
 0x1b8   :  { %vm1228_vm1 = vcmp.gt.f32.partialorder %v964_v5, 0.0  ;;  %v1328_v9 = vmul.f32 0.01, %v964_v5  ;;  %vm1278_vm2 = vcmp.gt.f32.partialorder %v1164_v6, 0.0  ;;  %v1378_v10 = vmul.f32 0.01, %v1164_v6 }
 0x1b9   :  { %v968_v11 = vpop.f32.mrf.mxu0  ;;  %v1168_v12 = vpop.f32.mrf.mxu1 }
 0x1ba   :  { %v1428_v13 = vsel %vm1228_vm1, %v964_v5, %v1328_v9  ;;  %v1478_v14 = vsel %vm1278_vm2, %v1164_v6, %v1378_v10  ;;  %v969_v15 = vadd.f32 %v2680_v50, %v968_v11  ;;  %v1169_v16 = vadd.f32 %v2680_v50, %v1168_v12 }
 0x1bb   :  { %1529 = vst.msk [vmem:[%s2823_s3 + $0x168] sm:$0xff] %vm1483_vm0, %v1428_v13  ;;  %1579 = vst.msk [vmem:[%s2823_s3 + $0x2f8] sm:$0xff] %vm1483_vm0, %v1478_v14  ;;  %v970_v17 = vpop.f32.mrf.mxu0  ;;  %v1170_v18 = vpop.f32.mrf.mxu1 }
 0x1bc   :  { %vm1229_vm3 = vcmp.gt.f32.partialorder %v969_v15, 0.0  ;;  %v1329_v19 = vmul.f32 0.01, %v969_v15  ;;  %vm1279_vm4 = vcmp.gt.f32.partialorder %v1169_v16, 0.0  ;;  %v1379_v20 = vmul.f32 0.01, %v1169_v16 }
 0x1bd   :  { %v971_v21 = vpop.f32.mrf.mxu0  ;;  %v1171_v22 = vpop.f32.mrf.mxu1 }
 0x1be   :  { %v1429_v23 = vsel %vm1229_vm3, %v969_v15, %v1329_v19  ;;  %v1479_v24 = vsel %vm1279_vm4, %v1169_v16, %v1379_v20  ;;  %v972_v25 = vadd.f32 %v2680_v50, %v971_v21  ;;  %v1172_v26 = vadd.f32 %v2680_v50, %v1171_v22 }
 0x1bf   :  { %1530 = vst.msk [vmem:[%s2823_s3 + $0x170] sm:$0xff] %vm1483_vm0, %v1429_v23  ;;  %1580 = vst.msk [vmem:[%s2823_s3 + $0x300] sm:$0xff] %vm1483_vm0, %v1479_v24  ;;  %v973_v27 = vpop.f32.mrf.mxu0  ;;  %v1173_v28 = vpop.f32.mrf.mxu1 }
 0x1c0   :  { %vm1230_vm5 = vcmp.gt.f32.partialorder %v972_v25, 0.0  ;;  %v1330_v29 = vmul.f32 0.01, %v972_v25  ;;  %vm1280_vm6 = vcmp.gt.f32.partialorder %v1172_v26, 0.0  ;;  %v1380_v30 = vmul.f32 0.01, %v1172_v26 }
 0x1c1   :  { %v976_v31 = vpop.f32.mrf.mxu0  ;;  %v1176_v32 = vpop.f32.mrf.mxu1 }
 0x1c2   :  { %v1430_v33 = vsel %vm1230_vm5, %v972_v25, %v1330_v29  ;;  %v1480_v34 = vsel %vm1280_vm6, %v1172_v26, %v1380_v30  ;;  %v977_v35 = vadd.f32 %v2680_v50, %v976_v31  ;;  %v1177_v36 = vadd.f32 %v2680_v50, %v1176_v32 }
 0x1c3   :  { %1531 = vst.msk [vmem:[%s2823_s3 + $0x178] sm:$0xff] %vm1483_vm0, %v1430_v33  ;;  %1581 = vst.msk [vmem:[%s2823_s3 + $0x308] sm:$0xff] %vm1483_vm0, %v1480_v34  ;;  %v978_v37 = vpop.f32.mrf.mxu0  ;;  %v1178_v38 = vpop.f32.mrf.mxu1 }
 0x1c4   :  { %vm1231_vm7 = vcmp.gt.f32.partialorder %v977_v35, 0.0  ;;  %v1331_v39 = vmul.f32 0.01, %v977_v35  ;;  %vm1281_vm8 = vcmp.gt.f32.partialorder %v1177_v36, 0.0  ;;  %v1381_v40 = vmul.f32 0.01, %v1177_v36 }
 0x1c5   :  { %v979_v41 = vpop.f32.mrf.mxu0  ;;  %v1179_v42 = vpop.f32.mrf.mxu1 }
 0x1c6   :  { %v1431_v43 = vsel %vm1231_vm7, %v977_v35, %v1331_v39  ;;  %v1481_v44 = vsel %vm1281_vm8, %v1177_v36, %v1381_v40  ;;  %v980_v45 = vadd.f32 %v2680_v50, %v979_v41  ;;  %v1180_v46 = vadd.f32 %v2680_v50, %v1179_v42 }
 0x1c7   :  { %1532 = vst.msk [vmem:[%s2823_s3 + $0x180] sm:$0xff] %vm1483_vm0, %v1431_v43  ;;  %1582 = vst.msk [vmem:[%s2823_s3 + $0x310] sm:$0xff] %vm1483_vm0, %v1481_v44  ;;  %v981_v47 = vpop.f32.mrf.mxu0  ;;  %v1181_v48 = vpop.f32.mrf.mxu1 }
 0x1c8   :  { %vm1232_vm9 = vcmp.gt.f32.partialorder %v980_v45, 0.0  ;;  %v1332_v49 = vmul.f32 0.01, %v980_v45  ;;  %vm1282_vm10 = vcmp.gt.f32.partialorder %v1180_v46, 0.0  ;;  %v1382_v57 = vmul.f32 0.01, %v1180_v46 }
 0x1ca   :  { %v1432_v51 = vsel %vm1232_vm9, %v980_v45, %v1332_v49  ;;  %v1482_v52 = vsel %vm1282_vm10, %v1180_v46, %v1382_v57 }
 0x1cb   :  { %1533 = vst.msk [vmem:[%s2823_s3 + $0x188] sm:$0xff] %vm1483_vm0, %v1432_v51  ;;  %1583 = vst.msk [vmem:[%s2823_s3 + $0x318] sm:$0xff] %vm1483_vm0, %v1482_v52 }

// kernel: forward.5
= control target key start
LH: loop header
LB: loop body
LE: loop exit
PB: predicated region body
PF: predicated region fallthrough
CT: control target
= control target key end

     0   :  { %vm837_vm0 = vcmask 523264   ;;  %s1552_s1 = inlined_call_operand.vmem [shape: bf16[512,64], index: 1, kind: input, shape index: {}]   ;;  %s1553_s0 = inlined_call_operand.vmem [shape: bf16[162,512], index: 0, kind: input, shape index: {}]   ;;  %s1554_s2 = inlined_call_operand.vmem [shape: f32[1,64], index: 2, kind: input, shape index: {}]   ;;  %s1555_s3 = inlined_call_operand.vmem [shape: f32[162,64], index: 3, kind: output, shape index: {}]  }
   0x1   :  { %v1105_v0 = vld [vmem:[%s1552_s1 + $0x78] sm:$0xff]   ;;  %v1109_v4 = vld [vmem:[%s1552_s1 + $0x70] sm:$0xff]   ;;  %v1113_v8 = vld [vmem:[%s1552_s1 + $0x68] sm:$0xff]  }
   0x2   :  { %v1106_v1 = vld [vmem:[%s1552_s1 + $0xf8] sm:$0xff]   ;;  %941 = vmatprep.subr.bf16.mxu0 %v1105_v0  ;;  %v1110_v5 = vld [vmem:[%s1552_s1 + $0xf0] sm:$0xff]   ;;  %v1114_v9 = vld [vmem:[%s1552_s1 + $0xe8] sm:$0xff]  }
   0x3   :  { %v1107_v2 = vld [vmem:[%s1552_s1 + $0x38] sm:$0xff]   ;;  %1023 = vmatprep.subr.bf16.mxu1 %v1106_v1  ;;  %v1111_v6 = vld [vmem:[%s1552_s1 + $0x30] sm:$0xff]   ;;  %v1115_v10 = vld [vmem:[%s1552_s1 + $0x28] sm:$0xff]  }
   0x4   :  { %v1108_v3 = vld [vmem:[%s1552_s1 + $0xb8] sm:$0xff]   ;;  %942 = vmatpush3.bf16.msra.mxu0 %v1107_v2  ;;  %v1112_v7 = vld [vmem:[%s1552_s1 + $0xb0] sm:$0xff]   ;;  %v1116_v11 = vld [vmem:[%s1552_s1 + $0xa8] sm:$0xff]  }
   0x5   :  { %1024 = vmatpush3.bf16.msra.mxu1 %v1108_v3  ;;  %943 = vmatprep.subr.bf16.mxu0 %v1109_v4  ;;  %v1117_v12 = vld [vmem:[%s1552_s1 + $0x60] sm:$0xff]   ;;  %v1121_v16 = vld [vmem:[%s1552_s1 + $0x58] sm:$0xff]   ;;  %v1125_v20 = vld [vmem:[%s1552_s1 + $0x50] sm:$0xff]  }
   0x6   :  { %1025 = vmatprep.subr.bf16.mxu1 %v1110_v5  ;;  %v1118_v13 = vld [vmem:[%s1552_s1 + $0xe0] sm:$0xff]   ;;  %v1122_v17 = vld [vmem:[%s1552_s1 + $0xd8] sm:$0xff]   ;;  %v1126_v21 = vld [vmem:[%s1552_s1 + $0xd0] sm:$0xff]  }
   0x7   :  { %v1119_v14 = vld [vmem:[%s1552_s1 + $0x20] sm:$0xff]   ;;  %v1123_v18 = vld [vmem:[%s1552_s1 + $0x18] sm:$0xff]   ;;  %v1127_v22 = vld [vmem:[%s1552_s1 + $0x10] sm:$0xff]  }
   0x8   :  { %944 = vmatpush3.bf16.msra.mxu0 %v1111_v6  ;;  %v1120_v15 = vld [vmem:[%s1552_s1 + $0xa0] sm:$0xff]   ;;  %v1124_v19 = vld [vmem:[%s1552_s1 + $0x98] sm:$0xff]   ;;  %v1128_v23 = vld [vmem:[%s1552_s1 + $0x90] sm:$0xff]  }
   0x9   :  { %1026 = vmatpush3.bf16.msra.mxu1 %v1112_v7  ;;  %945 = vmatprep.subr.bf16.mxu0 %v1113_v8  ;;  %v1129_v24 = vld [vmem:[%s1552_s1 + $0x48] sm:$0xff]   ;;  %v1133_v28 = vld [vmem:[%s1552_s1 + $0x40] sm:$0xff]  }
   0xa   :  { %1027 = vmatprep.subr.bf16.mxu1 %v1114_v9  ;;  %v1130_v25 = vld [vmem:[%s1552_s1 + $0xc8] sm:$0xff]   ;;  %v1134_v29 = vld [vmem:[%s1552_s1 + $0xc0] sm:$0xff]  }
   0xb   :  { %v1131_v26 = vld [vmem:[%s1552_s1 + $0x8] sm:$0xff]   ;;  %v1135_v30 = vld [vmem:[%s1552_s1] sm:$0xff]  }
   0xc   :  { %946 = vmatpush3.bf16.msra.mxu0 %v1115_v10  ;;  %v1132_v27 = vld [vmem:[%s1552_s1 + $0x88] sm:$0xff]   ;;  %v1136_v31 = vld [vmem:[%s1552_s1 + $0x80] sm:$0xff]  }
   0xd   :  { %1028 = vmatpush3.bf16.msra.mxu1 %v1116_v11  ;;  %947 = vmatprep.subr.bf16.mxu0 %v1117_v12  ;;  %v1137_v32 = vld [vmem:[%s1553_s0] ss:$16 sps:$4 sm:$0xff]   ;;  %v1139_v33 = vld [vmem:[%s1553_s0 + $0x4] ss:$16 sps:$4 sm:$0xff]   ;;  %v1140_v34 = vld [vmem:[%s1553_s0 + $0x8] ss:$16 sps:$4 sm:$0xff]  }
   0xe   :  { %1029 = vmatprep.subr.bf16.mxu1 %v1118_v13  ;;  %v1142_v35 = vld [vmem:[%s1553_s0 + $0xc] ss:$16 sps:$4 sm:$0xff]   ;;  %566 = vmatprep.mubr.bf16.mxu0 %v1139_v33  ;;  %v1143_v36 = vld [vmem:[%s1553_s0 + $0x24] ss:$16 sps:$4 sm:$0xff]   ;;  %v1147_v38 = vld [vmem:[%s1553_s0 + $0x20] ss:$16 sps:$4 sm:$0xff]  }
   0xf   :  { %686 = vmatprep.mubr.bf16.mxu1 %v1142_v35  ;;  %v1145_v37 = vld [vmem:[%s1553_s0 + $0x2c] ss:$16 sps:$4 sm:$0xff]   ;;  %v1148_v39 = vld [vmem:[%s1553_s0 + $0x28] ss:$16 sps:$4 sm:$0xff]   ;;  %v1149_v40 = vld [vmem:[%s1553_s0 + $0x44] ss:$16 sps:$4 sm:$0xff]  }
  0x10   :  { %948 = vmatpush3.bf16.msra.mxu0 %v1119_v14  ;;  %v1151_v41 = vld [vmem:[%s1553_s0 + $0x4c] ss:$16 sps:$4 sm:$0xff]   ;;  %v1153_v42 = vld [vmem:[%s1553_s0 + $0x40] ss:$16 sps:$4 sm:$0xff]   ;;  %v1154_v43 = vld [vmem:[%s1553_s0 + $0x48] ss:$16 sps:$4 sm:$0xff]  }
  0x11   :  { %1030 = vmatpush3.bf16.msra.mxu1 %v1120_v15  ;;  %949 = vmatprep.subr.bf16.mxu0 %v1121_v16  ;;  %v1155_v44 = vld [vmem:[%s1553_s0 + $0x64] ss:$16 sps:$4 sm:$0xff]   ;;  %v1157_v45 = vld [vmem:[%s1553_s0 + $0x6c] ss:$16 sps:$4 sm:$0xff]   ;;  %v1159_v46 = vld [vmem:[%s1553_s0 + $0x60] ss:$16 sps:$4 sm:$0xff]  }
  0x12   :  { %1031 = vmatprep.subr.bf16.mxu1 %v1122_v17  ;;  %v1160_v47 = vld [vmem:[%s1553_s0 + $0x68] ss:$16 sps:$4 sm:$0xff]   ;;  %v1161_v48 = vld [vmem:[%s1553_s0 + $0x84] ss:$16 sps:$4 sm:$0xff]   ;;  %v1163_v49 = vld [vmem:[%s1553_s0 + $0x8c] ss:$16 sps:$4 sm:$0xff]  }
  0x13   :  { %v1165_v50 = vld [vmem:[%s1553_s0 + $0x80] ss:$16 sps:$4 sm:$0xff]   ;;  %v1166_v51 = vld [vmem:[%s1553_s0 + $0x88] ss:$16 sps:$4 sm:$0xff]   ;;  %v1167_v52 = vld [vmem:[%s1553_s0 + $0xa4] ss:$16 sps:$4 sm:$0xff]  }
  0x14   :  { %950 = vmatpush3.bf16.msra.mxu0 %v1123_v18  ;;  %v1169_v53 = vld [vmem:[%s1553_s0 + $0xac] ss:$16 sps:$4 sm:$0xff]   ;;  %v1171_v54 = vld [vmem:[%s1553_s0 + $0xa0] ss:$16 sps:$4 sm:$0xff]   ;;  %v1172_v55 = vld [vmem:[%s1553_s0 + $0xa8] ss:$16 sps:$4 sm:$0xff]  }
  0x15   :  { %1032 = vmatpush3.bf16.msra.mxu1 %v1124_v19  ;;  %951 = vmatprep.subr.bf16.mxu0 %v1125_v20  ;;  %v1173_v56 = vld [vmem:[%s1553_s0 + $0xc4] ss:$16 sps:$4 sm:$0xff]   ;;  %v1175_v57 = vld [vmem:[%s1553_s0 + $0xcc] ss:$16 sps:$4 sm:$0xff]   ;;  %v1177_v58 = vld [vmem:[%s1553_s0 + $0xc0] ss:$16 sps:$4 sm:$0xff]  }
  0x16   :  { %1033 = vmatprep.subr.bf16.mxu1 %v1126_v21  ;;  %v1178_v59 = vld [vmem:[%s1553_s0 + $0xc8] ss:$16 sps:$4 sm:$0xff]   ;;  %v1179_v60 = vld [vmem:[%s1553_s0 + $0xe4] ss:$16 sps:$4 sm:$0xff]   ;;  %v1181_v61 = vld [vmem:[%s1553_s0 + $0xec] ss:$16 sps:$4 sm:$0xff]  }
  0x17   :  { %v1183_v62 = vld [vmem:[%s1553_s0 + $0xe0] ss:$16 sps:$4 sm:$0xff]   ;;  %v1184_v63 = vld [vmem:[%s1553_s0 + $0xe8] ss:$16 sps:$4 sm:$0xff]   ;;  %v1185_v0 = vld [vmem:[%s1553_s0 + $0x104] ss:$16 sps:$4 sm:$0xff]  }
  0x18   :  { %952 = vmatpush3.bf16.msra.mxu0 %v1127_v22  ;;  %v1187_v1 = vld [vmem:[%s1553_s0 + $0x10c] ss:$16 sps:$4 sm:$0xff]   ;;  %v1189_v2 = vld [vmem:[%s1553_s0 + $0x100] ss:$16 sps:$4 sm:$0xff]   ;;  %v1190_v3 = vld [vmem:[%s1553_s0 + $0x108] ss:$16 sps:$4 sm:$0xff]  }
  0x19   :  { %1034 = vmatpush3.bf16.msra.mxu1 %v1128_v23  ;;  %953 = vmatprep.subr.bf16.mxu0 %v1129_v24  ;;  %v1191_v4 = vld [vmem:[%s1553_s0 + $0x124] ss:$16 sps:$4 sm:$0xff]   ;;  %v1193_v5 = vld [vmem:[%s1553_s0 + $0x12c] ss:$16 sps:$4 sm:$0xff]   ;;  %v1195_v8 = vld [vmem:[%s1553_s0 + $0x120] ss:$16 sps:$4 sm:$0xff]  }
  0x1a   :  { %1035 = vmatprep.subr.bf16.mxu1 %v1130_v25  ;;  %v55_v6 = vld [vmem:[%s1553_s0 + $0x140] sm:$0x11]  ;;  %v56_v7 = vld [vmem:[%s1553_s0 + $0x148] sm:$0x11] }
  0x1b   :  { %v1196_v9 = vld [vmem:[%s1553_s0 + $0x128] ss:$16 sps:$4 sm:$0xff]   ;;  %v906_v10 = vcombine.high %v55_v6, %v55_v6  ;;  %v908_v11 = vcombine.high %v56_v7, %v56_v7  ;;  %v905_v12 = vcombine.low %v55_v6, %v55_v6  ;;  %v907_v13 = vcombine.low %v56_v7, %v56_v7  ;;  %v1446_v16 = vld [vmem:[%s1554_s2] ss:$0 sm:$0xff] }
  0x1c   :  { %954 = vmatpush3.bf16.msra.mxu0 %v1131_v26 }
  0x1d   :  { %1036 = vmatpush3.bf16.msra.mxu1 %v1132_v27  ;;  %955 = vmatprep.subr.bf16.mxu0 %v1133_v28 }
  0x1e   :  { %1037 = vmatprep.subr.bf16.mxu1 %v1134_v29 }
  0x20   :  { %956 = vmatpush3.bf16.msra.mxu0 %v1135_v30 }
  0x21   :  { %1038 = vmatpush3.bf16.msra.mxu1 %v1136_v31 }
  0x23   :  { %567 = vmatmul.mubr.bf16.vlgmr.msra.gmra.mxu0 %v1137_v32 }
  0x24   :  { %687 = vmatmul.mubr.bf16.vlgmr.msra.gmra.mxu1 %v1140_v34  ;;  %574 = vmatprep.mubr.bf16.mxu0 %v1143_v36 }
  0x25   :  { %694 = vmatprep.mubr.bf16.mxu1 %v1145_v37 }
  0x2b   :  { %575 = vmatmul.mubr.bf16.gmra.mxu0 %v1147_v38 }
  0x2c   :  { %695 = vmatmul.mubr.bf16.gmra.mxu1 %v1148_v39  ;;  %582 = vmatprep.mubr.bf16.mxu0 %v1149_v40 }
  0x2d   :  { %702 = vmatprep.mubr.bf16.mxu1 %v1151_v41 }
  0x33   :  { %583 = vmatmul.mubr.bf16.gmra.mxu0 %v1153_v42 }
  0x34   :  { %703 = vmatmul.mubr.bf16.gmra.mxu1 %v1154_v43  ;;  %590 = vmatprep.mubr.bf16.mxu0 %v1155_v44 }
  0x35   :  { %710 = vmatprep.mubr.bf16.mxu1 %v1157_v45 }
  0x3b   :  { %591 = vmatmul.mubr.bf16.gmra.mxu0 %v1159_v46 }
  0x3c   :  { %711 = vmatmul.mubr.bf16.gmra.mxu1 %v1160_v47  ;;  %598 = vmatprep.mubr.bf16.mxu0 %v1161_v48 }
  0x3d   :  { %718 = vmatprep.mubr.bf16.mxu1 %v1163_v49 }
  0x43   :  { %599 = vmatmul.mubr.bf16.gmra.mxu0 %v1165_v50 }
  0x44   :  { %719 = vmatmul.mubr.bf16.gmra.mxu1 %v1166_v51  ;;  %606 = vmatprep.mubr.bf16.mxu0 %v1167_v52 }
  0x45   :  { %726 = vmatprep.mubr.bf16.mxu1 %v1169_v53 }
  0x4b   :  { %607 = vmatmul.mubr.bf16.gmra.mxu0 %v1171_v54 }
  0x4c   :  { %727 = vmatmul.mubr.bf16.gmra.mxu1 %v1172_v55  ;;  %614 = vmatprep.mubr.bf16.mxu0 %v1173_v56 }
  0x4d   :  { %734 = vmatprep.mubr.bf16.mxu1 %v1175_v57 }
  0x53   :  { %615 = vmatmul.mubr.bf16.gmra.mxu0 %v1177_v58 }
  0x54   :  { %735 = vmatmul.mubr.bf16.gmra.mxu1 %v1178_v59  ;;  %622 = vmatprep.mubr.bf16.mxu0 %v1179_v60 }
  0x55   :  { %742 = vmatprep.mubr.bf16.mxu1 %v1181_v61 }
  0x5b   :  { %623 = vmatmul.mubr.bf16.gmra.mxu0 %v1183_v62 }
  0x5c   :  { %743 = vmatmul.mubr.bf16.gmra.mxu1 %v1184_v63  ;;  %630 = vmatprep.mubr.bf16.mxu0 %v1185_v0 }
  0x5d   :  { %750 = vmatprep.mubr.bf16.mxu1 %v1187_v1 }
  0x63   :  { %631 = vmatmul.mubr.bf16.gmra.mxu0 %v1189_v2 }
  0x64   :  { %751 = vmatmul.mubr.bf16.gmra.mxu1 %v1190_v3  ;;  %638 = vmatprep.mubr.bf16.mxu0 %v1191_v4 }
  0x65   :  { %758 = vmatprep.mubr.bf16.mxu1 %v1193_v5 }
  0x6b   :  { %639 = vmatmul.mubr.bf16.gmra.mxu0 %v1195_v8 }
  0x6c   :  { %759 = vmatmul.mubr.bf16.gmra.mxu1 %v1196_v9  ;;  %646 = vmatprep.mubr.bf16.mxu0 %v906_v10 }
  0x6d   :  { %766 = vmatprep.mubr.bf16.mxu1 %v908_v11 }
  0x73   :  { %647 = vmatmul.mubr.bf16.gmra.mxu0 %v905_v12 }
  0x74   :  { %767 = vmatmul.mubr.bf16.gmra.mxu1 %v907_v13 }
  0xe3   :  { %v957_v14 = vpop.f32.mrf.mxu0 }
  0xe4   :  { %v1039_v15 = vpop.f32.mrf.mxu1 }
  0xe5   :  { %v958_v17 = vpop.f32.mrf.mxu0 }
  0xe6   :  { %v959_v18 = vadd.f32 %v958_v17, %v957_v14  ;;  %v1040_v19 = vpop.f32.mrf.mxu1 }
  0xe7   :  { %v960_v20 = vpop.f32.mrf.mxu0  ;;  %v1041_v22 = vadd.f32 %v1040_v19, %v1039_v15 }
  0xe8   :  { %v569_v21 = vadd.f32 %v959_v18, %v1446_v16  ;;  %v1042_v23 = vpop.f32.mrf.mxu1 }
  0xe9   :  { %v961_v24 = vpop.f32.mrf.mxu0 }
  0xea   :  { %v689_v25 = vadd.f32 %v1041_v22, %v569_v21  ;;  %v962_v26 = vadd.f32 %v961_v24, %v960_v20  ;;  %v1043_v27 = vpop.f32.mrf.mxu1 }
  0xeb   :  { %v963_v28 = vpop.f32.mrf.mxu0  ;;  %v1044_v31 = vadd.f32 %v1043_v27, %v1042_v23 }
  0xec   :  { %vm774_vm1 = vcmp.gt.f32.partialorder %v689_v25, 0.0  ;;  %v795_v29 = vmul.f32 0.01, %v689_v25  ;;  %v572_v30 = vadd.f32 %v962_v26, %v1446_v16  ;;  %v1045_v32 = vpop.f32.mrf.mxu1 }
  0xed   :  { %v964_v33 = vpop.f32.mrf.mxu0 }
  0xee   :  { %v816_v34 = vsel %vm774_vm1, %v689_v25, %v795_v29  ;;  %v692_v35 = vadd.f32 %v1044_v31, %v572_v30  ;;  %v965_v36 = vadd.f32 %v964_v33, %v963_v28  ;;  %v1046_v37 = vpop.f32.mrf.mxu1 }
  0xef   :  { %838 = vst.msk [vmem:[%s1555_s3] sm:$0xff] %vm837_vm0, %v816_v34  ;;  %v966_v38 = vpop.f32.mrf.mxu0  ;;  %v1047_v41 = vadd.f32 %v1046_v37, %v1045_v32 }
  0xf0   :  { %vm775_vm2 = vcmp.gt.f32.partialorder %v692_v35, 0.0  ;;  %v796_v39 = vmul.f32 0.01, %v692_v35  ;;  %v577_v40 = vadd.f32 %v965_v36, %v1446_v16  ;;  %v1048_v42 = vpop.f32.mrf.mxu1 }
  0xf1   :  { %v967_v43 = vpop.f32.mrf.mxu0 }
  0xf2   :  { %v817_v44 = vsel %vm775_vm2, %v692_v35, %v796_v39  ;;  %v697_v45 = vadd.f32 %v1047_v41, %v577_v40  ;;  %v968_v46 = vadd.f32 %v967_v43, %v966_v38  ;;  %v1049_v47 = vpop.f32.mrf.mxu1 }
  0xf3   :  { %839 = vst.msk [vmem:[%s1555_s3 + $0x8] sm:$0xff] %vm837_vm0, %v817_v44  ;;  %v969_v48 = vpop.f32.mrf.mxu0  ;;  %v1050_v51 = vadd.f32 %v1049_v47, %v1048_v42 }
  0xf4   :  { %vm776_vm3 = vcmp.gt.f32.partialorder %v697_v45, 0.0  ;;  %v797_v49 = vmul.f32 0.01, %v697_v45  ;;  %v580_v50 = vadd.f32 %v968_v46, %v1446_v16  ;;  %v1051_v52 = vpop.f32.mrf.mxu1 }
  0xf5   :  { %v970_v53 = vpop.f32.mrf.mxu0 }
  0xf6   :  { %v818_v54 = vsel %vm776_vm3, %v697_v45, %v797_v49  ;;  %v700_v55 = vadd.f32 %v1050_v51, %v580_v50  ;;  %v971_v56 = vadd.f32 %v970_v53, %v969_v48  ;;  %v1052_v57 = vpop.f32.mrf.mxu1 }
  0xf7   :  { %840 = vst.msk [vmem:[%s1555_s3 + $0x10] sm:$0xff] %vm837_vm0, %v818_v54  ;;  %v972_v58 = vpop.f32.mrf.mxu0  ;;  %v1053_v61 = vadd.f32 %v1052_v57, %v1051_v52 }
  0xf8   :  { %vm777_vm4 = vcmp.gt.f32.partialorder %v700_v55, 0.0  ;;  %v798_v59 = vmul.f32 0.01, %v700_v55  ;;  %v585_v60 = vadd.f32 %v971_v56, %v1446_v16  ;;  %v1054_v62 = vpop.f32.mrf.mxu1 }
  0xf9   :  { %v973_v63 = vpop.f32.mrf.mxu0 }
  0xfa   :  { %v819_v0 = vsel %vm777_vm4, %v700_v55, %v798_v59  ;;  %v705_v1 = vadd.f32 %v1053_v61, %v585_v60  ;;  %v974_v2 = vadd.f32 %v973_v63, %v972_v58  ;;  %v1055_v3 = vpop.f32.mrf.mxu1 }
  0xfb   :  { %841 = vst.msk [vmem:[%s1555_s3 + $0x18] sm:$0xff] %vm837_vm0, %v819_v0  ;;  %v975_v4 = vpop.f32.mrf.mxu0  ;;  %v1056_v7 = vadd.f32 %v1055_v3, %v1054_v62 }
  0xfc   :  { %vm778_vm5 = vcmp.gt.f32.partialorder %v705_v1, 0.0  ;;  %v799_v5 = vmul.f32 0.01, %v705_v1  ;;  %v588_v6 = vadd.f32 %v974_v2, %v1446_v16  ;;  %v1057_v8 = vpop.f32.mrf.mxu1 }
  0xfd   :  { %v976_v9 = vpop.f32.mrf.mxu0 }
  0xfe   :  { %v820_v10 = vsel %vm778_vm5, %v705_v1, %v799_v5  ;;  %v708_v11 = vadd.f32 %v1056_v7, %v588_v6  ;;  %v977_v12 = vadd.f32 %v976_v9, %v975_v4  ;;  %v1058_v13 = vpop.f32.mrf.mxu1 }
  0xff   :  { %842 = vst.msk [vmem:[%s1555_s3 + $0x20] sm:$0xff] %vm837_vm0, %v820_v10  ;;  %v978_v14 = vpop.f32.mrf.mxu0  ;;  %v1059_v18 = vadd.f32 %v1058_v13, %v1057_v8 }
 0x100   :  { %vm779_vm6 = vcmp.gt.f32.partialorder %v708_v11, 0.0  ;;  %v800_v15 = vmul.f32 0.01, %v708_v11  ;;  %v593_v17 = vadd.f32 %v977_v12, %v1446_v16  ;;  %v1060_v19 = vpop.f32.mrf.mxu1 }
 0x101   :  { %v979_v20 = vpop.f32.mrf.mxu0 }
 0x102   :  { %v821_v21 = vsel %vm779_vm6, %v708_v11, %v800_v15  ;;  %v713_v22 = vadd.f32 %v1059_v18, %v593_v17  ;;  %v980_v23 = vadd.f32 %v979_v20, %v978_v14  ;;  %v1061_v24 = vpop.f32.mrf.mxu1 }
 0x103   :  { %843 = vst.msk [vmem:[%s1555_s3 + $0x28] sm:$0xff] %vm837_vm0, %v821_v21  ;;  %v981_v25 = vpop.f32.mrf.mxu0  ;;  %v1062_v28 = vadd.f32 %v1061_v24, %v1060_v19 }
 0x104   :  { %vm780_vm7 = vcmp.gt.f32.partialorder %v713_v22, 0.0  ;;  %v801_v26 = vmul.f32 0.01, %v713_v22  ;;  %v596_v27 = vadd.f32 %v980_v23, %v1446_v16  ;;  %v1063_v29 = vpop.f32.mrf.mxu1 }
 0x105   :  { %v982_v30 = vpop.f32.mrf.mxu0 }
 0x106   :  { %v822_v31 = vsel %vm780_vm7, %v713_v22, %v801_v26  ;;  %v716_v32 = vadd.f32 %v1062_v28, %v596_v27  ;;  %v983_v33 = vadd.f32 %v982_v30, %v981_v25  ;;  %v1064_v34 = vpop.f32.mrf.mxu1  ;;  %vm858_vm7 = vcmask 517120  }
 0x107   :  { %844 = vst.msk [vmem:[%s1555_s3 + $0x30] sm:$0xff] %vm837_vm0, %v822_v31  ;;  %v984_v35 = vpop.f32.mrf.mxu0  ;;  %v1065_v38 = vadd.f32 %v1064_v34, %v1063_v29 }
 0x108   :  { %vm781_vm8 = vcmp.gt.f32.partialorder %v716_v32, 0.0  ;;  %v802_v36 = vmul.f32 0.01, %v716_v32  ;;  %v601_v37 = vadd.f32 %v983_v33, %v1446_v16  ;;  %v1066_v39 = vpop.f32.mrf.mxu1 }
 0x109   :  { %v985_v40 = vpop.f32.mrf.mxu0 }
 0x10a   :  { %v823_v41 = vsel %vm781_vm8, %v716_v32, %v802_v36  ;;  %v721_v42 = vadd.f32 %v1065_v38, %v601_v37  ;;  %v986_v43 = vadd.f32 %v985_v40, %v984_v35  ;;  %v1067_v44 = vpop.f32.mrf.mxu1 }
 0x10b   :  { %845 = vst.msk [vmem:[%s1555_s3 + $0x38] sm:$0xff] %vm837_vm0, %v823_v41  ;;  %v987_v45 = vpop.f32.mrf.mxu0  ;;  %v1068_v48 = vadd.f32 %v1067_v44, %v1066_v39 }
 0x10c   :  { %vm782_vm9 = vcmp.gt.f32.partialorder %v721_v42, 0.0  ;;  %v803_v46 = vmul.f32 0.01, %v721_v42  ;;  %v604_v47 = vadd.f32 %v986_v43, %v1446_v16  ;;  %v1069_v49 = vpop.f32.mrf.mxu1 }
 0x10d   :  { %v988_v50 = vpop.f32.mrf.mxu0 }
 0x10e   :  { %v824_v51 = vsel %vm782_vm9, %v721_v42, %v803_v46  ;;  %v724_v52 = vadd.f32 %v1068_v48, %v604_v47  ;;  %v989_v53 = vadd.f32 %v988_v50, %v987_v45  ;;  %v1070_v54 = vpop.f32.mrf.mxu1 }
 0x10f   :  { %846 = vst.msk [vmem:[%s1555_s3 + $0x40] sm:$0xff] %vm837_vm0, %v824_v51  ;;  %v990_v55 = vpop.f32.mrf.mxu0  ;;  %v1071_v58 = vadd.f32 %v1070_v54, %v1069_v49 }
 0x110   :  { %vm783_vm10 = vcmp.gt.f32.partialorder %v724_v52, 0.0  ;;  %v804_v56 = vmul.f32 0.01, %v724_v52  ;;  %v609_v57 = vadd.f32 %v989_v53, %v1446_v16  ;;  %v1072_v59 = vpop.f32.mrf.mxu1 }
 0x111   :  { %v991_v60 = vpop.f32.mrf.mxu0 }
 0x112   :  { %v825_v61 = vsel %vm783_vm10, %v724_v52, %v804_v56  ;;  %v729_v62 = vadd.f32 %v1071_v58, %v609_v57  ;;  %v992_v63 = vadd.f32 %v991_v60, %v990_v55  ;;  %v1073_v0 = vpop.f32.mrf.mxu1 }
 0x113   :  { %847 = vst.msk [vmem:[%s1555_s3 + $0x48] sm:$0xff] %vm837_vm0, %v825_v61  ;;  %v993_v1 = vpop.f32.mrf.mxu0  ;;  %v1074_v4 = vadd.f32 %v1073_v0, %v1072_v59 }
 0x114   :  { %vm784_vm11 = vcmp.gt.f32.partialorder %v729_v62, 0.0  ;;  %v805_v2 = vmul.f32 0.01, %v729_v62  ;;  %v612_v3 = vadd.f32 %v992_v63, %v1446_v16  ;;  %v1075_v5 = vpop.f32.mrf.mxu1 }
 0x115   :  { %v994_v6 = vpop.f32.mrf.mxu0 }
 0x116   :  { %v826_v7 = vsel %vm784_vm11, %v729_v62, %v805_v2  ;;  %v732_v8 = vadd.f32 %v1074_v4, %v612_v3  ;;  %v995_v9 = vadd.f32 %v994_v6, %v993_v1  ;;  %v1076_v10 = vpop.f32.mrf.mxu1 }
 0x117   :  { %848 = vst.msk [vmem:[%s1555_s3 + $0x50] sm:$0xff] %vm837_vm0, %v826_v7  ;;  %v996_v11 = vpop.f32.mrf.mxu0  ;;  %v1077_v14 = vadd.f32 %v1076_v10, %v1075_v5 }
 0x118   :  { %vm785_vm12 = vcmp.gt.f32.partialorder %v732_v8, 0.0  ;;  %v806_v12 = vmul.f32 0.01, %v732_v8  ;;  %v617_v13 = vadd.f32 %v995_v9, %v1446_v16  ;;  %v1078_v15 = vpop.f32.mrf.mxu1 }
 0x119   :  { %v997_v17 = vpop.f32.mrf.mxu0 }
 0x11a   :  { %v827_v18 = vsel %vm785_vm12, %v732_v8, %v806_v12  ;;  %v737_v19 = vadd.f32 %v1077_v14, %v617_v13  ;;  %v998_v20 = vadd.f32 %v997_v17, %v996_v11  ;;  %v1079_v21 = vpop.f32.mrf.mxu1 }
 0x11b   :  { %849 = vst.msk [vmem:[%s1555_s3 + $0x58] sm:$0xff] %vm837_vm0, %v827_v18  ;;  %v999_v22 = vpop.f32.mrf.mxu0  ;;  %v1080_v25 = vadd.f32 %v1079_v21, %v1078_v15 }
 0x11c   :  { %vm786_vm13 = vcmp.gt.f32.partialorder %v737_v19, 0.0  ;;  %v807_v23 = vmul.f32 0.01, %v737_v19  ;;  %v620_v24 = vadd.f32 %v998_v20, %v1446_v16  ;;  %v1081_v26 = vpop.f32.mrf.mxu1 }
 0x11d   :  { %v1000_v27 = vpop.f32.mrf.mxu0 }
 0x11e   :  { %v828_v28 = vsel %vm786_vm13, %v737_v19, %v807_v23  ;;  %v740_v29 = vadd.f32 %v1080_v25, %v620_v24  ;;  %v1001_v30 = vadd.f32 %v1000_v27, %v999_v22  ;;  %v1082_v31 = vpop.f32.mrf.mxu1 }
 0x11f   :  { %850 = vst.msk [vmem:[%s1555_s3 + $0x60] sm:$0xff] %vm837_vm0, %v828_v28  ;;  %v1002_v32 = vpop.f32.mrf.mxu0  ;;  %v1083_v35 = vadd.f32 %v1082_v31, %v1081_v26 }
 0x120   :  { %vm787_vm14 = vcmp.gt.f32.partialorder %v740_v29, 0.0  ;;  %v808_v33 = vmul.f32 0.01, %v740_v29  ;;  %v625_v34 = vadd.f32 %v1001_v30, %v1446_v16  ;;  %v1084_v36 = vpop.f32.mrf.mxu1 }
 0x121   :  { %v1003_v37 = vpop.f32.mrf.mxu0 }
 0x122   :  { %v829_v38 = vsel %vm787_vm14, %v740_v29, %v808_v33  ;;  %v745_v39 = vadd.f32 %v1083_v35, %v625_v34  ;;  %v1004_v40 = vadd.f32 %v1003_v37, %v1002_v32  ;;  %v1085_v41 = vpop.f32.mrf.mxu1 }
 0x123   :  { %851 = vst.msk [vmem:[%s1555_s3 + $0x68] sm:$0xff] %vm837_vm0, %v829_v38  ;;  %v1005_v42 = vpop.f32.mrf.mxu0  ;;  %v1086_v45 = vadd.f32 %v1085_v41, %v1084_v36 }
 0x124   :  { %vm788_vm15 = vcmp.gt.f32.partialorder %v745_v39, 0.0  ;;  %v809_v43 = vmul.f32 0.01, %v745_v39  ;;  %v628_v44 = vadd.f32 %v1004_v40, %v1446_v16  ;;  %v1087_v46 = vpop.f32.mrf.mxu1 }
 0x125   :  { %v1006_v47 = vpop.f32.mrf.mxu0 }
 0x126   :  { %v830_v48 = vsel %vm788_vm15, %v745_v39, %v809_v43  ;;  %v748_v49 = vadd.f32 %v1086_v45, %v628_v44  ;;  %v1007_v50 = vadd.f32 %v1006_v47, %v1005_v42  ;;  %v1088_v51 = vpop.f32.mrf.mxu1 }
 0x127   :  { %852 = vst.msk [vmem:[%s1555_s3 + $0x70] sm:$0xff] %vm837_vm0, %v830_v48  ;;  %v1008_v52 = vpop.f32.mrf.mxu0  ;;  %v1089_v55 = vadd.f32 %v1088_v51, %v1087_v46 }
 0x128   :  { %vm789_vm1 = vcmp.gt.f32.partialorder %v748_v49, 0.0  ;;  %v810_v53 = vmul.f32 0.01, %v748_v49  ;;  %v633_v54 = vadd.f32 %v1007_v50, %v1446_v16  ;;  %v1090_v56 = vpop.f32.mrf.mxu1 }
 0x129   :  { %v1009_v57 = vpop.f32.mrf.mxu0 }
 0x12a   :  { %v831_v58 = vsel %vm789_vm1, %v748_v49, %v810_v53  ;;  %v753_v59 = vadd.f32 %v1089_v55, %v633_v54  ;;  %v1010_v60 = vadd.f32 %v1009_v57, %v1008_v52  ;;  %v1091_v61 = vpop.f32.mrf.mxu1 }
 0x12b   :  { %853 = vst.msk [vmem:[%s1555_s3 + $0x78] sm:$0xff] %vm837_vm0, %v831_v58  ;;  %v1011_v62 = vpop.f32.mrf.mxu0  ;;  %v1092_v1 = vadd.f32 %v1091_v61, %v1090_v56 }
 0x12c   :  { %vm790_vm2 = vcmp.gt.f32.partialorder %v753_v59, 0.0  ;;  %v811_v63 = vmul.f32 0.01, %v753_v59  ;;  %v636_v0 = vadd.f32 %v1010_v60, %v1446_v16  ;;  %v1093_v2 = vpop.f32.mrf.mxu1 }
 0x12d   :  { %v1012_v3 = vpop.f32.mrf.mxu0 }
 0x12e   :  { %v832_v4 = vsel %vm790_vm2, %v753_v59, %v811_v63  ;;  %v756_v5 = vadd.f32 %v1092_v1, %v636_v0  ;;  %v1013_v6 = vadd.f32 %v1012_v3, %v1011_v62  ;;  %v1094_v7 = vpop.f32.mrf.mxu1 }
 0x12f   :  { %854 = vst.msk [vmem:[%s1555_s3 + $0x80] sm:$0xff] %vm837_vm0, %v832_v4  ;;  %v1014_v8 = vpop.f32.mrf.mxu0  ;;  %v1095_v11 = vadd.f32 %v1094_v7, %v1093_v2 }
 0x130   :  { %vm791_vm3 = vcmp.gt.f32.partialorder %v756_v5, 0.0  ;;  %v812_v9 = vmul.f32 0.01, %v756_v5  ;;  %v641_v10 = vadd.f32 %v1013_v6, %v1446_v16  ;;  %v1096_v12 = vpop.f32.mrf.mxu1 }
 0x131   :  { %v1015_v13 = vpop.f32.mrf.mxu0 }
 0x132   :  { %v833_v14 = vsel %vm791_vm3, %v756_v5, %v812_v9  ;;  %v761_v15 = vadd.f32 %v1095_v11, %v641_v10  ;;  %v1016_v17 = vadd.f32 %v1015_v13, %v1014_v8  ;;  %v1097_v18 = vpop.f32.mrf.mxu1 }
 0x133   :  { %855 = vst.msk [vmem:[%s1555_s3 + $0x88] sm:$0xff] %vm837_vm0, %v833_v14  ;;  %v1017_v19 = vpop.f32.mrf.mxu0  ;;  %v1098_v22 = vadd.f32 %v1097_v18, %v1096_v12 }
 0x134   :  { %vm792_vm4 = vcmp.gt.f32.partialorder %v761_v15, 0.0  ;;  %v813_v20 = vmul.f32 0.01, %v761_v15  ;;  %v644_v21 = vadd.f32 %v1016_v17, %v1446_v16  ;;  %v1099_v23 = vpop.f32.mrf.mxu1 }
 0x135   :  { %v1018_v24 = vpop.f32.mrf.mxu0 }
 0x136   :  { %v834_v25 = vsel %vm792_vm4, %v761_v15, %v813_v20  ;;  %v764_v26 = vadd.f32 %v1098_v22, %v644_v21  ;;  %v1019_v27 = vadd.f32 %v1018_v24, %v1017_v19  ;;  %v1100_v28 = vpop.f32.mrf.mxu1 }
 0x137   :  { %856 = vst.msk [vmem:[%s1555_s3 + $0x90] sm:$0xff] %vm837_vm0, %v834_v25  ;;  %v1020_v29 = vpop.f32.mrf.mxu0  ;;  %v1101_v32 = vadd.f32 %v1100_v28, %v1099_v23 }
 0x138   :  { %vm793_vm5 = vcmp.gt.f32.partialorder %v764_v26, 0.0  ;;  %v814_v30 = vmul.f32 0.01, %v764_v26  ;;  %v649_v31 = vadd.f32 %v1019_v27, %v1446_v16  ;;  %v1102_v33 = vpop.f32.mrf.mxu1 }
 0x139   :  { %v1021_v34 = vpop.f32.mrf.mxu0 }
 0x13a   :  { %v835_v35 = vsel %vm793_vm5, %v764_v26, %v814_v30  ;;  %v769_v36 = vadd.f32 %v1101_v32, %v649_v31  ;;  %v1103_v37 = vpop.f32.mrf.mxu1 }
 0x13b   :  { %857 = vst.msk [vmem:[%s1555_s3 + $0x98] sm:$0xff] %vm837_vm0, %v835_v35 }
 0x13c   :  { %vm794_vm6 = vcmp.gt.f32.partialorder %v769_v36, 0.0  ;;  %v815_v38 = vmul.f32 0.01, %v769_v36 }
 0x13e   :  { %v836_v39 = vsel %vm794_vm6, %v769_v36, %v815_v38 }
 0x13f   :  { %859 = vst.msk [vmem:[%s1555_s3 + $0xa0] sm:$0x3] %vm858_vm7, %v836_v39 }

// kernel: forward.6
= control target key start
LH: loop header
LB: loop body
LE: loop exit
PB: predicated region body
PF: predicated region fallthrough
CT: control target
= control target key end

     0   :  { %v1194_v34 = vmov 0.0   ;;  %vm1195_vm0 = vmmov 0   ;;  %vm516_vm1 = vcmask 523264   ;;  %vm853_vm12 = vcmask 517120   ;;  %s1590_s1 = inlined_call_operand.vmem [shape: bf16[576,64], index: 1, kind: input, shape index: {}]   ;;  %s1591_s0 = inlined_call_operand.vmem [shape: bf16[98,576], index: 0, kind: input, shape index: {}]   ;;  %s1592_s2 = inlined_call_operand.vmem [shape: f32[1,64], index: 2, kind: input, shape index: {}]   ;;  %s1593_s3 = inlined_call_operand.vmem [shape: f32[98,64], index: 3, kind: output, shape index: {}]  }
   0x1   :  { %v1111_v0 = vld [vmem:[%s1590_s1 + $0x78] sm:$0xff]   ;;  %v1115_v4 = vld [vmem:[%s1590_s1 + $0x70] sm:$0xff]   ;;  %v1119_v8 = vld [vmem:[%s1590_s1 + $0x68] sm:$0xff]  }
   0x2   :  { %v1112_v1 = vld [vmem:[%s1590_s1 + $0xf8] sm:$0xff]   ;;  %938 = vmatprep.subr.bf16.mxu0 %v1111_v0  ;;  %v1116_v5 = vld [vmem:[%s1590_s1 + $0xf0] sm:$0xff]   ;;  %v1120_v9 = vld [vmem:[%s1590_s1 + $0xe8] sm:$0xff]  }
   0x3   :  { %v1113_v2 = vld [vmem:[%s1590_s1 + $0x38] sm:$0xff]   ;;  %996 = vmatprep.subr.bf16.mxu1 %v1112_v1  ;;  %v1117_v6 = vld [vmem:[%s1590_s1 + $0x30] sm:$0xff]   ;;  %v1121_v10 = vld [vmem:[%s1590_s1 + $0x28] sm:$0xff]  }
   0x4   :  { %v1114_v3 = vld [vmem:[%s1590_s1 + $0xb8] sm:$0xff]   ;;  %939 = vmatpush3.bf16.msra.mxu0 %v1113_v2  ;;  %v1118_v7 = vld [vmem:[%s1590_s1 + $0xb0] sm:$0xff]   ;;  %v1122_v11 = vld [vmem:[%s1590_s1 + $0xa8] sm:$0xff]  }
   0x5   :  { %997 = vmatpush3.bf16.msra.mxu1 %v1114_v3  ;;  %940 = vmatprep.subr.bf16.mxu0 %v1115_v4  ;;  %v1123_v12 = vld [vmem:[%s1590_s1 + $0x60] sm:$0xff]   ;;  %v1127_v16 = vld [vmem:[%s1590_s1 + $0x58] sm:$0xff]   ;;  %v1131_v20 = vld [vmem:[%s1590_s1 + $0x50] sm:$0xff]  }
   0x6   :  { %998 = vmatprep.subr.bf16.mxu1 %v1116_v5  ;;  %v1124_v13 = vld [vmem:[%s1590_s1 + $0xe0] sm:$0xff]   ;;  %v1128_v17 = vld [vmem:[%s1590_s1 + $0xd8] sm:$0xff]   ;;  %v1132_v21 = vld [vmem:[%s1590_s1 + $0xd0] sm:$0xff]  }
   0x7   :  { %v1125_v14 = vld [vmem:[%s1590_s1 + $0x20] sm:$0xff]   ;;  %v1129_v18 = vld [vmem:[%s1590_s1 + $0x18] sm:$0xff]   ;;  %v1133_v22 = vld [vmem:[%s1590_s1 + $0x10] sm:$0xff]  }
   0x8   :  { %941 = vmatpush3.bf16.msra.mxu0 %v1117_v6  ;;  %v1126_v15 = vld [vmem:[%s1590_s1 + $0xa0] sm:$0xff]   ;;  %v1130_v19 = vld [vmem:[%s1590_s1 + $0x98] sm:$0xff]   ;;  %v1134_v23 = vld [vmem:[%s1590_s1 + $0x90] sm:$0xff]  }
   0x9   :  { %999 = vmatpush3.bf16.msra.mxu1 %v1118_v7  ;;  %942 = vmatprep.subr.bf16.mxu0 %v1119_v8  ;;  %v1135_v24 = vld [vmem:[%s1590_s1 + $0x48] sm:$0xff]   ;;  %v1139_v28 = vld [vmem:[%s1590_s1 + $0x40] sm:$0xff]   ;;  %v1149_v37 = vld [vmem:[%s1590_s1 + $0x118] sm:$0xff]  }
   0xa   :  { %1000 = vmatprep.subr.bf16.mxu1 %v1120_v9  ;;  %v1136_v25 = vld [vmem:[%s1590_s1 + $0xc8] sm:$0xff]   ;;  %v1140_v29 = vld [vmem:[%s1590_s1 + $0xc0] sm:$0xff]   ;;  %v1160_v43 = vld [vmem:[%s1590_s1 + $0x110] sm:$0xff]  }
   0xb   :  { %v1137_v26 = vld [vmem:[%s1590_s1 + $0x8] sm:$0xff]   ;;  %v1141_v30 = vld [vmem:[%s1590_s1] sm:$0xff]   ;;  %v1158_v44 = vld [vmem:[%s1591_s0 + $0x5c] ss:$20 sps:$4 sm:$0xff]  }
   0xc   :  { %943 = vmatpush3.bf16.msra.mxu0 %v1121_v10  ;;  %v1138_v27 = vld [vmem:[%s1590_s1 + $0x88] sm:$0xff]   ;;  %v1142_v31 = vld [vmem:[%s1590_s1 + $0x80] sm:$0xff]   ;;  %v1163_v48 = vld [vmem:[%s1591_s0 + $0x7c] ss:$20 sps:$4 sm:$0xff]  }
   0xd   :  { %1001 = vmatpush3.bf16.msra.mxu1 %v1122_v11  ;;  %944 = vmatprep.subr.bf16.mxu0 %v1123_v12  ;;  %v1143_v32 = vld [vmem:[%s1591_s0] ss:$20 sps:$4 sm:$0xff]   ;;  %v1145_v33 = vld [vmem:[%s1591_s0 + $0x4] ss:$20 sps:$4 sm:$0xff]   ;;  %v1146_v35 = vld [vmem:[%s1591_s0 + $0x8] ss:$20 sps:$4 sm:$0xff]  }
   0xe   :  { %1002 = vmatprep.subr.bf16.mxu1 %v1124_v13  ;;  %v1148_v36 = vld [vmem:[%s1591_s0 + $0xc] ss:$20 sps:$4 sm:$0xff]   ;;  %570 = vmatprep.mubr.bf16.mxu0 %v1145_v33  ;;  %v1152_v39 = vld [vmem:[%s1591_s0 + $0x34] ss:$20 sps:$4 sm:$0xff]   ;;  %v1155_v41 = vld [vmem:[%s1591_s0 + $0x30] ss:$20 sps:$4 sm:$0xff]  }
   0xf   :  { %658 = vmatprep.mubr.bf16.mxu1 %v1148_v36  ;;  %v1150_v38 = vld [vmem:[%s1591_s0 + $0x2c] ss:$20 sps:$4 sm:$0xff]   ;;  %v1154_v40 = vld [vmem:[%s1591_s0 + $0x28] ss:$20 sps:$4 sm:$0xff]   ;;  %v1161_v46 = vld [vmem:[%s1591_s0 + $0x50] ss:$20 sps:$4 sm:$0xff]  }
  0x10   :  { %945 = vmatpush3.bf16.msra.mxu0 %v1125_v14  ;;  %v1156_v42 = vld [vmem:[%s1591_s0 + $0x54] ss:$20 sps:$4 sm:$0xff]   ;;  %v1162_v47 = vld [vmem:[%s1591_s0 + $0x58] ss:$20 sps:$4 sm:$0xff]   ;;  %v1182_v50 = vld [vmem:[%s1590_s1 + $0x100] sm:$0xff]  }
  0x11   :  { %1003 = vmatpush3.bf16.msra.mxu1 %v1126_v15  ;;  %946 = vmatprep.subr.bf16.mxu0 %v1127_v16  ;;  %v1169_v45 = vld [vmem:[%s1590_s1 + $0x108] sm:$0xff]   ;;  %v1165_v49 = vld [vmem:[%s1591_s0 + $0x84] ss:$20 sps:$4 sm:$0xff]   ;;  %v1168_v52 = vld [vmem:[%s1591_s0 + $0x80] ss:$20 sps:$4 sm:$0xff]  }
  0x12   :  { %1004 = vmatprep.subr.bf16.mxu1 %v1128_v17  ;;  %v1167_v51 = vld [vmem:[%s1591_s0 + $0x78] ss:$20 sps:$4 sm:$0xff]   ;;  %v1174_v55 = vld [vmem:[%s1591_s0 + $0xa0] ss:$20 sps:$4 sm:$0xff]   ;;  %v1175_v56 = vld [vmem:[%s1591_s0 + $0xa8] ss:$20 sps:$4 sm:$0xff]  }
  0x13   :  { %v1170_v53 = vld [vmem:[%s1591_s0 + $0xa4] ss:$20 sps:$4 sm:$0xff]   ;;  %v1172_v54 = vld [vmem:[%s1591_s0 + $0xac] ss:$20 sps:$4 sm:$0xff]   ;;  %v1178_v58 = vld [vmem:[%s1591_s0 + $0xd4] ss:$20 sps:$4 sm:$0xff]  }
  0x14   :  { %947 = vmatpush3.bf16.msra.mxu0 %v1129_v18  ;;  %v1176_v57 = vld [vmem:[%s1591_s0 + $0xcc] ss:$20 sps:$4 sm:$0xff]   ;;  %v51_v59 = vld [vmem:[%s1591_s0 + $0xf0] sm:$0x11]  ;;  %v52_v60 = vld [vmem:[%s1591_s0 + $0xf8] sm:$0x11] }
  0x15   :  { %1005 = vmatpush3.bf16.msra.mxu1 %v1130_v19  ;;  %948 = vmatprep.subr.bf16.mxu0 %v1131_v20  ;;  %v1180_v61 = vld [vmem:[%s1591_s0 + $0xc8] ss:$20 sps:$4 sm:$0xff]   ;;  %v1181_v62 = vld [vmem:[%s1591_s0 + $0xd0] ss:$20 sps:$4 sm:$0xff]   ;;  %v891_v63 = vcombine.high %v51_v59, %v51_v59  ;;  %v893_v0 = vcombine.high %v52_v60, %v52_v60  ;;  %v890_v1 = vcombine.low %v51_v59, %v51_v59  ;;  %v1189_v5 = vld [vmem:[%s1591_s0 + $0x38] ss:$20 sps:$4 sm:$0xff]  }
  0x16   :  { %1006 = vmatprep.subr.bf16.mxu1 %v1132_v21  ;;  %v892_v2 = vcombine.low %v52_v60, %v52_v60  ;;  %v1187_v3 = vld [vmem:[%s1591_s0 + $0x10] ss:$20 sps:$4 sm:$0xff]   ;;  %v1190_v6 = vld [vmem:[%s1591_s0 + $0xd8] ss:$20 sps:$4 sm:$0xff]   ;;  %v1191_v7 = vld [vmem:[%s1591_s0 + $0x60] ss:$20 sps:$4 sm:$0xff]  }
  0x17   :  { %v1188_v4 = vld [vmem:[%s1591_s0 + $0xb0] ss:$20 sps:$4 sm:$0xff]   ;;  %v1192_v8 = vld [vmem:[%s1591_s0 + $0x100] ss:$0 sps:$4 sm:$0x11]  }
  0x18   :  { %949 = vmatpush3.bf16.msra.mxu0 %v1133_v22  ;;  %v1193_v9 = vld [vmem:[%s1591_s0 + $0x88] ss:$20 sps:$4 sm:$0xff]   ;;  %v1497_v59 = vld [vmem:[%s1592_s2] ss:$0 sm:$0xff] }
  0x19   :  { %1007 = vmatpush3.bf16.msra.mxu1 %v1134_v23  ;;  %950 = vmatprep.subr.bf16.mxu0 %v1135_v24 }
  0x1a   :  { %1008 = vmatprep.subr.bf16.mxu1 %v1136_v25 }
  0x1c   :  { %951 = vmatpush3.bf16.msra.mxu0 %v1137_v26 }
  0x1d   :  { %1009 = vmatpush3.bf16.msra.mxu1 %v1138_v27  ;;  %952 = vmatprep.subr.bf16.mxu0 %v1139_v28 }
  0x1e   :  { %1010 = vmatprep.subr.bf16.mxu1 %v1140_v29 }
  0x20   :  { %953 = vmatpush3.bf16.msra.mxu0 %v1141_v30 }
  0x21   :  { %1011 = vmatpush3.bf16.msra.mxu1 %v1142_v31  ;;  %1065 = vmatprep.subr.bf16.mxu0 %v1194_v34 }
  0x22   :  { %1101 = vmatprep.subr.bf16.mxu1 %v1194_v34 }
  0x23   :  { %571 = vmatmul.mubr.bf16.vlgmr.msra.gmra.mxu0 %v1143_v32 }
  0x24   :  { %659 = vmatmul.mubr.bf16.vlgmr.msra.gmra.mxu1 %v1146_v35  ;;  %1066 = vmatpush3.bf16.msra.mxu0 %v1149_v37 }
  0x25   :  { %578 = vmatprep.mubr.bf16.mxu0 %v1150_v38  ;;  %1105 = vmatpush3.bf16.msra.mxu1 %v1149_v37 }
  0x26   :  { %666 = vmatprep.mubr.bf16.mxu1 %v1152_v39  ;;  %1067 = vmatprep.subr.bf16.mxu0 %v1194_v34 }
  0x27   :  { %1102 = vmatprep.subr.bf16.mxu1 %v1194_v34 }
  0x28   :  { %1068 = vmatpush3.bf16.msra.mxu0 %v1160_v43 }
  0x29   :  { %1106 = vmatpush3.bf16.msra.mxu1 %v1160_v43  ;;  %1069 = vmatprep.subr.bf16.mxu0 %v1194_v34 }
  0x2a   :  { %1103 = vmatprep.subr.bf16.mxu1 %v1194_v34 }
  0x2b   :  { %579 = vmatmul.mubr.bf16.gmra.mxu0 %v1154_v40 }
  0x2c   :  { %667 = vmatmul.mubr.bf16.gmra.mxu1 %v1155_v41  ;;  %586 = vmatprep.mubr.bf16.mxu0 %v1156_v42 }
  0x2d   :  { %674 = vmatprep.mubr.bf16.mxu1 %v1158_v44  ;;  %1070 = vmatpush3.bf16.msra.mxu0 %v1169_v45 }
  0x2e   :  { %1107 = vmatpush3.bf16.msra.mxu1 %v1169_v45  ;;  %1071 = vmatprep.subr.bf16.mxu0 %v1194_v34 }
  0x2f   :  { %1104 = vmatprep.subr.bf16.mxu1 %v1194_v34 }
  0x31   :  { %1072 = vmatpush3.bf16.msra.mxu0 %v1182_v50 }
  0x32   :  { %1108 = vmatpush3.bf16.msra.mxu1 %v1182_v50 }
  0x33   :  { %587 = vmatmul.mubr.bf16.gmra.mxu0 %v1161_v46 }
  0x34   :  { %675 = vmatmul.mubr.bf16.gmra.mxu1 %v1162_v47  ;;  %594 = vmatprep.mubr.bf16.mxu0 %v1163_v48 }
  0x35   :  { %682 = vmatprep.mubr.bf16.mxu1 %v1165_v49 }
  0x3b   :  { %595 = vmatmul.mubr.bf16.gmra.mxu0 %v1167_v51 }
  0x3c   :  { %683 = vmatmul.mubr.bf16.gmra.mxu1 %v1168_v52  ;;  %602 = vmatprep.mubr.bf16.mxu0 %v1170_v53 }
  0x3d   :  { %690 = vmatprep.mubr.bf16.mxu1 %v1172_v54 }
  0x43   :  { %603 = vmatmul.mubr.bf16.gmra.mxu0 %v1174_v55 }
  0x44   :  { %691 = vmatmul.mubr.bf16.gmra.mxu1 %v1175_v56  ;;  %610 = vmatprep.mubr.bf16.mxu0 %v1176_v57 }
  0x45   :  { %698 = vmatprep.mubr.bf16.mxu1 %v1178_v58 }
  0x4b   :  { %611 = vmatmul.mubr.bf16.gmra.mxu0 %v1180_v61 }
  0x4c   :  { %699 = vmatmul.mubr.bf16.gmra.mxu1 %v1181_v62  ;;  %618 = vmatprep.mubr.bf16.mxu0 %v891_v63 }
  0x4d   :  { %706 = vmatprep.mubr.bf16.mxu1 %v893_v0 }
  0x53   :  { %619 = vmatmul.mubr.bf16.gmra.mxu0 %v890_v1 }
  0x54   :  { %707 = vmatmul.mubr.bf16.gmra.mxu1 %v892_v2  ;;  %1073 = vmatprep.mubr.msk.bf16.mxu0 %vm1195_vm0, %v1194_v34 }
  0x55   :  { %1089 = vmatprep.mubr.msk.bf16.mxu1 %vm1195_vm0, %v1194_v34 }
  0x5b   :  { %1074 = vmatmul.mubr.msk.bf16.vlgmr.msra.gmra.mxu0 %vm516_vm1, %v1187_v3 }
  0x5c   :  { %1090 = vmatmul.mubr.msk.bf16.vlgmr.msra.gmra.mxu1 %vm516_vm1, %v1188_v4  ;;  %1077 = vmatprep.mubr.msk.bf16.mxu0 %vm1195_vm0, %v1194_v34 }
  0x5d   :  { %1093 = vmatprep.mubr.msk.bf16.mxu1 %vm1195_vm0, %v1194_v34 }
  0x63   :  { %1078 = vmatmul.mubr.msk.bf16.gmra.mxu0 %vm516_vm1, %v1189_v5 }
  0x64   :  { %1094 = vmatmul.mubr.msk.bf16.gmra.mxu1 %vm516_vm1, %v1190_v6  ;;  %1081 = vmatprep.mubr.msk.bf16.mxu0 %vm1195_vm0, %v1194_v34 }
  0x65   :  { %1097 = vmatprep.mubr.msk.bf16.mxu1 %vm1195_vm0, %v1194_v34 }
  0x6b   :  { %1082 = vmatmul.mubr.msk.bf16.gmra.mxu0 %vm516_vm1, %v1191_v7 }
  0x6c   :  { %1098 = vmatmul.mubr.msk.bf16.gmra.mxu1 %vm516_vm1, %v1192_v8  ;;  %1085 = vmatprep.mubr.msk.bf16.mxu0 %vm1195_vm0, %v1194_v34 }
  0x73   :  { %1086 = vmatmul.mubr.msk.bf16.gmra.mxu0 %vm516_vm1, %v1193_v9 }
  0xe3   :  { %v954_v10 = vpop.f32.mrf.mxu0 }
  0xe4   :  { %v1012_v11 = vpop.f32.mrf.mxu1 }
  0xe5   :  { %v955_v12 = vpop.f32.mrf.mxu0 }
  0xe6   :  { %v1013_v13 = vpop.f32.mrf.mxu1  ;;  %v956_v57 = vadd.f32 %v955_v12, %v954_v10 }
  0xe7   :  { %v957_v14 = vpop.f32.mrf.mxu0  ;;  %v1014_v2 = vadd.f32 %v1013_v13, %v1012_v11 }
  0xe8   :  { %v1015_v15 = vpop.f32.mrf.mxu1  ;;  %v573_v1 = vadd.f32 %v956_v57, %v1497_v59 }
  0xe9   :  { %v958_v16 = vpop.f32.mrf.mxu0 }
  0xea   :  { %v1016_v17 = vpop.f32.mrf.mxu1  ;;  %v959_v63 = vadd.f32 %v958_v16, %v957_v14 }
  0xeb   :  { %v960_v18 = vpop.f32.mrf.mxu0  ;;  %v1017_v10 = vadd.f32 %v1016_v17, %v1015_v15 }
  0xec   :  { %v1452_v19 = vpop.f32.mrf.mxu1  ;;  %v576_v9 = vadd.f32 %v959_v63, %v1497_v59 }
  0xed   :  { %v961_v20 = vpop.f32.mrf.mxu0 }
  0xee   :  { %v1454_v21 = vpop.f32.mrf.mxu1  ;;  %v962_v12 = vadd.f32 %v961_v20, %v960_v18  ;;  %v664_v18 = vadd.f32 %v1017_v10, %v576_v9 }
  0xef   :  { %v1456_v22 = vpop.f32.mrf.mxu0 }
  0xf0   :  { %v1458_v23 = vpop.f32.mrf.mxu1 }
  0xf1   :  { %v964_v24 = vpop.f32.mrf.mxu0 }
  0xf2   :  { %v1460_v25 = vpop.f32.mrf.mxu1 }
  0xf3   :  { %v1462_v26 = vpop.f32.mrf.mxu0 }
  0xf4   :  { %v1464_v27 = vpop.f32.mrf.mxu1 }
  0xf5   :  { %v1466_v28 = vpop.f32.mrf.mxu0 }
  0xf6   :  { %v1468_v29 = vpop.f32.mrf.mxu1 }
  0xf7   :  { %v1470_v30 = vpop.f32.mrf.mxu0 }
  0xf8   :  { %v1472_v31 = vpop.f32.mrf.mxu1 }
  0xf9   :  { %v1474_v32 = vpop.f32.mrf.mxu0 }
  0xfa   :  { %v1476_v33 = vpop.f32.mrf.mxu1 }
  0xfb   :  { %v1478_v34 = vpop.f32.mrf.mxu0 }
  0xfc   :  { %v1480_v35 = vpop.f32.mrf.mxu1 }
  0xfd   :  { %v1482_v36 = vpop.f32.mrf.mxu0 }
  0xfe   :  { %v1484_v37 = vpop.f32.mrf.mxu1 }
  0xff   :  { %v1486_v38 = vpop.f32.mrf.mxu0 }
 0x100   :  { %v1488_v39 = vpop.f32.mrf.mxu1 }
 0x101   :  { %v1490_v40 = vpop.f32.mrf.mxu0 }
 0x102   :  { %v1492_v41 = vpop.f32.mrf.mxu1 }
 0x103   :  { %1594 = vst [vmem:[#allocation2_spill] sm:$0xff] %v1492_v41  ;;  %v978_v42 = vpop.f32.mrf.mxu0  ;;  %v661_v41 = vadd.f32 %v1014_v2, %v573_v1  ;;  %v1023_v1 = vadd.f32 %v1460_v25, %v1458_v23 }
 0x104   :  { %v1036_v43 = vpop.f32.mrf.mxu1 }
 0x105   :  { %v979_v44 = vpop.f32.mrf.mxu0 }
 0x106   :  { %v1037_v45 = vpop.f32.mrf.mxu1  ;;  %v980_v60 = vadd.f32 %v979_v44, %v978_v42 }
 0x107   :  { %v981_v46 = vpop.f32.mrf.mxu0  ;;  %v1038_v6 = vadd.f32 %v1037_v45, %v1036_v43  ;;  %v581_v43 = vadd.f32 %v962_v12, %v1497_v59  ;;  %v1020_v45 = vadd.f32 %v1454_v21, %v1452_v19 }
 0x108   :  { %v1039_v47 = vpop.f32.mrf.mxu1  ;;  %v605_v5 = vadd.f32 %v980_v60, %v1497_v59 }
 0x109   :  { %v982_v48 = vpop.f32.mrf.mxu0 }
 0x10a   :  { %v1040_v49 = vpop.f32.mrf.mxu1  ;;  %v983_v3 = vadd.f32 %v982_v48, %v981_v46  ;;  %v693_v13 = vadd.f32 %v1038_v6, %v605_v5  ;;  %v965_v46 = vadd.f32 %v964_v24, %v1456_v22 }
 0x10b   :  { %v984_v50 = vpop.f32.mrf.mxu0  ;;  %v1041_v14 = vadd.f32 %v1040_v49, %v1039_v47 }
 0x10c   :  { %v1042_v51 = vpop.f32.mrf.mxu1  ;;  %v608_v44 = vadd.f32 %v983_v3, %v1497_v59  ;;  %v669_v3 = vadd.f32 %v1020_v45, %v581_v43 }
 0x10d   :  { %v985_v52 = vpop.f32.mrf.mxu0 }
 0x10e   :  { %v1043_v53 = vpop.f32.mrf.mxu1  ;;  %v986_v57 = vadd.f32 %v985_v52, %v984_v50  ;;  %v696_v63 = vadd.f32 %v1041_v14, %v608_v44  ;;  %v971_v14 = vadd.f32 %v1474_v32, %v1470_v30  ;;  %v974_v32 = vadd.f32 %v1482_v36, %v1478_v34 }
 0x10f   :  { %v987_v54 = vpop.f32.mrf.mxu0  ;;  %v1044_v52 = vadd.f32 %v1043_v53, %v1042_v51 }
 0x110   :  { %v1045_v55 = vpop.f32.mrf.mxu1  ;;  %v613_v50 = vadd.f32 %v986_v57, %v1497_v59 }
 0x111   :  { %v988_v56 = vpop.f32.mrf.mxu0 }
 0x112   :  { %v1046_v58 = vpop.f32.mrf.mxu1  ;;  %v989_v20 = vadd.f32 %v988_v56, %v987_v54  ;;  %v968_v54 = vadd.f32 %v1466_v28, %v1462_v26 }
 0x113   :  { %v990_v61 = vpop.f32.mrf.mxu0  ;;  %v1047_v6 = vadd.f32 %v1046_v58, %v1045_v55  ;;  %v1026_v55 = vadd.f32 %v1468_v29, %v1464_v27 }
 0x114   :  { %v1499_v62 = vpop.f32.mrf.mxu1  ;;  %v616_v5 = vadd.f32 %v989_v20, %v1497_v59  ;;  %v589_v44 = vadd.f32 %v968_v54, %v1497_v59 }
 0x115   :  { %v991_v0 = vpop.f32.mrf.mxu0 }
 0x116   :  { %v1502_v4 = vpop.f32.mrf.mxu1  ;;  %v992_v26 = vadd.f32 %v991_v0, %v990_v61  ;;  %v704_v27 = vadd.f32 %v1047_v6, %v616_v5 }
 0x117   :  { %v993_v7 = vpop.f32.mrf.mxu0 }
 0x118   :  { %v1051_v8 = vpop.f32.mrf.mxu1  ;;  %v621_v29 = vadd.f32 %v992_v26, %v1497_v59 }
 0x119   :  { %v994_v42 = vpop.f32.mrf.mxu0  ;;  %v701_v8 = vadd.f32 %v1044_v52, %v613_v50  ;;  %v597_v52 = vadd.f32 %v974_v32, %v1497_v59 }
 0x11a   :  { %v1052_v16 = vpop.f32.mrf.mxu1 }
 0x11b   :  { %v748_v11 = vpop.f32.mrf.mxu0 }
 0x11c   :  { %v749_v48 = vadd.f32 %v748_v11, %v661_v41  ;;  %v780_v60 = vpop.f32.mrf.mxu1  ;;  %v584_v41 = vadd.f32 %v965_v46, %v1497_v59  ;;  %v1050_v11 = vadd.f32 %v1502_v4, %v1499_v62  ;;  %v592_v62 = vadd.f32 %v971_v14, %v1497_v59 }
 0x11d   :  { %v781_v15 = vadd.f32 %v780_v60, %v693_v13  ;;  %v1075_v17 = vpop.f32.mrf.mxu0  ;;  %v1029_v4 = vadd.f32 %v1476_v33, %v1472_v31  ;;  %v1032_v31 = vadd.f32 %v1484_v37, %v1480_v35 }
 0x11e   :  { %vm802_vm2 = vcmp.gt.f32.partialorder %v749_v48, 0.0  ;;  %v815_v47 = vmul.f32 0.01, %v749_v48  ;;  %v1091_v49 = vpop.f32.mrf.mxu1  ;;  %v672_v42 = vadd.f32 %v1023_v1, %v584_v41  ;;  %v677_v17 = vadd.f32 %v1026_v55, %v589_v44 }
 0x11f   :  { %vm810_vm3 = vcmp.gt.f32.partialorder %v781_v15, 0.0  ;;  %v823_v22 = vmul.f32 0.01, %v781_v15  ;;  %v751_v24 = vpop.f32.mrf.mxu0  ;;  %v977_v41 = vadd.f32 %v1490_v40, %v1486_v38 }
 0x120   :  { %v828_v19 = vsel %vm802_vm2, %v749_v48, %v815_v47  ;;  %v752_v21 = vadd.f32 %v751_v24, %v664_v18  ;;  %v783_v2 = vpop.f32.mrf.mxu1  ;;  %v709_v47 = vadd.f32 %v1050_v11, %v621_v29 }
 0x121   :  { %841 = vst.msk [vmem:[%s1593_s3] sm:$0xff] %vm516_vm1, %v828_v19  ;;  %v836_v51 = vsel %vm810_vm3, %v781_v15, %v823_v22  ;;  %v784_v53 = vadd.f32 %v783_v2, %v696_v63  ;;  %v1076_v56 = vpop.f32.mrf.mxu0  ;;  %v680_v19 = vadd.f32 %v1029_v4, %v592_v62 }
 0x122   :  { %849 = vst.msk [vmem:[%s1593_s3 + $0x40] sm:$0xff] %vm516_vm1, %v836_v51  ;;  %vm803_vm4 = vcmp.gt.f32.partialorder %v752_v21, 0.0  ;;  %v816_v23 = vmul.f32 0.01, %v752_v21  ;;  %v1092_v25 = vpop.f32.mrf.mxu1  ;;  %v600_v56 = vadd.f32 %v977_v41, %v1497_v59 }
 0x123   :  { %vm811_vm5 = vcmp.gt.f32.partialorder %v784_v53, 0.0  ;;  %v824_v28 = vmul.f32 0.01, %v784_v53  ;;  %v756_v7 = vpop.f32.mrf.mxu0 }
 0x124   :  { %v829_v9 = vsel %vm803_vm4, %v752_v21, %v816_v23  ;;  %v757_v10 = vadd.f32 %v756_v7, %v669_v3  ;;  %v788_v12 = vpop.f32.mrf.mxu1  ;;  %v1595_v3 = vld [vmem:[#allocation2_spill] sm:$0xff] }
 0x125   :  { %842 = vst.msk [vmem:[%s1593_s3 + $0x8] sm:$0xff] %vm516_vm1, %v829_v9  ;;  %v837_v58 = vsel %vm811_vm5, %v784_v53, %v824_v28  ;;  %v789_v61 = vadd.f32 %v788_v12, %v701_v8  ;;  %v1079_v0 = vpop.f32.mrf.mxu0  ;;  %v685_v53 = vadd.f32 %v1032_v31, %v597_v52  ;;  %v1035_v5 = vadd.f32 %v1595_v3, %v1488_v39 }
 0x126   :  { %850 = vst.msk [vmem:[%s1593_s3 + $0x48] sm:$0xff] %vm516_vm1, %v837_v58  ;;  %vm804_vm6 = vcmp.gt.f32.partialorder %v757_v10, 0.0  ;;  %v817_v16 = vmul.f32 0.01, %v757_v10  ;;  %v1095_v57 = vpop.f32.mrf.mxu1 }
 0x127   :  { %vm812_vm7 = vcmp.gt.f32.partialorder %v789_v61, 0.0  ;;  %v825_v13 = vmul.f32 0.01, %v789_v61  ;;  %v759_v46 = vpop.f32.mrf.mxu0  ;;  %v688_v8 = vadd.f32 %v1035_v5, %v600_v56 }
 0x128   :  { %v830_v48 = vsel %vm804_vm6, %v757_v10, %v817_v16  ;;  %v760_v60 = vadd.f32 %v759_v46, %v672_v42  ;;  %v791_v30 = vpop.f32.mrf.mxu1 }
 0x129   :  { %843 = vst.msk [vmem:[%s1593_s3 + $0x10] sm:$0xff] %vm516_vm1, %v830_v48  ;;  %v838_v43 = vsel %vm812_vm7, %v789_v61, %v825_v13  ;;  %v792_v45 = vadd.f32 %v791_v30, %v704_v27  ;;  %v1080_v15 = vpop.f32.mrf.mxu0 }
 0x12a   :  { %851 = vst.msk [vmem:[%s1593_s3 + $0x50] sm:$0xff] %vm516_vm1, %v838_v43  ;;  %vm805_vm8 = vcmp.gt.f32.partialorder %v760_v60, 0.0  ;;  %v818_v34 = vmul.f32 0.01, %v760_v60  ;;  %v1096_v36 = vpop.f32.mrf.mxu1 }
 0x12b   :  { %vm813_vm9 = vcmp.gt.f32.partialorder %v792_v45, 0.0  ;;  %v826_v18 = vmul.f32 0.01, %v792_v45  ;;  %v764_v20 = vpop.f32.mrf.mxu0 }
 0x12c   :  { %v831_v49 = vsel %vm805_vm8, %v760_v60, %v818_v34  ;;  %v765_v63 = vadd.f32 %v764_v20, %v677_v17  ;;  %v796_v50 = vpop.f32.mrf.mxu1 }
 0x12d   :  { %844 = vst.msk [vmem:[%s1593_s3 + $0x18] sm:$0xff] %vm516_vm1, %v831_v49  ;;  %v839_v33 = vsel %vm813_vm9, %v792_v45, %v826_v18  ;;  %v797_v22 = vadd.f32 %v796_v50, %v709_v47  ;;  %v1083_v24 = vpop.f32.mrf.mxu0 }
 0x12e   :  { %852 = vst.msk [vmem:[%s1593_s3 + $0x58] sm:$0xff] %vm516_vm1, %v839_v33  ;;  %vm806_vm10 = vcmp.gt.f32.partialorder %v765_v63, 0.0  ;;  %v819_v1 = vmul.f32 0.01, %v765_v63  ;;  %v1099_v35 = vpop.f32.mrf.mxu1 }
 0x12f   :  { %vm814_vm11 = vcmp.gt.f32.partialorder %v797_v22, 0.0  ;;  %v827_v37 = vmul.f32 0.01, %v797_v22  ;;  %v767_v21 = vpop.f32.mrf.mxu0 }
 0x130   :  { %v832_v2 = vsel %vm806_vm10, %v765_v63, %v819_v1  ;;  %v768_v54 = vadd.f32 %v767_v21, %v680_v19  ;;  %v799_v51 = vpop.f32.mrf.mxu1 }
 0x131   :  { %845 = vst.msk [vmem:[%s1593_s3 + $0x20] sm:$0xff] %vm516_vm1, %v832_v2  ;;  %v840_v38 = vsel %vm814_vm11, %v797_v22, %v827_v37  ;;  %v1084_v40 = vpop.f32.mrf.mxu0 }
 0x132   :  { %854 = vst.msk [vmem:[%s1593_s3 + $0x60] sm:$0x3] %vm853_vm12, %v840_v38  ;;  %vm807_vm13 = vcmp.gt.f32.partialorder %v768_v54, 0.0  ;;  %v820_v6 = vmul.f32 0.01, %v768_v54  ;;  %v1100_v23 = vpop.f32.mrf.mxu1 }
 0x133   :  { %v772_v25 = vpop.f32.mrf.mxu0 }
 0x134   :  { %v833_v26 = vsel %vm807_vm13, %v768_v54, %v820_v6  ;;  %v773_v28 = vadd.f32 %v772_v25, %v685_v53 }
 0x135   :  { %846 = vst.msk [vmem:[%s1593_s3 + $0x28] sm:$0xff] %vm516_vm1, %v833_v26  ;;  %v1087_v7 = vpop.f32.mrf.mxu0 }
 0x136   :  { %vm808_vm14 = vcmp.gt.f32.partialorder %v773_v28, 0.0  ;;  %v821_v59 = vmul.f32 0.01, %v773_v28 }
 0x137   :  { %v775_v39 = vpop.f32.mrf.mxu0 }
 0x138   :  { %v834_v9 = vsel %vm808_vm14, %v773_v28, %v821_v59  ;;  %v776_v10 = vadd.f32 %v775_v39, %v688_v8 }
 0x139   :  { %847 = vst.msk [vmem:[%s1593_s3 + $0x30] sm:$0xff] %vm516_vm1, %v834_v9  ;;  %v1088_v12 = vpop.f32.mrf.mxu0 }
 0x13a   :  { %vm809_vm15 = vcmp.gt.f32.partialorder %v776_v10, 0.0  ;;  %v822_v42 = vmul.f32 0.01, %v776_v10 }
 0x13c   :  { %v835_v44 = vsel %vm809_vm15, %v776_v10, %v822_v42 }
 0x13d   :  { %848 = vst.msk [vmem:[%s1593_s3 + $0x38] sm:$0xff] %vm516_vm1, %v835_v44 }

// kernel: forward.7
= control target key start
LH: loop header
LB: loop body
LE: loop exit
PB: predicated region body
PF: predicated region fallthrough
CT: control target
= control target key end

     0   :  { %v823_v36 = vlaneseq  ;;  %v8957_v37 = vmov 1966171168   ;;  %vm4952_vm0 = vcmask 523264   ;;  %vm6117_vm2 = vcmask 1041408   ;;  %s11892_s2 = inlined_call_operand.vmem [shape: bf16[3136,512], index: 2, kind: input, shape index: {}]   ;;  %s11893_s0 = inlined_call_operand.vmem [shape: bf16[2,3136], index: 0, kind: input, shape index: {}]   ;;  %s11894_s3 = inlined_call_operand.vmem [shape: f32[1,512], index: 3, kind: input, shape index: {}]   ;;  %s11895_s4 = inlined_call_operand.vmem [shape: bf16[512,256], index: 4, kind: input, shape index: {}]   ;;  %s11896_s5 = inlined_call_operand.vmem [shape: bf16[4,256], index: 5, kind: input, shape index: {}]   ;;  %s11897_s1 = inlined_call_operand.vmem [shape: bf16[2,4], index: 1, kind: input, shape index: {}]   ;;  %s11898_s7 = inlined_call_operand.vmem [shape: bf16[256,11], index: 7, kind: input, shape index: {}]   ;;  %s11899_s6 = inlined_call_operand.vmem [shape: f32[1,256], index: 6, kind: input, shape index: {}]   ;;  %s11900_s8 = inlined_call_operand.vmem [shape: f32[1,11], index: 8, kind: input, shape index: {}]   ;;  %s11901_s9 = inlined_call_operand.vmem [shape: f32[2,11], index: 9, kind: output, shape index: {}]  }
   0x1   :  { %v7665_v0 = vld [vmem:[%s11892_s2 + $0xe4] ss:$16 sps:$4 sm:$0xff]   ;;  %v7669_v2 = vld [vmem:[%s11892_s2 + $0xe0] ss:$16 sps:$4 sm:$0xff]   ;;  %v849_v38 = vunpack.c.l.s4 %v8957_v37  ;;  %vm6113_vm3 = vcmask 31744   ;;  %vm6764_vm9 = vcmask 82944  }
   0x2   :  { %v7667_v1 = vld [vmem:[%s11892_s2 + $0x2e4] ss:$16 sps:$4 sm:$0xff]   ;;  %4956 = vmatprep.subr.bf16.mxu0 %v7665_v0  ;;  %v7670_v3 = vld [vmem:[%s11892_s2 + $0x2e0] ss:$16 sps:$4 sm:$0xff]   ;;  %v9126_v42 = vshrl.u32 %v823_v36, 7 }
   0x3   :  { %4997 = vmatprep.subr.bf16.mxu1 %v7667_v1  ;;  %v7671_v4 = vld [vmem:[%s11892_s2 + $0xc4] ss:$16 sps:$4 sm:$0xff]   ;;  %4957 = vmatpush1.bf16.msra.mxu0 %v7669_v2  ;;  %v7675_v6 = vld [vmem:[%s11892_s2 + $0xc0] ss:$16 sps:$4 sm:$0xff]   ;;  %v850_v43 = vunpack.c.0.s8 %v849_v38 }
   0x4   :  { %4998 = vmatpush1.bf16.msra.mxu1 %v7670_v3  ;;  %v7673_v5 = vld [vmem:[%s11892_s2 + $0x2c4] ss:$16 sps:$4 sm:$0xff]   ;;  %4958 = vmatprep.subr.bf16.mxu0 %v7671_v4  ;;  %v7676_v7 = vld [vmem:[%s11892_s2 + $0x2c0] ss:$16 sps:$4 sm:$0xff]  }
   0x5   :  { %4999 = vmatprep.subr.bf16.mxu1 %v7673_v5  ;;  %v7677_v8 = vld [vmem:[%s11892_s2 + $0xa4] ss:$16 sps:$4 sm:$0xff]   ;;  %v7681_v10 = vld [vmem:[%s11892_s2 + $0xa0] ss:$16 sps:$4 sm:$0xff]   ;;  %v9144_v49 = vsub.s32 %v850_v43, %v9126_v42 }
   0x6   :  { %v7679_v9 = vld [vmem:[%s11892_s2 + $0x2a4] ss:$16 sps:$4 sm:$0xff]   ;;  %v7682_v11 = vld [vmem:[%s11892_s2 + $0x2a0] ss:$16 sps:$4 sm:$0xff]  }
   0x7   :  { %4959 = vmatpush1.bf16.msra.mxu0 %v7675_v6  ;;  %v7683_v12 = vld [vmem:[%s11892_s2 + $0x84] ss:$16 sps:$4 sm:$0xff]   ;;  %v7687_v14 = vld [vmem:[%s11892_s2 + $0x80] ss:$16 sps:$4 sm:$0xff]  }
   0x8   :  { %5000 = vmatpush1.bf16.msra.mxu1 %v7676_v7  ;;  %4960 = vmatprep.subr.bf16.mxu0 %v7677_v8  ;;  %v7685_v13 = vld [vmem:[%s11892_s2 + $0x284] ss:$16 sps:$4 sm:$0xff]   ;;  %v7688_v15 = vld [vmem:[%s11892_s2 + $0x280] ss:$16 sps:$4 sm:$0xff]  }
   0x9   :  { %5001 = vmatprep.subr.bf16.mxu1 %v7679_v9  ;;  %v7689_v16 = vld [vmem:[%s11892_s2 + $0x64] ss:$16 sps:$4 sm:$0xff]   ;;  %v7693_v18 = vld [vmem:[%s11892_s2 + $0x60] ss:$16 sps:$4 sm:$0xff]  }
   0xa   :  { %v7691_v17 = vld [vmem:[%s11892_s2 + $0x264] ss:$16 sps:$4 sm:$0xff]   ;;  %v7694_v19 = vld [vmem:[%s11892_s2 + $0x260] ss:$16 sps:$4 sm:$0xff]  }
   0xb   :  { %4961 = vmatpush1.bf16.msra.mxu0 %v7681_v10  ;;  %v7695_v20 = vld [vmem:[%s11892_s2 + $0x44] ss:$16 sps:$4 sm:$0xff]   ;;  %v7699_v22 = vld [vmem:[%s11892_s2 + $0x40] ss:$16 sps:$4 sm:$0xff]  }
   0xc   :  { %5002 = vmatpush1.bf16.msra.mxu1 %v7682_v11  ;;  %4962 = vmatprep.subr.bf16.mxu0 %v7683_v12  ;;  %v7697_v21 = vld [vmem:[%s11892_s2 + $0x244] ss:$16 sps:$4 sm:$0xff]   ;;  %v7700_v23 = vld [vmem:[%s11892_s2 + $0x240] ss:$16 sps:$4 sm:$0xff]  }
   0xd   :  { %5003 = vmatprep.subr.bf16.mxu1 %v7685_v13  ;;  %v7701_v24 = vld [vmem:[%s11892_s2 + $0x24] ss:$16 sps:$4 sm:$0xff]   ;;  %v7705_v26 = vld [vmem:[%s11892_s2 + $0x20] ss:$16 sps:$4 sm:$0xff]  }
   0xe   :  { %v7703_v25 = vld [vmem:[%s11892_s2 + $0x224] ss:$16 sps:$4 sm:$0xff]   ;;  %v7706_v27 = vld [vmem:[%s11892_s2 + $0x220] ss:$16 sps:$4 sm:$0xff]  }
   0xf   :  { %4963 = vmatpush1.bf16.msra.mxu0 %v7687_v14  ;;  %v7707_v28 = vld [vmem:[%s11892_s2 + $0x4] ss:$16 sps:$4 sm:$0xff]   ;;  %v7711_v30 = vld [vmem:[%s11892_s2] ss:$16 sps:$4 sm:$0xff]  }
  0x10   :  { %5004 = vmatpush1.bf16.msra.mxu1 %v7688_v15  ;;  %4964 = vmatprep.subr.bf16.mxu0 %v7689_v16  ;;  %v7709_v29 = vld [vmem:[%s11892_s2 + $0x204] ss:$16 sps:$4 sm:$0xff]   ;;  %v7712_v31 = vld [vmem:[%s11892_s2 + $0x200] ss:$16 sps:$4 sm:$0xff]  }
  0x11   :  { %5005 = vmatprep.subr.bf16.mxu1 %v7691_v17  ;;  %v7713_v32 = vld [vmem:[%s11892_s2 + $0x1e4] ss:$16 sps:$4 sm:$0xff]   ;;  %v7717_v34 = vld [vmem:[%s11892_s2 + $0x1e0] ss:$16 sps:$4 sm:$0xff]  }
  0x12   :  { %v7715_v33 = vld [vmem:[%s11892_s2 + $0x3e4] ss:$16 sps:$4 sm:$0xff]   ;;  %v7718_v35 = vld [vmem:[%s11892_s2 + $0x3e0] ss:$16 sps:$4 sm:$0xff]  }
  0x13   :  { %4965 = vmatpush1.bf16.msra.mxu0 %v7693_v18  ;;  %v7719_v39 = vld [vmem:[%s11892_s2 + $0x1c4] ss:$16 sps:$4 sm:$0xff]   ;;  %v7723_v41 = vld [vmem:[%s11892_s2 + $0x1c0] ss:$16 sps:$4 sm:$0xff]  }
  0x14   :  { %5006 = vmatpush1.bf16.msra.mxu1 %v7694_v19  ;;  %4966 = vmatprep.subr.bf16.mxu0 %v7695_v20  ;;  %v7721_v40 = vld [vmem:[%s11892_s2 + $0x3c4] ss:$16 sps:$4 sm:$0xff]   ;;  %v7724_v44 = vld [vmem:[%s11892_s2 + $0x3c0] ss:$16 sps:$4 sm:$0xff]  }
  0x15   :  { %5007 = vmatprep.subr.bf16.mxu1 %v7697_v21  ;;  %v7725_v45 = vld [vmem:[%s11892_s2 + $0x1a4] ss:$16 sps:$4 sm:$0xff]   ;;  %v7729_v47 = vld [vmem:[%s11892_s2 + $0x1a0] ss:$16 sps:$4 sm:$0xff]  }
  0x16   :  { %v7727_v46 = vld [vmem:[%s11892_s2 + $0x3a4] ss:$16 sps:$4 sm:$0xff]   ;;  %v7730_v48 = vld [vmem:[%s11892_s2 + $0x3a0] ss:$16 sps:$4 sm:$0xff]  }
  0x17   :  { %4967 = vmatpush1.bf16.msra.mxu0 %v7699_v22  ;;  %v7731_v50 = vld [vmem:[%s11892_s2 + $0x184] ss:$16 sps:$4 sm:$0xff]   ;;  %v7735_v53 = vld [vmem:[%s11892_s2 + $0x180] ss:$16 sps:$4 sm:$0xff]  }
  0x18   :  { %5008 = vmatpush1.bf16.msra.mxu1 %v7700_v23  ;;  %4968 = vmatprep.subr.bf16.mxu0 %v7701_v24  ;;  %v7733_v51 = vld [vmem:[%s11892_s2 + $0x384] ss:$16 sps:$4 sm:$0xff]   ;;  %v7736_v55 = vld [vmem:[%s11892_s2 + $0x380] ss:$16 sps:$4 sm:$0xff]  }
  0x19   :  { %5009 = vmatprep.subr.bf16.mxu1 %v7703_v25  ;;  %v33_v52 = vld [vmem:[%s11893_s0] sm:$0xff] }
  0x1a   :  { %v854_v54 = vrot.slane %v33_v52, %v9144_v49  ;;  %v7737_v56 = vld [vmem:[%s11892_s2 + $0x164] ss:$16 sps:$4 sm:$0xff]   ;;  %v7741_v59 = vld [vmem:[%s11892_s2 + $0x160] ss:$16 sps:$4 sm:$0xff]   ;;  %v847_v1 = vcombine.high %v33_v52, %v33_v52 }
  0x1b   :  { %4969 = vmatpush1.bf16.msra.mxu0 %v7705_v26  ;;  %v7739_v57 = vld [vmem:[%s11892_s2 + $0x364] ss:$16 sps:$4 sm:$0xff]   ;;  %v7742_v61 = vld [vmem:[%s11892_s2 + $0x360] ss:$16 sps:$4 sm:$0xff]  }
  0x1c   :  { %5010 = vmatpush1.bf16.msra.mxu1 %v7706_v27  ;;  %4970 = vmatprep.subr.bf16.mxu0 %v7707_v28  ;;  %v862_v58 = vcombine.high %v854_v54, %v854_v54  ;;  %v7743_v62 = vld [vmem:[%s11892_s2 + $0x144] ss:$16 sps:$4 sm:$0xff]   ;;  %v7747_v2 = vld [vmem:[%s11892_s2 + $0x140] ss:$16 sps:$4 sm:$0xff]   ;;  %v9202_v6 = vrot.slane %v847_v1, %v9144_v49  ;;  %v9222_v13 = vrot.slane %v854_v54, %v9144_v49 }
  0x1d   :  { %5011 = vmatprep.subr.bf16.mxu1 %v7709_v29  ;;  %v7745_v63 = vld [vmem:[%s11892_s2 + $0x344] ss:$16 sps:$4 sm:$0xff]   ;;  %v7748_v3 = vld [vmem:[%s11892_s2 + $0x340] ss:$16 sps:$4 sm:$0xff]  }
  0x1e   :  { %v9172_v60 = vrot.slane %v862_v58, %v9144_v49  ;;  %v7749_v4 = vld [vmem:[%s11892_s2 + $0x124] ss:$16 sps:$4 sm:$0xff]   ;;  %v7753_v7 = vld [vmem:[%s11892_s2 + $0x120] ss:$16 sps:$4 sm:$0xff]   ;;  %v863_v11 = vcombine.high %v9202_v6, %v9202_v6  ;;  %v9241_v19 = vcombine.high %v9222_v13, %v9222_v13 }
  0x1f   :  { %4971 = vmatpush1.bf16.msra.mxu0 %v7711_v30  ;;  %v7751_v5 = vld [vmem:[%s11892_s2 + $0x324] ss:$16 sps:$4 sm:$0xff]   ;;  %v7754_v8 = vld [vmem:[%s11892_s2 + $0x320] ss:$16 sps:$4 sm:$0xff]  }
  0x20   :  { %5012 = vmatpush1.bf16.msra.mxu1 %v7712_v31  ;;  %4972 = vmatprep.subr.bf16.mxu0 %v7713_v32  ;;  %v9185_v0 = vcombine.high %v9172_v60, %v9172_v60  ;;  %v7755_v9 = vld [vmem:[%s11892_s2 + $0x104] ss:$16 sps:$4 sm:$0xff]   ;;  %v7759_v12 = vld [vmem:[%s11892_s2 + $0x100] ss:$16 sps:$4 sm:$0xff]   ;;  %v9234_v17 = vrot.slane %v863_v11, %v9144_v49 }
  0x21   :  { %5013 = vmatprep.subr.bf16.mxu1 %v7715_v33  ;;  %4988 = vmatprep.mubr.bf16.mxu0 %v9172_v60  ;;  %v7757_v10 = vld [vmem:[%s11892_s2 + $0x304] ss:$16 sps:$4 sm:$0xff]   ;;  %v7760_v14 = vld [vmem:[%s11892_s2 + $0x300] ss:$16 sps:$4 sm:$0xff]  }
  0x22   :  { %5029 = vmatprep.mubr.bf16.mxu1 %v9185_v0  ;;  %v7763_v15 = vld [vmem:[%s11892_s2 + $0x4e4] ss:$16 sps:$4 sm:$0xff]   ;;  %v7761_v18 = vld [vmem:[%s11892_s2 + $0x4e0] ss:$16 sps:$4 sm:$0xff]   ;;  %v9254_v23 = vcombine.high %v9234_v17, %v9234_v17 }
  0x23   :  { %4973 = vmatpush2.bf16.msra.mxu0 %v7717_v34  ;;  %v7766_v16 = vld [vmem:[%s11892_s2 + $0x6e4] ss:$16 sps:$4 sm:$0xff]   ;;  %v7764_v20 = vld [vmem:[%s11892_s2 + $0x6e0] ss:$16 sps:$4 sm:$0xff]  }
  0x24   :  { %5014 = vmatpush2.bf16.msra.mxu1 %v7718_v35  ;;  %4974 = vmatprep.subr.bf16.mxu0 %v7719_v39  ;;  %v7769_v21 = vld [vmem:[%s11892_s2 + $0x4c4] ss:$16 sps:$4 sm:$0xff]   ;;  %v7767_v24 = vld [vmem:[%s11892_s2 + $0x4c0] ss:$16 sps:$4 sm:$0xff]  }
  0x25   :  { %5015 = vmatprep.subr.bf16.mxu1 %v7721_v40  ;;  %v7772_v22 = vld [vmem:[%s11892_s2 + $0x6c4] ss:$16 sps:$4 sm:$0xff]   ;;  %v7770_v25 = vld [vmem:[%s11892_s2 + $0x6c0] ss:$16 sps:$4 sm:$0xff]  }
  0x26   :  { %v7775_v26 = vld [vmem:[%s11892_s2 + $0x4a4] ss:$16 sps:$4 sm:$0xff]   ;;  %v7773_v28 = vld [vmem:[%s11892_s2 + $0x4a0] ss:$16 sps:$4 sm:$0xff]  }
  0x27   :  { %4975 = vmatpush2.bf16.msra.mxu0 %v7723_v41  ;;  %v7778_v27 = vld [vmem:[%s11892_s2 + $0x6a4] ss:$16 sps:$4 sm:$0xff]   ;;  %v7776_v29 = vld [vmem:[%s11892_s2 + $0x6a0] ss:$16 sps:$4 sm:$0xff]  }
  0x28   :  { %5016 = vmatpush2.bf16.msra.mxu1 %v7724_v44  ;;  %4976 = vmatprep.subr.bf16.mxu0 %v7725_v45  ;;  %v7781_v30 = vld [vmem:[%s11892_s2 + $0x484] ss:$16 sps:$4 sm:$0xff]   ;;  %v7779_v32 = vld [vmem:[%s11892_s2 + $0x480] ss:$16 sps:$4 sm:$0xff]  }
  0x29   :  { %5017 = vmatprep.subr.bf16.mxu1 %v7727_v46  ;;  %v7784_v31 = vld [vmem:[%s11892_s2 + $0x684] ss:$16 sps:$4 sm:$0xff]   ;;  %v7782_v33 = vld [vmem:[%s11892_s2 + $0x680] ss:$16 sps:$4 sm:$0xff]  }
  0x2a   :  { %v7787_v34 = vld [vmem:[%s11892_s2 + $0x464] ss:$16 sps:$4 sm:$0xff]   ;;  %v7785_v36 = vld [vmem:[%s11892_s2 + $0x460] ss:$16 sps:$4 sm:$0xff]  }
  0x2b   :  { %4977 = vmatpush2.bf16.msra.mxu0 %v7729_v47  ;;  %v7790_v35 = vld [vmem:[%s11892_s2 + $0x664] ss:$16 sps:$4 sm:$0xff]   ;;  %v7788_v37 = vld [vmem:[%s11892_s2 + $0x660] ss:$16 sps:$4 sm:$0xff]  }
  0x2c   :  { %5018 = vmatpush2.bf16.msra.mxu1 %v7730_v48  ;;  %4978 = vmatprep.subr.bf16.mxu0 %v7731_v50  ;;  %v7793_v38 = vld [vmem:[%s11892_s2 + $0x444] ss:$16 sps:$4 sm:$0xff]   ;;  %v7791_v40 = vld [vmem:[%s11892_s2 + $0x440] ss:$16 sps:$4 sm:$0xff]  }
  0x2d   :  { %5019 = vmatprep.subr.bf16.mxu1 %v7733_v51  ;;  %v7796_v39 = vld [vmem:[%s11892_s2 + $0x644] ss:$16 sps:$4 sm:$0xff]   ;;  %v7794_v41 = vld [vmem:[%s11892_s2 + $0x640] ss:$16 sps:$4 sm:$0xff]  }
  0x2e   :  { %v7799_v43 = vld [vmem:[%s11892_s2 + $0x424] ss:$16 sps:$4 sm:$0xff]   ;;  %v7797_v45 = vld [vmem:[%s11892_s2 + $0x420] ss:$16 sps:$4 sm:$0xff]  }
  0x2f   :  { %4979 = vmatpush2.bf16.msra.mxu0 %v7735_v53  ;;  %v7802_v44 = vld [vmem:[%s11892_s2 + $0x624] ss:$16 sps:$4 sm:$0xff]   ;;  %v7800_v46 = vld [vmem:[%s11892_s2 + $0x620] ss:$16 sps:$4 sm:$0xff]  }
  0x30   :  { %5020 = vmatpush2.bf16.msra.mxu1 %v7736_v55  ;;  %4980 = vmatprep.subr.bf16.mxu0 %v7737_v56  ;;  %v7805_v47 = vld [vmem:[%s11892_s2 + $0x404] ss:$16 sps:$4 sm:$0xff]   ;;  %v7803_v50 = vld [vmem:[%s11892_s2 + $0x400] ss:$16 sps:$4 sm:$0xff]  }
  0x31   :  { %5021 = vmatprep.subr.bf16.mxu1 %v7739_v57  ;;  %v7808_v48 = vld [vmem:[%s11892_s2 + $0x604] ss:$16 sps:$4 sm:$0xff]   ;;  %v7806_v51 = vld [vmem:[%s11892_s2 + $0x600] ss:$16 sps:$4 sm:$0xff]  }
  0x32   :  { %v7811_v52 = vld [vmem:[%s11892_s2 + $0x5e4] ss:$16 sps:$4 sm:$0xff]   ;;  %v7809_v54 = vld [vmem:[%s11892_s2 + $0x5e0] ss:$16 sps:$4 sm:$0xff]  }
  0x33   :  { %4981 = vmatpush2.bf16.msra.mxu0 %v7741_v59  ;;  %v7814_v53 = vld [vmem:[%s11892_s2 + $0x7e4] ss:$16 sps:$4 sm:$0xff]   ;;  %v7812_v55 = vld [vmem:[%s11892_s2 + $0x7e0] ss:$16 sps:$4 sm:$0xff]  }
  0x34   :  { %5022 = vmatpush2.bf16.msra.mxu1 %v7742_v61  ;;  %4982 = vmatprep.subr.bf16.mxu0 %v7743_v62  ;;  %v7817_v56 = vld [vmem:[%s11892_s2 + $0x5c4] ss:$16 sps:$4 sm:$0xff]   ;;  %v7815_v58 = vld [vmem:[%s11892_s2 + $0x5c0] ss:$16 sps:$4 sm:$0xff]  }
  0x35   :  { %5023 = vmatprep.subr.bf16.mxu1 %v7745_v63  ;;  %v7820_v57 = vld [vmem:[%s11892_s2 + $0x7c4] ss:$16 sps:$4 sm:$0xff]   ;;  %v7818_v59 = vld [vmem:[%s11892_s2 + $0x7c0] ss:$16 sps:$4 sm:$0xff]  }
  0x36   :  { %v7823_v61 = vld [vmem:[%s11892_s2 + $0x5a4] ss:$16 sps:$4 sm:$0xff]   ;;  %v7821_v63 = vld [vmem:[%s11892_s2 + $0x5a0] ss:$16 sps:$4 sm:$0xff]  }
  0x37   :  { %4983 = vmatpush2.bf16.msra.mxu0 %v7747_v2  ;;  %v7826_v62 = vld [vmem:[%s11892_s2 + $0x7a4] ss:$16 sps:$4 sm:$0xff]   ;;  %v7824_v1 = vld [vmem:[%s11892_s2 + $0x7a0] ss:$16 sps:$4 sm:$0xff]  }
  0x38   :  { %5024 = vmatpush2.bf16.msra.mxu1 %v7748_v3  ;;  %4984 = vmatprep.subr.bf16.mxu0 %v7749_v4  ;;  %v7829_v2 = vld [vmem:[%s11892_s2 + $0x584] ss:$16 sps:$4 sm:$0xff]   ;;  %v7827_v4 = vld [vmem:[%s11892_s2 + $0x580] ss:$16 sps:$4 sm:$0xff]  }
  0x39   :  { %5025 = vmatprep.subr.bf16.mxu1 %v7751_v5  ;;  %v7832_v3 = vld [vmem:[%s11892_s2 + $0x784] ss:$16 sps:$4 sm:$0xff]   ;;  %v7830_v5 = vld [vmem:[%s11892_s2 + $0x780] ss:$16 sps:$4 sm:$0xff]  }
  0x3a   :  { %v7841_v11 = vld [vmem:[%s11892_s2 + $0x544] ss:$16 sps:$4 sm:$0xff]  }
  0x3b   :  { %4985 = vmatpush2.bf16.msra.mxu0 %v7753_v7  ;;  %v7835_v7 = vld [vmem:[%s11892_s2 + $0x564] ss:$16 sps:$4 sm:$0xff]  }
  0x3c   :  { %5026 = vmatpush2.bf16.msra.mxu1 %v7754_v8  ;;  %4986 = vmatprep.subr.bf16.mxu0 %v7755_v9  ;;  %v7838_v8 = vld [vmem:[%s11892_s2 + $0x764] ss:$16 sps:$4 sm:$0xff]   ;;  %v7833_v9 = vld [vmem:[%s11892_s2 + $0x560] ss:$16 sps:$4 sm:$0xff]  }
  0x3d   :  { %5027 = vmatprep.subr.bf16.mxu1 %v7757_v10  ;;  %v7836_v10 = vld [vmem:[%s11892_s2 + $0x760] ss:$16 sps:$4 sm:$0xff]  }
  0x3f   :  { %4987 = vmatpush2.bf16.msra.mxu0 %v7759_v12  ;;  %v7844_v12 = vld [vmem:[%s11892_s2 + $0x744] ss:$16 sps:$4 sm:$0xff]  }
  0x40   :  { %5028 = vmatpush2.bf16.msra.mxu1 %v7760_v14  ;;  %5038 = vmatprep.subr.bf16.mxu0 %v7763_v15  ;;  %v7839_v14 = vld [vmem:[%s11892_s2 + $0x540] ss:$16 sps:$4 sm:$0xff]  }
  0x41   :  { %5079 = vmatprep.subr.bf16.mxu1 %v7766_v16  ;;  %v7842_v15 = vld [vmem:[%s11892_s2 + $0x740] ss:$16 sps:$4 sm:$0xff]   ;;  %v7847_v16 = vld [vmem:[%s11892_s2 + $0x524] ss:$16 sps:$4 sm:$0xff]  }
  0x42   :  { %4989 = vmatmul.mubr.bf16.vlgmr.msra.gmra.mxu0 %v9222_v13 }
  0x43   :  { %5030 = vmatmul.mubr.bf16.vlgmr.msra.gmra.mxu1 %v9241_v19  ;;  %5039 = vmatpush1.bf16.msra.mxu0 %v7761_v18  ;;  %v7850_v18 = vld [vmem:[%s11892_s2 + $0x724] ss:$16 sps:$4 sm:$0xff]  }
  0x44   :  { %5080 = vmatpush1.bf16.msra.mxu1 %v7764_v20  ;;  %5040 = vmatprep.subr.bf16.mxu0 %v7769_v21  ;;  %v7845_v20 = vld [vmem:[%s11892_s2 + $0x520] ss:$16 sps:$4 sm:$0xff]  }
  0x45   :  { %5081 = vmatprep.subr.bf16.mxu1 %v7772_v22  ;;  %5070 = vmatprep.mubr.bf16.mxu0 %v9234_v17  ;;  %v7848_v21 = vld [vmem:[%s11892_s2 + $0x720] ss:$16 sps:$4 sm:$0xff]   ;;  %v7853_v22 = vld [vmem:[%s11892_s2 + $0x504] ss:$16 sps:$4 sm:$0xff]  }
  0x46   :  { %5111 = vmatprep.mubr.bf16.mxu1 %v9254_v23 }
  0x47   :  { %5041 = vmatpush1.bf16.msra.mxu0 %v7767_v24  ;;  %v7856_v24 = vld [vmem:[%s11892_s2 + $0x704] ss:$16 sps:$4 sm:$0xff]  }
  0x48   :  { %5082 = vmatpush1.bf16.msra.mxu1 %v7770_v25  ;;  %5042 = vmatprep.subr.bf16.mxu0 %v7775_v26  ;;  %v7851_v25 = vld [vmem:[%s11892_s2 + $0x500] ss:$16 sps:$4 sm:$0xff]   ;;  %v9433_v26 = vrot.slane %v9202_v6, %v9144_v49 }
  0x49   :  { %5083 = vmatprep.subr.bf16.mxu1 %v7778_v27  ;;  %v7854_v27 = vld [vmem:[%s11892_s2 + $0x700] ss:$16 sps:$4 sm:$0xff]  }
  0x4a   :  { %v7858_v6 = vld [vmem:[%s11892_s2 + $0x8e0] ss:$16 sps:$4 sm:$0xff]  }
  0x4b   :  { %5043 = vmatpush1.bf16.msra.mxu0 %v7773_v28  ;;  %v7860_v28 = vld [vmem:[%s11892_s2 + $0x8e4] ss:$16 sps:$4 sm:$0xff]  }
  0x4c   :  { %5084 = vmatpush1.bf16.msra.mxu1 %v7776_v29  ;;  %5044 = vmatprep.subr.bf16.mxu0 %v7781_v30  ;;  %v7863_v29 = vld [vmem:[%s11892_s2 + $0xae4] ss:$16 sps:$4 sm:$0xff]   ;;  %v9449_v30 = vcombine.high %v9433_v26, %v9433_v26 }
  0x4d   :  { %5085 = vmatprep.subr.bf16.mxu1 %v7784_v31  ;;  %v7861_v31 = vld [vmem:[%s11892_s2 + $0xae0] ss:$16 sps:$4 sm:$0xff]  }
  0x4f   :  { %5045 = vmatpush1.bf16.msra.mxu0 %v7779_v32  ;;  %v9457_v32 = vld [vmem:[%s11893_s0 + $0x8] sm:$0xff] }
  0x50   :  { %5086 = vmatpush1.bf16.msra.mxu1 %v7782_v33  ;;  %5046 = vmatprep.subr.bf16.mxu0 %v7787_v34  ;;  %v7866_v33 = vld [vmem:[%s11892_s2 + $0x8c4] ss:$16 sps:$4 sm:$0xff]  }
  0x51   :  { %5087 = vmatprep.subr.bf16.mxu1 %v7790_v35  ;;  %v7869_v34 = vld [vmem:[%s11892_s2 + $0xac4] ss:$16 sps:$4 sm:$0xff]   ;;  %v9467_v35 = vrot.slane %v9457_v32, %v9144_v49 }
  0x53   :  { %5047 = vmatpush1.bf16.msra.mxu0 %v7785_v36  ;;  %v911_v36 = vcombine.high %v9467_v35, %v9467_v35 }
  0x54   :  { %5088 = vmatpush1.bf16.msra.mxu1 %v7788_v37  ;;  %5048 = vmatprep.subr.bf16.mxu0 %v7793_v38  ;;  %v7864_v37 = vld [vmem:[%s11892_s2 + $0x8c0] ss:$16 sps:$4 sm:$0xff]  }
  0x55   :  { %5089 = vmatprep.subr.bf16.mxu1 %v7796_v39  ;;  %v7867_v38 = vld [vmem:[%s11892_s2 + $0xac0] ss:$16 sps:$4 sm:$0xff]   ;;  %v7872_v39 = vld [vmem:[%s11892_s2 + $0x8a4] ss:$16 sps:$4 sm:$0xff]  }
  0x57   :  { %5049 = vmatpush1.bf16.msra.mxu0 %v7791_v40  ;;  %v7875_v40 = vld [vmem:[%s11892_s2 + $0xaa4] ss:$16 sps:$4 sm:$0xff]  }
  0x58   :  { %5090 = vmatpush1.bf16.msra.mxu1 %v7794_v41  ;;  %5050 = vmatprep.subr.bf16.mxu0 %v7799_v43  ;;  %v9486_v41 = vrot.slane %v911_v36, %v9144_v49  ;;  %v7936_v36 = vld [vmem:[%s11892_s2 + $0x940] ss:$16 sps:$4 sm:$0xff]  }
  0x59   :  { %5091 = vmatprep.subr.bf16.mxu1 %v7802_v44  ;;  %v7870_v44 = vld [vmem:[%s11892_s2 + $0x8a0] ss:$16 sps:$4 sm:$0xff]  }
  0x5a   :  { %v9491_v43 = vcombine.high %v9486_v41, %v9486_v41 }
  0x5b   :  { %5051 = vmatpush1.bf16.msra.mxu0 %v7797_v45  ;;  %v7873_v45 = vld [vmem:[%s11892_s2 + $0xaa0] ss:$16 sps:$4 sm:$0xff]  }
  0x5c   :  { %5092 = vmatpush1.bf16.msra.mxu1 %v7800_v46  ;;  %5052 = vmatprep.subr.bf16.mxu0 %v7805_v47  ;;  %v7878_v46 = vld [vmem:[%s11892_s2 + $0x884] ss:$16 sps:$4 sm:$0xff]  }
  0x5d   :  { %5093 = vmatprep.subr.bf16.mxu1 %v7808_v48  ;;  %v7881_v47 = vld [vmem:[%s11892_s2 + $0xa84] ss:$16 sps:$4 sm:$0xff]   ;;  %v7876_v48 = vld [vmem:[%s11892_s2 + $0x880] ss:$16 sps:$4 sm:$0xff]  }
  0x5f   :  { %5053 = vmatpush1.bf16.msra.mxu0 %v7803_v50  ;;  %v7879_v50 = vld [vmem:[%s11892_s2 + $0xa80] ss:$16 sps:$4 sm:$0xff]  }
  0x60   :  { %5094 = vmatpush1.bf16.msra.mxu1 %v7806_v51  ;;  %5054 = vmatprep.subr.bf16.mxu0 %v7811_v52  ;;  %v7884_v51 = vld [vmem:[%s11892_s2 + $0x864] ss:$16 sps:$4 sm:$0xff]  }
  0x61   :  { %5095 = vmatprep.subr.bf16.mxu1 %v7814_v53  ;;  %v7887_v52 = vld [vmem:[%s11892_s2 + $0xa64] ss:$16 sps:$4 sm:$0xff]   ;;  %v7882_v53 = vld [vmem:[%s11892_s2 + $0x860] ss:$16 sps:$4 sm:$0xff]  }
  0x63   :  { %5055 = vmatpush2.bf16.msra.mxu0 %v7809_v54  ;;  %v7885_v54 = vld [vmem:[%s11892_s2 + $0xa60] ss:$16 sps:$4 sm:$0xff]  }
  0x64   :  { %5096 = vmatpush2.bf16.msra.mxu1 %v7812_v55  ;;  %5056 = vmatprep.subr.bf16.mxu0 %v7817_v56  ;;  %v7890_v55 = vld [vmem:[%s11892_s2 + $0x844] ss:$16 sps:$4 sm:$0xff]  }
  0x65   :  { %5097 = vmatprep.subr.bf16.mxu1 %v7820_v57  ;;  %v7893_v56 = vld [vmem:[%s11892_s2 + $0xa44] ss:$16 sps:$4 sm:$0xff]   ;;  %v7888_v57 = vld [vmem:[%s11892_s2 + $0x840] ss:$16 sps:$4 sm:$0xff]  }
  0x67   :  { %5057 = vmatpush2.bf16.msra.mxu0 %v7815_v58  ;;  %v7891_v58 = vld [vmem:[%s11892_s2 + $0xa40] ss:$16 sps:$4 sm:$0xff]  }
  0x68   :  { %5098 = vmatpush2.bf16.msra.mxu1 %v7818_v59  ;;  %5058 = vmatprep.subr.bf16.mxu0 %v7823_v61  ;;  %v7896_v59 = vld [vmem:[%s11892_s2 + $0x824] ss:$16 sps:$4 sm:$0xff]  }
  0x69   :  { %5099 = vmatprep.subr.bf16.mxu1 %v7826_v62  ;;  %v7899_v61 = vld [vmem:[%s11892_s2 + $0xa24] ss:$16 sps:$4 sm:$0xff]   ;;  %v7894_v62 = vld [vmem:[%s11892_s2 + $0x820] ss:$16 sps:$4 sm:$0xff]  }
  0x6b   :  { %5059 = vmatpush2.bf16.msra.mxu0 %v7821_v63  ;;  %v7897_v63 = vld [vmem:[%s11892_s2 + $0xa20] ss:$16 sps:$4 sm:$0xff]  }
  0x6c   :  { %5100 = vmatpush2.bf16.msra.mxu1 %v7824_v1  ;;  %5060 = vmatprep.subr.bf16.mxu0 %v7829_v2  ;;  %v7902_v1 = vld [vmem:[%s11892_s2 + $0x804] ss:$16 sps:$4 sm:$0xff]  }
  0x6d   :  { %5101 = vmatprep.subr.bf16.mxu1 %v7832_v3  ;;  %v7905_v2 = vld [vmem:[%s11892_s2 + $0xa04] ss:$16 sps:$4 sm:$0xff]   ;;  %v7900_v3 = vld [vmem:[%s11892_s2 + $0x800] ss:$16 sps:$4 sm:$0xff]  }
  0x6f   :  { %5061 = vmatpush2.bf16.msra.mxu0 %v7827_v4  ;;  %v7903_v4 = vld [vmem:[%s11892_s2 + $0xa00] ss:$16 sps:$4 sm:$0xff]  }
  0x70   :  { %5102 = vmatpush2.bf16.msra.mxu1 %v7830_v5  ;;  %5062 = vmatprep.subr.bf16.mxu0 %v7835_v7  ;;  %v7908_v5 = vld [vmem:[%s11892_s2 + $0x9e4] ss:$16 sps:$4 sm:$0xff]  }
  0x71   :  { %5103 = vmatprep.subr.bf16.mxu1 %v7838_v8  ;;  %v7911_v7 = vld [vmem:[%s11892_s2 + $0xbe4] ss:$16 sps:$4 sm:$0xff]   ;;  %v7906_v8 = vld [vmem:[%s11892_s2 + $0x9e0] ss:$16 sps:$4 sm:$0xff]  }
  0x73   :  { %5063 = vmatpush2.bf16.msra.mxu0 %v7833_v9  ;;  %v7909_v9 = vld [vmem:[%s11892_s2 + $0xbe0] ss:$16 sps:$4 sm:$0xff]  }
  0x74   :  { %5104 = vmatpush2.bf16.msra.mxu1 %v7836_v10  ;;  %5064 = vmatprep.subr.bf16.mxu0 %v7841_v11  ;;  %v7914_v10 = vld [vmem:[%s11892_s2 + $0x9c4] ss:$16 sps:$4 sm:$0xff]  }
  0x75   :  { %5105 = vmatprep.subr.bf16.mxu1 %v7844_v12  ;;  %v7917_v11 = vld [vmem:[%s11892_s2 + $0xbc4] ss:$16 sps:$4 sm:$0xff]   ;;  %v7912_v12 = vld [vmem:[%s11892_s2 + $0x9c0] ss:$16 sps:$4 sm:$0xff]  }
  0x77   :  { %5065 = vmatpush2.bf16.msra.mxu0 %v7839_v14  ;;  %v7915_v14 = vld [vmem:[%s11892_s2 + $0xbc0] ss:$16 sps:$4 sm:$0xff]  }
  0x78   :  { %5106 = vmatpush2.bf16.msra.mxu1 %v7842_v15  ;;  %5066 = vmatprep.subr.bf16.mxu0 %v7847_v16  ;;  %v7920_v15 = vld [vmem:[%s11892_s2 + $0x9a4] ss:$16 sps:$4 sm:$0xff]  }
  0x79   :  { %5107 = vmatprep.subr.bf16.mxu1 %v7850_v18  ;;  %v7923_v16 = vld [vmem:[%s11892_s2 + $0xba4] ss:$16 sps:$4 sm:$0xff]   ;;  %v7918_v18 = vld [vmem:[%s11892_s2 + $0x9a0] ss:$16 sps:$4 sm:$0xff]  }
  0x7b   :  { %5067 = vmatpush2.bf16.msra.mxu0 %v7845_v20  ;;  %v7921_v20 = vld [vmem:[%s11892_s2 + $0xba0] ss:$16 sps:$4 sm:$0xff]  }
  0x7c   :  { %5108 = vmatpush2.bf16.msra.mxu1 %v7848_v21  ;;  %5068 = vmatprep.subr.bf16.mxu0 %v7853_v22  ;;  %v7926_v21 = vld [vmem:[%s11892_s2 + $0x984] ss:$16 sps:$4 sm:$0xff]  }
  0x7d   :  { %5109 = vmatprep.subr.bf16.mxu1 %v7856_v24  ;;  %v7929_v22 = vld [vmem:[%s11892_s2 + $0xb84] ss:$16 sps:$4 sm:$0xff]   ;;  %v7924_v24 = vld [vmem:[%s11892_s2 + $0x980] ss:$16 sps:$4 sm:$0xff]  }
  0x7f   :  { %5069 = vmatpush2.bf16.msra.mxu0 %v7851_v25  ;;  %v7927_v25 = vld [vmem:[%s11892_s2 + $0xb80] ss:$16 sps:$4 sm:$0xff]  }
  0x80   :  { %5110 = vmatpush2.bf16.msra.mxu1 %v7854_v27  ;;  %5120 = vmatprep.subr.bf16.mxu0 %v7860_v28  ;;  %v7932_v27 = vld [vmem:[%s11892_s2 + $0x964] ss:$16 sps:$4 sm:$0xff]  }
  0x81   :  { %5161 = vmatprep.subr.bf16.mxu1 %v7863_v29  ;;  %v7935_v28 = vld [vmem:[%s11892_s2 + $0xb64] ss:$16 sps:$4 sm:$0xff]   ;;  %v7930_v29 = vld [vmem:[%s11892_s2 + $0x960] ss:$16 sps:$4 sm:$0xff]  }
  0x82   :  { %5071 = vmatmul.mubr.bf16.vlgmr.msra.gmra.mxu0 %v9433_v26 }
  0x83   :  { %5112 = vmatmul.mubr.bf16.vlgmr.msra.gmra.mxu1 %v9449_v30  ;;  %5121 = vmatpush1.bf16.msra.mxu0 %v7858_v6  ;;  %v7933_v6 = vld [vmem:[%s11892_s2 + $0xb60] ss:$16 sps:$4 sm:$0xff]  }
  0x84   :  { %5162 = vmatpush1.bf16.msra.mxu1 %v7861_v31  ;;  %5122 = vmatprep.subr.bf16.mxu0 %v7866_v33  ;;  %v7938_v31 = vld [vmem:[%s11892_s2 + $0x944] ss:$16 sps:$4 sm:$0xff]  }
  0x85   :  { %5163 = vmatprep.subr.bf16.mxu1 %v7869_v34  ;;  %5152 = vmatprep.mubr.bf16.mxu0 %v9486_v41  ;;  %v7941_v33 = vld [vmem:[%s11892_s2 + $0xb44] ss:$16 sps:$4 sm:$0xff]   ;;  %v896_v34 = vcombine.high %v9457_v32, %v9457_v32 }
  0x86   :  { %5193 = vmatprep.mubr.bf16.mxu1 %v9491_v43  ;;  %v7947_v32 = vld [vmem:[%s11892_s2 + $0xb24] ss:$16 sps:$4 sm:$0xff]  }
  0x87   :  { %5123 = vmatpush1.bf16.msra.mxu0 %v7864_v37  ;;  %v7939_v37 = vld [vmem:[%s11892_s2 + $0xb40] ss:$16 sps:$4 sm:$0xff]  }
  0x88   :  { %5164 = vmatpush1.bf16.msra.mxu1 %v7867_v38  ;;  %5124 = vmatprep.subr.bf16.mxu0 %v7872_v39  ;;  %v7944_v38 = vld [vmem:[%s11892_s2 + $0x924] ss:$16 sps:$4 sm:$0xff]   ;;  %v9641_v39 = vrot.slane %v896_v34, %v9144_v49  ;;  %v8005_v34 = vld [vmem:[%s11892_s2 + $0xfe0] ss:$16 sps:$4 sm:$0xff]  }
  0x89   :  { %5165 = vmatprep.subr.bf16.mxu1 %v7875_v40  ;;  %v7942_v40 = vld [vmem:[%s11892_s2 + $0x920] ss:$16 sps:$4 sm:$0xff]  }
  0x8b   :  { %5125 = vmatpush1.bf16.msra.mxu0 %v7870_v44  ;;  %v7945_v44 = vld [vmem:[%s11892_s2 + $0xb20] ss:$16 sps:$4 sm:$0xff]  }
  0x8c   :  { %5166 = vmatpush1.bf16.msra.mxu1 %v7873_v45  ;;  %5126 = vmatprep.subr.bf16.mxu0 %v7878_v46  ;;  %v7950_v45 = vld [vmem:[%s11892_s2 + $0x904] ss:$16 sps:$4 sm:$0xff]  }
  0x8d   :  { %5167 = vmatprep.subr.bf16.mxu1 %v7881_v47  ;;  %v7953_v46 = vld [vmem:[%s11892_s2 + $0xb04] ss:$16 sps:$4 sm:$0xff]   ;;  %v912_v47 = vcombine.high %v9641_v39, %v9641_v39 }
  0x8f   :  { %5127 = vmatpush1.bf16.msra.mxu0 %v7876_v48  ;;  %v7948_v48 = vld [vmem:[%s11892_s2 + $0x900] ss:$16 sps:$4 sm:$0xff]  }
  0x90   :  { %5168 = vmatpush1.bf16.msra.mxu1 %v7879_v50  ;;  %5128 = vmatprep.subr.bf16.mxu0 %v7884_v51  ;;  %v9662_v50 = vrot.slane %v9467_v35, %v9144_v49  ;;  %v7951_v51 = vld [vmem:[%s11892_s2 + $0xb00] ss:$16 sps:$4 sm:$0xff]  }
  0x91   :  { %5169 = vmatprep.subr.bf16.mxu1 %v7887_v52  ;;  %v7956_v52 = vld [vmem:[%s11892_s2 + $0xce4] ss:$16 sps:$4 sm:$0xff]   ;;  %v7954_v35 = vld [vmem:[%s11892_s2 + $0xce0] ss:$16 sps:$4 sm:$0xff]  }
  0x93   :  { %5129 = vmatpush1.bf16.msra.mxu0 %v7882_v53  ;;  %v7959_v53 = vld [vmem:[%s11892_s2 + $0xee4] ss:$16 sps:$4 sm:$0xff]  }
  0x94   :  { %5170 = vmatpush1.bf16.msra.mxu1 %v7885_v54  ;;  %5130 = vmatprep.subr.bf16.mxu0 %v7890_v55  ;;  %v9674_v54 = vrot.slane %v912_v47, %v9144_v49  ;;  %v9681_v55 = vcombine.high %v9662_v50, %v9662_v50  ;;  %v8022_v47 = vld [vmem:[%s11892_s2 + $0xd84] ss:$16 sps:$4 sm:$0xff]  }
  0x95   :  { %5171 = vmatprep.subr.bf16.mxu1 %v7893_v56  ;;  %v7957_v56 = vld [vmem:[%s11892_s2 + $0xee0] ss:$16 sps:$4 sm:$0xff]  }
  0x97   :  { %5131 = vmatpush1.bf16.msra.mxu0 %v7888_v57  ;;  %v7962_v57 = vld [vmem:[%s11892_s2 + $0xcc4] ss:$16 sps:$4 sm:$0xff]  }
  0x98   :  { %5172 = vmatpush1.bf16.msra.mxu1 %v7891_v58  ;;  %5132 = vmatprep.subr.bf16.mxu0 %v7896_v59  ;;  %v7965_v58 = vld [vmem:[%s11892_s2 + $0xec4] ss:$16 sps:$4 sm:$0xff]   ;;  %v9694_v59 = vcombine.high %v9674_v54, %v9674_v54 }
  0x99   :  { %5173 = vmatprep.subr.bf16.mxu1 %v7899_v61  ;;  %v7960_v61 = vld [vmem:[%s11892_s2 + $0xcc0] ss:$16 sps:$4 sm:$0xff]  }
  0x9b   :  { %5133 = vmatpush1.bf16.msra.mxu0 %v7894_v62  ;;  %v7963_v62 = vld [vmem:[%s11892_s2 + $0xec0] ss:$16 sps:$4 sm:$0xff]  }
  0x9c   :  { %5174 = vmatpush1.bf16.msra.mxu1 %v7897_v63  ;;  %5134 = vmatprep.subr.bf16.mxu0 %v7902_v1  ;;  %v7968_v63 = vld [vmem:[%s11892_s2 + $0xca4] ss:$16 sps:$4 sm:$0xff]  }
  0x9d   :  { %5175 = vmatprep.subr.bf16.mxu1 %v7905_v2  ;;  %v7971_v1 = vld [vmem:[%s11892_s2 + $0xea4] ss:$16 sps:$4 sm:$0xff]   ;;  %v7966_v2 = vld [vmem:[%s11892_s2 + $0xca0] ss:$16 sps:$4 sm:$0xff]  }
  0x9f   :  { %5135 = vmatpush1.bf16.msra.mxu0 %v7900_v3  ;;  %v7969_v3 = vld [vmem:[%s11892_s2 + $0xea0] ss:$16 sps:$4 sm:$0xff]  }
  0xa0   :  { %5176 = vmatpush1.bf16.msra.mxu1 %v7903_v4  ;;  %5136 = vmatprep.subr.bf16.mxu0 %v7908_v5  ;;  %v7974_v4 = vld [vmem:[%s11892_s2 + $0xc84] ss:$16 sps:$4 sm:$0xff]  }
  0xa1   :  { %5177 = vmatprep.subr.bf16.mxu1 %v7911_v7  ;;  %v7977_v5 = vld [vmem:[%s11892_s2 + $0xe84] ss:$16 sps:$4 sm:$0xff]   ;;  %v7972_v7 = vld [vmem:[%s11892_s2 + $0xc80] ss:$16 sps:$4 sm:$0xff]  }
  0xa3   :  { %5137 = vmatpush2.bf16.msra.mxu0 %v7906_v8  ;;  %v7975_v8 = vld [vmem:[%s11892_s2 + $0xe80] ss:$16 sps:$4 sm:$0xff]  }
  0xa4   :  { %5178 = vmatpush2.bf16.msra.mxu1 %v7909_v9  ;;  %5138 = vmatprep.subr.bf16.mxu0 %v7914_v10  ;;  %v7980_v9 = vld [vmem:[%s11892_s2 + $0xc64] ss:$16 sps:$4 sm:$0xff]  }
  0xa5   :  { %5179 = vmatprep.subr.bf16.mxu1 %v7917_v11  ;;  %v7983_v10 = vld [vmem:[%s11892_s2 + $0xe64] ss:$16 sps:$4 sm:$0xff]   ;;  %v7978_v11 = vld [vmem:[%s11892_s2 + $0xc60] ss:$16 sps:$4 sm:$0xff]  }
  0xa7   :  { %5139 = vmatpush2.bf16.msra.mxu0 %v7912_v12  ;;  %v7981_v12 = vld [vmem:[%s11892_s2 + $0xe60] ss:$16 sps:$4 sm:$0xff]  }
  0xa8   :  { %5180 = vmatpush2.bf16.msra.mxu1 %v7915_v14  ;;  %5140 = vmatprep.subr.bf16.mxu0 %v7920_v15  ;;  %v7986_v14 = vld [vmem:[%s11892_s2 + $0xc44] ss:$16 sps:$4 sm:$0xff]  }
  0xa9   :  { %5181 = vmatprep.subr.bf16.mxu1 %v7923_v16  ;;  %v7989_v15 = vld [vmem:[%s11892_s2 + $0xe44] ss:$16 sps:$4 sm:$0xff]   ;;  %v7984_v16 = vld [vmem:[%s11892_s2 + $0xc40] ss:$16 sps:$4 sm:$0xff]  }
  0xab   :  { %5141 = vmatpush2.bf16.msra.mxu0 %v7918_v18  ;;  %v7987_v18 = vld [vmem:[%s11892_s2 + $0xe40] ss:$16 sps:$4 sm:$0xff]  }
  0xac   :  { %5182 = vmatpush2.bf16.msra.mxu1 %v7921_v20  ;;  %5142 = vmatprep.subr.bf16.mxu0 %v7926_v21  ;;  %v7992_v20 = vld [vmem:[%s11892_s2 + $0xc24] ss:$16 sps:$4 sm:$0xff]  }
  0xad   :  { %5183 = vmatprep.subr.bf16.mxu1 %v7929_v22  ;;  %v7995_v21 = vld [vmem:[%s11892_s2 + $0xe24] ss:$16 sps:$4 sm:$0xff]   ;;  %v7990_v22 = vld [vmem:[%s11892_s2 + $0xc20] ss:$16 sps:$4 sm:$0xff]  }
  0xaf   :  { %5143 = vmatpush2.bf16.msra.mxu0 %v7924_v24  ;;  %v7993_v24 = vld [vmem:[%s11892_s2 + $0xe20] ss:$16 sps:$4 sm:$0xff]  }
  0xb0   :  { %5184 = vmatpush2.bf16.msra.mxu1 %v7927_v25  ;;  %5144 = vmatprep.subr.bf16.mxu0 %v7932_v27  ;;  %v7998_v25 = vld [vmem:[%s11892_s2 + $0xc04] ss:$16 sps:$4 sm:$0xff]  }
  0xb1   :  { %5185 = vmatprep.subr.bf16.mxu1 %v7935_v28  ;;  %v8001_v27 = vld [vmem:[%s11892_s2 + $0xe04] ss:$16 sps:$4 sm:$0xff]   ;;  %v7996_v28 = vld [vmem:[%s11892_s2 + $0xc00] ss:$16 sps:$4 sm:$0xff]  }
  0xb3   :  { %5145 = vmatpush2.bf16.msra.mxu0 %v7930_v29  ;;  %v7999_v29 = vld [vmem:[%s11892_s2 + $0xe00] ss:$16 sps:$4 sm:$0xff]  }
  0xb4   :  { %5186 = vmatpush2.bf16.msra.mxu1 %v7933_v6  ;;  %5146 = vmatprep.subr.bf16.mxu0 %v7938_v31  ;;  %v8004_v6 = vld [vmem:[%s11892_s2 + $0xde4] ss:$16 sps:$4 sm:$0xff]  }
  0xb5   :  { %5187 = vmatprep.subr.bf16.mxu1 %v7941_v33  ;;  %v8007_v31 = vld [vmem:[%s11892_s2 + $0xfe4] ss:$16 sps:$4 sm:$0xff]   ;;  %v8002_v33 = vld [vmem:[%s11892_s2 + $0xde0] ss:$16 sps:$4 sm:$0xff]  }
  0xb7   :  { %5147 = vmatpush2.bf16.msra.mxu0 %v7936_v36  ;;  %v8010_v36 = vld [vmem:[%s11892_s2 + $0xdc4] ss:$16 sps:$4 sm:$0xff]  }
  0xb8   :  { %5188 = vmatpush2.bf16.msra.mxu1 %v7939_v37  ;;  %5148 = vmatprep.subr.bf16.mxu0 %v7944_v38  ;;  %v8013_v37 = vld [vmem:[%s11892_s2 + $0xfc4] ss:$16 sps:$4 sm:$0xff]   ;;  %v8008_v38 = vld [vmem:[%s11892_s2 + $0xdc0] ss:$16 sps:$4 sm:$0xff]  }
  0xb9   :  { %5189 = vmatprep.subr.bf16.mxu1 %v7947_v32  ;;  %v8011_v32 = vld [vmem:[%s11892_s2 + $0xfc0] ss:$16 sps:$4 sm:$0xff]  }
  0xbb   :  { %5149 = vmatpush2.bf16.msra.mxu0 %v7942_v40  ;;  %v8016_v40 = vld [vmem:[%s11892_s2 + $0xda4] ss:$16 sps:$4 sm:$0xff]  }
  0xbc   :  { %5190 = vmatpush2.bf16.msra.mxu1 %v7945_v44  ;;  %5150 = vmatprep.subr.bf16.mxu0 %v7950_v45  ;;  %v8019_v44 = vld [vmem:[%s11892_s2 + $0xfa4] ss:$16 sps:$4 sm:$0xff]   ;;  %v8014_v45 = vld [vmem:[%s11892_s2 + $0xda0] ss:$16 sps:$4 sm:$0xff]  }
  0xbd   :  { %5191 = vmatprep.subr.bf16.mxu1 %v7953_v46  ;;  %v8017_v46 = vld [vmem:[%s11892_s2 + $0xfa0] ss:$16 sps:$4 sm:$0xff]  }
  0xbf   :  { %5151 = vmatpush2.bf16.msra.mxu0 %v7948_v48  ;;  %v8025_v48 = vld [vmem:[%s11892_s2 + $0xf84] ss:$16 sps:$4 sm:$0xff]  }
  0xc0   :  { %5192 = vmatpush2.bf16.msra.mxu1 %v7951_v51  ;;  %5202 = vmatprep.subr.bf16.mxu0 %v7956_v52  ;;  %v8020_v51 = vld [vmem:[%s11892_s2 + $0xd80] ss:$16 sps:$4 sm:$0xff]  }
  0xc1   :  { %5243 = vmatprep.subr.bf16.mxu1 %v7959_v53  ;;  %v8023_v52 = vld [vmem:[%s11892_s2 + $0xf80] ss:$16 sps:$4 sm:$0xff]   ;;  %v8028_v53 = vld [vmem:[%s11892_s2 + $0xd64] ss:$16 sps:$4 sm:$0xff]  }
  0xc2   :  { %5153 = vmatmul.mubr.bf16.vlgmr.msra.gmra.mxu0 %v9662_v50 }
  0xc3   :  { %5194 = vmatmul.mubr.bf16.vlgmr.msra.gmra.mxu1 %v9681_v55  ;;  %5203 = vmatpush1.bf16.msra.mxu0 %v7954_v35  ;;  %v8031_v35 = vld [vmem:[%s11892_s2 + $0xf64] ss:$16 sps:$4 sm:$0xff]  }
  0xc4   :  { %5244 = vmatpush1.bf16.msra.mxu1 %v7957_v56  ;;  %5204 = vmatprep.subr.bf16.mxu0 %v7962_v57  ;;  %v8026_v56 = vld [vmem:[%s11892_s2 + $0xd60] ss:$16 sps:$4 sm:$0xff]  }
  0xc5   :  { %5245 = vmatprep.subr.bf16.mxu1 %v7965_v58  ;;  %5234 = vmatprep.mubr.bf16.mxu0 %v9674_v54  ;;  %v8029_v57 = vld [vmem:[%s11892_s2 + $0xf60] ss:$16 sps:$4 sm:$0xff]   ;;  %v8034_v58 = vld [vmem:[%s11892_s2 + $0xd44] ss:$16 sps:$4 sm:$0xff]  }
  0xc6   :  { %5275 = vmatprep.mubr.bf16.mxu1 %v9694_v59 }
  0xc7   :  { %5205 = vmatpush1.bf16.msra.mxu0 %v7960_v61  ;;  %v8037_v61 = vld [vmem:[%s11892_s2 + $0xf44] ss:$16 sps:$4 sm:$0xff]  }
  0xc8   :  { %5246 = vmatpush1.bf16.msra.mxu1 %v7963_v62  ;;  %5206 = vmatprep.subr.bf16.mxu0 %v7968_v63  ;;  %v8032_v62 = vld [vmem:[%s11892_s2 + $0xd40] ss:$16 sps:$4 sm:$0xff]  }
  0xc9   :  { %5247 = vmatprep.subr.bf16.mxu1 %v7971_v1  ;;  %v8035_v63 = vld [vmem:[%s11892_s2 + $0xf40] ss:$16 sps:$4 sm:$0xff]  }
  0xca   :  { %v9853_v1 = vld [vmem:[%s11893_s0 + $0x10] sm:$0xff] }
  0xcb   :  { %5207 = vmatpush1.bf16.msra.mxu0 %v7966_v2  ;;  %v8040_v2 = vld [vmem:[%s11892_s2 + $0xd24] ss:$16 sps:$4 sm:$0xff]  }
  0xcc   :  { %5248 = vmatpush1.bf16.msra.mxu1 %v7969_v3  ;;  %5208 = vmatprep.subr.bf16.mxu0 %v7974_v4  ;;  %v8043_v3 = vld [vmem:[%s11892_s2 + $0xf24] ss:$16 sps:$4 sm:$0xff]   ;;  %v9863_v4 = vrot.slane %v9853_v1, %v9144_v49 }
  0xcd   :  { %5249 = vmatprep.subr.bf16.mxu1 %v7977_v5  ;;  %v8038_v5 = vld [vmem:[%s11892_s2 + $0xd20] ss:$16 sps:$4 sm:$0xff]  }
  0xcf   :  { %5209 = vmatpush1.bf16.msra.mxu0 %v7972_v7  ;;  %v8041_v7 = vld [vmem:[%s11892_s2 + $0xf20] ss:$16 sps:$4 sm:$0xff]  }
  0xd0   :  { %5250 = vmatpush1.bf16.msra.mxu1 %v7975_v8  ;;  %5210 = vmatprep.subr.bf16.mxu0 %v7980_v9  ;;  %v8046_v8 = vld [vmem:[%s11892_s2 + $0xd04] ss:$16 sps:$4 sm:$0xff]  }
  0xd1   :  { %5251 = vmatprep.subr.bf16.mxu1 %v7983_v10  ;;  %v8049_v9 = vld [vmem:[%s11892_s2 + $0xf04] ss:$16 sps:$4 sm:$0xff]   ;;  %v8044_v10 = vld [vmem:[%s11892_s2 + $0xd00] ss:$16 sps:$4 sm:$0xff]  }
  0xd3   :  { %5211 = vmatpush1.bf16.msra.mxu0 %v7978_v11  ;;  %v960_v11 = vcombine.high %v9863_v4, %v9863_v4 }
  0xd4   :  { %5252 = vmatpush1.bf16.msra.mxu1 %v7981_v12  ;;  %5212 = vmatprep.subr.bf16.mxu0 %v7986_v14  ;;  %v8047_v12 = vld [vmem:[%s11892_s2 + $0xf00] ss:$16 sps:$4 sm:$0xff]  }
  0xd5   :  { %5253 = vmatprep.subr.bf16.mxu1 %v7989_v15  ;;  %v821_v14 = vld [vmem:[%s11894_s3] sm:$0xf]  ;;  %v9890_v15 = vrot.slane %v9641_v39, %v9144_v49 }
  0xd6   :  { %v8051_v39 = vld [vmem:[%s11892_s2 + $0x10e0] ss:$16 sps:$4 sm:$0xff]  }
  0xd7   :  { %5213 = vmatpush1.bf16.msra.mxu0 %v7984_v16  ;;  %v825_v16 = vsub.s32 0, %v9126_v42 }
  0xd8   :  { %5254 = vmatpush1.bf16.msra.mxu1 %v7987_v18  ;;  %5214 = vmatprep.subr.bf16.mxu0 %v7992_v20  ;;  %v8053_v18 = vld [vmem:[%s11892_s2 + $0x10e4] ss:$16 sps:$4 sm:$0xff]  }
  0xd9   :  { %5255 = vmatprep.subr.bf16.mxu1 %v7995_v21  ;;  %v8056_v20 = vld [vmem:[%s11892_s2 + $0x12e4] ss:$16 sps:$4 sm:$0xff]   ;;  %v829_v21 = vsub.s32 1, %v9126_v42 }
  0xdb   :  { %5215 = vmatpush1.bf16.msra.mxu0 %v7990_v22  ;;  %v9901_v22 = vrot.slane %v960_v11, %v9144_v49  ;;  %v8084_v11 = vld [vmem:[%s11892_s2 + $0x1240] ss:$16 sps:$4 sm:$0xff]  }
  0xdc   :  { %5256 = vmatpush1.bf16.msra.mxu1 %v7993_v24  ;;  %5216 = vmatprep.subr.bf16.mxu0 %v7998_v25  ;;  %v8054_v24 = vld [vmem:[%s11892_s2 + $0x12e0] ss:$16 sps:$4 sm:$0xff]   ;;  %v9911_v25 = vcombine.high %v9890_v15, %v9890_v15 }
  0xdd   :  { %5257 = vmatprep.subr.bf16.mxu1 %v8001_v27  ;;  %v826_v27 = vrot.slane %v821_v14, %v825_v16 }
  0xdf   :  { %5217 = vmatpush1.bf16.msra.mxu0 %v7996_v28  ;;  %v8059_v28 = vld [vmem:[%s11892_s2 + $0x10c4] ss:$16 sps:$4 sm:$0xff]  }
  0xe0   :  { %5258 = vmatpush1.bf16.msra.mxu1 %v7999_v29  ;;  %5218 = vmatprep.subr.bf16.mxu0 %v8004_v6  ;;  %v8062_v29 = vld [vmem:[%s11892_s2 + $0x12c4] ss:$16 sps:$4 sm:$0xff]   ;;  %v830_v6 = vrot.slane %v821_v14, %v829_v21 }
  0xe1   :  { %5259 = vmatprep.subr.bf16.mxu1 %v8007_v31  ;;  %v9925_v31 = vcombine.high %v9901_v22, %v9901_v22  ;;  %v8092_v14 = vld [vmem:[%s11892_s2 + $0x1224] ss:$16 sps:$4 sm:$0xff]  }
  0xe3   :  { %5219 = vmatpush2.bf16.msra.mxu0 %v8002_v33 }
  0xe4   :  { %5260 = vmatpush2.bf16.msra.mxu1 %v8005_v34  ;;  %5220 = vmatprep.subr.bf16.mxu0 %v8010_v36  ;;  %v8057_v36 = vld [vmem:[%s11892_s2 + $0x10c0] ss:$16 sps:$4 sm:$0xff]  }
  0xe5   :  { %5261 = vmatprep.subr.bf16.mxu1 %v8013_v37  ;;  %v8060_v37 = vld [vmem:[%s11892_s2 + $0x12c0] ss:$16 sps:$4 sm:$0xff]  }
  0xe7   :  { %5221 = vmatpush2.bf16.msra.mxu0 %v8008_v38 }
  0xe8   :  { %5262 = vmatpush2.bf16.msra.mxu1 %v8011_v32  ;;  %5222 = vmatprep.subr.bf16.mxu0 %v8016_v40 }
  0xe9   :  { %5263 = vmatprep.subr.bf16.mxu1 %v8019_v44  ;;  %v8065_v44 = vld [vmem:[%s11892_s2 + $0x10a4] ss:$16 sps:$4 sm:$0xff]  }
  0xeb   :  { %5223 = vmatpush2.bf16.msra.mxu0 %v8014_v45  ;;  %v8068_v45 = vld [vmem:[%s11892_s2 + $0x12a4] ss:$16 sps:$4 sm:$0xff]  }
  0xec   :  { %5264 = vmatpush2.bf16.msra.mxu1 %v8017_v46  ;;  %5224 = vmatprep.subr.bf16.mxu0 %v8022_v47 }
  0xed   :  { %5265 = vmatprep.subr.bf16.mxu1 %v8025_v48  ;;  %v8063_v48 = vld [vmem:[%s11892_s2 + $0x10a0] ss:$16 sps:$4 sm:$0xff]  }
  0xef   :  { %5225 = vmatpush2.bf16.msra.mxu0 %v8020_v51  ;;  %v8066_v51 = vld [vmem:[%s11892_s2 + $0x12a0] ss:$16 sps:$4 sm:$0xff]  }
  0xf0   :  { %5266 = vmatpush2.bf16.msra.mxu1 %v8023_v52  ;;  %5226 = vmatprep.subr.bf16.mxu0 %v8028_v53 }
  0xf1   :  { %5267 = vmatprep.subr.bf16.mxu1 %v8031_v35 }
  0xf3   :  { %5227 = vmatpush2.bf16.msra.mxu0 %v8026_v56 }
  0xf4   :  { %5268 = vmatpush2.bf16.msra.mxu1 %v8029_v57  ;;  %5228 = vmatprep.subr.bf16.mxu0 %v8034_v58  ;;  %v8071_v57 = vld [vmem:[%s11892_s2 + $0x1084] ss:$16 sps:$4 sm:$0xff]  }
  0xf5   :  { %5269 = vmatprep.subr.bf16.mxu1 %v8037_v61  ;;  %v8074_v58 = vld [vmem:[%s11892_s2 + $0x1284] ss:$16 sps:$4 sm:$0xff]  }
  0xf7   :  { %5229 = vmatpush2.bf16.msra.mxu0 %v8032_v62  ;;  %v8069_v62 = vld [vmem:[%s11892_s2 + $0x1080] ss:$16 sps:$4 sm:$0xff]  }
  0xf8   :  { %5270 = vmatpush2.bf16.msra.mxu1 %v8035_v63  ;;  %5230 = vmatprep.subr.bf16.mxu0 %v8040_v2  ;;  %v8072_v63 = vld [vmem:[%s11892_s2 + $0x1280] ss:$16 sps:$4 sm:$0xff]   ;;  %v8077_v2 = vld [vmem:[%s11892_s2 + $0x1064] ss:$16 sps:$4 sm:$0xff]  }
  0xf9   :  { %5271 = vmatprep.subr.bf16.mxu1 %v8043_v3  ;;  %v8080_v3 = vld [vmem:[%s11892_s2 + $0x1264] ss:$16 sps:$4 sm:$0xff]  }
  0xfb   :  { %5231 = vmatpush2.bf16.msra.mxu0 %v8038_v5  ;;  %v8075_v5 = vld [vmem:[%s11892_s2 + $0x1060] ss:$16 sps:$4 sm:$0xff]  }
  0xfc   :  { %5272 = vmatpush2.bf16.msra.mxu1 %v8041_v7  ;;  %5232 = vmatprep.subr.bf16.mxu0 %v8046_v8  ;;  %v8078_v7 = vld [vmem:[%s11892_s2 + $0x1260] ss:$16 sps:$4 sm:$0xff]   ;;  %v8083_v8 = vld [vmem:[%s11892_s2 + $0x1044] ss:$16 sps:$4 sm:$0xff]  }
  0xfd   :  { %5273 = vmatprep.subr.bf16.mxu1 %v8049_v9  ;;  %v8086_v9 = vld [vmem:[%s11892_s2 + $0x1244] ss:$16 sps:$4 sm:$0xff]  }
  0xff   :  { %5233 = vmatpush2.bf16.msra.mxu0 %v8044_v10  ;;  %v8081_v10 = vld [vmem:[%s11892_s2 + $0x1040] ss:$16 sps:$4 sm:$0xff]  }
 0x100   :  { %5274 = vmatpush2.bf16.msra.mxu1 %v8047_v12  ;;  %5284 = vmatprep.subr.bf16.mxu0 %v8053_v18  ;;  %v8089_v12 = vld [vmem:[%s11892_s2 + $0x1024] ss:$16 sps:$4 sm:$0xff]   ;;  %v8087_v18 = vld [vmem:[%s11892_s2 + $0x1020] ss:$16 sps:$4 sm:$0xff]  }
 0x101   :  { %5325 = vmatprep.subr.bf16.mxu1 %v8056_v20  ;;  %v8090_v20 = vld [vmem:[%s11892_s2 + $0x1220] ss:$16 sps:$4 sm:$0xff]  }
 0x102   :  { %v4990_v33 = vpop.f32.mrf.mxu0  ;;  %5235 = vmatmul.mubr.bf16.vlgmr.msra.gmra.mxu0 %v9890_v15 }
 0x103   :  { %5276 = vmatmul.mubr.bf16.vlgmr.msra.gmra.mxu1 %v9911_v25  ;;  %v5031_v34 = vpop.f32.mrf.mxu1  ;;  %v4991_v38 = vadd.f32 %v4990_v33, %v826_v27  ;;  %5285 = vmatpush1.bf16.msra.mxu0 %v8051_v39  ;;  %v8095_v39 = vld [vmem:[%s11892_s2 + $0x1004] ss:$16 sps:$4 sm:$0xff]   ;;  %v8093_v27 = vld [vmem:[%s11892_s2 + $0x1000] ss:$16 sps:$4 sm:$0xff]  }
 0x104   :  { %5326 = vmatpush1.bf16.msra.mxu1 %v8054_v24  ;;  %v4992_v32 = vpop.f32.mrf.mxu0  ;;  %5286 = vmatprep.subr.bf16.mxu0 %v8059_v28  ;;  %v8098_v24 = vld [vmem:[%s11892_s2 + $0x1204] ss:$16 sps:$4 sm:$0xff]   ;;  %v8096_v28 = vld [vmem:[%s11892_s2 + $0x1200] ss:$16 sps:$4 sm:$0xff]  }
 0x105   :  { %v5033_v40 = vpop.f32.mrf.mxu1  ;;  %5327 = vmatprep.subr.bf16.mxu1 %v8062_v29  ;;  %v4993_v46 = vadd.f32 %v4992_v32, %v830_v6  ;;  %v9941_v47 = vadd.f32 %v5031_v34, %v4991_v38  ;;  %5316 = vmatprep.mubr.bf16.mxu0 %v9901_v22  ;;  %v8101_v29 = vld [vmem:[%s11892_s2 + $0x11e4] ss:$16 sps:$4 sm:$0xff]   ;;  %v8099_v33 = vld [vmem:[%s11892_s2 + $0x11e0] ss:$16 sps:$4 sm:$0xff]  }
 0x106   :  { %5357 = vmatprep.mubr.bf16.mxu1 %v9925_v31  ;;  %v4994_v52 = vpop.f32.mrf.mxu0  ;;  %v8104_v6 = vld [vmem:[%s11892_s2 + $0x13e4] ss:$16 sps:$4 sm:$0xff]   ;;  %v8102_v34 = vld [vmem:[%s11892_s2 + $0x13e0] ss:$16 sps:$4 sm:$0xff]  }
 0x107   :  { %v5035_v53 = vpop.f32.mrf.mxu1  ;;  %v9951_v35 = vadd.f32 %v5033_v40, %v4993_v46  ;;  %5287 = vmatpush1.bf16.msra.mxu0 %v8057_v36  ;;  %v8107_v36 = vld [vmem:[%s11892_s2 + $0x11c4] ss:$16 sps:$4 sm:$0xff]   ;;  %v8105_v38 = vld [vmem:[%s11892_s2 + $0x11c0] ss:$16 sps:$4 sm:$0xff]  }
 0x108   :  { %5328 = vmatpush1.bf16.msra.mxu1 %v8060_v37  ;;  %v4995_v56 = vpop.f32.mrf.mxu0  ;;  %5288 = vmatprep.subr.bf16.mxu0 %v8065_v44  ;;  %v8110_v37 = vld [vmem:[%s11892_s2 + $0x13c4] ss:$16 sps:$4 sm:$0xff]   ;;  %v8108_v32 = vld [vmem:[%s11892_s2 + $0x13c0] ss:$16 sps:$4 sm:$0xff]  }
 0x109   :  { %5329 = vmatprep.subr.bf16.mxu1 %v8068_v45  ;;  %v5036_v61 = vpop.f32.mrf.mxu1  ;;  %v8113_v40 = vld [vmem:[%s11892_s2 + $0x11a4] ss:$16 sps:$4 sm:$0xff]   ;;  %v8111_v45 = vld [vmem:[%s11892_s2 + $0x11a0] ss:$16 sps:$4 sm:$0xff]  }
 0x10a   :  { %v8116_v44 = vld [vmem:[%s11892_s2 + $0x13a4] ss:$16 sps:$4 sm:$0xff]   ;;  %v8114_v46 = vld [vmem:[%s11892_s2 + $0x13a0] ss:$16 sps:$4 sm:$0xff]  }
 0x10b   :  { %5289 = vmatpush1.bf16.msra.mxu0 %v8063_v48  ;;  %v8119_v48 = vld [vmem:[%s11892_s2 + $0x1184] ss:$16 sps:$4 sm:$0xff]   ;;  %v8117_v52 = vld [vmem:[%s11892_s2 + $0x1180] ss:$16 sps:$4 sm:$0xff]  }
 0x10c   :  { %5330 = vmatpush1.bf16.msra.mxu1 %v8066_v51  ;;  %5290 = vmatprep.subr.bf16.mxu0 %v8071_v57  ;;  %v8122_v51 = vld [vmem:[%s11892_s2 + $0x1384] ss:$16 sps:$4 sm:$0xff]   ;;  %v8120_v53 = vld [vmem:[%s11892_s2 + $0x1380] ss:$16 sps:$4 sm:$0xff]  }
 0x10d   :  { %5331 = vmatprep.subr.bf16.mxu1 %v8074_v58  ;;  %v8125_v56 = vld [vmem:[%s11892_s2 + $0x1164] ss:$16 sps:$4 sm:$0xff]   ;;  %v8123_v58 = vld [vmem:[%s11892_s2 + $0x1160] ss:$16 sps:$4 sm:$0xff]  }
 0x10e   :  { %v8128_v57 = vld [vmem:[%s11892_s2 + $0x1364] ss:$16 sps:$4 sm:$0xff]   ;;  %v8126_v61 = vld [vmem:[%s11892_s2 + $0x1360] ss:$16 sps:$4 sm:$0xff]  }
 0x10f   :  { %5291 = vmatpush1.bf16.msra.mxu0 %v8069_v62  ;;  %v8131_v62 = vld [vmem:[%s11892_s2 + $0x1144] ss:$16 sps:$4 sm:$0xff]  }
 0x110   :  { %5332 = vmatpush1.bf16.msra.mxu1 %v8072_v63  ;;  %5292 = vmatprep.subr.bf16.mxu0 %v8077_v2  ;;  %v8134_v63 = vld [vmem:[%s11892_s2 + $0x1344] ss:$16 sps:$4 sm:$0xff]   ;;  %v945_v2 = vcombine.high %v9853_v1, %v9853_v1 }
 0x111   :  { %5333 = vmatprep.subr.bf16.mxu1 %v8080_v3  ;;  %v8129_v3 = vld [vmem:[%s11892_s2 + $0x1140] ss:$16 sps:$4 sm:$0xff]   ;;  %v8140_v1 = vld [vmem:[%s11892_s2 + $0x1324] ss:$16 sps:$4 sm:$0xff]  }
 0x113   :  { %5293 = vmatpush1.bf16.msra.mxu0 %v8075_v5  ;;  %v8132_v5 = vld [vmem:[%s11892_s2 + $0x1340] ss:$16 sps:$4 sm:$0xff]  }
 0x114   :  { %5334 = vmatpush1.bf16.msra.mxu1 %v8078_v7  ;;  %5294 = vmatprep.subr.bf16.mxu0 %v8083_v8  ;;  %v8137_v7 = vld [vmem:[%s11892_s2 + $0x1124] ss:$16 sps:$4 sm:$0xff]   ;;  %v10094_v8 = vrot.slane %v945_v2, %v9144_v49 }
 0x115   :  { %5335 = vmatprep.subr.bf16.mxu1 %v8086_v9  ;;  %v8135_v9 = vld [vmem:[%s11892_s2 + $0x1120] ss:$16 sps:$4 sm:$0xff]  }
 0x117   :  { %5295 = vmatpush1.bf16.msra.mxu0 %v8081_v10  ;;  %v8138_v10 = vld [vmem:[%s11892_s2 + $0x1320] ss:$16 sps:$4 sm:$0xff]  }
 0x118   :  { %5336 = vmatpush1.bf16.msra.mxu1 %v8084_v11  ;;  %5296 = vmatprep.subr.bf16.mxu0 %v8089_v12  ;;  %v8143_v11 = vld [vmem:[%s11892_s2 + $0x1104] ss:$16 sps:$4 sm:$0xff]  }
 0x119   :  { %5337 = vmatprep.subr.bf16.mxu1 %v8092_v14  ;;  %v8146_v12 = vld [vmem:[%s11892_s2 + $0x1304] ss:$16 sps:$4 sm:$0xff]   ;;  %v961_v14 = vcombine.high %v10094_v8, %v10094_v8 }
 0x11b   :  { %5297 = vmatpush1.bf16.msra.mxu0 %v8087_v18  ;;  %v10112_v18 = vrot.slane %v9863_v4, %v9144_v49  ;;  %v8152_v4 = vld [vmem:[%s11892_s2 + $0x16e4] ss:$16 sps:$4 sm:$0xff]  }
 0x11c   :  { %5338 = vmatpush1.bf16.msra.mxu1 %v8090_v20  ;;  %5298 = vmatprep.subr.bf16.mxu0 %v8095_v39  ;;  %v8141_v20 = vld [vmem:[%s11892_s2 + $0x1100] ss:$16 sps:$4 sm:$0xff]  }
 0x11d   :  { %5339 = vmatprep.subr.bf16.mxu1 %v8098_v24  ;;  %v8144_v39 = vld [vmem:[%s11892_s2 + $0x1300] ss:$16 sps:$4 sm:$0xff]   ;;  %v8149_v24 = vld [vmem:[%s11892_s2 + $0x14e4] ss:$16 sps:$4 sm:$0xff]  }
 0x11f   :  { %5299 = vmatpush1.bf16.msra.mxu0 %v8093_v27  ;;  %v8147_v27 = vld [vmem:[%s11892_s2 + $0x14e0] ss:$16 sps:$4 sm:$0xff]  }
 0x120   :  { %5340 = vmatpush1.bf16.msra.mxu1 %v8096_v28  ;;  %5300 = vmatprep.subr.bf16.mxu0 %v8101_v29  ;;  %v8150_v28 = vld [vmem:[%s11892_s2 + $0x16e0] ss:$16 sps:$4 sm:$0xff]   ;;  %v10133_v29 = vrot.slane %v961_v14, %v9144_v49 }
 0x121   :  { %5341 = vmatprep.subr.bf16.mxu1 %v8104_v6  ;;  %v10137_v6 = vcombine.high %v10112_v18, %v10112_v18  ;;  %v8177_v14 = vld [vmem:[%s11892_s2 + $0x1440] ss:$16 sps:$4 sm:$0xff]  }
 0x123   :  { %5301 = vmatpush2.bf16.msra.mxu0 %v8099_v33  ;;  %v8155_v33 = vld [vmem:[%s11892_s2 + $0x14c4] ss:$16 sps:$4 sm:$0xff]  }
 0x124   :  { %5342 = vmatpush2.bf16.msra.mxu1 %v8102_v34  ;;  %5302 = vmatprep.subr.bf16.mxu0 %v8107_v36  ;;  %v8158_v34 = vld [vmem:[%s11892_s2 + $0x16c4] ss:$16 sps:$4 sm:$0xff]   ;;  %v8153_v36 = vld [vmem:[%s11892_s2 + $0x14c0] ss:$16 sps:$4 sm:$0xff]  }
 0x125   :  { %5343 = vmatprep.subr.bf16.mxu1 %v8110_v37  ;;  %v8156_v37 = vld [vmem:[%s11892_s2 + $0x16c0] ss:$16 sps:$4 sm:$0xff]  }
 0x127   :  { %5303 = vmatpush2.bf16.msra.mxu0 %v8105_v38  ;;  %v10153_v38 = vcombine.high %v10133_v29, %v10133_v29 }
 0x128   :  { %5344 = vmatpush2.bf16.msra.mxu1 %v8108_v32  ;;  %5304 = vmatprep.subr.bf16.mxu0 %v8113_v40 }
 0x129   :  { %5345 = vmatprep.subr.bf16.mxu1 %v8116_v44 }
 0x12b   :  { %5305 = vmatpush2.bf16.msra.mxu0 %v8111_v45 }
 0x12c   :  { %5346 = vmatpush2.bf16.msra.mxu1 %v8114_v46  ;;  %5306 = vmatprep.subr.bf16.mxu0 %v8119_v48  ;;  %v8161_v48 = vld [vmem:[%s11892_s2 + $0x14a4] ss:$16 sps:$4 sm:$0xff]  }
 0x12d   :  { %5347 = vmatprep.subr.bf16.mxu1 %v8122_v51  ;;  %v8164_v51 = vld [vmem:[%s11892_s2 + $0x16a4] ss:$16 sps:$4 sm:$0xff]  }
 0x12f   :  { %5307 = vmatpush2.bf16.msra.mxu0 %v8117_v52 }
 0x130   :  { %5348 = vmatpush2.bf16.msra.mxu1 %v8120_v53  ;;  %5308 = vmatprep.subr.bf16.mxu0 %v8125_v56  ;;  %v8162_v56 = vld [vmem:[%s11892_s2 + $0x16a0] ss:$16 sps:$4 sm:$0xff]  }
 0x131   :  { %5349 = vmatprep.subr.bf16.mxu1 %v8128_v57 }
 0x133   :  { %5309 = vmatpush2.bf16.msra.mxu0 %v8123_v58 }
 0x134   :  { %5350 = vmatpush2.bf16.msra.mxu1 %v8126_v61  ;;  %5310 = vmatprep.subr.bf16.mxu0 %v8131_v62  ;;  %v8167_v62 = vld [vmem:[%s11892_s2 + $0x1484] ss:$16 sps:$4 sm:$0xff]  }
 0x135   :  { %5351 = vmatprep.subr.bf16.mxu1 %v8134_v63  ;;  %v8170_v63 = vld [vmem:[%s11892_s2 + $0x1684] ss:$16 sps:$4 sm:$0xff]  }
 0x137   :  { %5311 = vmatpush2.bf16.msra.mxu0 %v8129_v3  ;;  %v8165_v3 = vld [vmem:[%s11892_s2 + $0x1480] ss:$16 sps:$4 sm:$0xff]  }
 0x138   :  { %5352 = vmatpush2.bf16.msra.mxu1 %v8132_v5  ;;  %5312 = vmatprep.subr.bf16.mxu0 %v8137_v7  ;;  %v8168_v5 = vld [vmem:[%s11892_s2 + $0x1680] ss:$16 sps:$4 sm:$0xff]   ;;  %v8173_v7 = vld [vmem:[%s11892_s2 + $0x1464] ss:$16 sps:$4 sm:$0xff]  }
 0x139   :  { %5353 = vmatprep.subr.bf16.mxu1 %v8140_v1  ;;  %v8176_v1 = vld [vmem:[%s11892_s2 + $0x1664] ss:$16 sps:$4 sm:$0xff]  }
 0x13b   :  { %5313 = vmatpush2.bf16.msra.mxu0 %v8135_v9  ;;  %v8171_v9 = vld [vmem:[%s11892_s2 + $0x1460] ss:$16 sps:$4 sm:$0xff]  }
 0x13c   :  { %5354 = vmatpush2.bf16.msra.mxu1 %v8138_v10  ;;  %5314 = vmatprep.subr.bf16.mxu0 %v8143_v11  ;;  %v8174_v10 = vld [vmem:[%s11892_s2 + $0x1660] ss:$16 sps:$4 sm:$0xff]   ;;  %v8179_v11 = vld [vmem:[%s11892_s2 + $0x1444] ss:$16 sps:$4 sm:$0xff]  }
 0x13d   :  { %5355 = vmatprep.subr.bf16.mxu1 %v8146_v12  ;;  %v8182_v12 = vld [vmem:[%s11892_s2 + $0x1644] ss:$16 sps:$4 sm:$0xff]  }
 0x13f   :  { %5315 = vmatpush2.bf16.msra.mxu0 %v8141_v20  ;;  %v8180_v20 = vld [vmem:[%s11892_s2 + $0x1640] ss:$16 sps:$4 sm:$0xff]  }
 0x140   :  { %5356 = vmatpush2.bf16.msra.mxu1 %v8144_v39  ;;  %5366 = vmatprep.subr.bf16.mxu0 %v8149_v24  ;;  %v8185_v39 = vld [vmem:[%s11892_s2 + $0x1424] ss:$16 sps:$4 sm:$0xff]  }
 0x141   :  { %5407 = vmatprep.subr.bf16.mxu1 %v8152_v4  ;;  %v8188_v24 = vld [vmem:[%s11892_s2 + $0x1624] ss:$16 sps:$4 sm:$0xff]   ;;  %v8183_v4 = vld [vmem:[%s11892_s2 + $0x1420] ss:$16 sps:$4 sm:$0xff]  }
 0x142   :  { %v5072_v32 = vpop.f32.mrf.mxu0  ;;  %5317 = vmatmul.mubr.bf16.vlgmr.msra.gmra.mxu0 %v10112_v18 }
 0x143   :  { %5358 = vmatmul.mubr.bf16.vlgmr.msra.gmra.mxu1 %v10137_v6  ;;  %v5113_v40 = vpop.f32.mrf.mxu1  ;;  %v5073_v44 = vadd.f32 %v5072_v32, %v9941_v47  ;;  %5367 = vmatpush1.bf16.msra.mxu0 %v8147_v27  ;;  %v8159_v47 = vld [vmem:[%s11892_s2 + $0x14a0] ss:$16 sps:$4 sm:$0xff]   ;;  %v8200_v32 = vld [vmem:[%s11892_s2 + $0x17e4] ss:$16 sps:$4 sm:$0xff]  }
 0x144   :  { %5408 = vmatpush1.bf16.msra.mxu1 %v8150_v28  ;;  %v5074_v45 = vpop.f32.mrf.mxu0  ;;  %5368 = vmatprep.subr.bf16.mxu0 %v8155_v33  ;;  %v8186_v27 = vld [vmem:[%s11892_s2 + $0x1620] ss:$16 sps:$4 sm:$0xff]   ;;  %v8191_v28 = vld [vmem:[%s11892_s2 + $0x1404] ss:$16 sps:$4 sm:$0xff]  }
 0x145   :  { %v5115_v46 = vpop.f32.mrf.mxu1  ;;  %5409 = vmatprep.subr.bf16.mxu1 %v8158_v34  ;;  %v5075_v52 = vadd.f32 %v5074_v45, %v9951_v35  ;;  %v10165_v53 = vadd.f32 %v5113_v40, %v5073_v44  ;;  %5398 = vmatprep.mubr.bf16.mxu0 %v10133_v29  ;;  %v8194_v33 = vld [vmem:[%s11892_s2 + $0x1604] ss:$16 sps:$4 sm:$0xff]   ;;  %v8189_v34 = vld [vmem:[%s11892_s2 + $0x1400] ss:$16 sps:$4 sm:$0xff]  }
 0x146   :  { %5439 = vmatprep.mubr.bf16.mxu1 %v10153_v38  ;;  %v5076_v57 = vpop.f32.mrf.mxu0  ;;  %v8195_v40 = vld [vmem:[%s11892_s2 + $0x15e0] ss:$16 sps:$4 sm:$0xff]   ;;  %v8203_v45 = vld [vmem:[%s11892_s2 + $0x15c4] ss:$16 sps:$4 sm:$0xff]  }
 0x147   :  { %v5117_v58 = vpop.f32.mrf.mxu1  ;;  %v10175_v61 = vadd.f32 %v5115_v46, %v5075_v52  ;;  %5369 = vmatpush1.bf16.msra.mxu0 %v8153_v36  ;;  %v8192_v36 = vld [vmem:[%s11892_s2 + $0x1600] ss:$16 sps:$4 sm:$0xff]   ;;  %v8206_v46 = vld [vmem:[%s11892_s2 + $0x17c4] ss:$16 sps:$4 sm:$0xff]  }
 0x148   :  { %5410 = vmatpush1.bf16.msra.mxu1 %v8156_v37  ;;  %v5077_v35 = vpop.f32.mrf.mxu0  ;;  %5370 = vmatprep.subr.bf16.mxu0 %v8161_v48  ;;  %v8197_v37 = vld [vmem:[%s11892_s2 + $0x15e4] ss:$16 sps:$4 sm:$0xff]   ;;  %v8198_v44 = vld [vmem:[%s11892_s2 + $0x17e0] ss:$16 sps:$4 sm:$0xff]  }
 0x149   :  { %5411 = vmatprep.subr.bf16.mxu1 %v8164_v51  ;;  %v5118_v2 = vpop.f32.mrf.mxu1  ;;  %v8201_v48 = vld [vmem:[%s11892_s2 + $0x15c0] ss:$16 sps:$4 sm:$0xff]   ;;  %v8209_v52 = vld [vmem:[%s11892_s2 + $0x15a4] ss:$16 sps:$4 sm:$0xff]  }
 0x14a   :  { %v8204_v51 = vld [vmem:[%s11892_s2 + $0x17c0] ss:$16 sps:$4 sm:$0xff]   ;;  %v8215_v58 = vld [vmem:[%s11892_s2 + $0x1584] ss:$16 sps:$4 sm:$0xff]  }
 0x14b   :  { %5371 = vmatpush1.bf16.msra.mxu0 %v8159_v47  ;;  %v8212_v47 = vld [vmem:[%s11892_s2 + $0x17a4] ss:$16 sps:$4 sm:$0xff]   ;;  %v8210_v57 = vld [vmem:[%s11892_s2 + $0x17a0] ss:$16 sps:$4 sm:$0xff]  }
 0x14c   :  { %5412 = vmatpush1.bf16.msra.mxu1 %v8162_v56  ;;  %5372 = vmatprep.subr.bf16.mxu0 %v8167_v62  ;;  %v8207_v56 = vld [vmem:[%s11892_s2 + $0x15a0] ss:$16 sps:$4 sm:$0xff]   ;;  %v8218_v35 = vld [vmem:[%s11892_s2 + $0x1784] ss:$16 sps:$4 sm:$0xff]  }
 0x14d   :  { %5413 = vmatprep.subr.bf16.mxu1 %v8170_v63  ;;  %v8213_v62 = vld [vmem:[%s11892_s2 + $0x1580] ss:$16 sps:$4 sm:$0xff]   ;;  %v8221_v2 = vld [vmem:[%s11892_s2 + $0x1564] ss:$16 sps:$4 sm:$0xff]  }
 0x14e   :  { %v8216_v63 = vld [vmem:[%s11892_s2 + $0x1780] ss:$16 sps:$4 sm:$0xff]  }
 0x14f   :  { %5373 = vmatpush1.bf16.msra.mxu0 %v8165_v3  ;;  %v8224_v3 = vld [vmem:[%s11892_s2 + $0x1764] ss:$16 sps:$4 sm:$0xff]  }
 0x150   :  { %5414 = vmatpush1.bf16.msra.mxu1 %v8168_v5  ;;  %5374 = vmatprep.subr.bf16.mxu0 %v8173_v7  ;;  %v8219_v5 = vld [vmem:[%s11892_s2 + $0x1560] ss:$16 sps:$4 sm:$0xff]  }
 0x151   :  { %5415 = vmatprep.subr.bf16.mxu1 %v8176_v1  ;;  %v8222_v7 = vld [vmem:[%s11892_s2 + $0x1760] ss:$16 sps:$4 sm:$0xff]   ;;  %v8227_v1 = vld [vmem:[%s11892_s2 + $0x1544] ss:$16 sps:$4 sm:$0xff]  }
 0x153   :  { %5375 = vmatpush1.bf16.msra.mxu0 %v8171_v9  ;;  %v8230_v9 = vld [vmem:[%s11892_s2 + $0x1744] ss:$16 sps:$4 sm:$0xff]  }
 0x154   :  { %5416 = vmatpush1.bf16.msra.mxu1 %v8174_v10  ;;  %5376 = vmatprep.subr.bf16.mxu0 %v8179_v11  ;;  %v8225_v10 = vld [vmem:[%s11892_s2 + $0x1540] ss:$16 sps:$4 sm:$0xff]  }
 0x155   :  { %5417 = vmatprep.subr.bf16.mxu1 %v8182_v12  ;;  %v8228_v11 = vld [vmem:[%s11892_s2 + $0x1740] ss:$16 sps:$4 sm:$0xff]   ;;  %v8233_v12 = vld [vmem:[%s11892_s2 + $0x1524] ss:$16 sps:$4 sm:$0xff]  }
 0x157   :  { %5377 = vmatpush1.bf16.msra.mxu0 %v8177_v14  ;;  %v8236_v14 = vld [vmem:[%s11892_s2 + $0x1724] ss:$16 sps:$4 sm:$0xff]  }
 0x158   :  { %5418 = vmatpush1.bf16.msra.mxu1 %v8180_v20  ;;  %5378 = vmatprep.subr.bf16.mxu0 %v8185_v39  ;;  %v8231_v20 = vld [vmem:[%s11892_s2 + $0x1520] ss:$16 sps:$4 sm:$0xff]  }
 0x159   :  { %5419 = vmatprep.subr.bf16.mxu1 %v8188_v24  ;;  %v8234_v39 = vld [vmem:[%s11892_s2 + $0x1720] ss:$16 sps:$4 sm:$0xff]   ;;  %v8239_v24 = vld [vmem:[%s11892_s2 + $0x1504] ss:$16 sps:$4 sm:$0xff]  }
 0x15b   :  { %5379 = vmatpush1.bf16.msra.mxu0 %v8183_v4  ;;  %v8242_v4 = vld [vmem:[%s11892_s2 + $0x1704] ss:$16 sps:$4 sm:$0xff]  }
 0x15c   :  { %5420 = vmatpush1.bf16.msra.mxu1 %v8186_v27  ;;  %5380 = vmatprep.subr.bf16.mxu0 %v8191_v28  ;;  %v10329_v27 = vrot.slane %v10094_v8, %v9144_v49  ;;  %v8237_v28 = vld [vmem:[%s11892_s2 + $0x1500] ss:$16 sps:$4 sm:$0xff]   ;;  %v8249_v8 = vld [vmem:[%s11892_s2 + $0xec] ss:$16 sps:$4 sm:$0xff]  }
 0x15d   :  { %5421 = vmatprep.subr.bf16.mxu1 %v8194_v33  ;;  %v8240_v33 = vld [vmem:[%s11892_s2 + $0x1700] ss:$16 sps:$4 sm:$0xff]  }
 0x15f   :  { %5381 = vmatpush1.bf16.msra.mxu0 %v8189_v34  ;;  %v8246_v34 = vld [vmem:[%s11892_s2 + $0x1864] ss:$16 sps:$4 sm:$0xff]  }
 0x160   :  { %5422 = vmatpush1.bf16.msra.mxu1 %v8192_v36  ;;  %5382 = vmatprep.subr.bf16.mxu0 %v8197_v37  ;;  %v8244_v36 = vld [vmem:[%s11892_s2 + $0x1860] ss:$16 sps:$4 sm:$0xff]   ;;  %v8247_v37 = vld [vmem:[%s11892_s2 + $0xe8] ss:$16 sps:$4 sm:$0xff]  }
 0x161   :  { %5423 = vmatprep.subr.bf16.mxu1 %v8200_v32  ;;  %v10351_v32 = vcombine.high %v10329_v27, %v10329_v27 }
 0x163   :  { %5383 = vmatpush2.bf16.msra.mxu0 %v8195_v40  ;;  %v8252_v40 = vld [vmem:[%s11892_s2 + $0x1844] ss:$16 sps:$4 sm:$0xff]  }
 0x164   :  { %5424 = vmatpush2.bf16.msra.mxu1 %v8198_v44  ;;  %5384 = vmatprep.subr.bf16.mxu0 %v8203_v45  ;;  %v8255_v44 = vld [vmem:[%s11892_s2 + $0xcc] ss:$16 sps:$4 sm:$0xff]   ;;  %v8250_v45 = vld [vmem:[%s11892_s2 + $0x1840] ss:$16 sps:$4 sm:$0xff]  }
 0x165   :  { %5425 = vmatprep.subr.bf16.mxu1 %v8206_v46  ;;  %v8253_v46 = vld [vmem:[%s11892_s2 + $0xc8] ss:$16 sps:$4 sm:$0xff]  }
 0x167   :  { %5385 = vmatpush2.bf16.msra.mxu0 %v8201_v48 }
 0x168   :  { %5426 = vmatpush2.bf16.msra.mxu1 %v8204_v51  ;;  %5386 = vmatprep.subr.bf16.mxu0 %v8209_v52 }
 0x169   :  { %5427 = vmatprep.subr.bf16.mxu1 %v8212_v47 }
 0x16b   :  { %5387 = vmatpush2.bf16.msra.mxu0 %v8207_v56 }
 0x16c   :  { %5428 = vmatpush2.bf16.msra.mxu1 %v8210_v57  ;;  %5388 = vmatprep.subr.bf16.mxu0 %v8215_v58  ;;  %v8258_v57 = vld [vmem:[%s11892_s2 + $0x1824] ss:$16 sps:$4 sm:$0xff]   ;;  %v8261_v58 = vld [vmem:[%s11892_s2 + $0xac] ss:$16 sps:$4 sm:$0xff]  }
 0x16d   :  { %5429 = vmatprep.subr.bf16.mxu1 %v8218_v35 }
 0x16f   :  { %5389 = vmatpush2.bf16.msra.mxu0 %v8213_v62 }
 0x170   :  { %5430 = vmatpush2.bf16.msra.mxu1 %v8216_v63  ;;  %5390 = vmatprep.subr.bf16.mxu0 %v8221_v2  ;;  %v8259_v63 = vld [vmem:[%s11892_s2 + $0xa8] ss:$16 sps:$4 sm:$0xff]   ;;  %v8958_v2 = vmov 0  }
 0x171   :  { %5431 = vmatprep.subr.bf16.mxu1 %v8224_v3 }
 0x173   :  { %5391 = vmatpush2.bf16.msra.mxu0 %v8219_v5 }
 0x174   :  { %5432 = vmatpush2.bf16.msra.mxu1 %v8222_v7  ;;  %5392 = vmatprep.subr.bf16.mxu0 %v8227_v1  ;;  %v8264_v1 = vld [vmem:[%s11892_s2 + $0x1804] ss:$16 sps:$4 sm:$0xff]  }
 0x175   :  { %5433 = vmatprep.subr.bf16.mxu1 %v8230_v9  ;;  %v8267_v9 = vld [vmem:[%s11892_s2 + $0x8c] ss:$16 sps:$4 sm:$0xff]  }
 0x177   :  { %5393 = vmatpush2.bf16.msra.mxu0 %v8225_v10 }
 0x178   :  { %5434 = vmatpush2.bf16.msra.mxu1 %v8228_v11  ;;  %5394 = vmatprep.subr.bf16.mxu0 %v8233_v12  ;;  %v8265_v11 = vld [vmem:[%s11892_s2 + $0x88] ss:$16 sps:$4 sm:$0xff]  }
 0x179   :  { %5435 = vmatprep.subr.bf16.mxu1 %v8236_v14  ;;  %v6770_v12 = vld.sshfl [vmem:[%s11893_s0 + $0x18] sm:$0x1 pattern:$0x75316420]  ;;  %v8270_v14 = vld [vmem:[%s11892_s2 + $0x6c] ss:$16 sps:$4 sm:$0xff]  }
 0x17b   :  { %5395 = vmatpush2.bf16.msra.mxu0 %v8231_v20  ;;  %v8273_v20 = vld [vmem:[%s11892_s2 + $0x2ec] ss:$16 sps:$4 sm:$0xff]  }
 0x17c   :  { %5436 = vmatpush2.bf16.msra.mxu1 %v8234_v39  ;;  %5396 = vmatprep.subr.bf16.mxu0 %v8239_v24  ;;  %v8268_v39 = vld [vmem:[%s11892_s2 + $0x68] ss:$16 sps:$4 sm:$0xff]  }
 0x17d   :  { %5437 = vmatprep.subr.bf16.mxu1 %v8242_v4  ;;  %v8271_v24 = vld [vmem:[%s11892_s2 + $0x2e8] ss:$16 sps:$4 sm:$0xff]   ;;  %v10415_v4 = vrot.slane %v6770_v12, %v9144_v49 }
 0x17e   :  { %v8274_v49 = vld [vmem:[%s11892_s2 + $0x48] ss:$16 sps:$4 sm:$0xff]  }
 0x17f   :  { %5397 = vmatpush2.bf16.msra.mxu0 %v8237_v28  ;;  %v8276_v28 = vld [vmem:[%s11892_s2 + $0x4c] ss:$16 sps:$4 sm:$0xff]   ;;  %v8316_v12 = vld [vmem:[%s11892_s2 + $0x168] ss:$16 sps:$4 sm:$0xff]  }
 0x180   :  { %5438 = vmatpush2.bf16.msra.mxu1 %v8240_v33  ;;  %5456 = vmatprep.subr.bf16.mxu0 %v8246_v34  ;;  %v8279_v33 = vld [vmem:[%s11892_s2 + $0x2cc] ss:$16 sps:$4 sm:$0xff]   ;;  %v8277_v34 = vld [vmem:[%s11892_s2 + $0x2c8] ss:$16 sps:$4 sm:$0xff]  }
 0x181   :  { %5489 = vmatprep.subr.bf16.mxu1 %v8249_v8  ;;  %v8282_v8 = vld [vmem:[%s11892_s2 + $0x2c] ss:$16 sps:$4 sm:$0xff]  }
 0x182   :  { %v5154_v48 = vpop.f32.mrf.mxu0  ;;  %5399 = vmatmul.mubr.bf16.vlgmr.msra.gmra.mxu0 %v10329_v27 }
 0x183   :  { %5440 = vmatmul.mubr.bf16.vlgmr.msra.gmra.mxu1 %v10351_v32  ;;  %v5195_v51 = vpop.f32.mrf.mxu1  ;;  %v5155_v52 = vadd.f32 %v5154_v48, %v10165_v53  ;;  %5457 = vmatpush1.bf16.msra.mxu0 %v8244_v36  ;;  %v8256_v53 = vld [vmem:[%s11892_s2 + $0x1820] ss:$16 sps:$4 sm:$0xff]   ;;  %v8285_v36 = vld [vmem:[%s11892_s2 + $0x2ac] ss:$16 sps:$4 sm:$0xff]  }
 0x184   :  { %5490 = vmatpush1.bf16.msra.mxu1 %v8247_v37  ;;  %v5156_v47 = vpop.f32.mrf.mxu0  ;;  %5458 = vmatprep.subr.bf16.mxu0 %v8252_v40  ;;  %v8280_v37 = vld [vmem:[%s11892_s2 + $0x28] ss:$16 sps:$4 sm:$0xff]   ;;  %v8294_v48 = vld [vmem:[%s11892_s2 + $0x1ec] ss:$16 sps:$4 sm:$0xff]  }
 0x185   :  { %v5197_v56 = vpop.f32.mrf.mxu1  ;;  %5491 = vmatprep.subr.bf16.mxu1 %v8255_v44  ;;  %v5157_v35 = vadd.f32 %v5156_v47, %v10175_v61  ;;  %v10375_v62 = vadd.f32 %v5195_v51, %v5155_v52  ;;  %5480 = vmatprep.mubr.bf16.mxu0 %v8958_v2  ;;  %v8283_v40 = vld [vmem:[%s11892_s2 + $0x2a8] ss:$16 sps:$4 sm:$0xff]   ;;  %v8288_v44 = vld [vmem:[%s11892_s2 + $0xc] ss:$16 sps:$4 sm:$0xff]  }
 0x186   :  { %5521 = vmatprep.mubr.bf16.mxu1 %v9172_v60  ;;  %v5158_v3 = vpop.f32.mrf.mxu0  ;;  %v8262_v60 = vld [vmem:[%s11892_s2 + $0x1800] ss:$16 sps:$4 sm:$0xff]   ;;  %v8297_v51 = vld [vmem:[%s11892_s2 + $0x26c] ss:$16 sps:$4 sm:$0xff]   ;;  %v8292_v52 = vld [vmem:[%s11892_s2 + $0x1e8] ss:$16 sps:$4 sm:$0xff]  }
 0x187   :  { %v5199_v5 = vpop.f32.mrf.mxu1  ;;  %v10385_v7 = vadd.f32 %v5197_v56, %v5157_v35  ;;  %5459 = vmatpush1.bf16.msra.mxu0 %v8250_v45  ;;  %v8286_v45 = vld [vmem:[%s11892_s2 + $0x8] ss:$16 sps:$4 sm:$0xff]   ;;  %v8300_v56 = vld [vmem:[%s11892_s2 + $0x1cc] ss:$16 sps:$4 sm:$0xff]  }
 0x188   :  { %5492 = vmatpush1.bf16.msra.mxu1 %v8253_v46  ;;  %v5159_v61 = vpop.f32.mrf.mxu0  ;;  %5460 = vmatprep.subr.bf16.mxu0 %v8258_v57  ;;  %v8289_v46 = vld [vmem:[%s11892_s2 + $0x288] ss:$16 sps:$4 sm:$0xff]   ;;  %v8303_v57 = vld [vmem:[%s11892_s2 + $0x24c] ss:$16 sps:$4 sm:$0xff]  }
 0x189   :  { %5493 = vmatprep.subr.bf16.mxu1 %v8261_v58  ;;  %v5200_v10 = vpop.f32.mrf.mxu1  ;;  %v8295_v47 = vld [vmem:[%s11892_s2 + $0x268] ss:$16 sps:$4 sm:$0xff]   ;;  %v8312_v61 = vld [vmem:[%s11892_s2 + $0x18c] ss:$16 sps:$4 sm:$0xff]  }
 0x18a   :  { %v8298_v58 = vld [vmem:[%s11892_s2 + $0x1c8] ss:$16 sps:$4 sm:$0xff]  }
 0x18b   :  { %5461 = vmatpush1.bf16.msra.mxu0 %v8256_v53  ;;  %v8301_v35 = vld [vmem:[%s11892_s2 + $0x248] ss:$16 sps:$4 sm:$0xff]   ;;  %v8306_v53 = vld [vmem:[%s11892_s2 + $0x1ac] ss:$16 sps:$4 sm:$0xff]  }
 0x18c   :  { %5494 = vmatpush1.bf16.msra.mxu1 %v8259_v63  ;;  %5462 = vmatprep.subr.bf16.mxu0 %v8264_v1  ;;  %v8309_v63 = vld [vmem:[%s11892_s2 + $0x22c] ss:$16 sps:$4 sm:$0xff]   ;;  %v8304_v3 = vld [vmem:[%s11892_s2 + $0x1a8] ss:$16 sps:$4 sm:$0xff]  }
 0x18d   :  { %5495 = vmatprep.subr.bf16.mxu1 %v8267_v9  ;;  %v8307_v5 = vld [vmem:[%s11892_s2 + $0x228] ss:$16 sps:$4 sm:$0xff]   ;;  %v8315_v1 = vld [vmem:[%s11892_s2 + $0x20c] ss:$16 sps:$4 sm:$0xff]  }
 0x18e   :  { %v8310_v9 = vld [vmem:[%s11892_s2 + $0x188] ss:$16 sps:$4 sm:$0xff]  }
 0x18f   :  { %5463 = vmatpush1.bf16.msra.mxu0 %v8262_v60  ;;  %v8313_v10 = vld [vmem:[%s11892_s2 + $0x208] ss:$16 sps:$4 sm:$0xff]   ;;  %v8318_v60 = vld [vmem:[%s11892_s2 + $0x16c] ss:$16 sps:$4 sm:$0xff]  }
 0x190   :  { %5496 = vmatpush1.bf16.msra.mxu1 %v8265_v11  ;;  %5530 = vmatprep.subr.bf16.mxu0 %v8273_v20  ;;  %v8321_v11 = vld [vmem:[%s11892_s2 + $0x3ec] ss:$16 sps:$4 sm:$0xff]  }
 0x191   :  { %5497 = vmatprep.subr.bf16.mxu1 %v8270_v14  ;;  %v8319_v14 = vld [vmem:[%s11892_s2 + $0x3e8] ss:$16 sps:$4 sm:$0xff]   ;;  %v8324_v20 = vld [vmem:[%s11892_s2 + $0x14c] ss:$16 sps:$4 sm:$0xff]  }
 0x192   :  { %7555 = vmatmul.mubr.msk.bf16.vlgmr.msra.gmra.mxu0 %vm4952_vm0, %v10415_v4 }
 0x193   :  { %5531 = vmatpush1.bf16.msra.mxu0 %v8271_v24  ;;  %5562 = vmatprep.mubr.bf16.mxu0 %v9185_v0  ;;  %v8291_v0 = vld [vmem:[%s11892_s2 + $0x28c] ss:$16 sps:$4 sm:$0xff]   ;;  %v8322_v24 = vld [vmem:[%s11892_s2 + $0x148] ss:$16 sps:$4 sm:$0xff]  }
 0x194   :  { %5498 = vmatpush1.bf16.msra.mxu1 %v8268_v39  ;;  %5532 = vmatprep.subr.bf16.mxu0 %v8279_v33  ;;  %v8327_v39 = vld [vmem:[%s11892_s2 + $0x3cc] ss:$16 sps:$4 sm:$0xff]  }
 0x195   :  { %5499 = vmatprep.subr.bf16.mxu1 %v8276_v28  ;;  %v8325_v28 = vld [vmem:[%s11892_s2 + $0x3c8] ss:$16 sps:$4 sm:$0xff]   ;;  %v8330_v33 = vld [vmem:[%s11892_s2 + $0x12c] ss:$16 sps:$4 sm:$0xff]  }
 0x197   :  { %5533 = vmatpush1.bf16.msra.mxu0 %v8277_v34  ;;  %v8328_v34 = vld [vmem:[%s11892_s2 + $0x128] ss:$16 sps:$4 sm:$0xff]  }
 0x198   :  { %5500 = vmatpush1.bf16.msra.mxu1 %v8274_v49  ;;  %5534 = vmatprep.subr.bf16.mxu0 %v8285_v36  ;;  %v8333_v49 = vld [vmem:[%s11892_s2 + $0x3ac] ss:$16 sps:$4 sm:$0xff]  }
 0x199   :  { %5501 = vmatprep.subr.bf16.mxu1 %v8282_v8  ;;  %v8331_v8 = vld [vmem:[%s11892_s2 + $0x3a8] ss:$16 sps:$4 sm:$0xff]   ;;  %v8336_v36 = vld [vmem:[%s11892_s2 + $0x10c] ss:$16 sps:$4 sm:$0xff]  }
 0x19b   :  { %5535 = vmatpush1.bf16.msra.mxu0 %v8283_v40  ;;  %v8334_v40 = vld [vmem:[%s11892_s2 + $0x108] ss:$16 sps:$4 sm:$0xff]  }
 0x19c   :  { %5502 = vmatpush1.bf16.msra.mxu1 %v8280_v37  ;;  %5536 = vmatprep.subr.bf16.mxu0 %v8291_v0  ;;  %v8339_v37 = vld [vmem:[%s11892_s2 + $0x38c] ss:$16 sps:$4 sm:$0xff]  }
 0x19d   :  { %5503 = vmatprep.subr.bf16.mxu1 %v8288_v44  ;;  %v8337_v44 = vld [vmem:[%s11892_s2 + $0x388] ss:$16 sps:$4 sm:$0xff]   ;;  %v8342_v0 = vld [vmem:[%s11892_s2 + $0x36c] ss:$16 sps:$4 sm:$0xff]  }
 0x19f   :  { %5537 = vmatpush1.bf16.msra.mxu0 %v8289_v46  ;;  %v8340_v46 = vld [vmem:[%s11892_s2 + $0x368] ss:$16 sps:$4 sm:$0xff]  }
 0x1a0   :  { %5504 = vmatpush1.bf16.msra.mxu1 %v8286_v45  ;;  %5538 = vmatprep.subr.bf16.mxu0 %v8297_v51  ;;  %v8345_v45 = vld [vmem:[%s11892_s2 + $0x4ec] ss:$16 sps:$4 sm:$0xff]  }
 0x1a1   :  { %5505 = vmatprep.subr.bf16.mxu1 %v8294_v48  ;;  %v8343_v48 = vld [vmem:[%s11892_s2 + $0x4e8] ss:$16 sps:$4 sm:$0xff]   ;;  %v8348_v51 = vld [vmem:[%s11892_s2 + $0x34c] ss:$16 sps:$4 sm:$0xff]  }
 0x1a3   :  { %5539 = vmatpush1.bf16.msra.mxu0 %v8295_v47  ;;  %v8346_v47 = vld [vmem:[%s11892_s2 + $0x348] ss:$16 sps:$4 sm:$0xff]  }
 0x1a4   :  { %5506 = vmatpush2.bf16.msra.mxu1 %v8292_v52  ;;  %5540 = vmatprep.subr.bf16.mxu0 %v8303_v57  ;;  %v8351_v52 = vld [vmem:[%s11892_s2 + $0x4cc] ss:$16 sps:$4 sm:$0xff]  }
 0x1a5   :  { %5507 = vmatprep.subr.bf16.mxu1 %v8300_v56  ;;  %v8349_v56 = vld [vmem:[%s11892_s2 + $0x4c8] ss:$16 sps:$4 sm:$0xff]  }
 0x1a7   :  { %5541 = vmatpush1.bf16.msra.mxu0 %v8301_v35 }
 0x1a8   :  { %5508 = vmatpush2.bf16.msra.mxu1 %v8298_v58  ;;  %5542 = vmatprep.subr.bf16.mxu0 %v8309_v63 }
 0x1a9   :  { %5509 = vmatprep.subr.bf16.mxu1 %v8306_v53 }
 0x1ab   :  { %5543 = vmatpush1.bf16.msra.mxu0 %v8307_v5  ;;  %v8357_v5 = vld [vmem:[%s11892_s2 + $0x4ac] ss:$16 sps:$4 sm:$0xff]  }
 0x1ac   :  { %5510 = vmatpush2.bf16.msra.mxu1 %v8304_v3  ;;  %5544 = vmatprep.subr.bf16.mxu0 %v8315_v1  ;;  %v8354_v3 = vld [vmem:[%s11892_s2 + $0x32c] ss:$16 sps:$4 sm:$0xff]   ;;  %v8355_v1 = vld [vmem:[%s11892_s2 + $0x4a8] ss:$16 sps:$4 sm:$0xff]  }
 0x1ad   :  { %5511 = vmatprep.subr.bf16.mxu1 %v8312_v61 }
 0x1af   :  { %5545 = vmatpush1.bf16.msra.mxu0 %v8313_v10 }
 0x1b0   :  { %5512 = vmatpush2.bf16.msra.mxu1 %v8310_v9  ;;  %5546 = vmatprep.subr.bf16.mxu0 %v8321_v11 }
 0x1b1   :  { %5513 = vmatprep.subr.bf16.mxu1 %v8318_v60 }
 0x1b3   :  { %5547 = vmatpush2.bf16.msra.mxu0 %v8319_v14 }
 0x1b4   :  { %5514 = vmatpush2.bf16.msra.mxu1 %v8316_v12  ;;  %5548 = vmatprep.subr.bf16.mxu0 %v8327_v39  ;;  %v8363_v12 = vld [vmem:[%s11892_s2 + $0x48c] ss:$16 sps:$4 sm:$0xff]  }
 0x1b5   :  { %5515 = vmatprep.subr.bf16.mxu1 %v8324_v20  ;;  %v8361_v20 = vld [vmem:[%s11892_s2 + $0x488] ss:$16 sps:$4 sm:$0xff]   ;;  %v8366_v39 = vld [vmem:[%s11892_s2 + $0x46c] ss:$16 sps:$4 sm:$0xff]  }
 0x1b7   :  { %5549 = vmatpush2.bf16.msra.mxu0 %v8325_v28  ;;  %v8364_v28 = vld [vmem:[%s11892_s2 + $0x468] ss:$16 sps:$4 sm:$0xff]  }
 0x1b8   :  { %5516 = vmatpush2.bf16.msra.mxu1 %v8322_v24  ;;  %5550 = vmatprep.subr.bf16.mxu0 %v8333_v49  ;;  %v8369_v24 = vld [vmem:[%s11892_s2 + $0x6ec] ss:$16 sps:$4 sm:$0xff]  }
 0x1b9   :  { %5517 = vmatprep.subr.bf16.mxu1 %v8330_v33  ;;  %v8367_v33 = vld [vmem:[%s11892_s2 + $0x6e8] ss:$16 sps:$4 sm:$0xff]   ;;  %v8372_v49 = vld [vmem:[%s11892_s2 + $0x44c] ss:$16 sps:$4 sm:$0xff]  }
 0x1bb   :  { %5551 = vmatpush2.bf16.msra.mxu0 %v8331_v8  ;;  %v8370_v8 = vld [vmem:[%s11892_s2 + $0x448] ss:$16 sps:$4 sm:$0xff]  }
 0x1bc   :  { %5518 = vmatpush2.bf16.msra.mxu1 %v8328_v34  ;;  %5552 = vmatprep.subr.bf16.mxu0 %v8339_v37  ;;  %v8375_v34 = vld [vmem:[%s11892_s2 + $0x6cc] ss:$16 sps:$4 sm:$0xff]  }
 0x1bd   :  { %5519 = vmatprep.subr.bf16.mxu1 %v8336_v36  ;;  %v8373_v36 = vld [vmem:[%s11892_s2 + $0x6c8] ss:$16 sps:$4 sm:$0xff]   ;;  %v8378_v37 = vld [vmem:[%s11892_s2 + $0x42c] ss:$16 sps:$4 sm:$0xff]  }
 0x1bf   :  { %5553 = vmatpush2.bf16.msra.mxu0 %v8337_v44  ;;  %v8379_v44 = vld [vmem:[%s11892_s2 + $0x6a8] ss:$16 sps:$4 sm:$0xff]  }
 0x1c0   :  { %5520 = vmatpush2.bf16.msra.mxu1 %v8334_v40  ;;  %5554 = vmatprep.subr.bf16.mxu0 %v8342_v0  ;;  %v8376_v40 = vld [vmem:[%s11892_s2 + $0x428] ss:$16 sps:$4 sm:$0xff]   ;;  %v8384_v0 = vld [vmem:[%s11892_s2 + $0x40c] ss:$16 sps:$4 sm:$0xff]  }
 0x1c1   :  { %5571 = vmatprep.subr.bf16.mxu1 %v8345_v45  ;;  %v8382_v45 = vld [vmem:[%s11892_s2 + $0x408] ss:$16 sps:$4 sm:$0xff]  }
 0x1c2   :  { %v5236_v57 = vpop.f32.mrf.mxu0 }
 0x1c3   :  { %5522 = vmatmul.mubr.bf16.vlgmr.msra.gmra.mxu1 %v9222_v13  ;;  %v5277_v58 = vpop.f32.mrf.mxu1  ;;  %v5237_v35 = vadd.f32 %v5236_v57, %v10375_v62  ;;  %5555 = vmatpush2.bf16.msra.mxu0 %v8340_v46  ;;  %v8352_v62 = vld [vmem:[%s11892_s2 + $0x328] ss:$16 sps:$4 sm:$0xff]   ;;  %v8399_v57 = vld [vmem:[%s11892_s2 + $0x64c] ss:$16 sps:$4 sm:$0xff]  }
 0x1c4   :  { %5572 = vmatpush1.bf16.msra.mxu1 %v8343_v48  ;;  %v5238_v53 = vpop.f32.mrf.mxu0  ;;  %5556 = vmatprep.subr.bf16.mxu0 %v8348_v51  ;;  %v8385_v46 = vld [vmem:[%s11892_s2 + $0x688] ss:$16 sps:$4 sm:$0xff]   ;;  %v8390_v48 = vld [vmem:[%s11892_s2 + $0x5ec] ss:$16 sps:$4 sm:$0xff]  }
 0x1c5   :  { %v5279_v63 = vpop.f32.mrf.mxu1  ;;  %5573 = vmatprep.subr.bf16.mxu1 %v8351_v52  ;;  %v5239_v61 = vadd.f32 %v5238_v53, %v10385_v7  ;;  %v10585_v13 = vadd.f32 %v5277_v58, %v5237_v35  ;;  %5603 = vmatprep.mubr.bf16.mxu1 %v9234_v17  ;;  %v8360_v7 = vld [vmem:[%s11892_s2 + $0x30c] ss:$16 sps:$4 sm:$0xff]   ;;  %v8358_v17 = vld [vmem:[%s11892_s2 + $0x308] ss:$16 sps:$4 sm:$0xff]  }
 0x1c6   :  { %v5240_v9 = vpop.f32.mrf.mxu0  ;;  %v8393_v51 = vld [vmem:[%s11892_s2 + $0x66c] ss:$16 sps:$4 sm:$0xff]   ;;  %v8388_v52 = vld [vmem:[%s11892_s2 + $0x5e8] ss:$16 sps:$4 sm:$0xff]  }
 0x1c7   :  { %v5281_v10 = vpop.f32.mrf.mxu1  ;;  %v10594_v60 = vadd.f32 %v5279_v63, %v5239_v61  ;;  %5557 = vmatpush2.bf16.msra.mxu0 %v8346_v47  ;;  %v8391_v47 = vld [vmem:[%s11892_s2 + $0x668] ss:$16 sps:$4 sm:$0xff]   ;;  %v8402_v53 = vld [vmem:[%s11892_s2 + $0x5ac] ss:$16 sps:$4 sm:$0xff]  }
 0x1c8   :  { %5574 = vmatpush1.bf16.msra.mxu1 %v8349_v56  ;;  %v5241_v11 = vpop.f32.mrf.mxu0  ;;  %5558 = vmatprep.subr.bf16.mxu0 %v8354_v3  ;;  %v8396_v56 = vld [vmem:[%s11892_s2 + $0x5cc] ss:$16 sps:$4 sm:$0xff]   ;;  %v8394_v58 = vld [vmem:[%s11892_s2 + $0x5c8] ss:$16 sps:$4 sm:$0xff]  }
 0x1c9   :  { %5575 = vmatprep.subr.bf16.mxu1 %v8357_v5  ;;  %v5282_v14 = vpop.f32.mrf.mxu1  ;;  %v8397_v35 = vld [vmem:[%s11892_s2 + $0x648] ss:$16 sps:$4 sm:$0xff]   ;;  %v8405_v63 = vld [vmem:[%s11892_s2 + $0x62c] ss:$16 sps:$4 sm:$0xff]  }
 0x1ca   :  { %v8400_v3 = vld [vmem:[%s11892_s2 + $0x5a8] ss:$16 sps:$4 sm:$0xff]   ;;  %v8408_v61 = vld [vmem:[%s11892_s2 + $0x58c] ss:$16 sps:$4 sm:$0xff]  }
 0x1cb   :  { %5559 = vmatpush2.bf16.msra.mxu0 %v8352_v62  ;;  %v8403_v5 = vld [vmem:[%s11892_s2 + $0x628] ss:$16 sps:$4 sm:$0xff]   ;;  %v8411_v62 = vld [vmem:[%s11892_s2 + $0x60c] ss:$16 sps:$4 sm:$0xff]  }
 0x1cc   :  { %5576 = vmatpush1.bf16.msra.mxu1 %v8355_v1  ;;  %5560 = vmatprep.subr.bf16.mxu0 %v8360_v7  ;;  %v8406_v1 = vld [vmem:[%s11892_s2 + $0x588] ss:$16 sps:$4 sm:$0xff]   ;;  %v8414_v10 = vld [vmem:[%s11892_s2 + $0x56c] ss:$16 sps:$4 sm:$0xff]  }
 0x1cd   :  { %5577 = vmatprep.subr.bf16.mxu1 %v8363_v12  ;;  %v8409_v9 = vld [vmem:[%s11892_s2 + $0x608] ss:$16 sps:$4 sm:$0xff]   ;;  %v8417_v11 = vld [vmem:[%s11892_s2 + $0x7ec] ss:$16 sps:$4 sm:$0xff]  }
 0x1ce   :  { %v8412_v7 = vld [vmem:[%s11892_s2 + $0x568] ss:$16 sps:$4 sm:$0xff]   ;;  %v8420_v14 = vld [vmem:[%s11892_s2 + $0x54c] ss:$16 sps:$4 sm:$0xff]  }
 0x1cf   :  { %5561 = vmatpush2.bf16.msra.mxu0 %v8358_v17  ;;  %v8415_v12 = vld [vmem:[%s11892_s2 + $0x7e8] ss:$16 sps:$4 sm:$0xff]   ;;  %v8423_v17 = vld [vmem:[%s11892_s2 + $0x7cc] ss:$16 sps:$4 sm:$0xff]  }
 0x1d0   :  { %5578 = vmatpush1.bf16.msra.mxu1 %v8361_v20  ;;  %5612 = vmatprep.subr.bf16.mxu0 %v8369_v24  ;;  %v8418_v20 = vld [vmem:[%s11892_s2 + $0x548] ss:$16 sps:$4 sm:$0xff]   ;;  %v8426_v24 = vld [vmem:[%s11892_s2 + $0x52c] ss:$16 sps:$4 sm:$0xff]  }
 0x1d1   :  { %5579 = vmatprep.subr.bf16.mxu1 %v8366_v39  ;;  %v8421_v39 = vld [vmem:[%s11892_s2 + $0x7c8] ss:$16 sps:$4 sm:$0xff]  }
 0x1d2   :  { %5563 = vmatmul.mubr.bf16.vlgmr.msra.gmra.mxu0 %v9241_v19  ;;  %v8381_v19 = vld [vmem:[%s11892_s2 + $0x6ac] ss:$16 sps:$4 sm:$0xff]  }
 0x1d3   :  { %5613 = vmatpush1.bf16.msra.mxu0 %v8367_v33  ;;  %5644 = vmatprep.mubr.bf16.mxu0 %v9254_v23  ;;  %v8387_v23 = vld [vmem:[%s11892_s2 + $0x68c] ss:$16 sps:$4 sm:$0xff]   ;;  %v8424_v33 = vld [vmem:[%s11892_s2 + $0x528] ss:$16 sps:$4 sm:$0xff]  }
 0x1d4   :  { %5580 = vmatpush1.bf16.msra.mxu1 %v8364_v28  ;;  %5614 = vmatprep.subr.bf16.mxu0 %v8375_v34  ;;  %v8429_v28 = vld [vmem:[%s11892_s2 + $0x7ac] ss:$16 sps:$4 sm:$0xff]  }
 0x1d5   :  { %5581 = vmatprep.subr.bf16.mxu1 %v8372_v49  ;;  %v8427_v49 = vld [vmem:[%s11892_s2 + $0x7a8] ss:$16 sps:$4 sm:$0xff]   ;;  %v8432_v34 = vld [vmem:[%s11892_s2 + $0x50c] ss:$16 sps:$4 sm:$0xff]  }
 0x1d7   :  { %5615 = vmatpush1.bf16.msra.mxu0 %v8373_v36  ;;  %v8430_v36 = vld [vmem:[%s11892_s2 + $0x508] ss:$16 sps:$4 sm:$0xff]  }
 0x1d8   :  { %5582 = vmatpush1.bf16.msra.mxu1 %v8370_v8  ;;  %5616 = vmatprep.subr.bf16.mxu0 %v8381_v19  ;;  %v8435_v8 = vld [vmem:[%s11892_s2 + $0x78c] ss:$16 sps:$4 sm:$0xff]  }
 0x1d9   :  { %5583 = vmatprep.subr.bf16.mxu1 %v8378_v37  ;;  %v8433_v37 = vld [vmem:[%s11892_s2 + $0x788] ss:$16 sps:$4 sm:$0xff]   ;;  %v8438_v19 = vld [vmem:[%s11892_s2 + $0x76c] ss:$16 sps:$4 sm:$0xff]  }
 0x1db   :  { %5617 = vmatpush1.bf16.msra.mxu0 %v8379_v44  ;;  %v8436_v44 = vld [vmem:[%s11892_s2 + $0x768] ss:$16 sps:$4 sm:$0xff]  }
 0x1dc   :  { %5584 = vmatpush1.bf16.msra.mxu1 %v8376_v40  ;;  %5618 = vmatprep.subr.bf16.mxu0 %v8387_v23  ;;  %v8441_v40 = vld [vmem:[%s11892_s2 + $0x8ec] ss:$16 sps:$4 sm:$0xff]  }
 0x1dd   :  { %5585 = vmatprep.subr.bf16.mxu1 %v8384_v0  ;;  %v8439_v0 = vld [vmem:[%s11892_s2 + $0x8e8] ss:$16 sps:$4 sm:$0xff]   ;;  %v8444_v23 = vld [vmem:[%s11892_s2 + $0x74c] ss:$16 sps:$4 sm:$0xff]  }
 0x1df   :  { %5619 = vmatpush1.bf16.msra.mxu0 %v8385_v46 }
 0x1e0   :  { %5586 = vmatpush1.bf16.msra.mxu1 %v8382_v45  ;;  %5620 = vmatprep.subr.bf16.mxu0 %v8393_v51  ;;  %v8447_v45 = vld [vmem:[%s11892_s2 + $0x8cc] ss:$16 sps:$4 sm:$0xff]  }
 0x1e1   :  { %5587 = vmatprep.subr.bf16.mxu1 %v8390_v48 }
 0x1e3   :  { %5621 = vmatpush1.bf16.msra.mxu0 %v8391_v47  ;;  %v8445_v47 = vld [vmem:[%s11892_s2 + $0x8c8] ss:$16 sps:$4 sm:$0xff]  }
 0x1e4   :  { %5588 = vmatpush2.bf16.msra.mxu1 %v8388_v52  ;;  %5622 = vmatprep.subr.bf16.mxu0 %v8399_v57  ;;  %v8442_v52 = vld [vmem:[%s11892_s2 + $0x748] ss:$16 sps:$4 sm:$0xff]  }
 0x1e5   :  { %5589 = vmatprep.subr.bf16.mxu1 %v8396_v56 }
 0x1e7   :  { %5623 = vmatpush1.bf16.msra.mxu0 %v8397_v35 }
 0x1e8   :  { %5590 = vmatpush2.bf16.msra.mxu1 %v8394_v58  ;;  %5624 = vmatprep.subr.bf16.mxu0 %v8405_v63 }
 0x1e9   :  { %5591 = vmatprep.subr.bf16.mxu1 %v8402_v53 }
 0x1eb   :  { %5625 = vmatpush1.bf16.msra.mxu0 %v8403_v5  ;;  %v8448_v5 = vld [vmem:[%s11892_s2 + $0x728] ss:$16 sps:$4 sm:$0xff]  }
 0x1ec   :  { %5592 = vmatpush2.bf16.msra.mxu1 %v8400_v3  ;;  %5626 = vmatprep.subr.bf16.mxu0 %v8411_v62 }
 0x1ed   :  { %5593 = vmatprep.subr.bf16.mxu1 %v8408_v61  ;;  %v8451_v61 = vld [vmem:[%s11892_s2 + $0x8a8] ss:$16 sps:$4 sm:$0xff]  }
 0x1ef   :  { %5627 = vmatpush1.bf16.msra.mxu0 %v8409_v9  ;;  %v8454_v9 = vld [vmem:[%s11892_s2 + $0x708] ss:$16 sps:$4 sm:$0xff]  }
 0x1f0   :  { %5594 = vmatpush2.bf16.msra.mxu1 %v8406_v1  ;;  %5628 = vmatprep.subr.bf16.mxu0 %v8417_v11  ;;  %v8462_v11 = vld [vmem:[%s11892_s2 + $0x86c] ss:$16 sps:$4 sm:$0xff]  }
 0x1f1   :  { %5595 = vmatprep.subr.bf16.mxu1 %v8414_v10  ;;  %v8457_v10 = vld [vmem:[%s11892_s2 + $0x888] ss:$16 sps:$4 sm:$0xff]  }
 0x1f3   :  { %5629 = vmatpush2.bf16.msra.mxu0 %v8415_v12  ;;  %v8460_v12 = vld [vmem:[%s11892_s2 + $0x868] ss:$16 sps:$4 sm:$0xff]  }
 0x1f4   :  { %5596 = vmatpush2.bf16.msra.mxu1 %v8412_v7  ;;  %5630 = vmatprep.subr.bf16.mxu0 %v8423_v17  ;;  %v8465_v7 = vld [vmem:[%s11892_s2 + $0xaec] ss:$16 sps:$4 sm:$0xff]  }
 0x1f5   :  { %5597 = vmatprep.subr.bf16.mxu1 %v8420_v14  ;;  %v8463_v14 = vld [vmem:[%s11892_s2 + $0xae8] ss:$16 sps:$4 sm:$0xff]   ;;  %v8468_v17 = vld [vmem:[%s11892_s2 + $0x84c] ss:$16 sps:$4 sm:$0xff]  }
 0x1f7   :  { %5631 = vmatpush2.bf16.msra.mxu0 %v8421_v39  ;;  %v8466_v39 = vld [vmem:[%s11892_s2 + $0x848] ss:$16 sps:$4 sm:$0xff]  }
 0x1f8   :  { %5598 = vmatpush2.bf16.msra.mxu1 %v8418_v20  ;;  %5632 = vmatprep.subr.bf16.mxu0 %v8429_v28  ;;  %v8471_v20 = vld [vmem:[%s11892_s2 + $0xacc] ss:$16 sps:$4 sm:$0xff]  }
 0x1f9   :  { %5599 = vmatprep.subr.bf16.mxu1 %v8426_v24  ;;  %v8469_v24 = vld [vmem:[%s11892_s2 + $0xac8] ss:$16 sps:$4 sm:$0xff]   ;;  %v8474_v28 = vld [vmem:[%s11892_s2 + $0x82c] ss:$16 sps:$4 sm:$0xff]  }
 0x1fb   :  { %5633 = vmatpush2.bf16.msra.mxu0 %v8427_v49  ;;  %v8475_v49 = vld [vmem:[%s11892_s2 + $0xaa8] ss:$16 sps:$4 sm:$0xff]  }
 0x1fc   :  { %5600 = vmatpush2.bf16.msra.mxu1 %v8424_v33  ;;  %5634 = vmatprep.subr.bf16.mxu0 %v8435_v8  ;;  %v8472_v33 = vld [vmem:[%s11892_s2 + $0x828] ss:$16 sps:$4 sm:$0xff]  }
 0x1fd   :  { %5601 = vmatprep.subr.bf16.mxu1 %v8432_v34  ;;  %v8480_v34 = vld [vmem:[%s11892_s2 + $0x80c] ss:$16 sps:$4 sm:$0xff]   ;;  %v8478_v8 = vld [vmem:[%s11892_s2 + $0x808] ss:$16 sps:$4 sm:$0xff]  }
 0x1ff   :  { %5635 = vmatpush2.bf16.msra.mxu0 %v8433_v37  ;;  %v8486_v37 = vld [vmem:[%s11892_s2 + $0x9ec] ss:$16 sps:$4 sm:$0xff]  }
 0x200   :  { %5602 = vmatpush2.bf16.msra.mxu1 %v8430_v36  ;;  %5636 = vmatprep.subr.bf16.mxu0 %v8438_v19  ;;  %v8481_v36 = vld [vmem:[%s11892_s2 + $0xa88] ss:$16 sps:$4 sm:$0xff]   ;;  %v8489_v19 = vld [vmem:[%s11892_s2 + $0xa6c] ss:$16 sps:$4 sm:$0xff]  }
 0x201   :  { %5653 = vmatprep.subr.bf16.mxu1 %v8441_v40  ;;  %v8484_v40 = vld [vmem:[%s11892_s2 + $0x9e8] ss:$16 sps:$4 sm:$0xff]  }
 0x202   :  { %v5318_v46 = vpop.f32.mrf.mxu0 }
 0x203   :  { %5604 = vmatmul.mubr.bf16.vlgmr.msra.gmra.mxu1 %v9433_v26  ;;  %v5359_v48 = vpop.f32.mrf.mxu1  ;;  %v5319_v51 = vadd.f32 %v5318_v46, %v10585_v13  ;;  %5637 = vmatpush2.bf16.msra.mxu0 %v8436_v44  ;;  %v8450_v26 = vld [vmem:[%s11892_s2 + $0x72c] ss:$16 sps:$4 sm:$0xff]   ;;  %v8487_v44 = vld [vmem:[%s11892_s2 + $0xa68] ss:$16 sps:$4 sm:$0xff]  }
 0x204   :  { %5654 = vmatpush1.bf16.msra.mxu1 %v8439_v0  ;;  %v5320_v56 = vpop.f32.mrf.mxu0  ;;  %5638 = vmatprep.subr.bf16.mxu0 %v8444_v23  ;;  %v8453_v13 = vld [vmem:[%s11892_s2 + $0x8ac] ss:$16 sps:$4 sm:$0xff]   ;;  %v8493_v46 = vld [vmem:[%s11892_s2 + $0xa48] ss:$16 sps:$4 sm:$0xff]  }
 0x205   :  { %v5361_v57 = vpop.f32.mrf.mxu1  ;;  %5655 = vmatprep.subr.bf16.mxu1 %v8447_v45  ;;  %v5321_v58 = vadd.f32 %v5320_v56, %v10594_v60  ;;  %v10787_v35 = vadd.f32 %v5359_v48, %v5319_v51  ;;  %5685 = vmatprep.mubr.bf16.mxu1 %v9486_v41  ;;  %v8456_v41 = vld [vmem:[%s11892_s2 + $0x70c] ss:$16 sps:$4 sm:$0xff]   ;;  %v8490_v45 = vld [vmem:[%s11892_s2 + $0x9c8] ss:$16 sps:$4 sm:$0xff]  }
 0x206   :  { %v5322_v53 = vpop.f32.mrf.mxu0  ;;  %v8459_v60 = vld [vmem:[%s11892_s2 + $0x88c] ss:$16 sps:$4 sm:$0xff]  }
 0x207   :  { %v5363_v63 = vpop.f32.mrf.mxu1  ;;  %v10790_v3 = vadd.f32 %v5361_v57, %v5321_v58  ;;  %5639 = vmatpush2.bf16.msra.mxu0 %v8442_v52  ;;  %v8492_v0 = vld [vmem:[%s11892_s2 + $0x9cc] ss:$16 sps:$4 sm:$0xff]   ;;  %v8496_v52 = vld [vmem:[%s11892_s2 + $0x9a8] ss:$16 sps:$4 sm:$0xff]  }
 0x208   :  { %5656 = vmatpush1.bf16.msra.mxu1 %v8445_v47  ;;  %v5323_v62 = vpop.f32.mrf.mxu0  ;;  %5640 = vmatprep.subr.bf16.mxu0 %v8450_v26  ;;  %v8495_v23 = vld [vmem:[%s11892_s2 + $0xa4c] ss:$16 sps:$4 sm:$0xff]   ;;  %v8499_v47 = vld [vmem:[%s11892_s2 + $0xa28] ss:$16 sps:$4 sm:$0xff]  }
 0x209   :  { %5657 = vmatprep.subr.bf16.mxu1 %v8453_v13  ;;  %v5364_v1 = vpop.f32.mrf.mxu1  ;;  %v8498_v48 = vld [vmem:[%s11892_s2 + $0x9ac] ss:$16 sps:$4 sm:$0xff]   ;;  %v8502_v26 = vld [vmem:[%s11892_s2 + $0x988] ss:$16 sps:$4 sm:$0xff]  }
 0x20a   :  { %v8501_v51 = vld [vmem:[%s11892_s2 + $0xa2c] ss:$16 sps:$4 sm:$0xff]   ;;  %v8505_v13 = vld [vmem:[%s11892_s2 + $0xa08] ss:$16 sps:$4 sm:$0xff]  }
 0x20b   :  { %5641 = vmatpush2.bf16.msra.mxu0 %v8448_v5  ;;  %v8504_v56 = vld [vmem:[%s11892_s2 + $0x98c] ss:$16 sps:$4 sm:$0xff]   ;;  %v8508_v63 = vld [vmem:[%s11892_s2 + $0x968] ss:$16 sps:$4 sm:$0xff]  }
 0x20c   :  { %5658 = vmatpush1.bf16.msra.mxu1 %v8451_v61  ;;  %5642 = vmatprep.subr.bf16.mxu0 %v8456_v41  ;;  %v8507_v57 = vld [vmem:[%s11892_s2 + $0xa0c] ss:$16 sps:$4 sm:$0xff]   ;;  %v8511_v5 = vld [vmem:[%s11892_s2 + $0xbe8] ss:$16 sps:$4 sm:$0xff]  }
 0x20d   :  { %5659 = vmatprep.subr.bf16.mxu1 %v8459_v60  ;;  %v8510_v58 = vld [vmem:[%s11892_s2 + $0x96c] ss:$16 sps:$4 sm:$0xff]   ;;  %v8514_v41 = vld [vmem:[%s11892_s2 + $0x948] ss:$16 sps:$4 sm:$0xff]  }
 0x20e   :  { %v8513_v53 = vld [vmem:[%s11892_s2 + $0xbec] ss:$16 sps:$4 sm:$0xff]   ;;  %v8517_v60 = vld [vmem:[%s11892_s2 + $0xbc8] ss:$16 sps:$4 sm:$0xff]  }
 0x20f   :  { %5643 = vmatpush2.bf16.msra.mxu0 %v8454_v9  ;;  %v8516_v61 = vld [vmem:[%s11892_s2 + $0x94c] ss:$16 sps:$4 sm:$0xff]  }
 0x210   :  { %5660 = vmatpush1.bf16.msra.mxu1 %v8457_v10  ;;  %5694 = vmatprep.subr.bf16.mxu0 %v8465_v7  ;;  %v8519_v62 = vld [vmem:[%s11892_s2 + $0xbcc] ss:$16 sps:$4 sm:$0xff]   ;;  %v8520_v10 = vld [vmem:[%s11892_s2 + $0x928] ss:$16 sps:$4 sm:$0xff]  }
 0x211   :  { %5661 = vmatprep.subr.bf16.mxu1 %v8462_v11  ;;  %v8522_v1 = vld [vmem:[%s11892_s2 + $0x92c] ss:$16 sps:$4 sm:$0xff]   ;;  %v8523_v11 = vld [vmem:[%s11892_s2 + $0xba8] ss:$16 sps:$4 sm:$0xff]  }
 0x212   :  { %5645 = vmatmul.mubr.bf16.vlgmr.msra.gmra.mxu0 %v9449_v30  ;;  %v8477_v30 = vld [vmem:[%s11892_s2 + $0xaac] ss:$16 sps:$4 sm:$0xff]  }
 0x213   :  { %5695 = vmatpush1.bf16.msra.mxu0 %v8463_v14  ;;  %5726 = vmatprep.mubr.bf16.mxu0 %v9491_v43  ;;  %v8483_v43 = vld [vmem:[%s11892_s2 + $0xa8c] ss:$16 sps:$4 sm:$0xff]   ;;  %v8526_v14 = vld [vmem:[%s11892_s2 + $0x908] ss:$16 sps:$4 sm:$0xff]  }
 0x214   :  { %5662 = vmatpush1.bf16.msra.mxu1 %v8460_v12  ;;  %5696 = vmatprep.subr.bf16.mxu0 %v8471_v20  ;;  %v8525_v9 = vld [vmem:[%s11892_s2 + $0xbac] ss:$16 sps:$4 sm:$0xff]  }
 0x215   :  { %5663 = vmatprep.subr.bf16.mxu1 %v8468_v17  ;;  %v8528_v7 = vld [vmem:[%s11892_s2 + $0x90c] ss:$16 sps:$4 sm:$0xff]   ;;  %v8529_v17 = vld [vmem:[%s11892_s2 + $0xb88] ss:$16 sps:$4 sm:$0xff]  }
 0x216   :  { %v8531_v12 = vld [vmem:[%s11892_s2 + $0xb8c] ss:$16 sps:$4 sm:$0xff]  }
 0x217   :  { %5697 = vmatpush1.bf16.msra.mxu0 %v8469_v24  ;;  %v8534_v20 = vld [vmem:[%s11892_s2 + $0xb6c] ss:$16 sps:$4 sm:$0xff]   ;;  %v8532_v24 = vld [vmem:[%s11892_s2 + $0xb68] ss:$16 sps:$4 sm:$0xff]  }
 0x218   :  { %5664 = vmatpush1.bf16.msra.mxu1 %v8466_v39  ;;  %5698 = vmatprep.subr.bf16.mxu0 %v8477_v30  ;;  %v8537_v39 = vld [vmem:[%s11892_s2 + $0xcec] ss:$16 sps:$4 sm:$0xff]  }
 0x219   :  { %5665 = vmatprep.subr.bf16.mxu1 %v8474_v28  ;;  %v8535_v28 = vld [vmem:[%s11892_s2 + $0xce8] ss:$16 sps:$4 sm:$0xff]   ;;  %v8540_v30 = vld [vmem:[%s11892_s2 + $0xb4c] ss:$16 sps:$4 sm:$0xff]  }
 0x21b   :  { %5699 = vmatpush1.bf16.msra.mxu0 %v8475_v49 }
 0x21c   :  { %5666 = vmatpush1.bf16.msra.mxu1 %v8472_v33  ;;  %5700 = vmatprep.subr.bf16.mxu0 %v8483_v43  ;;  %v8543_v33 = vld [vmem:[%s11892_s2 + $0xccc] ss:$16 sps:$4 sm:$0xff]  }
 0x21d   :  { %5667 = vmatprep.subr.bf16.mxu1 %v8480_v34 }
 0x21f   :  { %5701 = vmatpush1.bf16.msra.mxu0 %v8481_v36  ;;  %v8541_v36 = vld [vmem:[%s11892_s2 + $0xcc8] ss:$16 sps:$4 sm:$0xff]  }
 0x220   :  { %5668 = vmatpush1.bf16.msra.mxu1 %v8478_v8  ;;  %5702 = vmatprep.subr.bf16.mxu0 %v8489_v19  ;;  %v8538_v8 = vld [vmem:[%s11892_s2 + $0xb48] ss:$16 sps:$4 sm:$0xff]  }
 0x221   :  { %5669 = vmatprep.subr.bf16.mxu1 %v8486_v37 }
 0x223   :  { %5703 = vmatpush1.bf16.msra.mxu0 %v8487_v44 }
 0x224   :  { %5670 = vmatpush2.bf16.msra.mxu1 %v8484_v40  ;;  %5704 = vmatprep.subr.bf16.mxu0 %v8495_v23 }
 0x225   :  { %5671 = vmatprep.subr.bf16.mxu1 %v8492_v0 }
 0x227   :  { %5705 = vmatpush1.bf16.msra.mxu0 %v8493_v46  ;;  %v8544_v46 = vld [vmem:[%s11892_s2 + $0xb28] ss:$16 sps:$4 sm:$0xff]  }
 0x228   :  { %5672 = vmatpush2.bf16.msra.mxu1 %v8490_v45  ;;  %5706 = vmatprep.subr.bf16.mxu0 %v8501_v51 }
 0x229   :  { %5673 = vmatprep.subr.bf16.mxu1 %v8498_v48  ;;  %v8547_v48 = vld [vmem:[%s11892_s2 + $0xca8] ss:$16 sps:$4 sm:$0xff]  }
 0x22b   :  { %5707 = vmatpush1.bf16.msra.mxu0 %v8499_v47  ;;  %v8550_v47 = vld [vmem:[%s11892_s2 + $0xb08] ss:$16 sps:$4 sm:$0xff]  }
 0x22c   :  { %5674 = vmatpush2.bf16.msra.mxu1 %v8496_v52  ;;  %5708 = vmatprep.subr.bf16.mxu0 %v8507_v57  ;;  %v8558_v57 = vld [vmem:[%s11892_s2 + $0xc6c] ss:$16 sps:$4 sm:$0xff]  }
 0x22d   :  { %5675 = vmatprep.subr.bf16.mxu1 %v8504_v56  ;;  %v8553_v56 = vld [vmem:[%s11892_s2 + $0xc88] ss:$16 sps:$4 sm:$0xff]  }
 0x22f   :  { %5709 = vmatpush1.bf16.msra.mxu0 %v8505_v13  ;;  %v8556_v13 = vld [vmem:[%s11892_s2 + $0xc68] ss:$16 sps:$4 sm:$0xff]  }
 0x230   :  { %5676 = vmatpush2.bf16.msra.mxu1 %v8502_v26  ;;  %5710 = vmatprep.subr.bf16.mxu0 %v8513_v53  ;;  %v8561_v26 = vld [vmem:[%s11892_s2 + $0xeec] ss:$16 sps:$4 sm:$0xff]  }
 0x231   :  { %5677 = vmatprep.subr.bf16.mxu1 %v8510_v58  ;;  %v8559_v58 = vld [vmem:[%s11892_s2 + $0xee8] ss:$16 sps:$4 sm:$0xff]   ;;  %v8564_v53 = vld [vmem:[%s11892_s2 + $0xc4c] ss:$16 sps:$4 sm:$0xff]  }
 0x233   :  { %5711 = vmatpush2.bf16.msra.mxu0 %v8511_v5 }
 0x234   :  { %5678 = vmatpush2.bf16.msra.mxu1 %v8508_v63  ;;  %5712 = vmatprep.subr.bf16.mxu0 %v8519_v62  ;;  %v8567_v63 = vld [vmem:[%s11892_s2 + $0xecc] ss:$16 sps:$4 sm:$0xff]   ;;  %v8562_v62 = vld [vmem:[%s11892_s2 + $0xc48] ss:$16 sps:$4 sm:$0xff]  }
 0x235   :  { %5679 = vmatprep.subr.bf16.mxu1 %v8516_v61 }
 0x237   :  { %5713 = vmatpush2.bf16.msra.mxu0 %v8517_v60 }
 0x238   :  { %5680 = vmatpush2.bf16.msra.mxu1 %v8514_v41  ;;  %5714 = vmatprep.subr.bf16.mxu0 %v8525_v9  ;;  %v8565_v41 = vld [vmem:[%s11892_s2 + $0xec8] ss:$16 sps:$4 sm:$0xff]  }
 0x239   :  { %5681 = vmatprep.subr.bf16.mxu1 %v8522_v1  ;;  %v8570_v1 = vld [vmem:[%s11892_s2 + $0xc2c] ss:$16 sps:$4 sm:$0xff]  }
 0x23b   :  { %5715 = vmatpush2.bf16.msra.mxu0 %v8523_v11  ;;  %v8568_v11 = vld [vmem:[%s11892_s2 + $0xc28] ss:$16 sps:$4 sm:$0xff]  }
 0x23c   :  { %5682 = vmatpush2.bf16.msra.mxu1 %v8520_v10  ;;  %5716 = vmatprep.subr.bf16.mxu0 %v8531_v12 }
 0x23d   :  { %5683 = vmatprep.subr.bf16.mxu1 %v8528_v7  ;;  %v8571_v7 = vld [vmem:[%s11892_s2 + $0xea8] ss:$16 sps:$4 sm:$0xff]  }
 0x23f   :  { %5717 = vmatpush2.bf16.msra.mxu0 %v8529_v17  ;;  %v8574_v17 = vld [vmem:[%s11892_s2 + $0xc08] ss:$16 sps:$4 sm:$0xff]  }
 0x240   :  { %5684 = vmatpush2.bf16.msra.mxu1 %v8526_v14  ;;  %5718 = vmatprep.subr.bf16.mxu0 %v8534_v20  ;;  %v8576_v14 = vld [vmem:[%s11892_s2 + $0xc0c] ss:$16 sps:$4 sm:$0xff]   ;;  %v8577_v20 = vld [vmem:[%s11892_s2 + $0xe88] ss:$16 sps:$4 sm:$0xff]  }
 0x241   :  { %5735 = vmatprep.subr.bf16.mxu1 %v8537_v39  ;;  %v8582_v39 = vld [vmem:[%s11892_s2 + $0xdec] ss:$16 sps:$4 sm:$0xff]  }
 0x242   :  { %v5400_v49 = vpop.f32.mrf.mxu0 }
 0x243   :  { %5686 = vmatmul.mubr.bf16.vlgmr.msra.gmra.mxu1 %v9662_v50  ;;  %v5441_v34 = vpop.f32.mrf.mxu1  ;;  %v5401_v43 = vadd.f32 %v5400_v49, %v10787_v35  ;;  %5719 = vmatpush2.bf16.msra.mxu0 %v8532_v24  ;;  %v8546_v50 = vld [vmem:[%s11892_s2 + $0xb2c] ss:$16 sps:$4 sm:$0xff]  }
 0x244   :  { %5736 = vmatpush1.bf16.msra.mxu1 %v8535_v28  ;;  %v5402_v37 = vpop.f32.mrf.mxu0  ;;  %5720 = vmatprep.subr.bf16.mxu0 %v8540_v30  ;;  %v8549_v35 = vld [vmem:[%s11892_s2 + $0xcac] ss:$16 sps:$4 sm:$0xff]   ;;  %v8580_v28 = vld [vmem:[%s11892_s2 + $0xde8] ss:$16 sps:$4 sm:$0xff]  }
 0x245   :  { %v5443_v19 = vpop.f32.mrf.mxu1  ;;  %5737 = vmatprep.subr.bf16.mxu1 %v8543_v33  ;;  %v5403_v40 = vadd.f32 %v5402_v37, %v10790_v3  ;;  %v5442_v44 = vadd.f32 %v5441_v34, %v5401_v43  ;;  %5767 = vmatprep.mubr.bf16.mxu1 %v9674_v54  ;;  %v8552_v54 = vld [vmem:[%s11892_s2 + $0xb0c] ss:$16 sps:$4 sm:$0xff]   ;;  %v8583_v30 = vld [vmem:[%s11892_s2 + $0xe68] ss:$16 sps:$4 sm:$0xff]  }
 0x246   :  { %v5404_v0 = vpop.f32.mrf.mxu0  ;;  %v8555_v3 = vld [vmem:[%s11892_s2 + $0xc8c] ss:$16 sps:$4 sm:$0xff]   ;;  %v8586_v34 = vld [vmem:[%s11892_s2 + $0xdc8] ss:$16 sps:$4 sm:$0xff]  }
 0x247   :  { %v5445_v23 = vpop.f32.mrf.mxu1  ;;  %v5444_v45 = vadd.f32 %v5443_v19, %v5403_v40  ;;  %5721 = vmatpush2.bf16.msra.mxu0 %v8538_v8  ;;  %v8585_v24 = vld [vmem:[%s11892_s2 + $0xe6c] ss:$16 sps:$4 sm:$0xff]   ;;  %v8589_v43 = vld [vmem:[%s11892_s2 + $0xe48] ss:$16 sps:$4 sm:$0xff]  }
 0x248   :  { %5738 = vmatpush1.bf16.msra.mxu1 %v8541_v36  ;;  %v5405_v51 = vpop.f32.mrf.mxu0  ;;  %5722 = vmatprep.subr.bf16.mxu0 %v8546_v50  ;;  %v8588_v33 = vld [vmem:[%s11892_s2 + $0xdcc] ss:$16 sps:$4 sm:$0xff]   ;;  %v8592_v37 = vld [vmem:[%s11892_s2 + $0xda8] ss:$16 sps:$4 sm:$0xff]  }
 0x249   :  { %5739 = vmatprep.subr.bf16.mxu1 %v8549_v35  ;;  %v5446_v52 = vpop.f32.mrf.mxu1  ;;  %v8591_v49 = vld [vmem:[%s11892_s2 + $0xe4c] ss:$16 sps:$4 sm:$0xff]   ;;  %v8595_v19 = vld [vmem:[%s11892_s2 + $0xe28] ss:$16 sps:$4 sm:$0xff]  }
 0x24a   :  { %v8594_v8 = vld [vmem:[%s11892_s2 + $0xdac] ss:$16 sps:$4 sm:$0xff]   ;;  %v8598_v40 = vld [vmem:[%s11892_s2 + $0xd88] ss:$16 sps:$4 sm:$0xff]  }
 0x24b   :  { %5723 = vmatpush2.bf16.msra.mxu0 %v8544_v46  ;;  %v8597_v36 = vld [vmem:[%s11892_s2 + $0xe2c] ss:$16 sps:$4 sm:$0xff]   ;;  %v8607_v46 = vld [vmem:[%s11892_s2 + $0xfe8] ss:$16 sps:$4 sm:$0xff]  }
 0x24c   :  { %5740 = vmatpush1.bf16.msra.mxu1 %v8547_v48  ;;  %5724 = vmatprep.subr.bf16.mxu0 %v8552_v54  ;;  %v8600_v50 = vld [vmem:[%s11892_s2 + $0xd8c] ss:$16 sps:$4 sm:$0xff]   ;;  %v8610_v54 = vld [vmem:[%s11892_s2 + $0xd48] ss:$16 sps:$4 sm:$0xff]  }
 0x24d   :  { %5741 = vmatprep.subr.bf16.mxu1 %v8555_v3  ;;  %v8603_v35 = vld [vmem:[%s11892_s2 + $0xe0c] ss:$16 sps:$4 sm:$0xff]   ;;  %v8613_v3 = vld [vmem:[%s11892_s2 + $0xfc8] ss:$16 sps:$4 sm:$0xff]  }
 0x24e   :  { %v8606_v0 = vld [vmem:[%s11892_s2 + $0xd6c] ss:$16 sps:$4 sm:$0xff]  }
 0x24f   :  { %5725 = vmatpush2.bf16.msra.mxu0 %v8550_v47  ;;  %v8609_v23 = vld [vmem:[%s11892_s2 + $0xfec] ss:$16 sps:$4 sm:$0xff]  }
 0x250   :  { %5742 = vmatpush1.bf16.msra.mxu1 %v8553_v56  ;;  %5776 = vmatprep.subr.bf16.mxu0 %v8561_v26  ;;  %v8612_v48 = vld [vmem:[%s11892_s2 + $0xd4c] ss:$16 sps:$4 sm:$0xff]   ;;  %v8616_v56 = vld [vmem:[%s11892_s2 + $0xd28] ss:$16 sps:$4 sm:$0xff]  }
 0x251   :  { %5743 = vmatprep.subr.bf16.mxu1 %v8558_v57  ;;  %v8615_v51 = vld [vmem:[%s11892_s2 + $0xfcc] ss:$16 sps:$4 sm:$0xff]   ;;  %v8619_v57 = vld [vmem:[%s11892_s2 + $0xfa8] ss:$16 sps:$4 sm:$0xff]  }
 0x252   :  { %v5482_v5 = vpop.f32.mrf.mxu0  ;;  %5727 = vmatmul.mubr.bf16.vlgmr.msra.gmra.mxu0 %v9681_v55  ;;  %v8573_v55 = vld [vmem:[%s11892_s2 + $0xeac] ss:$16 sps:$4 sm:$0xff]  }
 0x253   :  { %v11027_v61 = vadd.f32 %v5482_v5, %v5442_v44  ;;  %5777 = vmatpush1.bf16.msra.mxu0 %v8559_v58  ;;  %5808 = vmatprep.mubr.bf16.mxu0 %v9694_v59  ;;  %v8579_v59 = vld [vmem:[%s11892_s2 + $0xe8c] ss:$16 sps:$4 sm:$0xff]   ;;  %v8601_v44 = vld [vmem:[%s11892_s2 + $0xe08] ss:$16 sps:$4 sm:$0xff]  }
 0x254   :  { %5744 = vmatpush1.bf16.msra.mxu1 %v8556_v13  ;;  %v5484_v60 = vpop.f32.mrf.mxu0  ;;  %5778 = vmatprep.subr.bf16.mxu0 %v8567_v63  ;;  %v8618_v52 = vld [vmem:[%s11892_s2 + $0xd2c] ss:$16 sps:$4 sm:$0xff]   ;;  %v8622_v58 = vld [vmem:[%s11892_s2 + $0xd08] ss:$16 sps:$4 sm:$0xff]  }
 0x255   :  { %5745 = vmatprep.subr.bf16.mxu1 %v8564_v53  ;;  %v11041_v9 = vadd.f32 %v5484_v60, %v5444_v45  ;;  %v8604_v45 = vld [vmem:[%s11892_s2 + $0xd68] ss:$16 sps:$4 sm:$0xff]   ;;  %v8621_v47 = vld [vmem:[%s11892_s2 + $0xfac] ss:$16 sps:$4 sm:$0xff]   ;;  %vm6022_vm4 = vcmp.gt.f32.partialorder %v11027_v61, 0.0 }
 0x256   :  { %v5486_v10 = vpop.f32.mrf.mxu0  ;;  %v8624_v26 = vld [vmem:[%s11892_s2 + $0xd0c] ss:$16 sps:$4 sm:$0xff]   ;;  %v8625_v53 = vld [vmem:[%s11892_s2 + $0xf88] ss:$16 sps:$4 sm:$0xff]  }
 0x257   :  { %5779 = vmatpush1.bf16.msra.mxu0 %v8565_v41  ;;  %v8627_v13 = vld [vmem:[%s11892_s2 + $0xf8c] ss:$16 sps:$4 sm:$0xff]   ;;  %v8631_v41 = vld [vmem:[%s11892_s2 + $0x10e8] ss:$16 sps:$4 sm:$0xff]   ;;  %vm6023_vm1 = vcmp.gt.f32.partialorder %v11041_v9, 0.0 }
 0x258   :  { %5746 = vmatpush1.bf16.msra.mxu1 %v8562_v62  ;;  %v5487_v12 = vpop.f32.mrf.mxu0  ;;  %5780 = vmatprep.subr.bf16.mxu0 %v8573_v55  ;;  %v8630_v63 = vld [vmem:[%s11892_s2 + $0xf6c] ss:$16 sps:$4 sm:$0xff]   ;;  %v8628_v62 = vld [vmem:[%s11892_s2 + $0xf68] ss:$16 sps:$4 sm:$0xff]  }
 0x259   :  { %5747 = vmatprep.subr.bf16.mxu1 %v8570_v1  ;;  %v8633_v5 = vld [vmem:[%s11892_s2 + $0x10ec] ss:$16 sps:$4 sm:$0xff]   ;;  %v8634_v55 = vld [vmem:[%s11892_s2 + $0xf48] ss:$16 sps:$4 sm:$0xff]  }
 0x25a   :  { %v8636_v60 = vld [vmem:[%s11892_s2 + $0xf4c] ss:$16 sps:$4 sm:$0xff]   ;;  %v8637_v10 = vld [vmem:[%s11892_s2 + $0x10c8] ss:$16 sps:$4 sm:$0xff]  }
 0x25b   :  { %5781 = vmatpush1.bf16.msra.mxu0 %v8571_v7  ;;  %v8639_v1 = vld [vmem:[%s11892_s2 + $0x10cc] ss:$16 sps:$4 sm:$0xff]  }
 0x25c   :  { %5748 = vmatpush1.bf16.msra.mxu1 %v8568_v11  ;;  %5782 = vmatprep.subr.bf16.mxu0 %v8579_v59  ;;  %v8642_v11 = vld [vmem:[%s11892_s2 + $0xf2c] ss:$16 sps:$4 sm:$0xff]  }
 0x25d   :  { %5749 = vmatprep.subr.bf16.mxu1 %v8576_v14  ;;  %v8645_v7 = vld [vmem:[%s11892_s2 + $0x10ac] ss:$16 sps:$4 sm:$0xff]  }
 0x25f   :  { %5783 = vmatpush1.bf16.msra.mxu0 %v8577_v20  ;;  %v833_v20 = vsub.s32 2, %v9126_v42 }
 0x260   :  { %5750 = vmatpush1.bf16.msra.mxu1 %v8574_v17  ;;  %5784 = vmatprep.subr.bf16.mxu0 %v8585_v24  ;;  %v8643_v17 = vld [vmem:[%s11892_s2 + $0x10a8] ss:$16 sps:$4 sm:$0xff]  }
 0x261   :  { %5751 = vmatprep.subr.bf16.mxu1 %v8582_v39  ;;  %v8648_v39 = vld [vmem:[%s11892_s2 + $0xf0c] ss:$16 sps:$4 sm:$0xff]  }
 0x263   :  { %5785 = vmatpush1.bf16.msra.mxu0 %v8583_v30  ;;  %v8646_v30 = vld [vmem:[%s11892_s2 + $0xf08] ss:$16 sps:$4 sm:$0xff]  }
 0x264   :  { %5752 = vmatpush2.bf16.msra.mxu1 %v8580_v28  ;;  %5786 = vmatprep.subr.bf16.mxu0 %v8591_v49  ;;  %v837_v28 = vsub.s32 3, %v9126_v42  ;;  %v8956_v49 = vld [vmem:[%s11894_s3] sm:$0xf] }
 0x265   :  { %5753 = vmatprep.subr.bf16.mxu1 %v8588_v33  ;;  %v8649_v33 = vld [vmem:[%s11892_s2 + $0x1088] ss:$16 sps:$4 sm:$0xff]   ;;  %v7624_v42 = vld [vmem:[%s11900_s8] ss:$0 sm:$0xff] }
 0x267   :  { %5787 = vmatpush1.bf16.msra.mxu0 %v8589_v43  ;;  %v8654_v43 = vld [vmem:[%s11892_s2 + $0x106c] ss:$16 sps:$4 sm:$0xff]  }
 0x268   :  { %5754 = vmatpush2.bf16.msra.mxu1 %v8586_v34  ;;  %5788 = vmatprep.subr.bf16.mxu0 %v8597_v36  ;;  %v834_v34 = vrot.slane %v8956_v49, %v833_v20  ;;  %v838_v36 = vrot.slane %v8956_v49, %v837_v28  ;;  %v8705_v20 = vld [vmem:[%s11892_s2 + $0x13ec] ss:$16 sps:$4 sm:$0xff]  }
 0x269   :  { %5755 = vmatprep.subr.bf16.mxu1 %v8594_v8  ;;  %v8657_v8 = vld [vmem:[%s11892_s2 + $0x12ec] ss:$16 sps:$4 sm:$0xff]  }
 0x26a   :  { %v8711_v28 = vld [vmem:[%s11892_s2 + $0x13cc] ss:$16 sps:$4 sm:$0xff]  }
 0x26b   :  { %5789 = vmatpush1.bf16.msra.mxu0 %v8595_v19  ;;  %v8655_v19 = vld [vmem:[%s11892_s2 + $0x12e8] ss:$16 sps:$4 sm:$0xff]   ;;  %v8714_v49 = vld [vmem:[%s11892_s2 + $0x112c] ss:$16 sps:$4 sm:$0xff]  }
 0x26c   :  { %5756 = vmatpush2.bf16.msra.mxu1 %v8592_v37  ;;  %5790 = vmatprep.subr.bf16.mxu0 %v8603_v35  ;;  %v8652_v37 = vld [vmem:[%s11892_s2 + $0x1068] ss:$16 sps:$4 sm:$0xff]   ;;  %v8663_v35 = vld [vmem:[%s11892_s2 + $0x12cc] ss:$16 sps:$4 sm:$0xff]  }
 0x26d   :  { %5757 = vmatprep.subr.bf16.mxu1 %v8600_v50  ;;  %v8660_v50 = vld [vmem:[%s11892_s2 + $0x104c] ss:$16 sps:$4 sm:$0xff]  }
 0x26f   :  { %5791 = vmatpush1.bf16.msra.mxu0 %v8601_v44 }
 0x270   :  { %5758 = vmatpush2.bf16.msra.mxu1 %v8598_v40  ;;  %5792 = vmatprep.subr.bf16.mxu0 %v8609_v23  ;;  %v8661_v23 = vld [vmem:[%s11892_s2 + $0x12c8] ss:$16 sps:$4 sm:$0xff]  }
 0x271   :  { %5759 = vmatprep.subr.bf16.mxu1 %v8606_v0  ;;  %v8658_v0 = vld [vmem:[%s11892_s2 + $0x1048] ss:$16 sps:$4 sm:$0xff]  }
 0x273   :  { %5793 = vmatpush2.bf16.msra.mxu0 %v8607_v46  ;;  %v8666_v46 = vld [vmem:[%s11892_s2 + $0x102c] ss:$16 sps:$4 sm:$0xff]  }
 0x274   :  { %5760 = vmatpush2.bf16.msra.mxu1 %v8604_v45  ;;  %5794 = vmatprep.subr.bf16.mxu0 %v8615_v51 }
 0x275   :  { %5761 = vmatprep.subr.bf16.mxu1 %v8612_v48  ;;  %v8669_v48 = vld [vmem:[%s11892_s2 + $0x12ac] ss:$16 sps:$4 sm:$0xff]  }
 0x277   :  { %5795 = vmatpush2.bf16.msra.mxu0 %v8613_v3 }
 0x278   :  { %5762 = vmatpush2.bf16.msra.mxu1 %v8610_v54  ;;  %5796 = vmatprep.subr.bf16.mxu0 %v8621_v47  ;;  %v8667_v47 = vld [vmem:[%s11892_s2 + $0x12a8] ss:$16 sps:$4 sm:$0xff]  }
 0x279   :  { %5763 = vmatprep.subr.bf16.mxu1 %v8618_v52  ;;  %v8664_v52 = vld [vmem:[%s11892_s2 + $0x1028] ss:$16 sps:$4 sm:$0xff]  }
 0x27b   :  { %5797 = vmatpush2.bf16.msra.mxu0 %v8619_v57  ;;  %v8672_v57 = vld [vmem:[%s11892_s2 + $0x100c] ss:$16 sps:$4 sm:$0xff]  }
 0x27c   :  { %5764 = vmatpush2.bf16.msra.mxu1 %v8616_v56  ;;  %5798 = vmatprep.subr.bf16.mxu0 %v8627_v13  ;;  %v8673_v13 = vld [vmem:[%s11892_s2 + $0x1288] ss:$16 sps:$4 sm:$0xff]  }
 0x27d   :  { %5765 = vmatprep.subr.bf16.mxu1 %v8624_v26  ;;  %v8670_v26 = vld [vmem:[%s11892_s2 + $0x1008] ss:$16 sps:$4 sm:$0xff]  }
 0x27f   :  { %5799 = vmatpush2.bf16.msra.mxu0 %v8625_v53  ;;  %v8681_v53 = vld [vmem:[%s11892_s2 + $0x126c] ss:$16 sps:$4 sm:$0xff]  }
 0x280   :  { %5766 = vmatpush2.bf16.msra.mxu1 %v8622_v58  ;;  %5800 = vmatprep.subr.bf16.mxu0 %v8630_v63  ;;  %v8678_v58 = vld [vmem:[%s11892_s2 + $0x11ec] ss:$16 sps:$4 sm:$0xff]   ;;  %v8676_v63 = vld [vmem:[%s11892_s2 + $0x11e8] ss:$16 sps:$4 sm:$0xff]  }
 0x281   :  { %5817 = vmatprep.subr.bf16.mxu1 %v8633_v5  ;;  %v8679_v5 = vld [vmem:[%s11892_s2 + $0x1268] ss:$16 sps:$4 sm:$0xff]  }
 0x283   :  { %5768 = vmatmul.mubr.bf16.vlgmr.msra.gmra.mxu1 %v9890_v15  ;;  %v5523_v12 = vpop.f32.mrf.mxu1  ;;  %5801 = vmatpush2.bf16.msra.mxu0 %v8628_v62  ;;  %v8640_v15 = vld [vmem:[%s11892_s2 + $0xf28] ss:$16 sps:$4 sm:$0xff]   ;;  %v8684_v62 = vld [vmem:[%s11892_s2 + $0x11cc] ss:$16 sps:$4 sm:$0xff]  }
 0x284   :  { %5818 = vmatpush1.bf16.msra.mxu1 %v8631_v41  ;;  %5802 = vmatprep.subr.bf16.mxu0 %v8636_v60  ;;  %v5524_v40 = vadd.f32 %v5523_v12, %v834_v34  ;;  %v8687_v41 = vld [vmem:[%s11892_s2 + $0x124c] ss:$16 sps:$4 sm:$0xff]   ;;  %v8682_v60 = vld [vmem:[%s11892_s2 + $0x11c8] ss:$16 sps:$4 sm:$0xff]  }
 0x285   :  { %5819 = vmatprep.subr.bf16.mxu1 %v8639_v1  ;;  %v5525_v14 = vpop.f32.mrf.mxu1  ;;  %5849 = vmatprep.mubr.bf16.mxu1 %v9901_v22  ;;  %v8651_v22 = vld [vmem:[%s11892_s2 + $0x108c] ss:$16 sps:$4 sm:$0xff]   ;;  %v8685_v1 = vld [vmem:[%s11892_s2 + $0x1248] ss:$16 sps:$4 sm:$0xff]  }
 0x286   :  { %v5526_v44 = vadd.f32 %v5525_v14, %v838_v36  ;;  %v8696_v12 = vld [vmem:[%s11892_s2 + $0x118c] ss:$16 sps:$4 sm:$0xff]  }
 0x287   :  { %v5527_v59 = vpop.f32.mrf.mxu1  ;;  %5803 = vmatpush2.bf16.msra.mxu0 %v8634_v55  ;;  %v8690_v55 = vld [vmem:[%s11892_s2 + $0x11ac] ss:$16 sps:$4 sm:$0xff]  }
 0x288   :  { %5820 = vmatpush1.bf16.msra.mxu1 %v8637_v10  ;;  %5804 = vmatprep.subr.bf16.mxu0 %v8642_v11  ;;  %v8693_v10 = vld [vmem:[%s11892_s2 + $0x122c] ss:$16 sps:$4 sm:$0xff]   ;;  %v8688_v11 = vld [vmem:[%s11892_s2 + $0x11a8] ss:$16 sps:$4 sm:$0xff]  }
 0x289   :  { %5821 = vmatprep.subr.bf16.mxu1 %v8645_v7  ;;  %v5528_v24 = vpop.f32.mrf.mxu1  ;;  %v8691_v7 = vld [vmem:[%s11892_s2 + $0x1228] ss:$16 sps:$4 sm:$0xff]   ;;  %v8699_v14 = vld [vmem:[%s11892_s2 + $0x120c] ss:$16 sps:$4 sm:$0xff]  }
 0x28a   :  { %v8694_v59 = vld [vmem:[%s11892_s2 + $0x1188] ss:$16 sps:$4 sm:$0xff]   ;;  %v8708_v24 = vld [vmem:[%s11892_s2 + $0x114c] ss:$16 sps:$4 sm:$0xff]  }
 0x28b   :  { %5805 = vmatpush2.bf16.msra.mxu0 %v8640_v15  ;;  %v8697_v15 = vld [vmem:[%s11892_s2 + $0x1208] ss:$16 sps:$4 sm:$0xff]   ;;  %v8717_v34 = vld [vmem:[%s11892_s2 + $0x13ac] ss:$16 sps:$4 sm:$0xff]  }
 0x28c   :  { %5822 = vmatpush1.bf16.msra.mxu1 %v8643_v17  ;;  %5806 = vmatprep.subr.bf16.mxu0 %v8648_v39  ;;  %v8702_v17 = vld [vmem:[%s11892_s2 + $0x116c] ss:$16 sps:$4 sm:$0xff]   ;;  %v8700_v39 = vld [vmem:[%s11892_s2 + $0x1168] ss:$16 sps:$4 sm:$0xff]  }
 0x28d   :  { %5823 = vmatprep.subr.bf16.mxu1 %v8651_v22  ;;  %v8703_v22 = vld [vmem:[%s11892_s2 + $0x13e8] ss:$16 sps:$4 sm:$0xff]   ;;  %v8720_v36 = vld [vmem:[%s11892_s2 + $0x110c] ss:$16 sps:$4 sm:$0xff]  }
 0x28f   :  { %5807 = vmatpush2.bf16.msra.mxu0 %v8646_v30  ;;  %v8706_v30 = vld [vmem:[%s11892_s2 + $0x1148] ss:$16 sps:$4 sm:$0xff]  }
 0x290   :  { %5824 = vmatpush1.bf16.msra.mxu1 %v8649_v33  ;;  %5858 = vmatprep.subr.bf16.mxu0 %v8657_v8  ;;  %v8709_v33 = vld [vmem:[%s11892_s2 + $0x13c8] ss:$16 sps:$4 sm:$0xff]  }
 0x291   :  { %5825 = vmatprep.subr.bf16.mxu1 %v8654_v43  ;;  %v8712_v43 = vld [vmem:[%s11892_s2 + $0x1128] ss:$16 sps:$4 sm:$0xff]  }
 0x292   :  { %v5564_v45 = vpop.f32.mrf.mxu0  ;;  %5809 = vmatmul.mubr.bf16.vlgmr.msra.gmra.mxu0 %v9911_v25  ;;  %v8715_v8 = vld [vmem:[%s11892_s2 + $0x13a8] ss:$16 sps:$4 sm:$0xff]  }
 0x293   :  { %v11244_v51 = vadd.f32 %v5564_v45, %v5524_v40  ;;  %5859 = vmatpush1.bf16.msra.mxu0 %v8655_v19  ;;  %5890 = vmatprep.mubr.bf16.mxu0 %v9925_v31  ;;  %v8675_v31 = vld [vmem:[%s11892_s2 + $0x128c] ss:$16 sps:$4 sm:$0xff]   ;;  %v8718_v19 = vld [vmem:[%s11892_s2 + $0x1108] ss:$16 sps:$4 sm:$0xff]  }
 0x294   :  { %5826 = vmatpush1.bf16.msra.mxu1 %v8652_v37  ;;  %v5566_v54 = vpop.f32.mrf.mxu0  ;;  %5860 = vmatprep.subr.bf16.mxu0 %v8663_v35  ;;  %v8723_v37 = vld [vmem:[%s11892_s2 + $0x138c] ss:$16 sps:$4 sm:$0xff]  }
 0x295   :  { %5827 = vmatprep.subr.bf16.mxu1 %v8660_v50  ;;  %v11246_v3 = vadd.f32 %v5566_v54, %v5526_v44  ;;  %v8721_v50 = vld [vmem:[%s11892_s2 + $0x1388] ss:$16 sps:$4 sm:$0xff]   ;;  %v8726_v35 = vld [vmem:[%s11892_s2 + $0x136c] ss:$16 sps:$4 sm:$0xff]  }
 0x296   :  { %v5568_v25 = vpop.f32.mrf.mxu0  ;;  %v8729_v40 = vld [vmem:[%s11892_s2 + $0x14ec] ss:$16 sps:$4 sm:$0xff]   ;;  %v8724_v44 = vld [vmem:[%s11892_s2 + $0x1368] ss:$16 sps:$4 sm:$0xff]  }
 0x297   :  { %5861 = vmatpush1.bf16.msra.mxu0 %v8661_v23  ;;  %v8732_v23 = vld [vmem:[%s11892_s2 + $0x134c] ss:$16 sps:$4 sm:$0xff]   ;;  %v8730_v54 = vld [vmem:[%s11892_s2 + $0x1348] ss:$16 sps:$4 sm:$0xff]  }
 0x298   :  { %5828 = vmatpush1.bf16.msra.mxu1 %v8658_v0  ;;  %v5569_v56 = vpop.f32.mrf.mxu0  ;;  %5862 = vmatprep.subr.bf16.mxu0 %v8669_v48  ;;  %v8727_v0 = vld [vmem:[%s11892_s2 + $0x14e8] ss:$16 sps:$4 sm:$0xff]   ;;  %v8735_v45 = vld [vmem:[%s11892_s2 + $0x14cc] ss:$16 sps:$4 sm:$0xff]  }
 0x299   :  { %5829 = vmatprep.subr.bf16.mxu1 %v8666_v46  ;;  %v8733_v25 = vld [vmem:[%s11892_s2 + $0x14c8] ss:$16 sps:$4 sm:$0xff]  }
 0x29b   :  { %5863 = vmatpush1.bf16.msra.mxu0 %v8667_v47  ;;  %v8738_v47 = vld [vmem:[%s11892_s2 + $0x132c] ss:$16 sps:$4 sm:$0xff]  }
 0x29c   :  { %5830 = vmatpush1.bf16.msra.mxu1 %v8664_v52  ;;  %5864 = vmatprep.subr.bf16.mxu0 %v8675_v31  ;;  %v8739_v31 = vld [vmem:[%s11892_s2 + $0x14a8] ss:$16 sps:$4 sm:$0xff]  }
 0x29d   :  { %5831 = vmatprep.subr.bf16.mxu1 %v8672_v57  ;;  %v8736_v57 = vld [vmem:[%s11892_s2 + $0x1328] ss:$16 sps:$4 sm:$0xff]  }
 0x29f   :  { %5865 = vmatpush1.bf16.msra.mxu0 %v8673_v13  ;;  %v8742_v13 = vld [vmem:[%s11892_s2 + $0x1308] ss:$16 sps:$4 sm:$0xff]  }
 0x2a0   :  { %5832 = vmatpush1.bf16.msra.mxu1 %v8670_v26  ;;  %5866 = vmatprep.subr.bf16.mxu0 %v8681_v53  ;;  %v8744_v26 = vld [vmem:[%s11892_s2 + $0x130c] ss:$16 sps:$4 sm:$0xff]  }
 0x2a1   :  { %5833 = vmatprep.subr.bf16.mxu1 %v8678_v58  ;;  %v8745_v58 = vld [vmem:[%s11892_s2 + $0x1488] ss:$16 sps:$4 sm:$0xff]   ;;  %v8750_v53 = vld [vmem:[%s11892_s2 + $0x146c] ss:$16 sps:$4 sm:$0xff]  }
 0x2a3   :  { %5867 = vmatpush1.bf16.msra.mxu0 %v8679_v5  ;;  %v8748_v5 = vld [vmem:[%s11892_s2 + $0x1468] ss:$16 sps:$4 sm:$0xff]  }
 0x2a4   :  { %5834 = vmatpush2.bf16.msra.mxu1 %v8676_v63  ;;  %5868 = vmatprep.subr.bf16.mxu0 %v8687_v41  ;;  %v8753_v63 = vld [vmem:[%s11892_s2 + $0x16ec] ss:$16 sps:$4 sm:$0xff]  }
 0x2a5   :  { %5835 = vmatprep.subr.bf16.mxu1 %v8684_v62  ;;  %v8751_v62 = vld [vmem:[%s11892_s2 + $0x16e8] ss:$16 sps:$4 sm:$0xff]   ;;  %v8756_v41 = vld [vmem:[%s11892_s2 + $0x144c] ss:$16 sps:$4 sm:$0xff]  }
 0x2a7   :  { %5869 = vmatpush1.bf16.msra.mxu0 %v8685_v1 }
 0x2a8   :  { %5836 = vmatpush2.bf16.msra.mxu1 %v8682_v60  ;;  %5870 = vmatprep.subr.bf16.mxu0 %v8693_v10  ;;  %v8759_v60 = vld [vmem:[%s11892_s2 + $0x16cc] ss:$16 sps:$4 sm:$0xff]   ;;  %v8754_v10 = vld [vmem:[%s11892_s2 + $0x1448] ss:$16 sps:$4 sm:$0xff]  }
 0x2a9   :  { %5837 = vmatprep.subr.bf16.mxu1 %v8690_v55 }
 0x2ab   :  { %5871 = vmatpush1.bf16.msra.mxu0 %v8691_v7 }
 0x2ac   :  { %5838 = vmatpush2.bf16.msra.mxu1 %v8688_v11  ;;  %5872 = vmatprep.subr.bf16.mxu0 %v8699_v14  ;;  %v8757_v11 = vld [vmem:[%s11892_s2 + $0x16c8] ss:$16 sps:$4 sm:$0xff]  }
 0x2ad   :  { %5839 = vmatprep.subr.bf16.mxu1 %v8696_v12  ;;  %v8762_v12 = vld [vmem:[%s11892_s2 + $0x142c] ss:$16 sps:$4 sm:$0xff]  }
 0x2af   :  { %5873 = vmatpush1.bf16.msra.mxu0 %v8697_v15  ;;  %v8760_v15 = vld [vmem:[%s11892_s2 + $0x1428] ss:$16 sps:$4 sm:$0xff]  }
 0x2b0   :  { %5840 = vmatpush2.bf16.msra.mxu1 %v8694_v59  ;;  %5874 = vmatprep.subr.bf16.mxu0 %v8705_v20 }
 0x2b1   :  { %5841 = vmatprep.subr.bf16.mxu1 %v8702_v17  ;;  %v8763_v17 = vld [vmem:[%s11892_s2 + $0x16a8] ss:$16 sps:$4 sm:$0xff]  }
 0x2b3   :  { %5875 = vmatpush2.bf16.msra.mxu0 %v8703_v22  ;;  %v8766_v22 = vld [vmem:[%s11892_s2 + $0x1408] ss:$16 sps:$4 sm:$0xff]  }
 0x2b4   :  { %5842 = vmatpush2.bf16.msra.mxu1 %v8700_v39  ;;  %5876 = vmatprep.subr.bf16.mxu0 %v8711_v28  ;;  %v8768_v39 = vld [vmem:[%s11892_s2 + $0x140c] ss:$16 sps:$4 sm:$0xff]  }
 0x2b5   :  { %5843 = vmatprep.subr.bf16.mxu1 %v8708_v24  ;;  %v8769_v24 = vld [vmem:[%s11892_s2 + $0x1688] ss:$16 sps:$4 sm:$0xff]   ;;  %v8774_v28 = vld [vmem:[%s11892_s2 + $0x15ec] ss:$16 sps:$4 sm:$0xff]  }
 0x2b7   :  { %5877 = vmatpush2.bf16.msra.mxu0 %v8709_v33  ;;  %v8772_v33 = vld [vmem:[%s11892_s2 + $0x15e8] ss:$16 sps:$4 sm:$0xff]  }
 0x2b8   :  { %5844 = vmatpush2.bf16.msra.mxu1 %v8706_v30  ;;  %5878 = vmatprep.subr.bf16.mxu0 %v8717_v34  ;;  %v8777_v30 = vld [vmem:[%s11892_s2 + $0x166c] ss:$16 sps:$4 sm:$0xff]  }
 0x2b9   :  { %5845 = vmatprep.subr.bf16.mxu1 %v8714_v49  ;;  %v8775_v49 = vld [vmem:[%s11892_s2 + $0x1668] ss:$16 sps:$4 sm:$0xff]   ;;  %v8780_v34 = vld [vmem:[%s11892_s2 + $0x15cc] ss:$16 sps:$4 sm:$0xff]  }
 0x2bb   :  { %5879 = vmatpush2.bf16.msra.mxu0 %v8715_v8  ;;  %v8778_v8 = vld [vmem:[%s11892_s2 + $0x15c8] ss:$16 sps:$4 sm:$0xff]  }
 0x2bc   :  { %5846 = vmatpush2.bf16.msra.mxu1 %v8712_v43  ;;  %5880 = vmatprep.subr.bf16.mxu0 %v8723_v37  ;;  %v8783_v43 = vld [vmem:[%s11892_s2 + $0x164c] ss:$16 sps:$4 sm:$0xff]  }
 0x2bd   :  { %5847 = vmatprep.subr.bf16.mxu1 %v8720_v36  ;;  %v8781_v36 = vld [vmem:[%s11892_s2 + $0x1648] ss:$16 sps:$4 sm:$0xff]   ;;  %v8786_v37 = vld [vmem:[%s11892_s2 + $0x15ac] ss:$16 sps:$4 sm:$0xff]  }
 0x2bf   :  { %5881 = vmatpush2.bf16.msra.mxu0 %v8721_v50  ;;  %v8784_v50 = vld [vmem:[%s11892_s2 + $0x15a8] ss:$16 sps:$4 sm:$0xff]  }
 0x2c0   :  { %5848 = vmatpush2.bf16.msra.mxu1 %v8718_v19  ;;  %5882 = vmatprep.subr.bf16.mxu0 %v8726_v35  ;;  %v8789_v19 = vld [vmem:[%s11892_s2 + $0x162c] ss:$16 sps:$4 sm:$0xff]   ;;  %v8787_v35 = vld [vmem:[%s11892_s2 + $0x1628] ss:$16 sps:$4 sm:$0xff]  }
 0x2c1   :  { %5899 = vmatprep.subr.bf16.mxu1 %v8729_v40  ;;  %v8792_v40 = vld [vmem:[%s11892_s2 + $0x158c] ss:$16 sps:$4 sm:$0xff]  }
 0x2c3   :  { %v5605_v46 = vpop.f32.mrf.mxu1  ;;  %5850 = vmatmul.mubr.bf16.vlgmr.msra.gmra.mxu1 %v10112_v18  ;;  %5883 = vmatpush2.bf16.msra.mxu0 %v8724_v44  ;;  %v8741_v18 = vld [vmem:[%s11892_s2 + $0x14ac] ss:$16 sps:$4 sm:$0xff]  }
 0x2c4   :  { %v5606_v48 = vadd.f32 %v5605_v46, %v11244_v51  ;;  %5900 = vmatpush1.bf16.msra.mxu1 %v8727_v0  ;;  %5884 = vmatprep.subr.bf16.mxu0 %v8732_v23  ;;  %v8795_v44 = vld [vmem:[%s11892_s2 + $0x160c] ss:$16 sps:$4 sm:$0xff]   ;;  %v8790_v0 = vld [vmem:[%s11892_s2 + $0x1588] ss:$16 sps:$4 sm:$0xff]  }
 0x2c5   :  { %v5607_v52 = vpop.f32.mrf.mxu1  ;;  %5901 = vmatprep.subr.bf16.mxu1 %v8735_v45  ;;  %5931 = vmatprep.mubr.bf16.mxu1 %v10133_v29  ;;  %v8747_v29 = vld [vmem:[%s11892_s2 + $0x148c] ss:$16 sps:$4 sm:$0xff]   ;;  %v8793_v23 = vld [vmem:[%s11892_s2 + $0x1608] ss:$16 sps:$4 sm:$0xff]  }
 0x2c6   :  { %v5608_v51 = vadd.f32 %v5607_v52, %v11246_v3  ;;  %v8798_v45 = vld [vmem:[%s11892_s2 + $0x156c] ss:$16 sps:$4 sm:$0xff]  }
 0x2c7   :  { %v5609_v56 = vpop.f32.mrf.mxu1  ;;  %5885 = vmatpush2.bf16.msra.mxu0 %v8730_v54  ;;  %v8801_v46 = vld [vmem:[%s11892_s2 + $0x17ec] ss:$16 sps:$4 sm:$0xff]   ;;  %v8799_v54 = vld [vmem:[%s11892_s2 + $0x17e8] ss:$16 sps:$4 sm:$0xff]  }
 0x2c8   :  { %5902 = vmatpush1.bf16.msra.mxu1 %v8733_v25  ;;  %5886 = vmatprep.subr.bf16.mxu0 %v8738_v47  ;;  %v8804_v25 = vld [vmem:[%s11892_s2 + $0x154c] ss:$16 sps:$4 sm:$0xff]   ;;  %v8802_v47 = vld [vmem:[%s11892_s2 + $0x1548] ss:$16 sps:$4 sm:$0xff]  }
 0x2c9   :  { %5903 = vmatprep.subr.bf16.mxu1 %v8741_v18  ;;  %v5610_v3 = vpop.f32.mrf.mxu1  ;;  %v8807_v52 = vld [vmem:[%s11892_s2 + $0x17cc] ss:$16 sps:$4 sm:$0xff]   ;;  %v8805_v18 = vld [vmem:[%s11892_s2 + $0x17c8] ss:$16 sps:$4 sm:$0xff]  }
 0x2ca   :  { %v8813_v56 = vld [vmem:[%s11892_s2 + $0x17ac] ss:$16 sps:$4 sm:$0xff]   ;;  %v6027_v3 = vmul.f32 0.01, %v11041_v9 }
 0x2cb   :  { %5887 = vmatpush2.bf16.msra.mxu0 %v8736_v57  ;;  %v8808_v57 = vld [vmem:[%s11892_s2 + $0x1528] ss:$16 sps:$4 sm:$0xff]  }
 0x2cc   :  { %5904 = vmatpush1.bf16.msra.mxu1 %v8739_v31  ;;  %5888 = vmatprep.subr.bf16.mxu0 %v8744_v26  ;;  %v8811_v31 = vld [vmem:[%s11892_s2 + $0x17a8] ss:$16 sps:$4 sm:$0xff]   ;;  %v8816_v26 = vld [vmem:[%s11892_s2 + $0x150c] ss:$16 sps:$4 sm:$0xff]  }
 0x2cd   :  { %5905 = vmatprep.subr.bf16.mxu1 %v8747_v29  ;;  %v8819_v29 = vld [vmem:[%s11892_s2 + $0x178c] ss:$16 sps:$4 sm:$0xff]  }
 0x2cf   :  { %5889 = vmatpush2.bf16.msra.mxu0 %v8742_v13  ;;  %v8814_v13 = vld [vmem:[%s11892_s2 + $0x1508] ss:$16 sps:$4 sm:$0xff]  }
 0x2d0   :  { %5906 = vmatpush1.bf16.msra.mxu1 %v8745_v58  ;;  %5940 = vmatprep.subr.bf16.mxu0 %v8753_v63  ;;  %v8817_v58 = vld [vmem:[%s11892_s2 + $0x1788] ss:$16 sps:$4 sm:$0xff]   ;;  %v8825_v63 = vld [vmem:[%s11895_s4 + $0x74] ss:$8 sps:$4 sm:$0xff]  }
 0x2d1   :  { %5907 = vmatprep.subr.bf16.mxu1 %v8750_v53  ;;  %v8822_v53 = vld [vmem:[%s11892_s2 + $0x176c] ss:$16 sps:$4 sm:$0xff]  }
 0x2d2   :  { %v5646_v1 = vpop.f32.mrf.mxu0  ;;  %5891 = vmatmul.mubr.bf16.vlgmr.msra.gmra.mxu0 %v10137_v6  ;;  %v8765_v6 = vld [vmem:[%s11892_s2 + $0x16ac] ss:$16 sps:$4 sm:$0xff]  }
 0x2d3   :  { %v11434_v55 = vadd.f32 %v5646_v1, %v5606_v48  ;;  %5941 = vmatpush1.bf16.msra.mxu0 %v8751_v62  ;;  %5972 = vmatprep.mubr.bf16.mxu0 %v10153_v38  ;;  %v8771_v38 = vld [vmem:[%s11892_s2 + $0x168c] ss:$16 sps:$4 sm:$0xff]   ;;  %v8796_v48 = vld [vmem:[%s11892_s2 + $0x1568] ss:$16 sps:$4 sm:$0xff]  }
 0x2d4   :  { %5908 = vmatpush1.bf16.msra.mxu1 %v8748_v5  ;;  %v5648_v7 = vpop.f32.mrf.mxu0  ;;  %5942 = vmatprep.subr.bf16.mxu0 %v8759_v60  ;;  %v8820_v5 = vld [vmem:[%s11892_s2 + $0x1768] ss:$16 sps:$4 sm:$0xff]   ;;  %v8828_v60 = vld [vmem:[%s11892_s2 + $0x174c] ss:$16 sps:$4 sm:$0xff]  }
 0x2d5   :  { %5909 = vmatprep.subr.bf16.mxu1 %v8756_v41  ;;  %v11448_v14 = vadd.f32 %v5648_v7, %v5608_v51  ;;  %v8810_v51 = vld [vmem:[%s11892_s2 + $0x152c] ss:$16 sps:$4 sm:$0xff]   ;;  %v8823_v62 = vld [vmem:[%s11895_s4 + $0x70] ss:$8 sps:$4 sm:$0xff]   ;;  %v6031_v41 = vsel %vm6023_vm1, %v11041_v9, %v6027_v3 }
 0x2d6   :  { %v5650_v59 = vpop.f32.mrf.mxu0  ;;  %v8831_v1 = vld [vmem:[%s11895_s4 + $0x64] ss:$8 sps:$4 sm:$0xff]   ;;  %v8826_v9 = vld [vmem:[%s11892_s2 + $0x1748] ss:$16 sps:$4 sm:$0xff]  }
 0x2d7   :  { %5943 = vmatpush1.bf16.msra.mxu0 %v8757_v11  ;;  %v6035_v11 = vpack.c.bf16 %v6031_v41, %v6031_v41  ;;  %v8874_v3 = vld [vmem:[%s11895_s4 + $0xd0] ss:$8 sps:$4 sm:$0xff]  }
 0x2d8   :  { %5910 = vmatpush1.bf16.msra.mxu1 %v8754_v10  ;;  %v5651_v20 = vpop.f32.mrf.mxu0  ;;  %5944 = vmatprep.subr.bf16.mxu0 %v8765_v6  ;;  %v8880_v41 = vld [vmem:[%s11895_s4 + $0xb0] ss:$8 sps:$4 sm:$0xff]  }
 0x2d9   :  { %5911 = vmatprep.subr.bf16.mxu1 %v8762_v12  ;;  %v8829_v12 = vld [vmem:[%s11895_s4 + $0x60] ss:$8 sps:$4 sm:$0xff]   ;;  %v8835_v20 = vld [vmem:[%s11895_s4 + $0x50] ss:$8 sps:$4 sm:$0xff]  }
 0x2db   :  { %5945 = vmatpush1.bf16.msra.mxu0 %v8763_v17  ;;  %v8832_v17 = vld [vmem:[%s11892_s2 + $0x1728] ss:$16 sps:$4 sm:$0xff]  }
 0x2dc   :  { %5912 = vmatpush1.bf16.msra.mxu1 %v8760_v15  ;;  %5946 = vmatprep.subr.bf16.mxu0 %v8771_v38 }
 0x2dd   :  { %5913 = vmatprep.subr.bf16.mxu1 %v8768_v39  ;;  %v8840_v39 = vld [vmem:[%s11892_s2 + $0x170c] ss:$16 sps:$4 sm:$0xff]  }
 0x2df   :  { %5947 = vmatpush1.bf16.msra.mxu0 %v8769_v24  ;;  %v8841_v24 = vld [vmem:[%s11895_s4 + $0x40] ss:$8 sps:$4 sm:$0xff]  }
 0x2e0   :  { %5914 = vmatpush1.bf16.msra.mxu1 %v8766_v22  ;;  %5948 = vmatprep.subr.bf16.mxu0 %v8777_v30  ;;  %v8838_v22 = vld [vmem:[%s11892_s2 + $0x1708] ss:$16 sps:$4 sm:$0xff]   ;;  %v8849_v30 = vld [vmem:[%s11895_s4 + $0x34] ss:$8 sps:$4 sm:$0xff]  }
 0x2e1   :  { %5915 = vmatprep.subr.bf16.mxu1 %v8774_v28  ;;  %v8846_v28 = vld [vmem:[%s11892_s2 + $0x186c] ss:$16 sps:$4 sm:$0xff]  }
 0x2e3   :  { %5949 = vmatpush1.bf16.msra.mxu0 %v8775_v49  ;;  %v8847_v49 = vld [vmem:[%s11895_s4 + $0x30] ss:$8 sps:$4 sm:$0xff]  }
 0x2e4   :  { %5916 = vmatpush2.bf16.msra.mxu1 %v8772_v33  ;;  %5950 = vmatprep.subr.bf16.mxu0 %v8783_v43  ;;  %v8844_v33 = vld [vmem:[%s11892_s2 + $0x1868] ss:$16 sps:$4 sm:$0xff]   ;;  %v8855_v43 = vld [vmem:[%s11895_s4 + $0x24] ss:$8 sps:$4 sm:$0xff]  }
 0x2e5   :  { %5917 = vmatprep.subr.bf16.mxu1 %v8780_v34  ;;  %v8852_v34 = vld [vmem:[%s11892_s2 + $0x184c] ss:$16 sps:$4 sm:$0xff]  }
 0x2e7   :  { %5951 = vmatpush1.bf16.msra.mxu0 %v8781_v36 }
 0x2e8   :  { %5918 = vmatpush2.bf16.msra.mxu1 %v8778_v8  ;;  %5952 = vmatprep.subr.bf16.mxu0 %v8789_v19  ;;  %v8853_v19 = vld [vmem:[%s11895_s4 + $0x20] ss:$8 sps:$4 sm:$0xff]  }
 0x2e9   :  { %5919 = vmatprep.subr.bf16.mxu1 %v8786_v37  ;;  %v8850_v37 = vld [vmem:[%s11892_s2 + $0x1848] ss:$16 sps:$4 sm:$0xff]  }
 0x2eb   :  { %5953 = vmatpush1.bf16.msra.mxu0 %v8787_v35  ;;  %v8858_v35 = vld [vmem:[%s11892_s2 + $0x182c] ss:$16 sps:$4 sm:$0xff]  }
 0x2ec   :  { %5920 = vmatpush2.bf16.msra.mxu1 %v8784_v50  ;;  %5954 = vmatprep.subr.bf16.mxu0 %v8795_v44 }
 0x2ed   :  { %5921 = vmatprep.subr.bf16.mxu1 %v8792_v40 }
 0x2ef   :  { %5955 = vmatpush1.bf16.msra.mxu0 %v8793_v23  ;;  %v8859_v23 = vld [vmem:[%s11895_s4 + $0x10] ss:$8 sps:$4 sm:$0xff]  }
 0x2f0   :  { %5922 = vmatpush2.bf16.msra.mxu1 %v8790_v0  ;;  %5956 = vmatprep.subr.bf16.mxu0 %v8801_v46  ;;  %v8856_v0 = vld [vmem:[%s11892_s2 + $0x1828] ss:$16 sps:$4 sm:$0xff]   ;;  %v8864_v46 = vld [vmem:[%s11892_s2 + $0x180c] ss:$16 sps:$4 sm:$0xff]  }
 0x2f1   :  { %5923 = vmatprep.subr.bf16.mxu1 %v8798_v45 }
 0x2f3   :  { %5957 = vmatpush2.bf16.msra.mxu0 %v8799_v54  ;;  %v7557_v54 = vld.sshfl [vmem:[%s11896_s5] sm:$0x33 pattern:$0x76325410] }
 0x2f4   :  { %5924 = vmatpush2.bf16.msra.mxu1 %v8796_v48  ;;  %5958 = vmatprep.subr.bf16.mxu0 %v8807_v52  ;;  %v8867_v48 = vld [vmem:[%s11895_s4 + $0x4] ss:$8 sps:$4 sm:$0xff]   ;;  %v8865_v52 = vld [vmem:[%s11895_s4] ss:$8 sps:$4 sm:$0xff]  }
 0x2f5   :  { %5925 = vmatprep.subr.bf16.mxu1 %v8804_v25  ;;  %v8862_v25 = vld [vmem:[%s11892_s2 + $0x1808] ss:$16 sps:$4 sm:$0xff]  }
 0x2f7   :  { %5959 = vmatpush2.bf16.msra.mxu0 %v8805_v18  ;;  %v6112_v18 = vcombine.high %v7557_v54, %v7557_v54 }
 0x2f8   :  { %5926 = vmatpush2.bf16.msra.mxu1 %v8802_v47  ;;  %5960 = vmatprep.subr.bf16.mxu0 %v8813_v56  ;;  %v8870_v47 = vld [vmem:[%s11895_s4 + $0xf4] ss:$8 sps:$4 sm:$0xff]   ;;  %v8873_v56 = vld [vmem:[%s11895_s4 + $0xe4] ss:$8 sps:$4 sm:$0xff]  }
 0x2f9   :  { %5927 = vmatprep.subr.bf16.mxu1 %v8810_v51  ;;  %v8868_v51 = vld [vmem:[%s11895_s4 + $0xf0] ss:$8 sps:$4 sm:$0xff]  }
 0x2fb   :  { %5961 = vmatpush2.bf16.msra.mxu0 %v8811_v31  ;;  %v8894_v31 = vld [vmem:[%s11895_s4 + $0x174] ss:$8 sps:$4 sm:$0xff]  }
 0x2fc   :  { %5928 = vmatpush2.bf16.msra.mxu1 %v8808_v57  ;;  %5962 = vmatprep.subr.bf16.mxu0 %v8819_v29  ;;  %v6119_v57 = vsel %vm6117_vm2, %v7557_v54, 0  ;;  %v8876_v29 = vld [vmem:[%s11895_s4 + $0xd4] ss:$8 sps:$4 sm:$0xff]  }
 0x2fd   :  { %5929 = vmatprep.subr.bf16.mxu1 %v8816_v26  ;;  %v8871_v26 = vld [vmem:[%s11895_s4 + $0xe0] ss:$8 sps:$4 sm:$0xff]   ;;  %v8930_v54 = vld [vmem:[%s11895_s4 + $0x1b4] ss:$8 sps:$4 sm:$0xff]  }
 0x2ff   :  { %5963 = vmatpush2.bf16.msra.mxu0 %v8817_v58  ;;  %v8897_v58 = vld [vmem:[%s11895_s4 + $0x164] ss:$8 sps:$4 sm:$0xff]  }
 0x300   :  { %5930 = vmatpush2.bf16.msra.mxu1 %v8814_v13  ;;  %5964 = vmatprep.subr.bf16.mxu0 %v8822_v53  ;;  %v8892_v13 = vld [vmem:[%s11895_s4 + $0x170] ss:$8 sps:$4 sm:$0xff]   ;;  %v8877_v53 = vld [vmem:[%s11895_s4 + $0xc0] ss:$8 sps:$4 sm:$0xff]  }
 0x301   :  { %6485 = vmatprep.subr.bf16.mxu1 %v8825_v63  ;;  %v8895_v63 = vld [vmem:[%s11895_s4 + $0x160] ss:$8 sps:$4 sm:$0xff]  }
 0x303   :  { %v5687_v10 = vpop.f32.mrf.mxu1  ;;  %5932 = vmatmul.mubr.bf16.vlgmr.msra.gmra.mxu1 %v10329_v27  ;;  %5965 = vmatpush2.bf16.msra.mxu0 %v8820_v5  ;;  %v8834_v27 = vld [vmem:[%s11892_s2 + $0x172c] ss:$16 sps:$4 sm:$0xff]  }
 0x304   :  { %v5688_v7 = vadd.f32 %v5687_v10, %v11434_v55  ;;  %6486 = vmatpush1.bf16.msra.mxu1 %v8823_v62  ;;  %6517 = vmatprep.mubr.bf16.mxu1 %v6035_v11  ;;  %v8837_v55 = vld [vmem:[%s11895_s4 + $0x54] ss:$8 sps:$4 sm:$0xff]   ;;  %v8903_v10 = vld [vmem:[%s11895_s4 + $0x144] ss:$8 sps:$4 sm:$0xff]   ;;  %v8883_v11 = vld [vmem:[%s11895_s4 + $0xa0] ss:$8 sps:$4 sm:$0xff]  }
 0x305   :  { %v5689_v6 = vpop.f32.mrf.mxu1  ;;  %5966 = vmatprep.subr.bf16.mxu0 %v8828_v60  ;;  %6487 = vmatprep.subr.bf16.mxu1 %v8831_v1  ;;  %v8882_v5 = vld [vmem:[%s11895_s4 + $0xb4] ss:$8 sps:$4 sm:$0xff]   ;;  %v8898_v60 = vld [vmem:[%s11895_s4 + $0x150] ss:$8 sps:$4 sm:$0xff]   ;;  %v8885_v1 = vld [vmem:[%s11895_s4 + $0xa4] ss:$8 sps:$4 sm:$0xff]  }
 0x306   :  { %v5690_v59 = vadd.f32 %v5689_v6, %v11448_v14  ;;  %v8843_v14 = vld [vmem:[%s11895_s4 + $0x44] ss:$8 sps:$4 sm:$0xff]   ;;  %v8900_v62 = vld [vmem:[%s11895_s4 + $0x154] ss:$8 sps:$4 sm:$0xff]   ;;  %v8886_v6 = vld [vmem:[%s11895_s4 + $0x90] ss:$8 sps:$4 sm:$0xff]  }
 0x307   :  { %v5691_v15 = vpop.f32.mrf.mxu1  ;;  %5967 = vmatpush2.bf16.msra.mxu0 %v8826_v9  ;;  %v8888_v9 = vld [vmem:[%s11895_s4 + $0x94] ss:$8 sps:$4 sm:$0xff]  }
 0x308   :  { %6488 = vmatpush1.bf16.msra.mxu1 %v8829_v12  ;;  %5968 = vmatprep.subr.bf16.mxu0 %v8834_v27  ;;  %v8906_v12 = vld [vmem:[%s11895_s4 + $0x134] ss:$8 sps:$4 sm:$0xff]   ;;  %v8904_v27 = vld [vmem:[%s11895_s4 + $0x130] ss:$8 sps:$4 sm:$0xff]   ;;  %v6026_v15 = vmul.f32 0.01, %v11027_v61 }
 0x309   :  { %6489 = vmatprep.subr.bf16.mxu1 %v8837_v55  ;;  %v5692_v38 = vpop.f32.mrf.mxu1  ;;  %v8891_v55 = vld [vmem:[%s11895_s4 + $0x84] ss:$8 sps:$4 sm:$0xff]  }
 0x30b   :  { %5969 = vmatpush2.bf16.msra.mxu0 %v8832_v17  ;;  %v8889_v17 = vld [vmem:[%s11895_s4 + $0x80] ss:$8 sps:$4 sm:$0xff]  }
 0x30c   :  { %6490 = vmatpush1.bf16.msra.mxu1 %v8835_v20  ;;  %5970 = vmatprep.subr.bf16.mxu0 %v8840_v39  ;;  %v8907_v20 = vld [vmem:[%s11895_s4 + $0x120] ss:$8 sps:$4 sm:$0xff]   ;;  %v6030_v39 = vsel %vm6022_vm4, %v11027_v61, %v6026_v15  ;;  %v8915_v61 = vld [vmem:[%s11895_s4 + $0x104] ss:$8 sps:$4 sm:$0xff]  }
 0x30d   :  { %6491 = vmatprep.subr.bf16.mxu1 %v8843_v14  ;;  %v6034_v14 = vpack.c.bf16 %v6030_v39, %v6030_v39 }
 0x30f   :  { %5971 = vmatpush2.bf16.msra.mxu0 %v8838_v22 }
 0x310   :  { %6492 = vmatpush1.bf16.msra.mxu1 %v8841_v24  ;;  %5989 = vmatprep.subr.bf16.mxu0 %v8846_v28  ;;  %v8912_v28 = vld [vmem:[%s11895_s4 + $0x114] ss:$8 sps:$4 sm:$0xff]  }
 0x311   :  { %6493 = vmatprep.subr.bf16.mxu1 %v8849_v30 }
 0x312   :  { %v5728_v8 = vpop.f32.mrf.mxu0  ;;  %5973 = vmatmul.mubr.bf16.vlgmr.msra.gmra.mxu0 %v10351_v32  ;;  %v8861_v32 = vld [vmem:[%s11895_s4 + $0x14] ss:$8 sps:$4 sm:$0xff]  }
 0x313   :  { %v11638_v36 = vadd.f32 %v5728_v8, %v5688_v7  ;;  %5990 = vmatpush1.bf16.msra.mxu0 %v8844_v33  ;;  %6013 = vmatprep.mubr.bf16.mxu0 %v8958_v2  ;;  %v8901_v7 = vld [vmem:[%s11895_s4 + $0x140] ss:$8 sps:$4 sm:$0xff]   ;;  %v8910_v33 = vld [vmem:[%s11895_s4 + $0x110] ss:$8 sps:$4 sm:$0xff]   ;;  %v8918_v8 = vld [vmem:[%s11895_s4 + $0x1f4] ss:$8 sps:$4 sm:$0xff]  }
 0x314   :  { %6494 = vmatpush1.bf16.msra.mxu1 %v8847_v49  ;;  %v5730_v50 = vpop.f32.mrf.mxu0  ;;  %5991 = vmatprep.subr.bf16.mxu0 %v8852_v34  ;;  %v8913_v34 = vld [vmem:[%s11895_s4 + $0x100] ss:$8 sps:$4 sm:$0xff]  }
 0x315   :  { %6495 = vmatprep.subr.bf16.mxu1 %v8855_v43  ;;  %v11652_v40 = vadd.f32 %v5730_v50, %v5690_v59  ;;  %v8909_v59 = vld [vmem:[%s11895_s4 + $0x124] ss:$8 sps:$4 sm:$0xff]  }
 0x316   :  { %v5732_v44 = vpop.f32.mrf.mxu0 }
 0x317   :  { %5992 = vmatpush1.bf16.msra.mxu0 %v8850_v37  ;;  %v8921_v37 = vld [vmem:[%s11895_s4 + $0x1e4] ss:$8 sps:$4 sm:$0xff]  }
 0x318   :  { %6496 = vmatpush1.bf16.msra.mxu1 %v8853_v19  ;;  %v5733_v45 = vpop.f32.mrf.mxu0  ;;  %5993 = vmatprep.subr.bf16.mxu0 %v8858_v35  ;;  %v8919_v19 = vld [vmem:[%s11895_s4 + $0x1e0] ss:$8 sps:$4 sm:$0xff]  }
 0x319   :  { %6497 = vmatprep.subr.bf16.mxu1 %v8861_v32 }
 0x31b   :  { %5994 = vmatpush1.bf16.msra.mxu0 %v8856_v0  ;;  %v8922_v0 = vld [vmem:[%s11895_s4 + $0x1d0] ss:$8 sps:$4 sm:$0xff]  }
 0x31c   :  { %6498 = vmatpush1.bf16.msra.mxu1 %v8859_v23  ;;  %5995 = vmatprep.subr.bf16.mxu0 %v8864_v46  ;;  %v8925_v46 = vld [vmem:[%s11895_s4 + $0x1c0] ss:$8 sps:$4 sm:$0xff]  }
 0x31d   :  { %6499 = vmatprep.subr.bf16.mxu1 %v8867_v48  ;;  %v8927_v48 = vld [vmem:[%s11895_s4 + $0x1c4] ss:$8 sps:$4 sm:$0xff]  }
 0x31f   :  { %5996 = vmatpush1.bf16.msra.mxu0 %v8862_v25  ;;  %v8928_v25 = vld [vmem:[%s11895_s4 + $0x1b0] ss:$8 sps:$4 sm:$0xff]  }
 0x320   :  { %6500 = vmatpush1.bf16.msra.mxu1 %v8865_v52  ;;  %7558 = vmatprep.subr.msk.bf16.mxu0 %vm6117_vm2, %v6112_v18  ;;  %v8933_v52 = vld [vmem:[%s11895_s4 + $0x1a4] ss:$8 sps:$4 sm:$0xff]   ;;  %v8936_v18 = vld [vmem:[%s11895_s4 + $0x194] ss:$8 sps:$4 sm:$0xff]  }
 0x321   :  { %6501 = vmatprep.subr.bf16.mxu1 %v8870_v47  ;;  %v8931_v47 = vld [vmem:[%s11895_s4 + $0x1a0] ss:$8 sps:$4 sm:$0xff]  }
 0x322   :  { %7556 = vmatmul.mubr.msk.bf16.vlgmr.msra.gmra.mxu0 %vm4952_vm0, %v10415_v4  ;;  %v6102_v4 = vld [vmem:[%s11897_s1] sm:$0x1] }
 0x323   :  { %6139 = vmatpush1.bf16.msra.mxu0 %v6119_v57  ;;  %6156 = vmatprep.mubr.bf16.mxu0 %v8958_v2  ;;  %v8879_v2 = vld [vmem:[%s11895_s4 + $0xc4] ss:$8 sps:$4 sm:$0xff]  }
 0x324   :  { %6502 = vmatpush2.bf16.msra.mxu1 %v8868_v51  ;;  %6526 = vmatprep.subr.bf16.mxu0 %v8894_v31  ;;  %v8934_v51 = vld [vmem:[%s11895_s4 + $0x190] ss:$8 sps:$4 sm:$0xff]   ;;  %v8939_v57 = vld [vmem:[%s11895_s4 + $0x184] ss:$8 sps:$4 sm:$0xff]  }
 0x325   :  { %6503 = vmatprep.subr.bf16.mxu1 %v8873_v56  ;;  %v8937_v56 = vld [vmem:[%s11895_s4 + $0x180] ss:$8 sps:$4 sm:$0xff]  }
 0x328   :  { %6504 = vmatpush2.bf16.msra.mxu1 %v8871_v26 }
 0x329   :  { %6505 = vmatprep.subr.bf16.mxu1 %v8876_v29 }
 0x32a   :  { %7559 = vmatmul.mubr.msk.bf16.vlgmr.msra.gmra.mxu0 %vm6113_vm3, %v6102_v4 }
 0x32b   :  { %6527 = vmatpush1.bf16.msra.mxu0 %v8892_v13 }
 0x32c   :  { %6506 = vmatpush2.bf16.msra.mxu1 %v8874_v3  ;;  %6528 = vmatprep.subr.bf16.mxu0 %v8897_v58  ;;  %v8941_v58 = vld [vmem:[%s11898_s7 + $0x38] sm:$0xff]  }
 0x32d   :  { %6507 = vmatprep.subr.bf16.mxu1 %v8879_v2  ;;  %v8940_v2 = vld [vmem:[%s11898_s7 + $0x78] sm:$0xff]  }
 0x32f   :  { %6529 = vmatpush1.bf16.msra.mxu0 %v8895_v63  ;;  %v8943_v63 = vld [vmem:[%s11898_s7 + $0x30] sm:$0xff]  }
 0x330   :  { %6508 = vmatpush2.bf16.msra.mxu1 %v8877_v53  ;;  %6530 = vmatprep.subr.bf16.mxu0 %v8900_v62  ;;  %v8942_v53 = vld [vmem:[%s11898_s7 + $0x70] sm:$0xff]   ;;  %v8945_v62 = vld [vmem:[%s11898_s7 + $0x28] sm:$0xff]  }
 0x331   :  { %6509 = vmatprep.subr.bf16.mxu1 %v8882_v5  ;;  %v8944_v5 = vld [vmem:[%s11898_s7 + $0x68] sm:$0xff]  }
 0x333   :  { %6531 = vmatpush1.bf16.msra.mxu0 %v8898_v60 }
 0x334   :  { %6510 = vmatpush2.bf16.msra.mxu1 %v8880_v41  ;;  %6532 = vmatprep.subr.bf16.mxu0 %v8903_v10  ;;  %v8946_v41 = vld [vmem:[%s11898_s7 + $0x60] sm:$0xff]  }
 0x335   :  { %6511 = vmatprep.subr.bf16.mxu1 %v8885_v1  ;;  %v8947_v1 = vld [vmem:[%s11898_s7 + $0x20] sm:$0xff]  }
 0x337   :  { %6533 = vmatpush1.bf16.msra.mxu0 %v8901_v7 }
 0x338   :  { %6512 = vmatpush2.bf16.msra.mxu1 %v8883_v11  ;;  %6534 = vmatprep.subr.bf16.mxu0 %v8906_v12  ;;  %v8948_v11 = vld [vmem:[%s11898_s7 + $0x58] sm:$0xff]  }
 0x339   :  { %6513 = vmatprep.subr.bf16.mxu1 %v8888_v9 }
 0x33b   :  { %6535 = vmatpush1.bf16.msra.mxu0 %v8904_v27  ;;  %v8949_v27 = vld [vmem:[%s11898_s7 + $0x18] sm:$0xff]  }
 0x33c   :  { %6514 = vmatpush2.bf16.msra.mxu1 %v8886_v6  ;;  %6536 = vmatprep.subr.bf16.mxu0 %v8909_v59 }
 0x33d   :  { %6515 = vmatprep.subr.bf16.mxu1 %v8891_v55 }
 0x33f   :  { %6537 = vmatpush1.bf16.msra.mxu0 %v8907_v20 }
 0x340   :  { %6516 = vmatpush2.bf16.msra.mxu1 %v8889_v17  ;;  %6538 = vmatprep.subr.bf16.mxu0 %v8912_v28 }
 0x341   :  { %7641 = vmatprep.subr.bf16.mxu1 %v8940_v2 }
 0x343   :  { %v5769_v38 = vpop.f32.mrf.mxu1  ;;  %6518 = vmatmul.mubr.bf16.vlgmr.msra.gmra.mxu1 %v6034_v14  ;;  %6539 = vmatpush1.bf16.msra.mxu0 %v8910_v33 }
 0x344   :  { %v5770_v22 = vadd.f32 %v5769_v38, %v11638_v36  ;;  %6540 = vmatprep.subr.bf16.mxu0 %v8915_v61  ;;  %v8916_v36 = vld [vmem:[%s11895_s4 + $0x1f0] ss:$8 sps:$4 sm:$0xff]   ;;  %7642 = vmatpush3.bf16.msra.mxu1 %v8941_v58 }
 0x345   :  { %v5771_v24 = vpop.f32.mrf.mxu1  ;;  %7643 = vmatprep.subr.bf16.mxu1 %v8942_v53 }
 0x346   :  { %v5772_v30 = vadd.f32 %v5771_v24, %v11652_v40  ;;  %v8924_v40 = vld [vmem:[%s11895_s4 + $0x1d4] ss:$8 sps:$4 sm:$0xff]  }
 0x347   :  { %v5773_v49 = vpop.f32.mrf.mxu1  ;;  %6541 = vmatpush1.bf16.msra.mxu0 %v8913_v34 }
 0x348   :  { %6542 = vmatprep.subr.bf16.mxu0 %v8918_v8  ;;  %7644 = vmatpush3.bf16.msra.mxu1 %v8943_v63 }
 0x349   :  { %v5774_v43 = vpop.f32.mrf.mxu1  ;;  %7645 = vmatprep.subr.bf16.mxu1 %v8944_v5 }
 0x34b   :  { %6543 = vmatpush2.bf16.msra.mxu0 %v8916_v36 }
 0x34c   :  { %6544 = vmatprep.subr.bf16.mxu0 %v8921_v37  ;;  %7646 = vmatpush3.bf16.msra.mxu1 %v8945_v62 }
 0x34d   :  { %7647 = vmatprep.subr.bf16.mxu1 %v8946_v41 }
 0x34f   :  { %6545 = vmatpush2.bf16.msra.mxu0 %v8919_v19 }
 0x350   :  { %6546 = vmatprep.subr.bf16.mxu0 %v8924_v40  ;;  %7648 = vmatpush3.bf16.msra.mxu1 %v8947_v1 }
 0x351   :  { %7649 = vmatprep.subr.bf16.mxu1 %v8948_v11 }
 0x352   :  { %v5810_v50 = vpop.f32.mrf.mxu0 }
 0x353   :  { %v5811_v35 = vadd.f32 %v5810_v50, %v5770_v22  ;;  %6547 = vmatpush2.bf16.msra.mxu0 %v8922_v0 }
 0x354   :  { %v5812_v32 = vpop.f32.mrf.mxu0  ;;  %6548 = vmatprep.subr.bf16.mxu0 %v8927_v48  ;;  %7650 = vmatpush3.bf16.msra.mxu1 %v8949_v27 }
 0x355   :  { %v5813_v44 = vadd.f32 %v5812_v32, %v5772_v30 }
 0x356   :  { %v5814_v23 = vpop.f32.mrf.mxu0 }
 0x357   :  { %6549 = vmatpush2.bf16.msra.mxu0 %v8925_v46 }
 0x358   :  { %v5815_v45 = vpop.f32.mrf.mxu0  ;;  %6550 = vmatprep.subr.bf16.mxu0 %v8930_v54 }
 0x35b   :  { %6551 = vmatpush2.bf16.msra.mxu0 %v8928_v25 }
 0x35c   :  { %6552 = vmatprep.subr.bf16.mxu0 %v8933_v52 }
 0x35f   :  { %6553 = vmatpush2.bf16.msra.mxu0 %v8931_v47  ;;  %v8950_v47 = vld [vmem:[%s11898_s7 + $0x50] sm:$0xff]  }
 0x360   :  { %6554 = vmatprep.subr.bf16.mxu0 %v8936_v18  ;;  %v8951_v18 = vld [vmem:[%s11898_s7 + $0x10] sm:$0xff]   ;;  %7651 = vmatprep.subr.bf16.mxu1 %v8950_v47 }
 0x361   :  { %7652 = vmatpush3.bf16.msra.mxu1 %v8951_v18 }
 0x363   :  { %6555 = vmatpush2.bf16.msra.mxu0 %v8934_v51  ;;  %v8952_v51 = vld [vmem:[%s11898_s7 + $0x48] sm:$0xff]  }
 0x364   :  { %6556 = vmatprep.subr.bf16.mxu0 %v8939_v57  ;;  %7653 = vmatprep.subr.bf16.mxu1 %v8952_v51  ;;  %v8954_v57 = vld [vmem:[%s11898_s7 + $0x40] sm:$0xff]  }
 0x367   :  { %6557 = vmatpush2.bf16.msra.mxu0 %v8937_v56  ;;  %v8953_v56 = vld [vmem:[%s11898_s7 + $0x8] sm:$0xff]  }
 0x368   :  { %7654 = vmatpush3.bf16.msra.mxu1 %v8953_v56 }
 0x369   :  { %7655 = vmatprep.subr.bf16.mxu1 %v8954_v57 }
 0x383   :  { %v5851_v31 = vpop.f32.mrf.mxu1 }
 0x384   :  { %v5852_v26 = vadd.f32 %v5851_v31, %v5811_v35  ;;  %v8955_v31 = vld [vmem:[%s11898_s7] sm:$0xff]  }
 0x385   :  { %v5853_v29 = vpop.f32.mrf.mxu1  ;;  %7656 = vmatpush3.bf16.msra.mxu1 %v8955_v31 }
 0x386   :  { %v5854_v3 = vadd.f32 %v5853_v29, %v5813_v44 }
 0x387   :  { %v5855_v4 = vpop.f32.mrf.mxu1 }
 0x389   :  { %v5856_v13 = vpop.f32.mrf.mxu1 }
 0x392   :  { %v5892_v60 = vpop.f32.mrf.mxu0 }
 0x393   :  { %v5893_v10 = vadd.f32 %v5892_v60, %v5852_v26  ;;  %v6567_v26 = vld [vmem:[%s11899_s6] sm:$0x3] }
 0x394   :  { %v5894_v7 = vpop.f32.mrf.mxu0  ;;  %v6572_v29 = vrot.slane %v6567_v26, %v825_v16  ;;  %v6576_v13 = vrot.slane %v6567_v26, %v829_v21 }
 0x395   :  { %v5895_v9 = vadd.f32 %v5894_v7, %v5854_v3 }
 0x396   :  { %v5896_v12 = vpop.f32.mrf.mxu0 }
 0x398   :  { %v5897_v6 = vpop.f32.mrf.mxu0 }
 0x3c3   :  { %v5933_v55 = vpop.f32.mrf.mxu1 }
 0x3c4   :  { %v5934_v22 = vadd.f32 %v5933_v55, %v5893_v10 }
 0x3c5   :  { %v5935_v59 = vpop.f32.mrf.mxu1 }
 0x3c6   :  { %v5936_v24 = vadd.f32 %v5935_v59, %v5895_v9 }
 0x3c7   :  { %v5937_v15 = vpop.f32.mrf.mxu1 }
 0x3c9   :  { %v5938_v17 = vpop.f32.mrf.mxu1 }
 0x3d2   :  { %v5974_v20 = vpop.f32.mrf.mxu0 }
 0x3d3   :  { %v5975_v28 = vadd.f32 %v5974_v20, %v5934_v22 }
 0x3d4   :  { %v5976_v39 = vpop.f32.mrf.mxu0 }
 0x3d5   :  { %v5977_v33 = vadd.f32 %v5976_v39, %v5936_v24 }
 0x3d6   :  { %v5978_v14 = vpop.f32.mrf.mxu0 }
 0x3d8   :  { %v5979_v38 = vpop.f32.mrf.mxu0 }
 0x3e2   :  { %v6015_v30 = vpop.f32.mrf.mxu0 }
 0x3e3   :  { %v6016_v61 = vadd.f32 %v6015_v30, %v5975_v28 }
 0x3e4   :  { %v6017_v49 = vpop.f32.mrf.mxu0 }
 0x3e5   :  { %vm6024_vm5 = vcmp.gt.f32.partialorder %v6016_v61, 0.0  ;;  %v6028_v34 = vmul.f32 0.01, %v6016_v61  ;;  %v6018_v43 = vadd.f32 %v6017_v49, %v5977_v33 }
 0x3e6   :  { %v6019_v8 = vpop.f32.mrf.mxu0 }
 0x3e7   :  { %vm6025_vm6 = vcmp.gt.f32.partialorder %v6018_v43, 0.0  ;;  %v6029_v36 = vmul.f32 0.01, %v6018_v43  ;;  %v6032_v37 = vsel %vm6024_vm5, %v6016_v61, %v6028_v34 }
 0x3e8   :  { %v6020_v19 = vpop.f32.mrf.mxu0  ;;  %v6036_v40 = vpack.c.bf16 %v6032_v37, %v6032_v37 }
 0x3e9   :  { %v6033_v50 = vsel %vm6025_vm6, %v6018_v43, %v6029_v36 }
 0x3ea   :  { %v6037_v35 = vpack.c.bf16 %v6033_v50, %v6033_v50  ;;  %v6158_v32 = vpop.f32.mrf.mxu0 }
 0x3ec   :  { %6558 = vmatprep.mubr.bf16.mxu0 %v6037_v35  ;;  %v6160_v44 = vpop.f32.mrf.mxu0 }
 0x3ed   :  { %6559 = vmatmul.mubr.bf16.vlgmr.msra.gmra.mxu0 %v6036_v40 }
 0x3ee   :  { %v6162_v0 = vpop.f32.mrf.mxu0 }
 0x3f0   :  { %v6163_v23 = vpop.f32.mrf.mxu0 }
 0x403   :  { %v6519_v45 = vpop.f32.mrf.mxu1 }
 0x404   :  { %v6520_v46 = vadd.f32 %v6519_v45, %v6158_v32 }
 0x405   :  { %v6521_v48 = vpop.f32.mrf.mxu1 }
 0x406   :  { %v6522_v54 = vadd.f32 %v6521_v48, %v6160_v44 }
 0x407   :  { %v6523_v25 = vpop.f32.mrf.mxu1 }
 0x409   :  { %v6524_v52 = vpop.f32.mrf.mxu1 }
 0x4ad   :  { %v6560_v3 = vpop.f32.mrf.mxu0 }
 0x4ae   :  { %v6561_v4 = vadd.f32 %v6560_v3, %v6520_v46 }
 0x4af   :  { %v6562_v2 = vpop.f32.mrf.mxu0 }
 0x4b0   :  { %v6579_v58 = vadd.f32 %v6572_v29, %v6561_v4  ;;  %v6563_v53 = vadd.f32 %v6562_v2, %v6522_v54 }
 0x4b1   :  { %v6564_v63 = vpop.f32.mrf.mxu0 }
 0x4b2   :  { %vm6581_vm7 = vcmp.gt.f32.partialorder %v6579_v58, 0.0  ;;  %v6583_v5 = vmul.f32 0.01, %v6579_v58  ;;  %v6580_v62 = vadd.f32 %v6576_v13, %v6563_v53 }
 0x4b3   :  { %v6565_v41 = vpop.f32.mrf.mxu0 }
 0x4b4   :  { %v6584_v60 = vmul.f32 0.01, %v6580_v62  ;;  %vm6582_vm8 = vcmp.gt.f32.partialorder %v6580_v62, 0.0  ;;  %v6585_v1 = vsel %vm6581_vm7, %v6579_v58, %v6583_v5 }
 0x4b5   :  { %v6587_v7 = vpack.c.bf16 %v6585_v1, %v6585_v1 }
 0x4b6   :  { %v6586_v10 = vsel %vm6582_vm8, %v6580_v62, %v6584_v60 }
 0x4b7   :  { %v6588_v11 = vpack.c.bf16 %v6586_v10, %v6586_v10 }
 0x4b9   :  { %6756 = vmatprep.mubr.bf16.mxu1 %v6588_v11 }
 0x4ba   :  { %6757 = vmatmul.mubr.bf16.vlgmr.msra.gmra.mxu1 %v6587_v7 }
 0x57a   :  { %v7657_v16 = vpop.f32.mrf.mxu1 }
 0x57c   :  { %v7658_v21 = vpop.f32.mrf.mxu1 }
 0x57d   :  { %v7659_v9 = vadd.f32 %v7658_v21, %v7657_v16 }
 0x57e   :  { %v7660_v12 = vpop.f32.mrf.mxu1 }
 0x57f   :  { %v6759_v6 = vadd.f32 %v7659_v9, %v7624_v42 }
 0x580   :  { %v7661_v27 = vpop.f32.mrf.mxu1 }
 0x581   :  { %6765 = vst.msk [vmem:[%s11901_s9] sm:$0x3] %vm6764_vm9, %v6759_v6 }

</bundles_post_ra>
